<compile_context>
chip_gen: v7x
topology: tpu7x:2x2x1
jax: 0.10.0
libtpu: 0.0.40
codegen_flags: <defaults>
</compile_context>

<pallas_src>
import jax
import jax.numpy as jnp
from jax.experimental import pallas as pl
from jax.experimental.pallas import tpu as pltpu

_K = 10                       # temporal kernel width (1, 10)
_FILTERS = [25, 50, 100, 200]


def _time_dims(nTime):
    """[(T_in, Tc, Tp)] per conv/pool stage: input width, 3*Tp used conv cols,
    pooled width -- all per-sample."""
    dims = []
    t_in = nTime
    for _ in range(4):
        t_conv = t_in - (_K - 1)
        tp = t_conv // 3
        tc = 3 * tp
        dims.append((t_in, tc, tp))
        t_in = tp
    return dims


def _pick_bt(B, max_bt=4):
    """Samples per grid step.  Keep grid >= 2 (v7x has two TensorCores)."""
    for bt in range(min(B, max_bt), 0, -1):
        if B % bt == 0 and (B // bt >= 2 or B == 1):
            return bt
    return 1


# --------------------------------------------------------------------------
# Fused Pallas kernel factory (whole forward pass, Bt samples per grid step)
# --------------------------------------------------------------------------
def _make_kernel(bt, dims):
    """bt: samples per grid step; dims: [(T_in, Tc, Tp)] per conv block."""

    def conv_block(h, w_ref, b_ref, s_ref, col_ref, t_in, tc, tp):
        """Conv(1,K) [BN folded] -> pool(1,3) -> +bias -> ELU for bt samples.

        h:       (C_in, bt*t_in) f32, sample b in columns [b*t_in,(b+1)*t_in)
        w_ref:   (C_out, K*C_in)  bf16 effective conv weight (BN scale folded)
        b_ref:   (C_out, 1)       f32  effective bias (BN shift folded)
        s_ref:   (bt*tc-2, bt*tp) bf16 0/1 "every 3rd column" selection matrix
        col_ref: (K*C_in, bt*tc)  bf16/f32 VMEM im2col scratch
        returns  (C_out, bt*tp)   f32
        """
        c_in = h.shape[0]
        k = col_ref.shape[0] // c_in
        # im2col: only the tc = 3*tp columns the pool consumes, per sample.
        # Stores are cast to the scratch dtype (bf16 where row offsets are
        # packed-sublane friendly, else f32).
        for j in range(k):
            for b in range(bt):
                col_ref[j * c_in:(j + 1) * c_in, b * tc:(b + 1) * tc] = (
                    h[:, b * t_in + j:b * t_in + j + tc].astype(col_ref.dtype))
        xcol = col_ref[...].astype(jnp.bfloat16)
        y = jnp.dot(w_ref[...], xcol, preferred_element_type=jnp.float32)

        # MaxPool2d((1,3)): running max of 3 shifted slices, then pick every
        # 3rd column via a 0/1 selection matmul.  Because tc is a multiple of
        # 3, the within-sample picks sit at global columns 3*(b*tp + t), so a
        # single uniform stride-3 matrix covers the whole batched slab (the
        # cross-sample boundary columns of `m` are never selected).
        n = bt * tc
        m = jnp.maximum(jnp.maximum(y[:, 0:n - 2], y[:, 1:n - 1]), y[:, 2:n])
        p = jnp.dot(m.astype(jnp.bfloat16), s_ref[...],
                    preferred_element_type=jnp.float32)       # (C_out, bt*tp)

        # bias + ELU AFTER the pool (exact reorder: per-channel constant bias
        # commutes with max, ELU is monotone) -> ~3x less elementwise work.
        v = p + b_ref[...]
        # TODO(synk): jnp.expm1 not used (uncertain Mosaic lowering); exp-1 is
        # within the checked tolerance.
        return jnp.where(v > 0.0, v, jnp.exp(jnp.minimum(v, 0.0)) - 1.0)

    def kernel(x_ref, w0, b0, s0, w1, b1, s1, w2, b2, s2, w3, b3, s3,
               wh, bh, o_ref, col0, col1, col2, col3):
        h = x_ref[0]                                    # (c0, bt*nTime) f32
        h = conv_block(h, w0, b0, s0, col0, *dims[0])   # (25,  bt*Tp0)
        h = conv_block(h, w1, b1, s1, col1, *dims[1])   # (50,  bt*Tp1)
        h = conv_block(h, w2, b2, s2, col2, *dims[2])   # (100, bt*Tp2)
        h = conv_block(h, w3, b3, s3, col3, *dims[3])   # (200, bt*Tp3)

        n_cls = bh.shape[0]
        tp4 = dims[3][2]
        if tp4 == 1:
            # Head as ONE lane-dense matmul over all bt samples: (cls,200)@(200,bt)
            logits = jnp.dot(wh[...], h.astype(jnp.bfloat16),
                             preferred_element_type=jnp.float32) + bh[...]
            z = logits - jnp.max(logits, axis=0, keepdims=True)
            o_ref[0] = z - jnp.log(jnp.sum(jnp.exp(z), axis=0, keepdims=True))
        else:
            # TODO(synk): Tp4 > 1 fallback uses per-(sample, t) N=1 dots; fine
            # for the tiny Tp4 this network produces but not lane-dense.
            for b in range(bt):
                logits = bh[...]
                for t in range(tp4):
                    wt = wh[t * n_cls:(t + 1) * n_cls, :]
                    col = h[:, b * tp4 + t:b * tp4 + t + 1].astype(jnp.bfloat16)
                    logits = logits + jnp.dot(
                        wt, col, preferred_element_type=jnp.float32)
                z = logits - jnp.max(logits, axis=0, keepdims=True)
                o_ref[0, :, b:b + 1] = z - jnp.log(
                    jnp.sum(jnp.exp(z), axis=0, keepdims=True))

    return kernel


# --------------------------------------------------------------------------
# Wrapper: fold weights (plain JAX glue) + one pallas_call
# --------------------------------------------------------------------------
def _const_spec(arr):
    nd = arr.ndim
    return pl.BlockSpec(arr.shape, lambda g: (0,) * nd)


def _sel_matrix(n_conv_cols):
    """0/1 matrix (n-2, n/3): column c has its single 1 at row 3*c."""
    tp = n_conv_cols // 3
    rows = jnp.arange(n_conv_cols - 2)[:, None]
    cols = jnp.arange(tp)[None, :]
    return (rows == 3 * cols).astype(jnp.bfloat16)


def _fold_kernel_params(p, nCh, c0, nTime, bt):
    """Fold eval-mode network into kernel-ready effective weights (exact)."""
    dims = _time_dims(nTime)
    kp = {}
    # first block: Conv(1->25,(1,K)) . Conv(25->25,(nCh,1),no bias) . BN (eval)
    w1 = p["w1"][:, 0, 0, :]                    # (25, K)
    w2 = p["w2"][:, :, :, 0]                    # (25, 25, nCh)
    sc, sh = p["bn1_scale"], p["bn1_shift"]
    w12 = jnp.einsum("gfc,fk->gkc", w2, w1)     # (25, K, nCh); row = k*c0 + ch
    w12 = sc[:, None, None] * w12
    w12 = jnp.pad(w12, ((0, 0), (0, 0), (0, c0 - nCh)))   # zero pad channels
    kp["w0"] = w12.reshape(25, _K * c0).astype(jnp.bfloat16)
    kp["b0"] = (sc * jnp.einsum("gfc,f->g", w2, p["b1"]) + sh).reshape(25, 1)
    kp["s0"] = _sel_matrix(bt * dims[0][1])
    # middle blocks: Dropout(id in eval) . Conv(ci->co,(1,K)) . BN (eval)
    for i, (ci, co) in enumerate(zip(_FILTERS[:-1], _FILTERS[1:])):
        wm = jnp.transpose(p[f"wm{i}"][:, :, 0, :], (0, 2, 1))   # (co, K, ci)
        sc, sh = p[f"bnm{i}_scale"], p[f"bnm{i}_shift"]
        kp[f"w{i + 1}"] = (sc[:, None, None] * wm).reshape(co, _K * ci).astype(jnp.bfloat16)
        kp[f"b{i + 1}"] = (sc * p[f"bm{i}"] + sh).reshape(co, 1)
        kp[f"s{i + 1}"] = _sel_matrix(bt * dims[i + 1][1])
    # head: Linear(200*Tp4 -> cls); PyTorch flatten index = c*Tp4 + t
    tp4 = dims[-1][2]
    cls = p["wh"].shape[0]
    wh3 = p["wh"].reshape(cls, _FILTERS[-1], tp4)
    kp["wh"] = jnp.transpose(wh3, (2, 0, 1)).reshape(tp4 * cls, _FILTERS[-1]).astype(jnp.bfloat16)
    kp["bh"] = p["bh"].reshape(cls, 1)
    # im2col scratch: bf16 only when C_in is even (packed-sublane aligned rows)
    c_ins = [c0] + _FILTERS[:-1]
    kp["col_shapes"] = [(ci * _K, bt * d[1]) for ci, d in zip(c_ins, dims)]
    kp["col_dtypes"] = [jnp.bfloat16 if ci % 2 == 0 else jnp.float32
                        for ci in c_ins]
    return kp


def deepconvnet_forward(x, params, max_bt=4):
    """x: (B, 1, nCh, nTime) f32 -> log-probabilities (B, cls) f32."""
    B, _, nCh, nTime = x.shape
    bt = _pick_bt(B, max_bt)
    G = B // bt
    dims = _time_dims(nTime)
    c0 = ((nCh + 7) // 8) * 8                  # pad block-0 channels to 8
    kp = _fold_kernel_params(params, nCh, c0, nTime, bt)
    cls = kp["bh"].shape[0]

    # Layout prep (plain JAX, input only): pad channels, group bt samples per
    # grid step and lay their time axes side-by-side along lanes.
    x0 = x[:, 0, :, :]
    if c0 != nCh:
        x0 = jnp.pad(x0, ((0, 0), (0, c0 - nCh), (0, 0)))
    xk = x0.reshape(G, bt, c0, nTime).transpose(0, 2, 1, 3).reshape(
        G, c0, bt * nTime)

    inputs = [xk]
    in_specs = [pl.BlockSpec((1, c0, bt * nTime), lambda g: (g, 0, 0))]
    for name in ("w0", "b0", "s0", "w1", "b1", "s1", "w2", "b2", "s2",
                 "w3", "b3", "s3", "wh", "bh"):
        arr = kp[name]
        inputs.append(arr)
        in_specs.append(_const_spec(arr))

    out = pl.pallas_call(
        _make_kernel(bt, dims),
        out_shape=jax.ShapeDtypeStruct((G, cls, bt), jnp.float32),
        grid=(G,),
        in_specs=in_specs,
        out_specs=pl.BlockSpec((1, cls, bt), lambda g: (g, 0, 0)),
        scratch_shapes=[pltpu.VMEM(s, dt) for s, dt in
                        zip(kp["col_shapes"], kp["col_dtypes"])],
        compiler_params=pltpu.CompilerParams(
            dimension_semantics=("parallel",)),
    )(*inputs)
    # (G, cls, bt) -> (B, cls); sample index = g*bt + b
    return jnp.transpose(out, (0, 2, 1)).reshape(B, cls)


# --------------------------------------------------------------------------
# Parameter construction (deterministic, synthetic, PyTorch layouts)
# --------------------------------------------------------------------------
def _renorm(w, max_norm):
    """torch.renorm(w, p=2, dim=0, maxnorm=max_norm) equivalent."""
    flat = w.reshape(w.shape[0], -1)
    n = jnp.sqrt(jnp.sum(flat * flat, axis=1, keepdims=True))
    s = jnp.minimum(1.0, max_norm / jnp.maximum(n, 1e-12))
    return (flat * s).reshape(w.shape)


def _bn_fold(key, c):
    """Synthetic eval-mode BatchNorm folded to per-channel scale/shift."""
    k1, k2, k3, k4 = jax.random.split(key, 4)
    gamma = 1.0 + 0.1 * jax.random.normal(k1, (c,), jnp.float32)
    beta = 0.1 * jax.random.normal(k2, (c,), jnp.float32)
    mean = 0.1 * jax.random.normal(k3, (c,), jnp.float32)
    var = jax.random.uniform(k4, (c,), jnp.float32, 0.5, 1.5)
    scale = gamma / jnp.sqrt(var + 1e-5)
    return scale, beta - mean * scale


def init_params(key, nCh, nTime, cls):
    keys = jax.random.split(key, 12)
    p = {}
    p["w1"] = _renorm(0.1 * jax.random.normal(keys[0], (25, 1, 1, _K), jnp.float32), 2.0)
    p["b1"] = 0.1 * jax.random.normal(keys[1], (25,), jnp.float32)
    p["w2"] = _renorm(0.1 * jax.random.normal(keys[2], (25, 25, nCh, 1), jnp.float32), 2.0)
    p["bn1_scale"], p["bn1_shift"] = _bn_fold(keys[3], 25)
    for i, (ci, co) in enumerate(zip(_FILTERS[:-1], _FILTERS[1:])):
        kw, kb, kbn = jax.random.split(keys[4 + i], 3)
        p[f"wm{i}"] = (1.0 / jnp.sqrt(ci * 10.0)) * jax.random.normal(
            kw, (co, ci, 1, _K), jnp.float32)
        p[f"bm{i}"] = 0.1 * jax.random.normal(kb, (co,), jnp.float32)
        p[f"bnm{i}_scale"], p[f"bnm{i}_shift"] = _bn_fold(kbn, co)
    linear_in = _FILTERS[-1] * _time_dims(nTime)[-1][2]
    p["wh"] = _renorm(0.1 * jax.random.normal(keys[8], (cls, linear_in), jnp.float32), 0.5)
    p["bh"] = 0.1 * jax.random.normal(keys[9], (cls,), jnp.float32)
    return p


# --------------------------------------------------------------------------
# Pure-JAX f32 reference (mirrors the PyTorch module, eval mode)
# --------------------------------------------------------------------------
def _reference_forward(x, p):
    dn = ("NCHW", "OIHW", "NCHW")

    def bn_elu_pool(h, scale, shift):
        h = h * scale.reshape(1, -1, 1, 1) + shift.reshape(1, -1, 1, 1)
        h = jnp.where(h > 0, h, jnp.expm1(jnp.minimum(h, 0.0)))
        b, c, hh, t = h.shape
        tp = t // 3
        return jnp.max(h[..., :3 * tp].reshape(b, c, hh, tp, 3), axis=-1)

    h = jax.lax.conv_general_dilated(x, p["w1"], (1, 1), "VALID", dimension_numbers=dn)
    h = h + p["b1"].reshape(1, -1, 1, 1)
    h = jax.lax.conv_general_dilated(h, p["w2"], (1, 1), "VALID", dimension_numbers=dn)
    h = bn_elu_pool(h, p["bn1_scale"], p["bn1_shift"])
    for i in range(3):
        h = jax.lax.conv_general_dilated(h, p[f"wm{i}"], (1, 1), "VALID",
                                         dimension_numbers=dn)
        h = h + p[f"bm{i}"].reshape(1, -1, 1, 1)
        h = bn_elu_pool(h, p[f"bnm{i}_scale"], p[f"bnm{i}_shift"])
    flat = h.reshape(h.shape[0], -1)
    logits = flat @ p["wh"].T + p["bh"]
    z = logits - jnp.max(logits, axis=1, keepdims=True)
    return z - jnp.log(jnp.sum(jnp.exp(z), axis=1, keepdims=True))


if __name__ == "__main__":
    # Small shapes consistent with the module: nCh=4, nTime=500, cls=4.
    # batch=4 so the per-step sample batching (bt=2) and the 2-step "parallel"
    # grid (v7x two-TensorCore sharding) are both exercised.
    nCh, nTime, cls, B = 4, 500, 4, 4
    key = jax.random.PRNGKey(0)
    kx, kparam = jax.random.split(key)
    x = jax.random.normal(kx, (B, 1, nCh, nTime), dtype=jnp.float32)
    params = init_params(kparam, nCh, nTime, cls)

    out = jax.block_until_ready(deepconvnet_forward(x, params))

    assert out.shape == (B, cls), out.shape
    assert bool(jnp.all(jnp.isfinite(out)))
    # log-softmax rows must (approximately) exponentiate to probability 1
    assert bool(jnp.all(jnp.abs(jnp.sum(jnp.exp(out), axis=1) - 1.0) < 1e-4))
    # cross-check against a pure-JAX f32 reference (bf16 matmuls => loose tol)
    ref = _reference_forward(x, params)
    err = float(jnp.max(jnp.abs(out - ref)))
    assert err < 0.1, f"mismatch vs reference: {err}"
    print("KERNEL_OK")
</pallas_src>

<mosaic_0001>
module attributes {stable_mosaic.version = 11 : i64} {
  func.func @kernel(%arg0: i32, %arg1: memref<1x8x1000xf32, #tpu.memory_space<vmem>>, %arg2: memref<25x80xbf16, #tpu.memory_space<vmem>>, %arg3: memref<25x1xf32, #tpu.memory_space<vmem>>, %arg4: memref<976x326xbf16, #tpu.memory_space<vmem>>, %arg5: memref<50x250xbf16, #tpu.memory_space<vmem>>, %arg6: memref<50x1xf32, #tpu.memory_space<vmem>>, %arg7: memref<304x102xbf16, #tpu.memory_space<vmem>>, %arg8: memref<100x500xbf16, #tpu.memory_space<vmem>>, %arg9: memref<100x1xf32, #tpu.memory_space<vmem>>, %arg10: memref<82x28xbf16, #tpu.memory_space<vmem>>, %arg11: memref<200x1000xbf16, #tpu.memory_space<vmem>>, %arg12: memref<200x1xf32, #tpu.memory_space<vmem>>, %arg13: memref<4x2xbf16, #tpu.memory_space<vmem>>, %arg14: memref<4x200xbf16, #tpu.memory_space<vmem>>, %arg15: memref<4x1xf32, #tpu.memory_space<vmem>>, %arg16: memref<1x4x2xf32, #tpu.memory_space<vmem>>, %arg17: memref<80x978xbf16, #tpu.memory_space<vmem>>, %arg18: memref<250x306xf32, #tpu.memory_space<vmem>>, %arg19: memref<500x84xbf16, #tpu.memory_space<vmem>>, %arg20: memref<1000x6xbf16, #tpu.memory_space<vmem>>) attributes {dimension_semantics = [#tpu.dimension_semantics<parallel>], iteration_bounds = array<i64: 2>, scalar_prefetch = 0 : i64, scratch_operands = 4 : i64, tpu.core_type = #tpu.core_type<tc>, window_params = [{transform_indices = @transform_0, window_bounds = array<i64: 1, 8, 1000>}, {pipeline_mode = #tpu.pipeline_mode<synchronous>, transform_indices = @transform_1, window_bounds = array<i64: 25, 80>}, {pipeline_mode = #tpu.pipeline_mode<synchronous>, transform_indices = @transform_2, window_bounds = array<i64: 25, 1>}, {pipeline_mode = #tpu.pipeline_mode<synchronous>, transform_indices = @transform_3, window_bounds = array<i64: 976, 326>}, {pipeline_mode = #tpu.pipeline_mode<synchronous>, transform_indices = @transform_4, window_bounds = array<i64: 50, 250>}, {pipeline_mode = #tpu.pipeline_mode<synchronous>, transform_indices = @transform_5, window_bounds = array<i64: 50, 1>}, {pipeline_mode = #tpu.pipeline_mode<synchronous>, transform_indices = @transform_6, window_bounds = array<i64: 304, 102>}, {pipeline_mode = #tpu.pipeline_mode<synchronous>, transform_indices = @transform_7, window_bounds = array<i64: 100, 500>}, {pipeline_mode = #tpu.pipeline_mode<synchronous>, transform_indices = @transform_8, window_bounds = array<i64: 100, 1>}, {pipeline_mode = #tpu.pipeline_mode<synchronous>, transform_indices = @transform_9, window_bounds = array<i64: 82, 28>}, {pipeline_mode = #tpu.pipeline_mode<synchronous>, transform_indices = @transform_10, window_bounds = array<i64: 200, 1000>}, {pipeline_mode = #tpu.pipeline_mode<synchronous>, transform_indices = @transform_11, window_bounds = array<i64: 200, 1>}, {pipeline_mode = #tpu.pipeline_mode<synchronous>, transform_indices = @transform_12, window_bounds = array<i64: 4, 2>}, {pipeline_mode = #tpu.pipeline_mode<synchronous>, transform_indices = @transform_13, window_bounds = array<i64: 4, 200>}, {pipeline_mode = #tpu.pipeline_mode<synchronous>, transform_indices = @transform_14, window_bounds = array<i64: 4, 1>}, {transform_indices = @transform_15, window_bounds = array<i64: 1, 4, 2>}]} {
    %c0 = arith.constant 0 : index
    %c0_0 = arith.constant 0 : index
    %c0_1 = arith.constant 0 : index
    %0 = vector.load %arg1[%c0, %c0_0, %c0_1] : memref<1x8x1000xf32, #tpu.memory_space<vmem>>, vector<1x8x1000xf32>
    %1 = vector.shape_cast %0 : vector<1x8x1000xf32> to vector<8x1000xf32>
    %2 = vector.extract_strided_slice %1 {offsets = [0, 0], sizes = [8, 489], strides = [1, 1]} : vector<8x1000xf32> to vector<8x489xf32>
    %3 = arith.truncf %2 : vector<8x489xf32> to vector<8x489xbf16>
    %c0_2 = arith.constant 0 : index
    %c0_3 = arith.constant 0 : index
    %4 = vector.load %arg17[%c0_2, %c0_3] : memref<80x978xbf16, #tpu.memory_space<vmem>>, vector<8x489xbf16>
    tpu.vector_store %arg17[%c0_2, %c0_3], %3 {strides = array<i32>} : memref<80x978xbf16, #tpu.memory_space<vmem>>, vector<8x489xbf16>,
    %5 = vector.extract_strided_slice %1 {offsets = [0, 500], sizes = [8, 489], strides = [1, 1]} : vector<8x1000xf32> to vector<8x489xf32>
    %6 = arith.truncf %5 : vector<8x489xf32> to vector<8x489xbf16>
    %c0_4 = arith.constant 0 : index
    %c489 = arith.constant 489 : index
    %7 = vector.load %arg17[%c0_4, %c489] : memref<80x978xbf16, #tpu.memory_space<vmem>>, vector<8x489xbf16>
    tpu.vector_store %arg17[%c0_4, %c489], %6 {strides = array<i32>} : memref<80x978xbf16, #tpu.memory_space<vmem>>, vector<8x489xbf16>,
    %8 = vector.extract_strided_slice %1 {offsets = [0, 1], sizes = [8, 489], strides = [1, 1]} : vector<8x1000xf32> to vector<8x489xf32>
    %9 = arith.truncf %8 : vector<8x489xf32> to vector<8x489xbf16>
    %c8 = arith.constant 8 : index
    %c0_5 = arith.constant 0 : index
    %10 = vector.load %arg17[%c8, %c0_5] : memref<80x978xbf16, #tpu.memory_space<vmem>>, vector<8x489xbf16>
    tpu.vector_store %arg17[%c8, %c0_5], %9 {strides = array<i32>} : memref<80x978xbf16, #tpu.memory_space<vmem>>, vector<8x489xbf16>,
    %11 = vector.extract_strided_slice %1 {offsets = [0, 501], sizes = [8, 489], strides = [1, 1]} : vector<8x1000xf32> to vector<8x489xf32>
    %12 = arith.truncf %11 : vector<8x489xf32> to vector<8x489xbf16>
    %c8_6 = arith.constant 8 : index
    %c489_7 = arith.constant 489 : index
    %13 = vector.load %arg17[%c8_6, %c489_7] : memref<80x978xbf16, #tpu.memory_space<vmem>>, vector<8x489xbf16>
    tpu.vector_store %arg17[%c8_6, %c489_7], %12 {strides = array<i32>} : memref<80x978xbf16, #tpu.memory_space<vmem>>, vector<8x489xbf16>,
    %14 = vector.extract_strided_slice %1 {offsets = [0, 2], sizes = [8, 489], strides = [1, 1]} : vector<8x1000xf32> to vector<8x489xf32>
    %15 = arith.truncf %14 : vector<8x489xf32> to vector<8x489xbf16>
    %c16 = arith.constant 16 : index
    %c0_8 = arith.constant 0 : index
    %16 = vector.load %arg17[%c16, %c0_8] : memref<80x978xbf16, #tpu.memory_space<vmem>>, vector<8x489xbf16>
    tpu.vector_store %arg17[%c16, %c0_8], %15 {strides = array<i32>} : memref<80x978xbf16, #tpu.memory_space<vmem>>, vector<8x489xbf16>,
    %17 = vector.extract_strided_slice %1 {offsets = [0, 502], sizes = [8, 489], strides = [1, 1]} : vector<8x1000xf32> to vector<8x489xf32>
    %18 = arith.truncf %17 : vector<8x489xf32> to vector<8x489xbf16>
    %c16_9 = arith.constant 16 : index
    %c489_10 = arith.constant 489 : index
    %19 = vector.load %arg17[%c16_9, %c489_10] : memref<80x978xbf16, #tpu.memory_space<vmem>>, vector<8x489xbf16>
    tpu.vector_store %arg17[%c16_9, %c489_10], %18 {strides = array<i32>} : memref<80x978xbf16, #tpu.memory_space<vmem>>, vector<8x489xbf16>,
    %20 = vector.extract_strided_slice %1 {offsets = [0, 3], sizes = [8, 489], strides = [1, 1]} : vector<8x1000xf32> to vector<8x489xf32>
    %21 = arith.truncf %20 : vector<8x489xf32> to vector<8x489xbf16>
    %c24 = arith.constant 24 : index
    %c0_11 = arith.constant 0 : index
    %22 = vector.load %arg17[%c24, %c0_11] : memref<80x978xbf16, #tpu.memory_space<vmem>>, vector<8x489xbf16>
    tpu.vector_store %arg17[%c24, %c0_11], %21 {strides = array<i32>} : memref<80x978xbf16, #tpu.memory_space<vmem>>, vector<8x489xbf16>,
    %23 = vector.extract_strided_slice %1 {offsets = [0, 503], sizes = [8, 489], strides = [1, 1]} : vector<8x1000xf32> to vector<8x489xf32>
    %24 = arith.truncf %23 : vector<8x489xf32> to vector<8x489xbf16>
    %c24_12 = arith.constant 24 : index
    %c489_13 = arith.constant 489 : index
    %25 = vector.load %arg17[%c24_12, %c489_13] : memref<80x978xbf16, #tpu.memory_space<vmem>>, vector<8x489xbf16>
    tpu.vector_store %arg17[%c24_12, %c489_13], %24 {strides = array<i32>} : memref<80x978xbf16, #tpu.memory_space<vmem>>, vector<8x489xbf16>,
    %26 = vector.extract_strided_slice %1 {offsets = [0, 4], sizes = [8, 489], strides = [1, 1]} : vector<8x1000xf32> to vector<8x489xf32>
    %27 = arith.truncf %26 : vector<8x489xf32> to vector<8x489xbf16>
    %c32 = arith.constant 32 : index
    %c0_14 = arith.constant 0 : index
    %28 = vector.load %arg17[%c32, %c0_14] : memref<80x978xbf16, #tpu.memory_space<vmem>>, vector<8x489xbf16>
    tpu.vector_store %arg17[%c32, %c0_14], %27 {strides = array<i32>} : memref<80x978xbf16, #tpu.memory_space<vmem>>, vector<8x489xbf16>,
    %29 = vector.extract_strided_slice %1 {offsets = [0, 504], sizes = [8, 489], strides = [1, 1]} : vector<8x1000xf32> to vector<8x489xf32>
    %30 = arith.truncf %29 : vector<8x489xf32> to vector<8x489xbf16>
    %c32_15 = arith.constant 32 : index
    %c489_16 = arith.constant 489 : index
    %31 = vector.load %arg17[%c32_15, %c489_16] : memref<80x978xbf16, #tpu.memory_space<vmem>>, vector<8x489xbf16>
    tpu.vector_store %arg17[%c32_15, %c489_16], %30 {strides = array<i32>} : memref<80x978xbf16, #tpu.memory_space<vmem>>, vector<8x489xbf16>,
    %32 = vector.extract_strided_slice %1 {offsets = [0, 5], sizes = [8, 489], strides = [1, 1]} : vector<8x1000xf32> to vector<8x489xf32>
    %33 = arith.truncf %32 : vector<8x489xf32> to vector<8x489xbf16>
    %c40 = arith.constant 40 : index
    %c0_17 = arith.constant 0 : index
    %34 = vector.load %arg17[%c40, %c0_17] : memref<80x978xbf16, #tpu.memory_space<vmem>>, vector<8x489xbf16>
    tpu.vector_store %arg17[%c40, %c0_17], %33 {strides = array<i32>} : memref<80x978xbf16, #tpu.memory_space<vmem>>, vector<8x489xbf16>,
    %35 = vector.extract_strided_slice %1 {offsets = [0, 505], sizes = [8, 489], strides = [1, 1]} : vector<8x1000xf32> to vector<8x489xf32>
    %36 = arith.truncf %35 : vector<8x489xf32> to vector<8x489xbf16>
    %c40_18 = arith.constant 40 : index
    %c489_19 = arith.constant 489 : index
    %37 = vector.load %arg17[%c40_18, %c489_19] : memref<80x978xbf16, #tpu.memory_space<vmem>>, vector<8x489xbf16>
    tpu.vector_store %arg17[%c40_18, %c489_19], %36 {strides = array<i32>} : memref<80x978xbf16, #tpu.memory_space<vmem>>, vector<8x489xbf16>,
    %38 = vector.extract_strided_slice %1 {offsets = [0, 6], sizes = [8, 489], strides = [1, 1]} : vector<8x1000xf32> to vector<8x489xf32>
    %39 = arith.truncf %38 : vector<8x489xf32> to vector<8x489xbf16>
    %c48 = arith.constant 48 : index
    %c0_20 = arith.constant 0 : index
    %40 = vector.load %arg17[%c48, %c0_20] : memref<80x978xbf16, #tpu.memory_space<vmem>>, vector<8x489xbf16>
    tpu.vector_store %arg17[%c48, %c0_20], %39 {strides = array<i32>} : memref<80x978xbf16, #tpu.memory_space<vmem>>, vector<8x489xbf16>,
    %41 = vector.extract_strided_slice %1 {offsets = [0, 506], sizes = [8, 489], strides = [1, 1]} : vector<8x1000xf32> to vector<8x489xf32>
    %42 = arith.truncf %41 : vector<8x489xf32> to vector<8x489xbf16>
    %c48_21 = arith.constant 48 : index
    %c489_22 = arith.constant 489 : index
    %43 = vector.load %arg17[%c48_21, %c489_22] : memref<80x978xbf16, #tpu.memory_space<vmem>>, vector<8x489xbf16>
    tpu.vector_store %arg17[%c48_21, %c489_22], %42 {strides = array<i32>} : memref<80x978xbf16, #tpu.memory_space<vmem>>, vector<8x489xbf16>,
    %44 = vector.extract_strided_slice %1 {offsets = [0, 7], sizes = [8, 489], strides = [1, 1]} : vector<8x1000xf32> to vector<8x489xf32>
    %45 = arith.truncf %44 : vector<8x489xf32> to vector<8x489xbf16>
    %c56 = arith.constant 56 : index
    %c0_23 = arith.constant 0 : index
    %46 = vector.load %arg17[%c56, %c0_23] : memref<80x978xbf16, #tpu.memory_space<vmem>>, vector<8x489xbf16>
    tpu.vector_store %arg17[%c56, %c0_23], %45 {strides = array<i32>} : memref<80x978xbf16, #tpu.memory_space<vmem>>, vector<8x489xbf16>,
    %47 = vector.extract_strided_slice %1 {offsets = [0, 507], sizes = [8, 489], strides = [1, 1]} : vector<8x1000xf32> to vector<8x489xf32>
    %48 = arith.truncf %47 : vector<8x489xf32> to vector<8x489xbf16>
    %c56_24 = arith.constant 56 : index
    %c489_25 = arith.constant 489 : index
    %49 = vector.load %arg17[%c56_24, %c489_25] : memref<80x978xbf16, #tpu.memory_space<vmem>>, vector<8x489xbf16>
    tpu.vector_store %arg17[%c56_24, %c489_25], %48 {strides = array<i32>} : memref<80x978xbf16, #tpu.memory_space<vmem>>, vector<8x489xbf16>,
    %50 = vector.extract_strided_slice %1 {offsets = [0, 8], sizes = [8, 489], strides = [1, 1]} : vector<8x1000xf32> to vector<8x489xf32>
    %51 = arith.truncf %50 : vector<8x489xf32> to vector<8x489xbf16>
    %c64 = arith.constant 64 : index
    %c0_26 = arith.constant 0 : index
    %52 = vector.load %arg17[%c64, %c0_26] : memref<80x978xbf16, #tpu.memory_space<vmem>>, vector<8x489xbf16>
    tpu.vector_store %arg17[%c64, %c0_26], %51 {strides = array<i32>} : memref<80x978xbf16, #tpu.memory_space<vmem>>, vector<8x489xbf16>,
    %53 = vector.extract_strided_slice %1 {offsets = [0, 508], sizes = [8, 489], strides = [1, 1]} : vector<8x1000xf32> to vector<8x489xf32>
    %54 = arith.truncf %53 : vector<8x489xf32> to vector<8x489xbf16>
    %c64_27 = arith.constant 64 : index
    %c489_28 = arith.constant 489 : index
    %55 = vector.load %arg17[%c64_27, %c489_28] : memref<80x978xbf16, #tpu.memory_space<vmem>>, vector<8x489xbf16>
    tpu.vector_store %arg17[%c64_27, %c489_28], %54 {strides = array<i32>} : memref<80x978xbf16, #tpu.memory_space<vmem>>, vector<8x489xbf16>,
    %56 = vector.extract_strided_slice %1 {offsets = [0, 9], sizes = [8, 489], strides = [1, 1]} : vector<8x1000xf32> to vector<8x489xf32>
    %57 = arith.truncf %56 : vector<8x489xf32> to vector<8x489xbf16>
    %c72 = arith.constant 72 : index
    %c0_29 = arith.constant 0 : index
    %58 = vector.load %arg17[%c72, %c0_29] : memref<80x978xbf16, #tpu.memory_space<vmem>>, vector<8x489xbf16>
    tpu.vector_store %arg17[%c72, %c0_29], %57 {strides = array<i32>} : memref<80x978xbf16, #tpu.memory_space<vmem>>, vector<8x489xbf16>,
    %59 = vector.extract_strided_slice %1 {offsets = [0, 509], sizes = [8, 489], strides = [1, 1]} : vector<8x1000xf32> to vector<8x489xf32>
    %60 = arith.truncf %59 : vector<8x489xf32> to vector<8x489xbf16>
    %c72_30 = arith.constant 72 : index
    %c489_31 = arith.constant 489 : index
    %61 = vector.load %arg17[%c72_30, %c489_31] : memref<80x978xbf16, #tpu.memory_space<vmem>>, vector<8x489xbf16>
    tpu.vector_store %arg17[%c72_30, %c489_31], %60 {strides = array<i32>} : memref<80x978xbf16, #tpu.memory_space<vmem>>, vector<8x489xbf16>,
    %c0_32 = arith.constant 0 : index
    %c0_33 = arith.constant 0 : index
    %62 = vector.load %arg17[%c0_32, %c0_33] : memref<80x978xbf16, #tpu.memory_space<vmem>>, vector<80x978xbf16>
    %c0_34 = arith.constant 0 : index
    %c0_35 = arith.constant 0 : index
    %63 = vector.load %arg2[%c0_34, %c0_35] : memref<25x80xbf16, #tpu.memory_space<vmem>>, vector<25x80xbf16>
    %cst = arith.constant dense<0.000000e+00> : vector<25x978xf32>
    %64 = tpu.matmul %63, %62, %cst {dimension_numbers = #tpu.dot_dimension_numbers<[1], [0], [0], [1], [0, 0, 1, 1], [], []>} : vector<25x80xbf16>, vector<80x978xbf16>, vector<25x978xf32> -> vector<25x978xf32>
    %65 = vector.extract_strided_slice %64 {offsets = [0, 0], sizes = [25, 976], strides = [1, 1]} : vector<25x978xf32> to vector<25x976xf32>
    %66 = vector.extract_strided_slice %64 {offsets = [0, 1], sizes = [25, 976], strides = [1, 1]} : vector<25x978xf32> to vector<25x976xf32>
    %67 = arith.maximumf %65, %66 : vector<25x976xf32>
    %68 = vector.extract_strided_slice %64 {offsets = [0, 2], sizes = [25, 976], strides = [1, 1]} : vector<25x978xf32> to vector<25x976xf32>
    %69 = arith.maximumf %67, %68 : vector<25x976xf32>
    %70 = arith.truncf %69 : vector<25x976xf32> to vector<25x976xbf16>
    %c0_36 = arith.constant 0 : index
    %c0_37 = arith.constant 0 : index
    %71 = vector.load %arg4[%c0_36, %c0_37] : memref<976x326xbf16, #tpu.memory_space<vmem>>, vector<976x326xbf16>
    %cst_38 = arith.constant dense<0.000000e+00> : vector<25x326xf32>
    %72 = tpu.matmul %70, %71, %cst_38 {dimension_numbers = #tpu.dot_dimension_numbers<[1], [0], [0], [1], [0, 0, 1, 1], [], []>} : vector<25x976xbf16>, vector<976x326xbf16>, vector<25x326xf32> -> vector<25x326xf32>
    %c0_39 = arith.constant 0 : index
    %c0_40 = arith.constant 0 : index
    %73 = vector.load %arg3[%c0_39, %c0_40] : memref<25x1xf32, #tpu.memory_space<vmem>>, vector<25x1xf32>
    %74 = vector.broadcast %73 : vector<25x1xf32> to vector<25x326xf32>
    %75 = arith.addf %72, %74 : vector<25x326xf32>
    %cst_41 = arith.constant 0.000000e+00 : f32
    %76 = vector.broadcast %cst_41 : f32 to vector<25x326xf32>
    %77 = arith.cmpf ogt, %75, %76 : vector<25x326xf32>
    %cst_42 = arith.constant 0.000000e+00 : f32
    %78 = vector.broadcast %cst_42 : f32 to vector<25x326xf32>
    %79 = arith.minimumf %75, %78 : vector<25x326xf32>
    %80 = math.exp %79 : vector<25x326xf32>
    %cst_43 = arith.constant 1.000000e+00 : f32
    %81 = vector.broadcast %cst_43 : f32 to vector<25x326xf32>
    %82 = arith.subf %80, %81 : vector<25x326xf32>
    %83 = arith.select %77, %75, %82 : vector<25x326xi1>, vector<25x326xf32>
    %84 = vector.extract_strided_slice %83 {offsets = [0, 0], sizes = [25, 153], strides = [1, 1]} : vector<25x326xf32> to vector<25x153xf32>
    %c0_44 = arith.constant 0 : index
    %c0_45 = arith.constant 0 : index
    %85 = vector.load %arg18[%c0_44, %c0_45] : memref<250x306xf32, #tpu.memory_space<vmem>>, vector<25x153xf32>
    tpu.vector_store %arg18[%c0_44, %c0_45], %84 {strides = array<i32>} : memref<250x306xf32, #tpu.memory_space<vmem>>, vector<25x153xf32>,
    %86 = vector.extract_strided_slice %83 {offsets = [0, 163], sizes = [25, 153], strides = [1, 1]} : vector<25x326xf32> to vector<25x153xf32>
    %c0_46 = arith.constant 0 : index
    %c153 = arith.constant 153 : index
    %87 = vector.load %arg18[%c0_46, %c153] : memref<250x306xf32, #tpu.memory_space<vmem>>, vector<25x153xf32>
    tpu.vector_store %arg18[%c0_46, %c153], %86 {strides = array<i32>} : memref<250x306xf32, #tpu.memory_space<vmem>>, vector<25x153xf32>,
    %88 = vector.extract_strided_slice %83 {offsets = [0, 1], sizes = [25, 153], strides = [1, 1]} : vector<25x326xf32> to vector<25x153xf32>
    %c25 = arith.constant 25 : index
    %c0_47 = arith.constant 0 : index
    %89 = vector.load %arg18[%c25, %c0_47] : memref<250x306xf32, #tpu.memory_space<vmem>>, vector<25x153xf32>
    tpu.vector_store %arg18[%c25, %c0_47], %88 {strides = array<i32>} : memref<250x306xf32, #tpu.memory_space<vmem>>, vector<25x153xf32>,
    %90 = vector.extract_strided_slice %83 {offsets = [0, 164], sizes = [25, 153], strides = [1, 1]} : vector<25x326xf32> to vector<25x153xf32>
    %c25_48 = arith.constant 25 : index
    %c153_49 = arith.constant 153 : index
    %91 = vector.load %arg18[%c25_48, %c153_49] : memref<250x306xf32, #tpu.memory_space<vmem>>, vector<25x153xf32>
    tpu.vector_store %arg18[%c25_48, %c153_49], %90 {strides = array<i32>} : memref<250x306xf32, #tpu.memory_space<vmem>>, vector<25x153xf32>,
    %92 = vector.extract_strided_slice %83 {offsets = [0, 2], sizes = [25, 153], strides = [1, 1]} : vector<25x326xf32> to vector<25x153xf32>
    %c50 = arith.constant 50 : index
    %c0_50 = arith.constant 0 : index
    %93 = vector.load %arg18[%c50, %c0_50] : memref<250x306xf32, #tpu.memory_space<vmem>>, vector<25x153xf32>
    tpu.vector_store %arg18[%c50, %c0_50], %92 {strides = array<i32>} : memref<250x306xf32, #tpu.memory_space<vmem>>, vector<25x153xf32>,
    %94 = vector.extract_strided_slice %83 {offsets = [0, 165], sizes = [25, 153], strides = [1, 1]} : vector<25x326xf32> to vector<25x153xf32>
    %c50_51 = arith.constant 50 : index
    %c153_52 = arith.constant 153 : index
    %95 = vector.load %arg18[%c50_51, %c153_52] : memref<250x306xf32, #tpu.memory_space<vmem>>, vector<25x153xf32>
    tpu.vector_store %arg18[%c50_51, %c153_52], %94 {strides = array<i32>} : memref<250x306xf32, #tpu.memory_space<vmem>>, vector<25x153xf32>,
    %96 = vector.extract_strided_slice %83 {offsets = [0, 3], sizes = [25, 153], strides = [1, 1]} : vector<25x326xf32> to vector<25x153xf32>
    %c75 = arith.constant 75 : index
    %c0_53 = arith.constant 0 : index
    %97 = vector.load %arg18[%c75, %c0_53] : memref<250x306xf32, #tpu.memory_space<vmem>>, vector<25x153xf32>
    tpu.vector_store %arg18[%c75, %c0_53], %96 {strides = array<i32>} : memref<250x306xf32, #tpu.memory_space<vmem>>, vector<25x153xf32>,
    %98 = vector.extract_strided_slice %83 {offsets = [0, 166], sizes = [25, 153], strides = [1, 1]} : vector<25x326xf32> to vector<25x153xf32>
    %c75_54 = arith.constant 75 : index
    %c153_55 = arith.constant 153 : index
    %99 = vector.load %arg18[%c75_54, %c153_55] : memref<250x306xf32, #tpu.memory_space<vmem>>, vector<25x153xf32>
    tpu.vector_store %arg18[%c75_54, %c153_55], %98 {strides = array<i32>} : memref<250x306xf32, #tpu.memory_space<vmem>>, vector<25x153xf32>,
    %100 = vector.extract_strided_slice %83 {offsets = [0, 4], sizes = [25, 153], strides = [1, 1]} : vector<25x326xf32> to vector<25x153xf32>
    %c100 = arith.constant 100 : index
    %c0_56 = arith.constant 0 : index
    %101 = vector.load %arg18[%c100, %c0_56] : memref<250x306xf32, #tpu.memory_space<vmem>>, vector<25x153xf32>
    tpu.vector_store %arg18[%c100, %c0_56], %100 {strides = array<i32>} : memref<250x306xf32, #tpu.memory_space<vmem>>, vector<25x153xf32>,
    %102 = vector.extract_strided_slice %83 {offsets = [0, 167], sizes = [25, 153], strides = [1, 1]} : vector<25x326xf32> to vector<25x153xf32>
    %c100_57 = arith.constant 100 : index
    %c153_58 = arith.constant 153 : index
    %103 = vector.load %arg18[%c100_57, %c153_58] : memref<250x306xf32, #tpu.memory_space<vmem>>, vector<25x153xf32>
    tpu.vector_store %arg18[%c100_57, %c153_58], %102 {strides = array<i32>} : memref<250x306xf32, #tpu.memory_space<vmem>>, vector<25x153xf32>,
    %104 = vector.extract_strided_slice %83 {offsets = [0, 5], sizes = [25, 153], strides = [1, 1]} : vector<25x326xf32> to vector<25x153xf32>
    %c125 = arith.constant 125 : index
    %c0_59 = arith.constant 0 : index
    %105 = vector.load %arg18[%c125, %c0_59] : memref<250x306xf32, #tpu.memory_space<vmem>>, vector<25x153xf32>
    tpu.vector_store %arg18[%c125, %c0_59], %104 {strides = array<i32>} : memref<250x306xf32, #tpu.memory_space<vmem>>, vector<25x153xf32>,
    %106 = vector.extract_strided_slice %83 {offsets = [0, 168], sizes = [25, 153], strides = [1, 1]} : vector<25x326xf32> to vector<25x153xf32>
    %c125_60 = arith.constant 125 : index
    %c153_61 = arith.constant 153 : index
    %107 = vector.load %arg18[%c125_60, %c153_61] : memref<250x306xf32, #tpu.memory_space<vmem>>, vector<25x153xf32>
    tpu.vector_store %arg18[%c125_60, %c153_61], %106 {strides = array<i32>} : memref<250x306xf32, #tpu.memory_space<vmem>>, vector<25x153xf32>,
    %108 = vector.extract_strided_slice %83 {offsets = [0, 6], sizes = [25, 153], strides = [1, 1]} : vector<25x326xf32> to vector<25x153xf32>
    %c150 = arith.constant 150 : index
    %c0_62 = arith.constant 0 : index
    %109 = vector.load %arg18[%c150, %c0_62] : memref<250x306xf32, #tpu.memory_space<vmem>>, vector<25x153xf32>
    tpu.vector_store %arg18[%c150, %c0_62], %108 {strides = array<i32>} : memref<250x306xf32, #tpu.memory_space<vmem>>, vector<25x153xf32>,
    %110 = vector.extract_strided_slice %83 {offsets = [0, 169], sizes = [25, 153], strides = [1, 1]} : vector<25x326xf32> to vector<25x153xf32>
    %c150_63 = arith.constant 150 : index
    %c153_64 = arith.constant 153 : index
    %111 = vector.load %arg18[%c150_63, %c153_64] : memref<250x306xf32, #tpu.memory_space<vmem>>, vector<25x153xf32>
    tpu.vector_store %arg18[%c150_63, %c153_64], %110 {strides = array<i32>} : memref<250x306xf32, #tpu.memory_space<vmem>>, vector<25x153xf32>,
    %112 = vector.extract_strided_slice %83 {offsets = [0, 7], sizes = [25, 153], strides = [1, 1]} : vector<25x326xf32> to vector<25x153xf32>
    %c175 = arith.constant 175 : index
    %c0_65 = arith.constant 0 : index
    %113 = vector.load %arg18[%c175, %c0_65] : memref<250x306xf32, #tpu.memory_space<vmem>>, vector<25x153xf32>
    tpu.vector_store %arg18[%c175, %c0_65], %112 {strides = array<i32>} : memref<250x306xf32, #tpu.memory_space<vmem>>, vector<25x153xf32>,
    %114 = vector.extract_strided_slice %83 {offsets = [0, 170], sizes = [25, 153], strides = [1, 1]} : vector<25x326xf32> to vector<25x153xf32>
    %c175_66 = arith.constant 175 : index
    %c153_67 = arith.constant 153 : index
    %115 = vector.load %arg18[%c175_66, %c153_67] : memref<250x306xf32, #tpu.memory_space<vmem>>, vector<25x153xf32>
    tpu.vector_store %arg18[%c175_66, %c153_67], %114 {strides = array<i32>} : memref<250x306xf32, #tpu.memory_space<vmem>>, vector<25x153xf32>,
    %116 = vector.extract_strided_slice %83 {offsets = [0, 8], sizes = [25, 153], strides = [1, 1]} : vector<25x326xf32> to vector<25x153xf32>
    %c200 = arith.constant 200 : index
    %c0_68 = arith.constant 0 : index
    %117 = vector.load %arg18[%c200, %c0_68] : memref<250x306xf32, #tpu.memory_space<vmem>>, vector<25x153xf32>
    tpu.vector_store %arg18[%c200, %c0_68], %116 {strides = array<i32>} : memref<250x306xf32, #tpu.memory_space<vmem>>, vector<25x153xf32>,
    %118 = vector.extract_strided_slice %83 {offsets = [0, 171], sizes = [25, 153], strides = [1, 1]} : vector<25x326xf32> to vector<25x153xf32>
    %c200_69 = arith.constant 200 : index
    %c153_70 = arith.constant 153 : index
    %119 = vector.load %arg18[%c200_69, %c153_70] : memref<250x306xf32, #tpu.memory_space<vmem>>, vector<25x153xf32>
    tpu.vector_store %arg18[%c200_69, %c153_70], %118 {strides = array<i32>} : memref<250x306xf32, #tpu.memory_space<vmem>>, vector<25x153xf32>,
    %120 = vector.extract_strided_slice %83 {offsets = [0, 9], sizes = [25, 153], strides = [1, 1]} : vector<25x326xf32> to vector<25x153xf32>
    %c225 = arith.constant 225 : index
    %c0_71 = arith.constant 0 : index
    %121 = vector.load %arg18[%c225, %c0_71] : memref<250x306xf32, #tpu.memory_space<vmem>>, vector<25x153xf32>
    tpu.vector_store %arg18[%c225, %c0_71], %120 {strides = array<i32>} : memref<250x306xf32, #tpu.memory_space<vmem>>, vector<25x153xf32>,
    %122 = vector.extract_strided_slice %83 {offsets = [0, 172], sizes = [25, 153], strides = [1, 1]} : vector<25x326xf32> to vector<25x153xf32>
    %c225_72 = arith.constant 225 : index
    %c153_73 = arith.constant 153 : index
    %123 = vector.load %arg18[%c225_72, %c153_73] : memref<250x306xf32, #tpu.memory_space<vmem>>, vector<25x153xf32>
    tpu.vector_store %arg18[%c225_72, %c153_73], %122 {strides = array<i32>} : memref<250x306xf32, #tpu.memory_space<vmem>>, vector<25x153xf32>,
    %c0_74 = arith.constant 0 : index
    %c0_75 = arith.constant 0 : index
    %124 = vector.load %arg18[%c0_74, %c0_75] : memref<250x306xf32, #tpu.memory_space<vmem>>, vector<250x306xf32>
    %125 = arith.truncf %124 : vector<250x306xf32> to vector<250x306xbf16>
    %c0_76 = arith.constant 0 : index
    %c0_77 = arith.constant 0 : index
    %126 = vector.load %arg5[%c0_76, %c0_77] : memref<50x250xbf16, #tpu.memory_space<vmem>>, vector<50x250xbf16>
    %cst_78 = arith.constant dense<0.000000e+00> : vector<50x306xf32>
    %127 = tpu.matmul %126, %125, %cst_78 {dimension_numbers = #tpu.dot_dimension_numbers<[1], [0], [0], [1], [0, 0, 1, 1], [], []>} : vector<50x250xbf16>, vector<250x306xbf16>, vector<50x306xf32> -> vector<50x306xf32>
    %128 = vector.extract_strided_slice %127 {offsets = [0, 0], sizes = [50, 304], strides = [1, 1]} : vector<50x306xf32> to vector<50x304xf32>
    %129 = vector.extract_strided_slice %127 {offsets = [0, 1], sizes = [50, 304], strides = [1, 1]} : vector<50x306xf32> to vector<50x304xf32>
    %130 = arith.maximumf %128, %129 : vector<50x304xf32>
    %131 = vector.extract_strided_slice %127 {offsets = [0, 2], sizes = [50, 304], strides = [1, 1]} : vector<50x306xf32> to vector<50x304xf32>
    %132 = arith.maximumf %130, %131 : vector<50x304xf32>
    %133 = arith.truncf %132 : vector<50x304xf32> to vector<50x304xbf16>
    %c0_79 = arith.constant 0 : index
    %c0_80 = arith.constant 0 : index
    %134 = vector.load %arg7[%c0_79, %c0_80] : memref<304x102xbf16, #tpu.memory_space<vmem>>, vector<304x102xbf16>
    %cst_81 = arith.constant dense<0.000000e+00> : vector<50x102xf32>
    %135 = tpu.matmul %133, %134, %cst_81 {dimension_numbers = #tpu.dot_dimension_numbers<[1], [0], [0], [1], [0, 0, 1, 1], [], []>} : vector<50x304xbf16>, vector<304x102xbf16>, vector<50x102xf32> -> vector<50x102xf32>
    %c0_82 = arith.constant 0 : index
    %c0_83 = arith.constant 0 : index
    %136 = vector.load %arg6[%c0_82, %c0_83] : memref<50x1xf32, #tpu.memory_space<vmem>>, vector<50x1xf32>
    %137 = vector.broadcast %136 : vector<50x1xf32> to vector<50x102xf32>
    %138 = arith.addf %135, %137 : vector<50x102xf32>
    %cst_84 = arith.constant 0.000000e+00 : f32
    %139 = vector.broadcast %cst_84 : f32 to vector<50x102xf32>
    %140 = arith.cmpf ogt, %138, %139 : vector<50x102xf32>
    %cst_85 = arith.constant 0.000000e+00 : f32
    %141 = vector.broadcast %cst_85 : f32 to vector<50x102xf32>
    %142 = arith.minimumf %138, %141 : vector<50x102xf32>
    %143 = math.exp %142 : vector<50x102xf32>
    %cst_86 = arith.constant 1.000000e+00 : f32
    %144 = vector.broadcast %cst_86 : f32 to vector<50x102xf32>
    %145 = arith.subf %143, %144 : vector<50x102xf32>
    %146 = arith.select %140, %138, %145 : vector<50x102xi1>, vector<50x102xf32>
    %147 = vector.extract_strided_slice %146 {offsets = [0, 0], sizes = [50, 42], strides = [1, 1]} : vector<50x102xf32> to vector<50x42xf32>
    %148 = arith.truncf %147 : vector<50x42xf32> to vector<50x42xbf16>
    %c0_87 = arith.constant 0 : index
    %c0_88 = arith.constant 0 : index
    %149 = vector.load %arg19[%c0_87, %c0_88] : memref<500x84xbf16, #tpu.memory_space<vmem>>, vector<50x42xbf16>
    tpu.vector_store %arg19[%c0_87, %c0_88], %148 {strides = array<i32>} : memref<500x84xbf16, #tpu.memory_space<vmem>>, vector<50x42xbf16>,
    %150 = vector.extract_strided_slice %146 {offsets = [0, 51], sizes = [50, 42], strides = [1, 1]} : vector<50x102xf32> to vector<50x42xf32>
    %151 = arith.truncf %150 : vector<50x42xf32> to vector<50x42xbf16>
    %c0_89 = arith.constant 0 : index
    %c42 = arith.constant 42 : index
    %152 = vector.load %arg19[%c0_89, %c42] : memref<500x84xbf16, #tpu.memory_space<vmem>>, vector<50x42xbf16>
    tpu.vector_store %arg19[%c0_89, %c42], %151 {strides = array<i32>} : memref<500x84xbf16, #tpu.memory_space<vmem>>, vector<50x42xbf16>,
    %153 = vector.extract_strided_slice %146 {offsets = [0, 1], sizes = [50, 42], strides = [1, 1]} : vector<50x102xf32> to vector<50x42xf32>
    %154 = arith.truncf %153 : vector<50x42xf32> to vector<50x42xbf16>
    %c50_90 = arith.constant 50 : index
    %c0_91 = arith.constant 0 : index
    %155 = vector.load %arg19[%c50_90, %c0_91] : memref<500x84xbf16, #tpu.memory_space<vmem>>, vector<50x42xbf16>
    tpu.vector_store %arg19[%c50_90, %c0_91], %154 {strides = array<i32>} : memref<500x84xbf16, #tpu.memory_space<vmem>>, vector<50x42xbf16>,
    %156 = vector.extract_strided_slice %146 {offsets = [0, 52], sizes = [50, 42], strides = [1, 1]} : vector<50x102xf32> to vector<50x42xf32>
    %157 = arith.truncf %156 : vector<50x42xf32> to vector<50x42xbf16>
    %c50_92 = arith.constant 50 : index
    %c42_93 = arith.constant 42 : index
    %158 = vector.load %arg19[%c50_92, %c42_93] : memref<500x84xbf16, #tpu.memory_space<vmem>>, vector<50x42xbf16>
    tpu.vector_store %arg19[%c50_92, %c42_93], %157 {strides = array<i32>} : memref<500x84xbf16, #tpu.memory_space<vmem>>, vector<50x42xbf16>,
    %159 = vector.extract_strided_slice %146 {offsets = [0, 2], sizes = [50, 42], strides = [1, 1]} : vector<50x102xf32> to vector<50x42xf32>
    %160 = arith.truncf %159 : vector<50x42xf32> to vector<50x42xbf16>
    %c100_94 = arith.constant 100 : index
    %c0_95 = arith.constant 0 : index
    %161 = vector.load %arg19[%c100_94, %c0_95] : memref<500x84xbf16, #tpu.memory_space<vmem>>, vector<50x42xbf16>
    tpu.vector_store %arg19[%c100_94, %c0_95], %160 {strides = array<i32>} : memref<500x84xbf16, #tpu.memory_space<vmem>>, vector<50x42xbf16>,
    %162 = vector.extract_strided_slice %146 {offsets = [0, 53], sizes = [50, 42], strides = [1, 1]} : vector<50x102xf32> to vector<50x42xf32>
    %163 = arith.truncf %162 : vector<50x42xf32> to vector<50x42xbf16>
    %c100_96 = arith.constant 100 : index
    %c42_97 = arith.constant 42 : index
    %164 = vector.load %arg19[%c100_96, %c42_97] : memref<500x84xbf16, #tpu.memory_space<vmem>>, vector<50x42xbf16>
    tpu.vector_store %arg19[%c100_96, %c42_97], %163 {strides = array<i32>} : memref<500x84xbf16, #tpu.memory_space<vmem>>, vector<50x42xbf16>,
    %165 = vector.extract_strided_slice %146 {offsets = [0, 3], sizes = [50, 42], strides = [1, 1]} : vector<50x102xf32> to vector<50x42xf32>
    %166 = arith.truncf %165 : vector<50x42xf32> to vector<50x42xbf16>
    %c150_98 = arith.constant 150 : index
    %c0_99 = arith.constant 0 : index
    %167 = vector.load %arg19[%c150_98, %c0_99] : memref<500x84xbf16, #tpu.memory_space<vmem>>, vector<50x42xbf16>
    tpu.vector_store %arg19[%c150_98, %c0_99], %166 {strides = array<i32>} : memref<500x84xbf16, #tpu.memory_space<vmem>>, vector<50x42xbf16>,
    %168 = vector.extract_strided_slice %146 {offsets = [0, 54], sizes = [50, 42], strides = [1, 1]} : vector<50x102xf32> to vector<50x42xf32>
    %169 = arith.truncf %168 : vector<50x42xf32> to vector<50x42xbf16>
    %c150_100 = arith.constant 150 : index
    %c42_101 = arith.constant 42 : index
    %170 = vector.load %arg19[%c150_100, %c42_101] : memref<500x84xbf16, #tpu.memory_space<vmem>>, vector<50x42xbf16>
    tpu.vector_store %arg19[%c150_100, %c42_101], %169 {strides = array<i32>} : memref<500x84xbf16, #tpu.memory_space<vmem>>, vector<50x42xbf16>,
    %171 = vector.extract_strided_slice %146 {offsets = [0, 4], sizes = [50, 42], strides = [1, 1]} : vector<50x102xf32> to vector<50x42xf32>
    %172 = arith.truncf %171 : vector<50x42xf32> to vector<50x42xbf16>
    %c200_102 = arith.constant 200 : index
    %c0_103 = arith.constant 0 : index
    %173 = vector.load %arg19[%c200_102, %c0_103] : memref<500x84xbf16, #tpu.memory_space<vmem>>, vector<50x42xbf16>
    tpu.vector_store %arg19[%c200_102, %c0_103], %172 {strides = array<i32>} : memref<500x84xbf16, #tpu.memory_space<vmem>>, vector<50x42xbf16>,
    %174 = vector.extract_strided_slice %146 {offsets = [0, 55], sizes = [50, 42], strides = [1, 1]} : vector<50x102xf32> to vector<50x42xf32>
    %175 = arith.truncf %174 : vector<50x42xf32> to vector<50x42xbf16>
    %c200_104 = arith.constant 200 : index
    %c42_105 = arith.constant 42 : index
    %176 = vector.load %arg19[%c200_104, %c42_105] : memref<500x84xbf16, #tpu.memory_space<vmem>>, vector<50x42xbf16>
    tpu.vector_store %arg19[%c200_104, %c42_105], %175 {strides = array<i32>} : memref<500x84xbf16, #tpu.memory_space<vmem>>, vector<50x42xbf16>,
    %177 = vector.extract_strided_slice %146 {offsets = [0, 5], sizes = [50, 42], strides = [1, 1]} : vector<50x102xf32> to vector<50x42xf32>
    %178 = arith.truncf %177 : vector<50x42xf32> to vector<50x42xbf16>
    %c250 = arith.constant 250 : index
    %c0_106 = arith.constant 0 : index
    %179 = vector.load %arg19[%c250, %c0_106] : memref<500x84xbf16, #tpu.memory_space<vmem>>, vector<50x42xbf16>
    tpu.vector_store %arg19[%c250, %c0_106], %178 {strides = array<i32>} : memref<500x84xbf16, #tpu.memory_space<vmem>>, vector<50x42xbf16>,
    %180 = vector.extract_strided_slice %146 {offsets = [0, 56], sizes = [50, 42], strides = [1, 1]} : vector<50x102xf32> to vector<50x42xf32>
    %181 = arith.truncf %180 : vector<50x42xf32> to vector<50x42xbf16>
    %c250_107 = arith.constant 250 : index
    %c42_108 = arith.constant 42 : index
    %182 = vector.load %arg19[%c250_107, %c42_108] : memref<500x84xbf16, #tpu.memory_space<vmem>>, vector<50x42xbf16>
    tpu.vector_store %arg19[%c250_107, %c42_108], %181 {strides = array<i32>} : memref<500x84xbf16, #tpu.memory_space<vmem>>, vector<50x42xbf16>,
    %183 = vector.extract_strided_slice %146 {offsets = [0, 6], sizes = [50, 42], strides = [1, 1]} : vector<50x102xf32> to vector<50x42xf32>
    %184 = arith.truncf %183 : vector<50x42xf32> to vector<50x42xbf16>
    %c300 = arith.constant 300 : index
    %c0_109 = arith.constant 0 : index
    %185 = vector.load %arg19[%c300, %c0_109] : memref<500x84xbf16, #tpu.memory_space<vmem>>, vector<50x42xbf16>
    tpu.vector_store %arg19[%c300, %c0_109], %184 {strides = array<i32>} : memref<500x84xbf16, #tpu.memory_space<vmem>>, vector<50x42xbf16>,
    %186 = vector.extract_strided_slice %146 {offsets = [0, 57], sizes = [50, 42], strides = [1, 1]} : vector<50x102xf32> to vector<50x42xf32>
    %187 = arith.truncf %186 : vector<50x42xf32> to vector<50x42xbf16>
    %c300_110 = arith.constant 300 : index
    %c42_111 = arith.constant 42 : index
    %188 = vector.load %arg19[%c300_110, %c42_111] : memref<500x84xbf16, #tpu.memory_space<vmem>>, vector<50x42xbf16>
    tpu.vector_store %arg19[%c300_110, %c42_111], %187 {strides = array<i32>} : memref<500x84xbf16, #tpu.memory_space<vmem>>, vector<50x42xbf16>,
    %189 = vector.extract_strided_slice %146 {offsets = [0, 7], sizes = [50, 42], strides = [1, 1]} : vector<50x102xf32> to vector<50x42xf32>
    %190 = arith.truncf %189 : vector<50x42xf32> to vector<50x42xbf16>
    %c350 = arith.constant 350 : index
    %c0_112 = arith.constant 0 : index
    %191 = vector.load %arg19[%c350, %c0_112] : memref<500x84xbf16, #tpu.memory_space<vmem>>, vector<50x42xbf16>
    tpu.vector_store %arg19[%c350, %c0_112], %190 {strides = array<i32>} : memref<500x84xbf16, #tpu.memory_space<vmem>>, vector<50x42xbf16>,
    %192 = vector.extract_strided_slice %146 {offsets = [0, 58], sizes = [50, 42], strides = [1, 1]} : vector<50x102xf32> to vector<50x42xf32>
    %193 = arith.truncf %192 : vector<50x42xf32> to vector<50x42xbf16>
    %c350_113 = arith.constant 350 : index
    %c42_114 = arith.constant 42 : index
    %194 = vector.load %arg19[%c350_113, %c42_114] : memref<500x84xbf16, #tpu.memory_space<vmem>>, vector<50x42xbf16>
    tpu.vector_store %arg19[%c350_113, %c42_114], %193 {strides = array<i32>} : memref<500x84xbf16, #tpu.memory_space<vmem>>, vector<50x42xbf16>,
    %195 = vector.extract_strided_slice %146 {offsets = [0, 8], sizes = [50, 42], strides = [1, 1]} : vector<50x102xf32> to vector<50x42xf32>
    %196 = arith.truncf %195 : vector<50x42xf32> to vector<50x42xbf16>
    %c400 = arith.constant 400 : index
    %c0_115 = arith.constant 0 : index
    %197 = vector.load %arg19[%c400, %c0_115] : memref<500x84xbf16, #tpu.memory_space<vmem>>, vector<50x42xbf16>
    tpu.vector_store %arg19[%c400, %c0_115], %196 {strides = array<i32>} : memref<500x84xbf16, #tpu.memory_space<vmem>>, vector<50x42xbf16>,
    %198 = vector.extract_strided_slice %146 {offsets = [0, 59], sizes = [50, 42], strides = [1, 1]} : vector<50x102xf32> to vector<50x42xf32>
    %199 = arith.truncf %198 : vector<50x42xf32> to vector<50x42xbf16>
    %c400_116 = arith.constant 400 : index
    %c42_117 = arith.constant 42 : index
    %200 = vector.load %arg19[%c400_116, %c42_117] : memref<500x84xbf16, #tpu.memory_space<vmem>>, vector<50x42xbf16>
    tpu.vector_store %arg19[%c400_116, %c42_117], %199 {strides = array<i32>} : memref<500x84xbf16, #tpu.memory_space<vmem>>, vector<50x42xbf16>,
    %201 = vector.extract_strided_slice %146 {offsets = [0, 9], sizes = [50, 42], strides = [1, 1]} : vector<50x102xf32> to vector<50x42xf32>
    %202 = arith.truncf %201 : vector<50x42xf32> to vector<50x42xbf16>
    %c450 = arith.constant 450 : index
    %c0_118 = arith.constant 0 : index
    %203 = vector.load %arg19[%c450, %c0_118] : memref<500x84xbf16, #tpu.memory_space<vmem>>, vector<50x42xbf16>
    tpu.vector_store %arg19[%c450, %c0_118], %202 {strides = array<i32>} : memref<500x84xbf16, #tpu.memory_space<vmem>>, vector<50x42xbf16>,
    %204 = vector.extract_strided_slice %146 {offsets = [0, 60], sizes = [50, 42], strides = [1, 1]} : vector<50x102xf32> to vector<50x42xf32>
    %205 = arith.truncf %204 : vector<50x42xf32> to vector<50x42xbf16>
    %c450_119 = arith.constant 450 : index
    %c42_120 = arith.constant 42 : index
    %206 = vector.load %arg19[%c450_119, %c42_120] : memref<500x84xbf16, #tpu.memory_space<vmem>>, vector<50x42xbf16>
    tpu.vector_store %arg19[%c450_119, %c42_120], %205 {strides = array<i32>} : memref<500x84xbf16, #tpu.memory_space<vmem>>, vector<50x42xbf16>,
    %c0_121 = arith.constant 0 : index
    %c0_122 = arith.constant 0 : index
    %207 = vector.load %arg19[%c0_121, %c0_122] : memref<500x84xbf16, #tpu.memory_space<vmem>>, vector<500x84xbf16>
    %c0_123 = arith.constant 0 : index
    %c0_124 = arith.constant 0 : index
    %208 = vector.load %arg8[%c0_123, %c0_124] : memref<100x500xbf16, #tpu.memory_space<vmem>>, vector<100x500xbf16>
    %cst_125 = arith.constant dense<0.000000e+00> : vector<100x84xf32>
    %209 = tpu.matmul %208, %207, %cst_125 {dimension_numbers = #tpu.dot_dimension_numbers<[1], [0], [0], [1], [0, 0, 1, 1], [], []>} : vector<100x500xbf16>, vector<500x84xbf16>, vector<100x84xf32> -> vector<100x84xf32>
    %210 = vector.extract_strided_slice %209 {offsets = [0, 0], sizes = [100, 82], strides = [1, 1]} : vector<100x84xf32> to vector<100x82xf32>
    %211 = vector.extract_strided_slice %209 {offsets = [0, 1], sizes = [100, 82], strides = [1, 1]} : vector<100x84xf32> to vector<100x82xf32>
    %212 = arith.maximumf %210, %211 : vector<100x82xf32>
    %213 = vector.extract_strided_slice %209 {offsets = [0, 2], sizes = [100, 82], strides = [1, 1]} : vector<100x84xf32> to vector<100x82xf32>
    %214 = arith.maximumf %212, %213 : vector<100x82xf32>
    %215 = arith.truncf %214 : vector<100x82xf32> to vector<100x82xbf16>
    %c0_126 = arith.constant 0 : index
    %c0_127 = arith.constant 0 : index
    %216 = vector.load %arg10[%c0_126, %c0_127] : memref<82x28xbf16, #tpu.memory_space<vmem>>, vector<82x28xbf16>
    %cst_128 = arith.constant dense<0.000000e+00> : vector<100x28xf32>
    %217 = tpu.matmul %215, %216, %cst_128 {dimension_numbers = #tpu.dot_dimension_numbers<[1], [0], [0], [1], [0, 0, 1, 1], [], []>} : vector<100x82xbf16>, vector<82x28xbf16>, vector<100x28xf32> -> vector<100x28xf32>
    %c0_129 = arith.constant 0 : index
    %c0_130 = arith.constant 0 : index
    %218 = vector.load %arg9[%c0_129, %c0_130] : memref<100x1xf32, #tpu.memory_space<vmem>>, vector<100x1xf32>
    %219 = vector.broadcast %218 : vector<100x1xf32> to vector<100x28xf32>
    %220 = arith.addf %217, %219 : vector<100x28xf32>
    %cst_131 = arith.constant 0.000000e+00 : f32
    %221 = vector.broadcast %cst_131 : f32 to vector<100x28xf32>
    %222 = arith.cmpf ogt, %220, %221 : vector<100x28xf32>
    %cst_132 = arith.constant 0.000000e+00 : f32
    %223 = vector.broadcast %cst_132 : f32 to vector<100x28xf32>
    %224 = arith.minimumf %220, %223 : vector<100x28xf32>
    %225 = math.exp %224 : vector<100x28xf32>
    %cst_133 = arith.constant 1.000000e+00 : f32
    %226 = vector.broadcast %cst_133 : f32 to vector<100x28xf32>
    %227 = arith.subf %225, %226 : vector<100x28xf32>
    %228 = arith.select %222, %220, %227 : vector<100x28xi1>, vector<100x28xf32>
    %229 = vector.extract_strided_slice %228 {offsets = [0, 0], sizes = [100, 3], strides = [1, 1]} : vector<100x28xf32> to vector<100x3xf32>
    %230 = arith.truncf %229 : vector<100x3xf32> to vector<100x3xbf16>
    %c0_134 = arith.constant 0 : index
    %c0_135 = arith.constant 0 : index
    %231 = vector.load %arg20[%c0_134, %c0_135] : memref<1000x6xbf16, #tpu.memory_space<vmem>>, vector<100x3xbf16>
    tpu.vector_store %arg20[%c0_134, %c0_135], %230 {strides = array<i32>} : memref<1000x6xbf16, #tpu.memory_space<vmem>>, vector<100x3xbf16>,
    %232 = vector.extract_strided_slice %228 {offsets = [0, 14], sizes = [100, 3], strides = [1, 1]} : vector<100x28xf32> to vector<100x3xf32>
    %233 = arith.truncf %232 : vector<100x3xf32> to vector<100x3xbf16>
    %c0_136 = arith.constant 0 : index
    %c3 = arith.constant 3 : index
    %234 = vector.load %arg20[%c0_136, %c3] : memref<1000x6xbf16, #tpu.memory_space<vmem>>, vector<100x3xbf16>
    tpu.vector_store %arg20[%c0_136, %c3], %233 {strides = array<i32>} : memref<1000x6xbf16, #tpu.memory_space<vmem>>, vector<100x3xbf16>,
    %235 = vector.extract_strided_slice %228 {offsets = [0, 1], sizes = [100, 3], strides = [1, 1]} : vector<100x28xf32> to vector<100x3xf32>
    %236 = arith.truncf %235 : vector<100x3xf32> to vector<100x3xbf16>
    %c100_137 = arith.constant 100 : index
    %c0_138 = arith.constant 0 : index
    %237 = vector.load %arg20[%c100_137, %c0_138] : memref<1000x6xbf16, #tpu.memory_space<vmem>>, vector<100x3xbf16>
    tpu.vector_store %arg20[%c100_137, %c0_138], %236 {strides = array<i32>} : memref<1000x6xbf16, #tpu.memory_space<vmem>>, vector<100x3xbf16>,
    %238 = vector.extract_strided_slice %228 {offsets = [0, 15], sizes = [100, 3], strides = [1, 1]} : vector<100x28xf32> to vector<100x3xf32>
    %239 = arith.truncf %238 : vector<100x3xf32> to vector<100x3xbf16>
    %c100_139 = arith.constant 100 : index
    %c3_140 = arith.constant 3 : index
    %240 = vector.load %arg20[%c100_139, %c3_140] : memref<1000x6xbf16, #tpu.memory_space<vmem>>, vector<100x3xbf16>
    tpu.vector_store %arg20[%c100_139, %c3_140], %239 {strides = array<i32>} : memref<1000x6xbf16, #tpu.memory_space<vmem>>, vector<100x3xbf16>,
    %241 = vector.extract_strided_slice %228 {offsets = [0, 2], sizes = [100, 3], strides = [1, 1]} : vector<100x28xf32> to vector<100x3xf32>
    %242 = arith.truncf %241 : vector<100x3xf32> to vector<100x3xbf16>
    %c200_141 = arith.constant 200 : index
    %c0_142 = arith.constant 0 : index
    %243 = vector.load %arg20[%c200_141, %c0_142] : memref<1000x6xbf16, #tpu.memory_space<vmem>>, vector<100x3xbf16>
    tpu.vector_store %arg20[%c200_141, %c0_142], %242 {strides = array<i32>} : memref<1000x6xbf16, #tpu.memory_space<vmem>>, vector<100x3xbf16>,
    %244 = vector.extract_strided_slice %228 {offsets = [0, 16], sizes = [100, 3], strides = [1, 1]} : vector<100x28xf32> to vector<100x3xf32>
    %245 = arith.truncf %244 : vector<100x3xf32> to vector<100x3xbf16>
    %c200_143 = arith.constant 200 : index
    %c3_144 = arith.constant 3 : index
    %246 = vector.load %arg20[%c200_143, %c3_144] : memref<1000x6xbf16, #tpu.memory_space<vmem>>, vector<100x3xbf16>
    tpu.vector_store %arg20[%c200_143, %c3_144], %245 {strides = array<i32>} : memref<1000x6xbf16, #tpu.memory_space<vmem>>, vector<100x3xbf16>,
    %247 = vector.extract_strided_slice %228 {offsets = [0, 3], sizes = [100, 3], strides = [1, 1]} : vector<100x28xf32> to vector<100x3xf32>
    %248 = arith.truncf %247 : vector<100x3xf32> to vector<100x3xbf16>
    %c300_145 = arith.constant 300 : index
    %c0_146 = arith.constant 0 : index
    %249 = vector.load %arg20[%c300_145, %c0_146] : memref<1000x6xbf16, #tpu.memory_space<vmem>>, vector<100x3xbf16>
    tpu.vector_store %arg20[%c300_145, %c0_146], %248 {strides = array<i32>} : memref<1000x6xbf16, #tpu.memory_space<vmem>>, vector<100x3xbf16>,
    %250 = vector.extract_strided_slice %228 {offsets = [0, 17], sizes = [100, 3], strides = [1, 1]} : vector<100x28xf32> to vector<100x3xf32>
    %251 = arith.truncf %250 : vector<100x3xf32> to vector<100x3xbf16>
    %c300_147 = arith.constant 300 : index
    %c3_148 = arith.constant 3 : index
    %252 = vector.load %arg20[%c300_147, %c3_148] : memref<1000x6xbf16, #tpu.memory_space<vmem>>, vector<100x3xbf16>
    tpu.vector_store %arg20[%c300_147, %c3_148], %251 {strides = array<i32>} : memref<1000x6xbf16, #tpu.memory_space<vmem>>, vector<100x3xbf16>,
    %253 = vector.extract_strided_slice %228 {offsets = [0, 4], sizes = [100, 3], strides = [1, 1]} : vector<100x28xf32> to vector<100x3xf32>
    %254 = arith.truncf %253 : vector<100x3xf32> to vector<100x3xbf16>
    %c400_149 = arith.constant 400 : index
    %c0_150 = arith.constant 0 : index
    %255 = vector.load %arg20[%c400_149, %c0_150] : memref<1000x6xbf16, #tpu.memory_space<vmem>>, vector<100x3xbf16>
    tpu.vector_store %arg20[%c400_149, %c0_150], %254 {strides = array<i32>} : memref<1000x6xbf16, #tpu.memory_space<vmem>>, vector<100x3xbf16>,
    %256 = vector.extract_strided_slice %228 {offsets = [0, 18], sizes = [100, 3], strides = [1, 1]} : vector<100x28xf32> to vector<100x3xf32>
    %257 = arith.truncf %256 : vector<100x3xf32> to vector<100x3xbf16>
    %c400_151 = arith.constant 400 : index
    %c3_152 = arith.constant 3 : index
    %258 = vector.load %arg20[%c400_151, %c3_152] : memref<1000x6xbf16, #tpu.memory_space<vmem>>, vector<100x3xbf16>
    tpu.vector_store %arg20[%c400_151, %c3_152], %257 {strides = array<i32>} : memref<1000x6xbf16, #tpu.memory_space<vmem>>, vector<100x3xbf16>,
    %259 = vector.extract_strided_slice %228 {offsets = [0, 5], sizes = [100, 3], strides = [1, 1]} : vector<100x28xf32> to vector<100x3xf32>
    %260 = arith.truncf %259 : vector<100x3xf32> to vector<100x3xbf16>
    %c500 = arith.constant 500 : index
    %c0_153 = arith.constant 0 : index
    %261 = vector.load %arg20[%c500, %c0_153] : memref<1000x6xbf16, #tpu.memory_space<vmem>>, vector<100x3xbf16>
    tpu.vector_store %arg20[%c500, %c0_153], %260 {strides = array<i32>} : memref<1000x6xbf16, #tpu.memory_space<vmem>>, vector<100x3xbf16>,
    %262 = vector.extract_strided_slice %228 {offsets = [0, 19], sizes = [100, 3], strides = [1, 1]} : vector<100x28xf32> to vector<100x3xf32>
    %263 = arith.truncf %262 : vector<100x3xf32> to vector<100x3xbf16>
    %c500_154 = arith.constant 500 : index
    %c3_155 = arith.constant 3 : index
    %264 = vector.load %arg20[%c500_154, %c3_155] : memref<1000x6xbf16, #tpu.memory_space<vmem>>, vector<100x3xbf16>
    tpu.vector_store %arg20[%c500_154, %c3_155], %263 {strides = array<i32>} : memref<1000x6xbf16, #tpu.memory_space<vmem>>, vector<100x3xbf16>,
    %265 = vector.extract_strided_slice %228 {offsets = [0, 6], sizes = [100, 3], strides = [1, 1]} : vector<100x28xf32> to vector<100x3xf32>
    %266 = arith.truncf %265 : vector<100x3xf32> to vector<100x3xbf16>
    %c600 = arith.constant 600 : index
    %c0_156 = arith.constant 0 : index
    %267 = vector.load %arg20[%c600, %c0_156] : memref<1000x6xbf16, #tpu.memory_space<vmem>>, vector<100x3xbf16>
    tpu.vector_store %arg20[%c600, %c0_156], %266 {strides = array<i32>} : memref<1000x6xbf16, #tpu.memory_space<vmem>>, vector<100x3xbf16>,
    %268 = vector.extract_strided_slice %228 {offsets = [0, 20], sizes = [100, 3], strides = [1, 1]} : vector<100x28xf32> to vector<100x3xf32>
    %269 = arith.truncf %268 : vector<100x3xf32> to vector<100x3xbf16>
    %c600_157 = arith.constant 600 : index
    %c3_158 = arith.constant 3 : index
    %270 = vector.load %arg20[%c600_157, %c3_158] : memref<1000x6xbf16, #tpu.memory_space<vmem>>, vector<100x3xbf16>
    tpu.vector_store %arg20[%c600_157, %c3_158], %269 {strides = array<i32>} : memref<1000x6xbf16, #tpu.memory_space<vmem>>, vector<100x3xbf16>,
    %271 = vector.extract_strided_slice %228 {offsets = [0, 7], sizes = [100, 3], strides = [1, 1]} : vector<100x28xf32> to vector<100x3xf32>
    %272 = arith.truncf %271 : vector<100x3xf32> to vector<100x3xbf16>
    %c700 = arith.constant 700 : index
    %c0_159 = arith.constant 0 : index
    %273 = vector.load %arg20[%c700, %c0_159] : memref<1000x6xbf16, #tpu.memory_space<vmem>>, vector<100x3xbf16>
    tpu.vector_store %arg20[%c700, %c0_159], %272 {strides = array<i32>} : memref<1000x6xbf16, #tpu.memory_space<vmem>>, vector<100x3xbf16>,
    %274 = vector.extract_strided_slice %228 {offsets = [0, 21], sizes = [100, 3], strides = [1, 1]} : vector<100x28xf32> to vector<100x3xf32>
    %275 = arith.truncf %274 : vector<100x3xf32> to vector<100x3xbf16>
    %c700_160 = arith.constant 700 : index
    %c3_161 = arith.constant 3 : index
    %276 = vector.load %arg20[%c700_160, %c3_161] : memref<1000x6xbf16, #tpu.memory_space<vmem>>, vector<100x3xbf16>
    tpu.vector_store %arg20[%c700_160, %c3_161], %275 {strides = array<i32>} : memref<1000x6xbf16, #tpu.memory_space<vmem>>, vector<100x3xbf16>,
    %277 = vector.extract_strided_slice %228 {offsets = [0, 8], sizes = [100, 3], strides = [1, 1]} : vector<100x28xf32> to vector<100x3xf32>
    %278 = arith.truncf %277 : vector<100x3xf32> to vector<100x3xbf16>
    %c800 = arith.constant 800 : index
    %c0_162 = arith.constant 0 : index
    %279 = vector.load %arg20[%c800, %c0_162] : memref<1000x6xbf16, #tpu.memory_space<vmem>>, vector<100x3xbf16>
    tpu.vector_store %arg20[%c800, %c0_162], %278 {strides = array<i32>} : memref<1000x6xbf16, #tpu.memory_space<vmem>>, vector<100x3xbf16>,
    %280 = vector.extract_strided_slice %228 {offsets = [0, 22], sizes = [100, 3], strides = [1, 1]} : vector<100x28xf32> to vector<100x3xf32>
    %281 = arith.truncf %280 : vector<100x3xf32> to vector<100x3xbf16>
    %c800_163 = arith.constant 800 : index
    %c3_164 = arith.constant 3 : index
    %282 = vector.load %arg20[%c800_163, %c3_164] : memref<1000x6xbf16, #tpu.memory_space<vmem>>, vector<100x3xbf16>
    tpu.vector_store %arg20[%c800_163, %c3_164], %281 {strides = array<i32>} : memref<1000x6xbf16, #tpu.memory_space<vmem>>, vector<100x3xbf16>,
    %283 = vector.extract_strided_slice %228 {offsets = [0, 9], sizes = [100, 3], strides = [1, 1]} : vector<100x28xf32> to vector<100x3xf32>
    %284 = arith.truncf %283 : vector<100x3xf32> to vector<100x3xbf16>
    %c900 = arith.constant 900 : index
    %c0_165 = arith.constant 0 : index
    %285 = vector.load %arg20[%c900, %c0_165] : memref<1000x6xbf16, #tpu.memory_space<vmem>>, vector<100x3xbf16>
    tpu.vector_store %arg20[%c900, %c0_165], %284 {strides = array<i32>} : memref<1000x6xbf16, #tpu.memory_space<vmem>>, vector<100x3xbf16>,
    %286 = vector.extract_strided_slice %228 {offsets = [0, 23], sizes = [100, 3], strides = [1, 1]} : vector<100x28xf32> to vector<100x3xf32>
    %287 = arith.truncf %286 : vector<100x3xf32> to vector<100x3xbf16>
    %c900_166 = arith.constant 900 : index
    %c3_167 = arith.constant 3 : index
    %288 = vector.load %arg20[%c900_166, %c3_167] : memref<1000x6xbf16, #tpu.memory_space<vmem>>, vector<100x3xbf16>
    tpu.vector_store %arg20[%c900_166, %c3_167], %287 {strides = array<i32>} : memref<1000x6xbf16, #tpu.memory_space<vmem>>, vector<100x3xbf16>,
    %c0_168 = arith.constant 0 : index
    %c0_169 = arith.constant 0 : index
    %289 = vector.load %arg20[%c0_168, %c0_169] : memref<1000x6xbf16, #tpu.memory_space<vmem>>, vector<1000x6xbf16>
    %c0_170 = arith.constant 0 : index
    %c0_171 = arith.constant 0 : index
    %290 = vector.load %arg11[%c0_170, %c0_171] : memref<200x1000xbf16, #tpu.memory_space<vmem>>, vector<200x1000xbf16>
    %cst_172 = arith.constant dense<0.000000e+00> : vector<200x6xf32>
    %291 = tpu.matmul %290, %289, %cst_172 {dimension_numbers = #tpu.dot_dimension_numbers<[1], [0], [0], [1], [0, 0, 1, 1], [], []>} : vector<200x1000xbf16>, vector<1000x6xbf16>, vector<200x6xf32> -> vector<200x6xf32>
    %292 = vector.extract_strided_slice %291 {offsets = [0, 0], sizes = [200, 4], strides = [1, 1]} : vector<200x6xf32> to vector<200x4xf32>
    %293 = vector.extract_strided_slice %291 {offsets = [0, 1], sizes = [200, 4], strides = [1, 1]} : vector<200x6xf32> to vector<200x4xf32>
    %294 = arith.maximumf %292, %293 : vector<200x4xf32>
    %295 = vector.extract_strided_slice %291 {offsets = [0, 2], sizes = [200, 4], strides = [1, 1]} : vector<200x6xf32> to vector<200x4xf32>
    %296 = arith.maximumf %294, %295 : vector<200x4xf32>
    %297 = arith.truncf %296 : vector<200x4xf32> to vector<200x4xbf16>
    %c0_173 = arith.constant 0 : index
    %c0_174 = arith.constant 0 : index
    %298 = vector.load %arg13[%c0_173, %c0_174] : memref<4x2xbf16, #tpu.memory_space<vmem>>, vector<4x2xbf16>
    %cst_175 = arith.constant dense<0.000000e+00> : vector<200x2xf32>
    %299 = tpu.matmul %297, %298, %cst_175 {dimension_numbers = #tpu.dot_dimension_numbers<[1], [0], [0], [1], [0, 0, 1, 1], [], []>} : vector<200x4xbf16>, vector<4x2xbf16>, vector<200x2xf32> -> vector<200x2xf32>
    %c0_176 = arith.constant 0 : index
    %c0_177 = arith.constant 0 : index
    %300 = vector.load %arg12[%c0_176, %c0_177] : memref<200x1xf32, #tpu.memory_space<vmem>>, vector<200x1xf32>
    %301 = vector.broadcast %300 : vector<200x1xf32> to vector<200x2xf32>
    %302 = arith.addf %299, %301 : vector<200x2xf32>
    %cst_178 = arith.constant 0.000000e+00 : f32
    %303 = vector.broadcast %cst_178 : f32 to vector<200x2xf32>
    %304 = arith.cmpf ogt, %302, %303 : vector<200x2xf32>
    %cst_179 = arith.constant 0.000000e+00 : f32
    %305 = vector.broadcast %cst_179 : f32 to vector<200x2xf32>
    %306 = arith.minimumf %302, %305 : vector<200x2xf32>
    %307 = math.exp %306 : vector<200x2xf32>
    %cst_180 = arith.constant 1.000000e+00 : f32
    %308 = vector.broadcast %cst_180 : f32 to vector<200x2xf32>
    %309 = arith.subf %307, %308 : vector<200x2xf32>
    %310 = arith.select %304, %302, %309 : vector<200x2xi1>, vector<200x2xf32>
    %c0_181 = arith.constant 0 : index
    %c0_182 = arith.constant 0 : index
    %311 = vector.load %arg14[%c0_181, %c0_182] : memref<4x200xbf16, #tpu.memory_space<vmem>>, vector<4x200xbf16>
    %312 = arith.truncf %310 : vector<200x2xf32> to vector<200x2xbf16>
    %cst_183 = arith.constant dense<0.000000e+00> : vector<4x2xf32>
    %313 = tpu.matmul %311, %312, %cst_183 {dimension_numbers = #tpu.dot_dimension_numbers<[1], [0], [0], [1], [0, 0, 1, 1], [], []>} : vector<4x200xbf16>, vector<200x2xbf16>, vector<4x2xf32> -> vector<4x2xf32>
    %c0_184 = arith.constant 0 : index
    %c0_185 = arith.constant 0 : index
    %314 = vector.load %arg15[%c0_184, %c0_185] : memref<4x1xf32, #tpu.memory_space<vmem>>, vector<4x1xf32>
    %315 = vector.broadcast %314 : vector<4x1xf32> to vector<4x2xf32>
    %316 = arith.addf %313, %315 : vector<4x2xf32>
    %cst_186 = arith.constant dense<0xFF800000> : vector<2xf32>
    %317 = vector.multi_reduction <maximumf>, %316, %cst_186 [0] : vector<4x2xf32> to vector<2xf32>
    %318 = vector.shape_cast %317 : vector<2xf32> to vector<1x2xf32>
    %319 = vector.broadcast %318 : vector<1x2xf32> to vector<4x2xf32>
    %320 = arith.subf %316, %319 : vector<4x2xf32>
    %321 = math.exp %320 : vector<4x2xf32>
    %cst_187 = arith.constant dense<0.000000e+00> : vector<2xf32>
    %322 = vector.multi_reduction <add>, %321, %cst_187 [0] : vector<4x2xf32> to vector<2xf32>
    %323 = vector.shape_cast %322 : vector<2xf32> to vector<1x2xf32>
    %324 = math.log %323 : vector<1x2xf32>
    %325 = vector.broadcast %324 : vector<1x2xf32> to vector<4x2xf32>
    %326 = arith.subf %320, %325 : vector<4x2xf32>
    %c0_188 = arith.constant 0 : index
    %c0_189 = arith.constant 0 : index
    %c0_190 = arith.constant 0 : index
    %327 = vector.load %arg16[%c0_188, %c0_189, %c0_190] : memref<1x4x2xf32, #tpu.memory_space<vmem>>, vector<1x4x2xf32>
    %328 = vector.shape_cast %327 : vector<1x4x2xf32> to vector<4x2xf32>
    %329 = vector.shape_cast %326 : vector<4x2xf32> to vector<1x4x2xf32>
    tpu.vector_store %arg16[%c0_188, %c0_189, %c0_190], %329 {strides = array<i32>} : memref<1x4x2xf32, #tpu.memory_space<vmem>>, vector<1x4x2xf32>,
    return
  }
  func.func @transform_0(%arg0: i32) -> (i32, i32, i32) {
    %c0_i32 = arith.constant 0 : i32
    %c0_i32_0 = arith.constant 0 : i32
    %c0_i32_1 = arith.constant 0 : i32
    return %arg0, %c0_i32, %c0_i32_0 : i32, i32, i32
  }
  func.func @transform_1(%arg0: i32) -> (i32, i32) {
    %c0_i32 = arith.constant 0 : i32
    %c0_i32_0 = arith.constant 0 : i32
    %c0_i32_1 = arith.constant 0 : i32
    return %c0_i32, %c0_i32_0 : i32, i32
  }
  func.func @transform_2(%arg0: i32) -> (i32, i32) {
    %c0_i32 = arith.constant 0 : i32
    %c0_i32_0 = arith.constant 0 : i32
    %c0_i32_1 = arith.constant 0 : i32
    return %c0_i32, %c0_i32_0 : i32, i32
  }
  func.func @transform_3(%arg0: i32) -> (i32, i32) {
    %c0_i32 = arith.constant 0 : i32
    %c0_i32_0 = arith.constant 0 : i32
    %c0_i32_1 = arith.constant 0 : i32
    return %c0_i32, %c0_i32_0 : i32, i32
  }
  func.func @transform_4(%arg0: i32) -> (i32, i32) {
    %c0_i32 = arith.constant 0 : i32
    %c0_i32_0 = arith.constant 0 : i32
    %c0_i32_1 = arith.constant 0 : i32
    return %c0_i32, %c0_i32_0 : i32, i32
  }
  func.func @transform_5(%arg0: i32) -> (i32, i32) {
    %c0_i32 = arith.constant 0 : i32
    %c0_i32_0 = arith.constant 0 : i32
    %c0_i32_1 = arith.constant 0 : i32
    return %c0_i32, %c0_i32_0 : i32, i32
  }
  func.func @transform_6(%arg0: i32) -> (i32, i32) {
    %c0_i32 = arith.constant 0 : i32
    %c0_i32_0 = arith.constant 0 : i32
    %c0_i32_1 = arith.constant 0 : i32
    return %c0_i32, %c0_i32_0 : i32, i32
  }
  func.func @transform_7(%arg0: i32) -> (i32, i32) {
    %c0_i32 = arith.constant 0 : i32
    %c0_i32_0 = arith.constant 0 : i32
    %c0_i32_1 = arith.constant 0 : i32
    return %c0_i32, %c0_i32_0 : i32, i32
  }
  func.func @transform_8(%arg0: i32) -> (i32, i32) {
    %c0_i32 = arith.constant 0 : i32
    %c0_i32_0 = arith.constant 0 : i32
    %c0_i32_1 = arith.constant 0 : i32
    return %c0_i32, %c0_i32_0 : i32, i32
  }
  func.func @transform_9(%arg0: i32) -> (i32, i32) {
    %c0_i32 = arith.constant 0 : i32
    %c0_i32_0 = arith.constant 0 : i32
    %c0_i32_1 = arith.constant 0 : i32
    return %c0_i32, %c0_i32_0 : i32, i32
  }
  func.func @transform_10(%arg0: i32) -> (i32, i32) {
    %c0_i32 = arith.constant 0 : i32
    %c0_i32_0 = arith.constant 0 : i32
    %c0_i32_1 = arith.constant 0 : i32
    return %c0_i32, %c0_i32_0 : i32, i32
  }
  func.func @transform_11(%arg0: i32) -> (i32, i32) {
    %c0_i32 = arith.constant 0 : i32
    %c0_i32_0 = arith.constant 0 : i32
    %c0_i32_1 = arith.constant 0 : i32
    return %c0_i32, %c0_i32_0 : i32, i32
  }
  func.func @transform_12(%arg0: i32) -> (i32, i32) {
    %c0_i32 = arith.constant 0 : i32
    %c0_i32_0 = arith.constant 0 : i32
    %c0_i32_1 = arith.constant 0 : i32
    return %c0_i32, %c0_i32_0 : i32, i32
  }
  func.func @transform_13(%arg0: i32) -> (i32, i32) {
    %c0_i32 = arith.constant 0 : i32
    %c0_i32_0 = arith.constant 0 : i32
    %c0_i32_1 = arith.constant 0 : i32
    return %c0_i32, %c0_i32_0 : i32, i32
  }
  func.func @transform_14(%arg0: i32) -> (i32, i32) {
    %c0_i32 = arith.constant 0 : i32
    %c0_i32_0 = arith.constant 0 : i32
    %c0_i32_1 = arith.constant 0 : i32
    return %c0_i32, %c0_i32_0 : i32, i32
  }
  func.func @transform_15(%arg0: i32) -> (i32, i32, i32) {
    %c0_i32 = arith.constant 0 : i32
    %c0_i32_0 = arith.constant 0 : i32
    %c0_i32_1 = arith.constant 0 : i32
    return %arg0, %c0_i32, %c0_i32_0 : i32, i32, i32
  }
}

</mosaic_0001>

<bundles_post_ra>
// kernel: tpu_custom_call.1
= control target key start
LH: loop header
LB: loop body
LE: loop exit
PB: predicated region body
PF: predicated region fallthrough
CT: control target
= control target key end

     0   :  { %s13021_s18 = smov 0   ;;  %s18249_s0 = inlined_call_operand.vmem [shape: f32[2,8,1000], index: 0, kind: input, shape index: {}]   ;;  %s18250_s1 = inlined_call_operand.vmem [shape: bf16[25,80], index: 1, kind: input, shape index: {}]   ;;  %s18251_s2 = inlined_call_operand.vmem [shape: f32[25,1], index: 2, kind: input, shape index: {}]   ;;  %s18252_s3 = inlined_call_operand.vmem [shape: bf16[976,326], index: 3, kind: input, shape index: {}]   ;;  %s18253_s4 = inlined_call_operand.vmem [shape: bf16[50,250], index: 4, kind: input, shape index: {}]   ;;  %s18254_s5 = inlined_call_operand.vmem [shape: f32[50,1], index: 5, kind: input, shape index: {}]   ;;  %s18255_s6 = inlined_call_operand.vmem [shape: bf16[304,102], index: 6, kind: input, shape index: {}]   ;;  %s18256_s7 = inlined_call_operand.vmem [shape: bf16[100,500], index: 7, kind: input, shape index: {}]   ;;  %s18257_s8 = inlined_call_operand.vmem [shape: f32[100,1], index: 8, kind: input, shape index: {}]   ;;  %s18258_s9 = inlined_call_operand.vmem [shape: bf16[82,28], index: 9, kind: input, shape index: {}]   ;;  %s18259_s10 = inlined_call_operand.vmem [shape: bf16[200,1000], index: 10, kind: input, shape index: {}]   ;;  %s18260_s11 = inlined_call_operand.vmem [shape: f32[200,1], index: 11, kind: input, shape index: {}]   ;;  %s18261_s12 = inlined_call_operand.vmem [shape: bf16[4,2], index: 12, kind: input, shape index: {}]   ;;  %s18262_s13 = inlined_call_operand.vmem [shape: bf16[4,200], index: 13, kind: input, shape index: {}]   ;;  %s18263_s14 = inlined_call_operand.vmem [shape: f32[4,1], index: 14, kind: input, shape index: {}]   ;;  %s18264_s15 = inlined_call_operand.vmem [shape: f32[2,4,2], index: 15, kind: output, shape index: {}]  }
   0x1   :  { %18357 = sst [smem:[#allocation10_spill]] %s18249_s0 }
   0x2   :  { %18358 = sst [smem:[#allocation11_spill]] %s18250_s1 }
   0x3   :  { %18359 = sst [smem:[#allocation12_spill]] %s18251_s2 }
   0x4   :  { %18360 = sst [smem:[#allocation13_spill]] %s18252_s3 }
   0x5   :  { %18361 = sst [smem:[#allocation14_spill]] %s18253_s4 }
   0x6   :  { %18362 = sst [smem:[#allocation15_spill]] %s18255_s6 }
   0x7   :  { %18363 = sst [smem:[#allocation16_spill]] %s18258_s9 }
   0x8   :  { %18364 = sst [smem:[#allocation17_spill]] %s18259_s10 }
   0x9   :  { %18365 = sst [smem:[#allocation18_spill]] %s18260_s11 }
   0xa   :  { %18366 = sst [smem:[#allocation19_spill]] %s18261_s12 }
   0xb   :  { %18367 = sst [smem:[#allocation20_spill]] %s18262_s13 }
   0xc   :  { %18368 = sst [smem:[#allocation21_spill]] %s18263_s14 }
   0xd   :  { %18369 = sst [smem:[#allocation22_spill]] %s18264_s15 }
   0xe LB: > { %18370 = sst [smem:[#allocation6_spill]] %s12916_s18  ;;  %s10536_s19 = sadd.s32 4294967295, %s12916_s18   ;;  %s12916_s18 = sphi %s13021_s18, %s25_s18  }
   0xf   : > { %p10540_p0 = scmp.ge.s32.totalorder %s12916_s18, 1  ;;  %p437_p1 = scmp.lt.s32.totalorder %s12916_s18, 3 }
  0x11   : > { %p438_p2 = pnand %p10540_p0, %p437_p1 }
  0x13   : > { %441 = sbr.rel (%p438_p2) target bundleno = 4556 (0x11cc), region = 80 }
  0x1a   : > { %p484_p3 = scmp.lt.s32.totalorder %s10536_s19, 1  ;;  %s18372_s0 = sld [smem:[#allocation10_spill]]  ;;  %vm509_vm0 = vcmask 855040   ;;  %v18309_v15 = vmov 0   ;;  %vm18284_vm1 = vcmask 1031168   ;;  %vm18283_vm2 = vcmask 1039360  }
  0x1b   : > { %s18269_s24 = smov 126   ;;  %s18265_s25 = smov 127   ;;  %1059 = vmatprep.mubr.bf16.mxu0 %v18309_v15  ;;  %1218 = vmatprep.mubr.bf16.mxu1 %v18309_v15  ;;  %vm18285_vm3 = vcmask 1022976   ;;  %vm18286_vm4 = vcmask 1014784   ;;  %vm18287_vm5 = vcmask 1006592   ;;  %vm18288_vm6 = vcmask 998400  }
  0x1c   : > { %s18606_s19 = smov (!%p484_p3, %s10536_s19), 1  ;;  %s18271_s26 = smov 125   ;;  %12085 = vset.pattern.permute.xlu0 %v18309_v15  ;;  %12086 = vset.pattern.permute.xlu1 %v18309_v15  ;;  %vm18289_vm7 = vcmask 990208   ;;  %vm18321_vm8 = vcmask 982016   ;;  %vm18308_vm9 = vcmask 973824   ;;  %vm18320_vm10 = vcmask 957440  }
  0x1d   : > { %18371 = sst [smem:[#allocation7_spill]] %s18606_s19  ;;  %s11135_s20 = sshll.u32 %s18606_s19, 6  ;;  %vm573_vm11 = vcmask 859140   ;;  %vm540_vm12 = vcmask 1044296   ;;  %vm18319_vm13 = vcmask 949248   ;;  %vm599_vm14 = vcmask 1048396  }
  0x1e   : > { %s18273_s27 = smov 124   ;;  %s18275_s28 = smov 123   ;;  %vm1020_vm15 = vcmask 654336  }
  0x1f   : > { %s18277_s29 = smov 122   ;;  %s18279_s30 = smov 121  }
  0x20   : > { %s13035_s23 = scalar_lea.vmem %s18372_s0, %s11135_s20  ;;  %s18292_s16 = smov 120  }
  0x21   : > { %v496_v0 = vld [vmem:[%s13035_s23 + $0x10] sm:$0xff]  ;;  %v495_v1 = vld [vmem:[%s13035_s23 + $0x8] sm:$0xff]  ;;  %v494_v4 = vld [vmem:[%s13035_s23] sm:$0xff]  ;;  %s18290_s17 = smov 119   ;;  %s18267_s20 = smov 117  }
  0x22   : > { %v504_v2 = vpack.c.bf16 %v496_v0, %v496_v0  ;;  %v503_v3 = vpack.c.bf16 %v495_v1, %v495_v1  ;;  %v502_v5 = vpack.c.bf16 %v494_v4, %v494_v4  ;;  %v497_v9 = vld [vmem:[%s13035_s23 + $0x18] sm:$0xff]  ;;  %v498_v11 = vld [vmem:[%s13035_s23 + $0x20] sm:$0xff]  ;;  %s18306_s21 = smov 116   ;;  %s18304_s22 = smov 115   ;;  %v499_v16 = vld [vmem:[%s13035_s23 + $0x28] sm:$0xff] }
  0x23   : > { %v505_v10 = vpack.c.bf16 %v497_v9, %v497_v9  ;;  %v511_v12 = vpack.c.bf16 %v498_v11, %v498_v11  ;;  %v500_v17 = vld [vmem:[%s13035_s23 + $0x30] sm:$0xff]  ;;  %v13105_v18 = vpack.c.bf16 %v499_v16, %v499_v16  ;;  %v501_v51 = vld [vmem:[%s13035_s23 + $0x38] sm:$0xff]  ;;  %s18374_s1 = sld [smem:[#allocation11_spill]]  ;;  %s18375_s3 = sld [smem:[#allocation13_spill]] }
  0x24   : > { %610 = vrot.lane.b32.xlu0 %v504_v2, %s18269_s24  ;;  %508 = vst [vmem:[#allocation2 + $0x10] sm:$0xf] %v504_v2  ;;  %608 = vrot.lane.b32.xlu1 %v503_v3, %s18269_s24  ;;  %507 = vst [vmem:[#allocation2 + $0x8] sm:$0xf] %v503_v3  ;;  %v551_v6 = vrot.slane %v503_v3, 4  ;;  %v550_v7 = vrot.slane %v502_v5, 4  ;;  %v13107_v19 = vpack.c.bf16 %v500_v17, %v500_v17 }
  0x25   : > { %506 = vst [vmem:[#allocation2] sm:$0xf] %v502_v5  ;;  %v552_v8 = vrot.slane %v504_v2, 4  ;;  %510 = vst.msk [vmem:[#allocation2 + $0x18] sm:$0xf] %vm509_vm0, %v505_v10  ;;  %v553_v13 = vrot.slane %v505_v10, 4  ;;  %v514_v53 = vpack.c.bf16 %v501_v51, %v501_v51 }
  0x26   : > { %v575_v14 = vrot.slane %v511_v12, 4  ;;  %v13114_v20 = vrot.slane %v13105_v18, 4  ;;  %v13117_v21 = vrot.slane %v13107_v19, 4  ;;  %s18378_s2 = sld [smem:[#allocation12_spill]]  ;;  %s18426_s23 = smov 115  }
  0x27   : > { %v578_v58 = vrot.slane %v514_v53, 4  ;;  %s18434_s0 = smov 120   ;;  %s18438_s18 = smov 121  }
  0x28   : > { %556 = vrot.lane.b32.xlu0 %v551_v6, %s18265_s25  ;;  %554 = vrot.lane.b32.xlu1 %v550_v7, %s18265_s25  ;;  %s18439_s15 = smov 119   ;;  %s18496_s4 = sld [smem:[#allocation14_spill]] }
  0x29   : > { %s18551_s6 = sld [smem:[#allocation15_spill]]  ;;  %s18593_s10 = sld [smem:[#allocation16_spill]] }
  0x2a   : > { %s18602_s12 = sld [smem:[#allocation7_spill]]  ;;  %s18603_s9 = sld [smem:[#allocation22_spill]] }
  0x2c   : > { %558 = vrot.lane.b32.xlu0 %v552_v8, %s18265_s25  ;;  %653 = vrot.lane.b32.xlu1 %v551_v6, %s18271_s26 }
  0x30   : > { %655 = vrot.lane.b32.xlu0 %v552_v8, %s18271_s26  ;;  %606 = vrot.lane.b32.xlu1 %v502_v5, %s18269_s24 }
  0x34   : > { %651 = vrot.lane.b32.xlu0 %v550_v7, %s18271_s26  ;;  %698 = vrot.lane.b32.xlu1 %v503_v3, %s18273_s27 }
  0x38   : > { %700 = vrot.lane.b32.xlu0 %v504_v2, %s18273_s27  ;;  %743 = vrot.lane.b32.xlu1 %v551_v6, %s18275_s28 }
  0x3c   : > { %745 = vrot.lane.b32.xlu0 %v552_v8, %s18275_s28  ;;  %696 = vrot.lane.b32.xlu1 %v502_v5, %s18273_s27 }
  0x40   : > { %741 = vrot.lane.b32.xlu0 %v550_v7, %s18275_s28  ;;  %788 = vrot.lane.b32.xlu1 %v503_v3, %s18277_s29 }
  0x44   : > { %790 = vrot.lane.b32.xlu0 %v504_v2, %s18277_s29  ;;  %833 = vrot.lane.b32.xlu1 %v551_v6, %s18279_s30 }
  0x48   : > { %835 = vrot.lane.b32.xlu0 %v552_v8, %s18279_s30  ;;  %786 = vrot.lane.b32.xlu1 %v502_v5, %s18277_s29 }
  0x4c   : > { %831 = vrot.lane.b32.xlu0 %v550_v7, %s18279_s30  ;;  %878 = vrot.lane.b32.xlu1 %v503_v3, %s18292_s16 }
  0x50   : > { %880 = vrot.lane.b32.xlu0 %v504_v2, %s18292_s16  ;;  %923 = vrot.lane.b32.xlu1 %v551_v6, %s18290_s17 }
  0x54   : > { %925 = vrot.lane.b32.xlu0 %v552_v8, %s18290_s17  ;;  %876 = vrot.lane.b32.xlu1 %v502_v5, %s18292_s16 }
  0x58   : > { %921 = vrot.lane.b32.xlu0 %v550_v7, %s18290_s17  ;;  %520 = vrot.lane.b32.xlu1 %v505_v10, %s18267_s20 }
  0x5c   : > { %522 = vrot.lane.b32.xlu0 %v511_v12, %s18267_s20  ;;  %560 = vrot.lane.b32.xlu1 %v553_v13, %s18265_s25  ;;  %s18302_s25 = smov 114   ;;  %s18300_s20 = smov 113  }
  0x60   : > { %579 = vrot.lane.b32.xlu0 %v553_v13, %s18306_s21  ;;  %581 = vrot.lane.b32.xlu1 %v575_v14, %s18306_s21 }
  0x64   : > { %612 = vrot.lane.b32.xlu0 %v505_v10, %s18269_s24  ;;  %626 = vrot.lane.b32.xlu1 %v505_v10, %s18304_s22  ;;  %s18298_s24 = smov 112  }
  0x68   : > { %628 = vrot.lane.b32.xlu0 %v511_v12, %s18304_s22  ;;  %657 = vrot.lane.b32.xlu1 %v553_v13, %s18271_s26  ;;  %s18296_s26 = smov 111  }
  0x6c   : > { %671 = vrot.lane.b32.xlu0 %v553_v13, %s18302_s25  ;;  %673 = vrot.lane.b32.xlu1 %v575_v14, %s18302_s25 }
  0x70   : > { %702 = vrot.lane.b32.xlu0 %v505_v10, %s18273_s27  ;;  %716 = vrot.lane.b32.xlu1 %v505_v10, %s18300_s20  ;;  %s18311_s27 = smov 110  }
  0x74   : > { %718 = vrot.lane.b32.xlu0 %v511_v12, %s18300_s20  ;;  %747 = vrot.lane.b32.xlu1 %v553_v13, %s18275_s28  ;;  %s18294_s28 = smov 109  }
  0x78   : > { %761 = vrot.lane.b32.xlu0 %v553_v13, %s18298_s24  ;;  %763 = vrot.lane.b32.xlu1 %v575_v14, %s18298_s24 }
  0x7c   : > { %792 = vrot.lane.b32.xlu0 %v505_v10, %s18277_s29  ;;  %806 = vrot.lane.b32.xlu1 %v505_v10, %s18296_s26  ;;  %s18281_s29 = smov 108  }
  0x80   : > { %808 = vrot.lane.b32.xlu0 %v511_v12, %s18296_s26  ;;  %837 = vrot.lane.b32.xlu1 %v553_v13, %s18279_s30  ;;  %s18373_s30 = smov 117  }
  0x84   : > { %851 = vrot.lane.b32.xlu0 %v553_v13, %s18311_s27  ;;  %853 = vrot.lane.b32.xlu1 %v575_v14, %s18311_s27 }
  0x88   : > { %882 = vrot.lane.b32.xlu0 %v505_v10, %s18292_s16  ;;  %896 = vrot.lane.b32.xlu1 %v505_v10, %s18294_s28  ;;  %s18377_s16 = smov 126  }
  0x8c   : > { %898 = vrot.lane.b32.xlu0 %v511_v12, %s18294_s28  ;;  %927 = vrot.lane.b32.xlu1 %v553_v13, %s18290_s17  ;;  %s18430_s17 = smov 111  }
  0x90   : > { %941 = vrot.lane.b32.xlu0 %v553_v13, %s18281_s29  ;;  %943 = vrot.lane.b32.xlu1 %v575_v14, %s18281_s29 }
  0x94   : > { %524 = vrot.lane.b32.xlu0 %v13105_v18, %s18373_s30  ;;  %526 = vrot.lane.b32.xlu1 %v13107_v19, %s18373_s30 }
  0x96   : > { %v13119_v22 = vpop.permute.xlu0 %610  ;;  %v609_v23 = vpop.permute.xlu1 %608 }
  0x97   : > { %v616_v24 = vsel %vm18284_vm1, %v609_v23, %v13119_v22 }
  0x98   : > { %623 = vst [vmem:[#allocation2 + $0x48] sm:$0xf] %v616_v24  ;;  %583 = vrot.lane.b32.xlu0 %v13114_v20, %s18306_s21  ;;  %585 = vrot.lane.b32.xlu1 %v13117_v21, %s18306_s21 }
  0x9a   : > { %v557_v25 = vpop.permute.xlu0 %556  ;;  %v555_v26 = vpop.permute.xlu1 %554 }
  0x9b   : > { %v563_v27 = vsel %vm18283_vm2, %v555_v26, %v557_v25  ;;  %v13226_v26 = vld [vmem:[%s18374_s1] sm:$0xff]  }
  0x9c   : > { %570 = vst [vmem:[#allocation2] sm:$0xf0] %v563_v27  ;;  %630 = vrot.lane.b32.xlu0 %v13105_v18, %s18304_s22  ;;  %632 = vrot.lane.b32.xlu1 %v13107_v19, %s18304_s22 }
  0x9e   : > { %v13132_v28 = vpop.permute.xlu0 %558  ;;  %v654_v29 = vpop.permute.xlu1 %653 }
  0x9f   : > { %v564_v30 = vsel %vm18283_vm2, %v557_v25, %v13132_v28 }
  0xa0   : > { %571 = vst [vmem:[#allocation2 + $0x8] sm:$0xf0] %v564_v30  ;;  %675 = vrot.lane.b32.xlu0 %v13114_v20, %s18302_s25  ;;  %677 = vrot.lane.b32.xlu1 %v13117_v21, %s18302_s25 }
  0xa2   : > { %v13140_v31 = vpop.permute.xlu0 %655  ;;  %v607_v32 = vpop.permute.xlu1 %606 }
  0xa3   : > { %v661_v33 = vsel %vm18285_vm3, %v654_v29, %v13140_v31  ;;  %v615_v34 = vsel %vm18284_vm1, %v607_v32, %v609_v23  ;;  %v966_v39 = vld [vmem:[#allocation2] sm:$0xff] }
  0xa4   : > { %668 = vst [vmem:[#allocation2 + $0x48] sm:$0xf0] %v661_v33  ;;  %622 = vst [vmem:[#allocation2 + $0x40] sm:$0xf] %v615_v34  ;;  %720 = vrot.lane.b32.xlu0 %v13105_v18, %s18300_s20  ;;  %722 = vrot.lane.b32.xlu1 %v13107_v19, %s18300_s20 }
  0xa6   : > { %v652_v35 = vpop.permute.xlu0 %651  ;;  %v699_v36 = vpop.permute.xlu1 %698 }
  0xa7   : > { %v660_v37 = vsel %vm18285_vm3, %v652_v35, %v654_v29  ;;  %v967_v38 = vld [vmem:[#allocation2 + $0x8] sm:$0xff] }
  0xa8   : > { %667 = vst [vmem:[#allocation2 + $0x40] sm:$0xf0] %v660_v37  ;;  %1027 = vmatprep.subr.bf16.mxu0 %v967_v38  ;;  %765 = vrot.lane.b32.xlu0 %v13114_v20, %s18298_s24  ;;  %v13245_v35 = vld [vmem:[%s18374_s1 + $0x8] sm:$0x1f]   ;;  %s18435_s1 = smov 118  }
  0xa9   : > { %767 = vrot.lane.b32.xlu1 %v13117_v21, %s18298_s24  ;;  %1028 = vmatpush1.bf16.msra.mxu0 %v966_v39 }
  0xaa   : > { %v13154_v40 = vpop.permute.xlu0 %700  ;;  %v744_v41 = vpop.permute.xlu1 %743 }
  0xab   : > { %v706_v42 = vsel %vm18286_vm4, %v699_v36, %v13154_v40  ;;  %v975_v43 = vld [vmem:[#allocation2 + $0x48] sm:$0xff] }
  0xac   : > { %713 = vst [vmem:[#allocation2 + $0x88] sm:$0xf] %v706_v42  ;;  %810 = vrot.lane.b32.xlu0 %v13105_v18, %s18296_s26  ;;  %1029 = vmatprep.subr.bf16.mxu0 %v975_v43 }
  0xad   : > { %812 = vrot.lane.b32.xlu1 %v13107_v19, %s18296_s26 }
  0xae   : > { %v13162_v44 = vpop.permute.xlu0 %745  ;;  %v697_v45 = vpop.permute.xlu1 %696 }
  0xaf   : > { %v751_v46 = vsel %vm18287_vm5, %v744_v41, %v13162_v44  ;;  %v705_v47 = vsel %vm18286_vm4, %v697_v45, %v699_v36  ;;  %v974_v48 = vld [vmem:[#allocation2 + $0x40] sm:$0xff] }
  0xb0   : > { %758 = vst [vmem:[#allocation2 + $0x88] sm:$0xf0] %v751_v46  ;;  %712 = vst [vmem:[#allocation2 + $0x80] sm:$0xf] %v705_v47  ;;  %855 = vrot.lane.b32.xlu0 %v13114_v20, %s18311_s27  ;;  %1030 = vmatpush1.bf16.msra.mxu0 %v974_v48 }
  0xb1   : > { %857 = vrot.lane.b32.xlu1 %v13117_v21, %s18311_s27 }
  0xb2   : > { %v742_v49 = vpop.permute.xlu0 %741  ;;  %v789_v50 = vpop.permute.xlu1 %788 }
  0xb3   : > { %v750_v52 = vsel %vm18287_vm5, %v742_v49, %v744_v41 }
  0xb4   : > { %757 = vst [vmem:[#allocation2 + $0x80] sm:$0xf0] %v750_v52  ;;  %900 = vrot.lane.b32.xlu0 %v13105_v18, %s18294_s28 }
  0xb5   : > { %902 = vrot.lane.b32.xlu1 %v13107_v19, %s18294_s28 }
  0xb6   : > { %v13177_v54 = vpop.permute.xlu0 %790  ;;  %v834_v55 = vpop.permute.xlu1 %833 }
  0xb7   : > { %v796_v56 = vsel %vm18288_vm6, %v789_v50, %v13177_v54  ;;  %v983_v57 = vld [vmem:[#allocation2 + $0x88] sm:$0xff] }
  0xb8   : > { %803 = vst [vmem:[#allocation2 + $0xc8] sm:$0xf] %v796_v56  ;;  %945 = vrot.lane.b32.xlu0 %v13114_v20, %s18281_s29  ;;  %1031 = vmatprep.subr.bf16.mxu0 %v983_v57 }
  0xb9   : > { %947 = vrot.lane.b32.xlu1 %v13117_v21, %s18281_s29 }
  0xba   : > { %v13185_v59 = vpop.permute.xlu0 %835  ;;  %v787_v60 = vpop.permute.xlu1 %786 }
  0xbb   : > { %v841_v61 = vsel %vm18289_vm7, %v834_v55, %v13185_v59  ;;  %v795_v62 = vsel %vm18288_vm6, %v787_v60, %v789_v50  ;;  %v982_v63 = vld [vmem:[#allocation2 + $0x80] sm:$0xff] }
  0xbc   : > { %848 = vst [vmem:[#allocation2 + $0xc8] sm:$0xf0] %v841_v61  ;;  %802 = vst [vmem:[#allocation2 + $0xc0] sm:$0xf] %v795_v62  ;;  %528 = vrot.lane.b32.xlu0 %v514_v53, %s18373_s30  ;;  %1032 = vmatpush1.bf16.msra.mxu0 %v982_v63 }
  0xbd   : > { %587 = vrot.lane.b32.xlu1 %v578_v58, %s18306_s21  ;;  %s18428_s21 = smov 113  }
  0xbe   : > { %v832_v0 = vpop.permute.xlu0 %831  ;;  %v879_v1 = vpop.permute.xlu1 %878 }
  0xbf   : > { %v840_v2 = vsel %vm18289_vm7, %v832_v0, %v834_v55 }
  0xc0   : > { %847 = vst [vmem:[#allocation2 + $0xc0] sm:$0xf0] %v840_v2  ;;  %634 = vrot.lane.b32.xlu0 %v514_v53, %s18304_s22  ;;  %s18429_s22 = smov 112  }
  0xc1   : > { %679 = vrot.lane.b32.xlu1 %v578_v58, %s18302_s25  ;;  %s18323_s25 = smov 118  }
  0xc2   : > { %v13195_v3 = vpop.permute.xlu0 %880  ;;  %v924_v4 = vpop.permute.xlu1 %923 }
  0xc3   : > { %v886_v5 = vsel %vm18321_vm8, %v879_v1, %v13195_v3  ;;  %v991_v6 = vld [vmem:[#allocation2 + $0xc8] sm:$0xff] }
  0xc4   : > { %893 = vst [vmem:[#allocation2 + $0x108] sm:$0xf] %v886_v5  ;;  %724 = vrot.lane.b32.xlu0 %v514_v53, %s18300_s20  ;;  %1033 = vmatprep.subr.bf16.mxu0 %v991_v6  ;;  %s18424_s20 = smov 110  }
  0xc5   : > { %769 = vrot.lane.b32.xlu1 %v578_v58, %s18298_s24  ;;  %s18376_s24 = smov 127  }
  0xc6   : > { %v13201_v7 = vpop.permute.xlu0 %925  ;;  %v877_v8 = vpop.permute.xlu1 %876 }
  0xc7   : > { %v931_v9 = vsel %vm18308_vm9, %v924_v4, %v13201_v7  ;;  %v885_v10 = vsel %vm18321_vm8, %v877_v8, %v879_v1  ;;  %v990_v11 = vld [vmem:[#allocation2 + $0xc0] sm:$0xff] }
  0xc8   : > { %938 = vst [vmem:[#allocation2 + $0x108] sm:$0xf0] %v931_v9  ;;  %892 = vst [vmem:[#allocation2 + $0x100] sm:$0xf] %v885_v10  ;;  %814 = vrot.lane.b32.xlu0 %v514_v53, %s18296_s26  ;;  %1034 = vmatpush1.bf16.msra.mxu0 %v990_v11  ;;  %s18431_s26 = smov 109  }
  0xc9   : > { %859 = vrot.lane.b32.xlu1 %v578_v58, %s18311_s27  ;;  %s18427_s27 = smov 114  }
  0xca   : > { %v922_v12 = vpop.permute.xlu0 %921  ;;  %v521_v13 = vpop.permute.xlu1 %520 }
  0xcb   : > { %v930_v14 = vsel %vm18308_vm9, %v922_v12, %v924_v4 }
  0xcc   : > { %937 = vst [vmem:[#allocation2 + $0x100] sm:$0xf0] %v930_v14  ;;  %904 = vrot.lane.b32.xlu0 %v514_v53, %s18294_s28  ;;  %s18432_s28 = smov 124  }
  0xcd   : > { %949 = vrot.lane.b32.xlu1 %v578_v58, %s18281_s29  ;;  %s18425_s29 = smov 116  }
  0xce   : > { %v13211_v16 = vpop.permute.xlu0 %522  ;;  %v561_v17 = vpop.permute.xlu1 %560 }
  0xcf   : > { %v531_v18 = vsel %vm18320_vm10, %v521_v13, %v13211_v16  ;;  %v565_v19 = vsel %vm18283_vm2, %v13132_v28, %v561_v17  ;;  %574 = vst.msk [vmem:[#allocation2 + $0x18] sm:$0xf0] %vm573_vm11, %v561_v17  ;;  %v999_v20 = vld [vmem:[#allocation2 + $0x108] sm:$0xff]  ;;  %vm18318_vm2 = vcmask 941056  }
  0xd0   : > { %541 = vst.msk [vmem:[#allocation2 + $0x18] sm:$0xf] %vm540_vm12, %v531_v18  ;;  %572 = vst [vmem:[#allocation2 + $0x10] sm:$0xf0] %v565_v19  ;;  %1035 = vmatprep.subr.bf16.mxu0 %v999_v20 }
  0xd2   : > { %v580_v21 = vpop.permute.xlu0 %579  ;;  %v13219_v23 = vpop.permute.xlu1 %581 }
  0xd3   : > { %v590_v24 = vsel %vm18319_vm13, %v580_v21, %v13219_v23  ;;  %v998_v25 = vld [vmem:[#allocation2 + $0x100] sm:$0xff] }
  0xd4   : > { %600 = vst.msk [vmem:[#allocation2 + $0x18] sm:$0xf0] %vm599_vm14, %v590_v24  ;;  %1036 = vmatpush1.bf16.msra.mxu0 %v998_v25 }
  0xd6   : > { %v613_v27 = vpop.permute.xlu0 %612  ;;  %v627_v28 = vpop.permute.xlu1 %626 }
  0xd7   : > { %v617_v29 = vsel %vm18284_vm1, %v13119_v22, %v613_v27  ;;  %625 = vst.msk [vmem:[#allocation2 + $0x58] sm:$0xf] %vm509_vm0, %v613_v27  ;;  %10546 = vmatmul.mubr.msk.bf16.vlgmr.msra.gmra.mrb[0].mxu0 %vm1020_vm15, %v13226_v26  ;;  %v968_v36 = vld [vmem:[#allocation2 + $0x10] sm:$0xff]  ;;  %vm18317_vm1 = vcmask 932864  }
  0xd8   : > { %624 = vst [vmem:[#allocation2 + $0x50] sm:$0xf] %v617_v29  ;;  %1069 = vmatprep.mubr.bf16.mxu0 %v18309_v15 }
  0xda   : > { %v13235_v30 = vpop.permute.xlu0 %628  ;;  %v658_v32 = vpop.permute.xlu1 %657 }
  0xdb   : > { %v637_v33 = vsel %vm18318_vm2, %v627_v28, %v13235_v30  ;;  %v662_v34 = vsel %vm18285_vm3, %v13140_v31, %v658_v32  ;;  %670 = vst.msk [vmem:[#allocation2 + $0x58] sm:$0xf0] %vm573_vm11, %v658_v32  ;;  %v969_v22 = vld [vmem:[#allocation2 + $0x18] sm:$0xff]  ;;  %vm18316_vm3 = vcmask 924672  }
  0xdc   : > { %646 = vst.msk [vmem:[#allocation2 + $0x58] sm:$0xf] %vm540_vm12, %v637_v33  ;;  %669 = vst [vmem:[#allocation2 + $0x50] sm:$0xf0] %v662_v34  ;;  %1080 = vmatprep.subr.bf16.mxu0 %v969_v22 }
  0xdd   : > { %1081 = vmatpush1.bf16.msra.mxu0 %v968_v36 }
  0xde   : > { %v672_v37 = vpop.permute.xlu0 %671  ;;  %v13248_v38 = vpop.permute.xlu1 %673 }
  0xdf   : > { %v682_v31 = vsel %vm18317_vm1, %v672_v37, %v13248_v38  ;;  %10547 = vmatmul.mubr.msk.bf16.gmra.mrb[4].mxu0 %vm1020_vm15, %v13245_v35 }
  0xe0   : > { %691 = vst.msk [vmem:[#allocation2 + $0x58] sm:$0xf0] %vm599_vm14, %v682_v31  ;;  %1112 = vmatprep.mubr.bf16.mxu0 %v18309_v15 }
  0xe2   : > { %v703_v39 = vpop.permute.xlu0 %702  ;;  %v717_v41 = vpop.permute.xlu1 %716 }
  0xe3   : > { %v707_v42 = vsel %vm18286_vm4, %v13154_v40, %v703_v39  ;;  %715 = vst.msk [vmem:[#allocation2 + $0x98] sm:$0xf] %vm509_vm0, %v703_v39  ;;  %v976_v40 = vld [vmem:[#allocation2 + $0x50] sm:$0xff]  ;;  %vm18315_vm4 = vcmask 916480  }
  0xe4   : > { %714 = vst [vmem:[#allocation2 + $0x90] sm:$0xf] %v707_v42 }
  0xe6   : > { %v13259_v43 = vpop.permute.xlu0 %718  ;;  %v748_v45 = vpop.permute.xlu1 %747 }
  0xe7   : > { %v727_v46 = vsel %vm18316_vm3, %v717_v41, %v13259_v43  ;;  %v752_v47 = vsel %vm18287_vm5, %v13162_v44, %v748_v45  ;;  %760 = vst.msk [vmem:[#allocation2 + $0x98] sm:$0xf0] %vm573_vm11, %v748_v45  ;;  %v977_v48 = vld [vmem:[#allocation2 + $0x58] sm:$0xff]  ;;  %vm18314_vm5 = vcmask 908288  }
  0xe8   : > { %736 = vst.msk [vmem:[#allocation2 + $0x98] sm:$0xf] %vm540_vm12, %v727_v46  ;;  %759 = vst [vmem:[#allocation2 + $0x90] sm:$0xf0] %v752_v47  ;;  %1082 = vmatprep.subr.bf16.mxu0 %v977_v48 }
  0xe9   : > { %1083 = vmatpush1.bf16.msra.mxu0 %v976_v40 }
  0xea   : > { %v762_v49 = vpop.permute.xlu0 %761  ;;  %v13267_v50 = vpop.permute.xlu1 %763 }
  0xeb   : > { %v772_v51 = vsel %vm18315_vm4, %v762_v49, %v13267_v50 }
  0xec   : > { %781 = vst.msk [vmem:[#allocation2 + $0x98] sm:$0xf0] %vm599_vm14, %v772_v51 }
  0xee   : > { %v793_v52 = vpop.permute.xlu0 %792  ;;  %v807_v44 = vpop.permute.xlu1 %806 }
  0xef   : > { %v797_v53 = vsel %vm18288_vm6, %v13177_v54, %v793_v52  ;;  %805 = vst.msk [vmem:[#allocation2 + $0xd8] sm:$0xf] %vm509_vm0, %v793_v52  ;;  %v984_v54 = vld [vmem:[#allocation2 + $0x90] sm:$0xff]  ;;  %vm18322_vm6 = vcmask 900096  }
  0xf0   : > { %804 = vst [vmem:[#allocation2 + $0xd0] sm:$0xf] %v797_v53 }
  0xf2   : > { %v13275_v55 = vpop.permute.xlu0 %808  ;;  %v838_v56 = vpop.permute.xlu1 %837 }
  0xf3   : > { %v817_v57 = vsel %vm18314_vm5, %v807_v44, %v13275_v55  ;;  %v842_v58 = vsel %vm18289_vm7, %v13185_v59, %v838_v56  ;;  %850 = vst.msk [vmem:[#allocation2 + $0xd8] sm:$0xf0] %vm573_vm11, %v838_v56  ;;  %v985_v60 = vld [vmem:[#allocation2 + $0x98] sm:$0xff]  ;;  %vm18313_vm7 = vcmask 891904  }
  0xf4   : > { %826 = vst.msk [vmem:[#allocation2 + $0xd8] sm:$0xf] %vm540_vm12, %v817_v57  ;;  %849 = vst [vmem:[#allocation2 + $0xd0] sm:$0xf0] %v842_v58  ;;  %1084 = vmatprep.subr.bf16.mxu0 %v985_v60 }
  0xf5   : > { %1085 = vmatpush1.bf16.msra.mxu0 %v984_v54 }
  0xf6   : > { %v852_v61 = vpop.permute.xlu0 %851  ;;  %v13283_v62 = vpop.permute.xlu1 %853 }
  0xf7   : > { %v862_v63 = vsel %vm18322_vm6, %v852_v61, %v13283_v62 }
  0xf8   : > { %871 = vst.msk [vmem:[#allocation2 + $0xd8] sm:$0xf0] %vm599_vm14, %v862_v63 }
  0xfa   : > { %v883_v0 = vpop.permute.xlu0 %882  ;;  %v897_v59 = vpop.permute.xlu1 %896 }
  0xfb   : > { %v887_v1 = vsel %vm18321_vm8, %v13195_v3, %v883_v0  ;;  %895 = vst.msk [vmem:[#allocation2 + $0x118] sm:$0xf] %vm509_vm0, %v883_v0  ;;  %v992_v3 = vld [vmem:[#allocation2 + $0xd0] sm:$0xff]  ;;  %vm951_vm0 = vcmask 883712   ;;  %vm18350_vm8 = vcmask 196608  }
  0xfc   : > { %894 = vst [vmem:[#allocation2 + $0x110] sm:$0xf] %v887_v1 }
  0xfe   : > { %v13291_v2 = vpop.permute.xlu0 %898  ;;  %v928_v4 = vpop.permute.xlu1 %927 }
  0xff   : > { %v907_v5 = vsel %vm18313_vm7, %v897_v59, %v13291_v2  ;;  %v932_v6 = vsel %vm18308_vm9, %v13201_v7, %v928_v4  ;;  %940 = vst.msk [vmem:[#allocation2 + $0x118] sm:$0xf0] %vm573_vm11, %v928_v4  ;;  %v993_v8 = vld [vmem:[#allocation2 + $0xd8] sm:$0xff]  ;;  %vm545_vm11 = vcmask 666624  }
 0x100   : > { %916 = vst.msk [vmem:[#allocation2 + $0x118] sm:$0xf] %vm540_vm12, %v907_v5  ;;  %939 = vst [vmem:[#allocation2 + $0x110] sm:$0xf0] %v932_v6  ;;  %1086 = vmatprep.subr.bf16.mxu0 %v993_v8  ;;  %vm604_vm12 = vcmask 670724  }
 0x101   : > { %1087 = vmatpush1.bf16.msra.mxu0 %v992_v3 }
 0x102   : > { %v942_v9 = vpop.permute.xlu0 %941  ;;  %v13299_v10 = vpop.permute.xlu1 %943 }
 0x103   : > { %v952_v11 = vsel %vm951_vm0, %v942_v9, %v13299_v10 }
 0x104   : > { %961 = vst.msk [vmem:[#allocation2 + $0x118] sm:$0xf0] %vm599_vm14, %v952_v11  ;;  %vm18379_vm14 = vcmask 1039360  }
 0x106   : > { %v525_v12 = vpop.permute.xlu0 %524  ;;  %v13304_v7 = vpop.permute.xlu1 %526 }
 0x107   : > { %v532_v13 = vsel %vm18320_vm10, %v13211_v16, %v525_v12  ;;  %v533_v14 = vsel %vm18320_vm10, %v525_v12, %v13304_v7  ;;  %v1000_v24 = vld [vmem:[#allocation2 + $0x110] sm:$0xff] }
 0x108   : > { %542 = vst [vmem:[#allocation2 + $0x20] sm:$0xf] %v532_v13  ;;  %543 = vst [vmem:[#allocation2 + $0x28] sm:$0xf] %v533_v14 }
 0x10a   : > { %v584_v17 = vpop.permute.xlu0 %583  ;;  %v13310_v18 = vpop.permute.xlu1 %585 }
 0x10b   : > { %v591_v19 = vsel %vm18319_vm13, %v13219_v23, %v584_v17  ;;  %v592_v20 = vsel %vm18319_vm13, %v584_v17, %v13310_v18  ;;  %v1001_v21 = vld [vmem:[#allocation2 + $0x118] sm:$0xff] }
 0x10c   : > { %601 = vst [vmem:[#allocation2 + $0x20] sm:$0xf0] %v591_v19  ;;  %602 = vst [vmem:[#allocation2 + $0x28] sm:$0xf0] %v592_v20  ;;  %1088 = vmatprep.subr.bf16.mxu0 %v1001_v21 }
 0x10d   : > { %1089 = vmatpush1.bf16.msra.mxu0 %v1000_v24 }
 0x10e   : > { %v631_v16 = vpop.permute.xlu0 %630  ;;  %v13316_v25 = vpop.permute.xlu1 %632 }
 0x10f   : > { %v638_v27 = vsel %vm18318_vm2, %v13235_v30, %v631_v16  ;;  %v639_v28 = vsel %vm18318_vm2, %v631_v16, %v13316_v25 }
 0x110   : > { %647 = vst [vmem:[#allocation2 + $0x60] sm:$0xf] %v638_v27  ;;  %648 = vst [vmem:[#allocation2 + $0x68] sm:$0xf] %v639_v28  ;;  %10548 = vmatmul.mubr.msk.bf16.vlgmr.msra.gmra.mrb[8].mxu0 %vm1020_vm15, %v13226_v26 }
 0x111   : > { %1122 = vmatprep.mubr.bf16.mxu0 %v18309_v15 }
 0x112   : > { %v676_v23 = vpop.permute.xlu0 %675  ;;  %v13325_v29 = vpop.permute.xlu1 %677 }
 0x113   : > { %v683_v32 = vsel %vm18317_vm1, %v13248_v38, %v676_v23  ;;  %v684_v33 = vsel %vm18317_vm1, %v676_v23, %v13325_v29  ;;  %v971_v30 = vld [vmem:[#allocation2 + $0x28] sm:$0xff]  ;;  %v970_v34 = vld [vmem:[#allocation2 + $0x20] sm:$0xff] }
 0x114   : > { %692 = vst [vmem:[#allocation2 + $0x60] sm:$0xf0] %v683_v32  ;;  %693 = vst [vmem:[#allocation2 + $0x68] sm:$0xf0] %v684_v33  ;;  %1133 = vmatprep.subr.bf16.mxu0 %v971_v30 }
 0x115   : > { %1134 = vmatpush1.bf16.msra.mxu0 %v970_v34 }
 0x116   : > { %v721_v22 = vpop.permute.xlu0 %720  ;;  %v13331_v36 = vpop.permute.xlu1 %722 }
 0x117   : > { %v728_v37 = vsel %vm18316_vm3, %v13259_v43, %v721_v22  ;;  %v729_v31 = vsel %vm18316_vm3, %v721_v22, %v13331_v36 }
 0x118   : > { %737 = vst [vmem:[#allocation2 + $0xa0] sm:$0xf] %v728_v37  ;;  %738 = vst [vmem:[#allocation2 + $0xa8] sm:$0xf] %v729_v31  ;;  %10549 = vmatmul.mubr.msk.bf16.gmra.mrb[12].mxu0 %vm1020_vm15, %v13245_v35  ;;  %v12369_v37 = vld [vmem:[%s18375_s3] ss:$12 sps:$4 sm:$0xff]  }
 0x119   : > { %1165 = vmatprep.mubr.bf16.mxu0 %v18309_v15 }
 0x11a   : > { %v766_v38 = vpop.permute.xlu0 %765 }
 0x11b   : > { %v773_v39 = vsel %vm18315_vm4, %v13267_v50, %v766_v38  ;;  %v13342_v41 = vpop.permute.xlu1 %767  ;;  %v979_v42 = vld [vmem:[#allocation2 + $0x68] sm:$0xff]  ;;  %v978_v45 = vld [vmem:[#allocation2 + $0x60] sm:$0xff] }
 0x11c   : > { %782 = vst [vmem:[#allocation2 + $0xa0] sm:$0xf0] %v773_v39  ;;  %v774_v43 = vsel %vm18315_vm4, %v766_v38, %v13342_v41  ;;  %1135 = vmatprep.subr.bf16.mxu0 %v979_v42 }
 0x11d   : > { %783 = vst [vmem:[#allocation2 + $0xa8] sm:$0xf0] %v774_v43  ;;  %1136 = vmatpush1.bf16.msra.mxu0 %v978_v45  ;;  %v12375_v45 = vld [vmem:[%s18375_s3 + $0x30] ss:$12 sps:$4 sm:$0xff]   ;;  %v12377_v43 = vld [vmem:[%s18375_s3 + $0x34] ss:$12 sps:$4 sm:$0xff]  }
 0x11e   : > { %v811_v46 = vpop.permute.xlu0 %810 }
 0x11f   : > { %v818_v47 = vsel %vm18314_vm5, %v13275_v55, %v811_v46  ;;  %v13348_v48 = vpop.permute.xlu1 %812 }
 0x120   : > { %827 = vst [vmem:[#allocation2 + $0xe0] sm:$0xf] %v818_v47  ;;  %v819_v40 = vsel %vm18314_vm5, %v811_v46, %v13348_v48  ;;  %v12378_v47 = vld [vmem:[%s18375_s3 + $0x48] ss:$12 sps:$4 sm:$0xff]  }
 0x121   : > { %828 = vst [vmem:[#allocation2 + $0xe8] sm:$0xf] %v819_v40 }
 0x122   : > { %v856_v49 = vpop.permute.xlu0 %855 }
 0x123   : > { %v863_v50 = vsel %vm18322_vm6, %v13283_v62, %v856_v49  ;;  %v13354_v51 = vpop.permute.xlu1 %857  ;;  %v986_v52 = vld [vmem:[#allocation2 + $0xa0] sm:$0xff] }
 0x124   : > { %872 = vst [vmem:[#allocation2 + $0xe0] sm:$0xf0] %v863_v50  ;;  %v864_v44 = vsel %vm18322_vm6, %v856_v49, %v13354_v51  ;;  %v987_v53 = vld [vmem:[#allocation2 + $0xa8] sm:$0xff] }
 0x125   : > { %873 = vst [vmem:[#allocation2 + $0xe8] sm:$0xf0] %v864_v44  ;;  %1137 = vmatprep.subr.bf16.mxu0 %v987_v53  ;;  %v12383_v44 = vld [vmem:[%s18375_s3 + $0x64] ss:$12 sps:$4 sm:$0xff]   ;;  %v12386_v53 = vld [vmem:[%s18375_s3 + $0x7c] ss:$12 sps:$4 sm:$0xff]  }
 0x126   : > { %1138 = vmatpush1.bf16.msra.mxu0 %v986_v52  ;;  %v901_v55 = vpop.permute.xlu0 %900  ;;  %v12381_v52 = vld [vmem:[%s18375_s3 + $0x60] ss:$12 sps:$4 sm:$0xff]  }
 0x127   : > { %v908_v56 = vsel %vm18313_vm7, %v13291_v2, %v901_v55  ;;  %v13360_v57 = vpop.permute.xlu1 %902 }
 0x128   : > { %917 = vst [vmem:[#allocation2 + $0x120] sm:$0xf] %v908_v56  ;;  %v909_v58 = vsel %vm18313_vm7, %v901_v55, %v13360_v57  ;;  %v12384_v55 = vld [vmem:[%s18375_s3 + $0x78] ss:$12 sps:$4 sm:$0xff]   ;;  %v12389_v56 = vld [vmem:[%s18375_s3 + $0x94] ss:$12 sps:$4 sm:$0xff]  }
 0x129   : > { %918 = vst [vmem:[#allocation2 + $0x128] sm:$0xf] %v909_v58  ;;  %v12397_v58 = vld [vmem:[%s18375_s3 + $0x8] ss:$12 sps:$4 sm:$0xff]  }
 0x12a   : > { %v946_v60 = vpop.permute.xlu0 %945 }
 0x12b   : > { %v953_v54 = vsel %vm951_vm0, %v13299_v10, %v946_v60  ;;  %v13366_v61 = vpop.permute.xlu1 %947  ;;  %v994_v62 = vld [vmem:[#allocation2 + $0xe0] sm:$0xff] }
 0x12c   : > { %962 = vst [vmem:[#allocation2 + $0x120] sm:$0xf0] %v953_v54  ;;  %v954_v63 = vsel %vm951_vm0, %v946_v60, %v13366_v61  ;;  %v995_v0 = vld [vmem:[#allocation2 + $0xe8] sm:$0xff]  ;;  %v12387_v54 = vld [vmem:[%s18375_s3 + $0x90] ss:$12 sps:$4 sm:$0xff]  }
 0x12d   : > { %963 = vst [vmem:[#allocation2 + $0x128] sm:$0xf0] %v954_v63  ;;  %1139 = vmatprep.subr.bf16.mxu0 %v995_v0  ;;  %v12401_v60 = vld [vmem:[%s18375_s3 + $0xe0] ss:$12 sps:$4 sm:$0xff]   ;;  %v12406_v63 = vld [vmem:[%s18375_s3 + $0xf8] ss:$12 sps:$4 sm:$0xff]  }
 0x12e   : > { %1140 = vmatpush1.bf16.msra.mxu0 %v994_v62  ;;  %v529_v59 = vpop.permute.xlu0 %528  ;;  %v12392_v62 = vld [vmem:[%s18375_s3 + $0xac] ss:$12 sps:$4 sm:$0xff]   ;;  %v12390_v0 = vld [vmem:[%s18375_s3 + $0xa8] ss:$12 sps:$4 sm:$0xff]  }
 0x12f   : > { %v534_v1 = vsel %vm18320_vm10, %v13304_v7, %v529_v59  ;;  %546 = vst.msk [vmem:[#allocation2 + $0x38] sm:$0xf] %vm545_vm11, %v529_v59  ;;  %v588_v2 = vpop.permute.xlu1 %587  ;;  %v12407_v59 = vld [vmem:[%s18375_s3 + $0x38] ss:$12 sps:$4 sm:$0xff]  }
 0x130   : > { %544 = vst [vmem:[#allocation2 + $0x30] sm:$0xf] %v534_v1  ;;  %v593_v4 = vsel %vm18319_vm13, %v13310_v18, %v588_v2  ;;  %605 = vst.msk [vmem:[#allocation2 + $0x38] sm:$0xf0] %vm604_vm12, %v588_v2  ;;  %v12395_v1 = vld [vmem:[%s18375_s3 + $0xc4] ss:$12 sps:$4 sm:$0xff]  }
 0x131   : > { %603 = vst [vmem:[#allocation2 + $0x30] sm:$0xf0] %v593_v4  ;;  %v12411_v2 = vld [vmem:[%s18375_s3 + $0x110] ss:$12 sps:$4 sm:$0xff]   ;;  %v12393_v4 = vld [vmem:[%s18375_s3 + $0xc0] ss:$12 sps:$4 sm:$0xff]  }
 0x132   : > { %v635_v5 = vpop.permute.xlu0 %634 }
 0x133   : > { %v640_v6 = vsel %vm18318_vm2, %v13316_v25, %v635_v5  ;;  %650 = vst.msk [vmem:[#allocation2 + $0x78] sm:$0xf] %vm545_vm11, %v635_v5  ;;  %v680_v8 = vpop.permute.xlu1 %679  ;;  %v1002_v3 = vld [vmem:[#allocation2 + $0x120] sm:$0xff]  ;;  %v12412_v5 = vld [vmem:[%s18375_s3 + $0x50] ss:$12 sps:$4 sm:$0xff]  }
 0x134   : > { %649 = vst [vmem:[#allocation2 + $0x70] sm:$0xf] %v640_v6  ;;  %v685_v9 = vsel %vm18317_vm1, %v13325_v29, %v680_v8  ;;  %695 = vst.msk [vmem:[#allocation2 + $0x78] sm:$0xf0] %vm604_vm12, %v680_v8  ;;  %v1003_v10 = vld [vmem:[#allocation2 + $0x128] sm:$0xff] }
 0x135   : > { %694 = vst [vmem:[#allocation2 + $0x70] sm:$0xf0] %v685_v9  ;;  %1141 = vmatprep.subr.bf16.mxu0 %v1003_v10  ;;  %v12400_v6 = vld [vmem:[%s18375_s3 + $0xdc] ss:$12 sps:$4 sm:$0xff]   ;;  %v12405_v9 = vld [vmem:[%s18375_s3 + $0xf4] ss:$12 sps:$4 sm:$0xff]  }
 0x136   : > { %1142 = vmatpush1.bf16.msra.mxu0 %v1002_v3  ;;  %v725_v11 = vpop.permute.xlu0 %724  ;;  %v12416_v8 = vld [vmem:[%s18375_s3 + $0x128] ss:$12 sps:$4 sm:$0xff]   ;;  %v12398_v3 = vld [vmem:[%s18375_s3 + $0xd8] ss:$12 sps:$4 sm:$0xff]   ;;  %v12403_v10 = vld [vmem:[%s18375_s3 + $0xf0] ss:$12 sps:$4 sm:$0xff]  }
 0x137   : > { %v730_v12 = vsel %vm18316_vm3, %v13331_v36, %v725_v11  ;;  %740 = vst.msk [vmem:[#allocation2 + $0xb8] sm:$0xf] %vm545_vm11, %v725_v11  ;;  %v770_v7 = vpop.permute.xlu1 %769  ;;  %v973_v13 = vld [vmem:[#allocation2 + $0x38] sm:$0xff]  ;;  %v12371_v36 = vld [vmem:[%s18375_s3 + $0x4] ss:$12 sps:$4 sm:$0xff]   ;;  %vm3332_vm3 = vcmask 203776  }
 0x138   : > { %739 = vst [vmem:[#allocation2 + $0xb0] sm:$0xf] %v730_v12  ;;  %v775_v14 = vsel %vm18315_vm4, %v13342_v41, %v770_v7  ;;  %785 = vst.msk [vmem:[#allocation2 + $0xb8] sm:$0xf0] %vm604_vm12, %v770_v7  ;;  %1186 = vmatprep.subr.bf16.mxu1 %v973_v13  ;;  %v972_v17 = vld [vmem:[#allocation2 + $0x30] sm:$0xff]  ;;  %2851 = vmatprep.subr.bf16.mxu0 %v12371_v36 }
 0x139   : > { %784 = vst [vmem:[#allocation2 + $0xb0] sm:$0xf0] %v775_v14  ;;  %10550 = vmatmul.mubr.msk.bf16.vlgmr.msra.gmra.mrb[16].mxu0 %vm1020_vm15, %v13226_v26  ;;  %1187 = vmatpush1.bf16.msra.mxu1 %v972_v17  ;;  %v12410_v11 = vld [vmem:[%s18375_s3 + $0x10c] ss:$12 sps:$4 sm:$0xff]   ;;  %v12408_v12 = vld [vmem:[%s18375_s3 + $0x108] ss:$12 sps:$4 sm:$0xff]  }
 0x13a   : > { %v815_v18 = vpop.permute.xlu0 %814  ;;  %1175 = vmatprep.mubr.bf16.mxu0 %v18309_v15  ;;  %2852 = vmatpush1.bf16.msra.mxu0 %v12369_v37  ;;  %v12415_v7 = vld [vmem:[%s18375_s3 + $0x124] ss:$12 sps:$4 sm:$0xff]   ;;  %v12413_v13 = vld [vmem:[%s18375_s3 + $0x120] ss:$12 sps:$4 sm:$0xff]   ;;  %v12417_v14 = vld [vmem:[%s18375_s3 + $0x68] ss:$12 sps:$4 sm:$0xff]  }
 0x13b   : > { %v820_v19 = vsel %vm18314_vm5, %v13348_v48, %v815_v18  ;;  %830 = vst.msk [vmem:[#allocation2 + $0xf8] sm:$0xf] %vm545_vm11, %v815_v18  ;;  %v860_v20 = vpop.permute.xlu1 %859  ;;  %v981_v21 = vld [vmem:[#allocation2 + $0x78] sm:$0xff]  ;;  %v12435_v37 = vld [vmem:[%s18375_s3 + $0x184] ss:$12 sps:$4 sm:$0xff]   ;;  %vm3902_vm5 = vcmask 1045504  }
 0x13c   : > { %829 = vst [vmem:[#allocation2 + $0xf0] sm:$0xf] %v820_v19  ;;  %v865_v24 = vsel %vm18322_vm6, %v13354_v51, %v860_v20  ;;  %875 = vst.msk [vmem:[#allocation2 + $0xf8] sm:$0xf0] %vm604_vm12, %v860_v20  ;;  %1188 = vmatprep.subr.bf16.mxu1 %v981_v21  ;;  %v980_v16 = vld [vmem:[#allocation2 + $0x70] sm:$0xff] }
 0x13d   : > { %874 = vst [vmem:[#allocation2 + $0xf0] sm:$0xf0] %v865_v24  ;;  %1189 = vmatpush1.bf16.msra.mxu1 %v980_v16  ;;  %v12380_v48 = vld [vmem:[%s18375_s3 + $0x4c] ss:$12 sps:$4 sm:$0xff]   ;;  %v12420_v17 = vld [vmem:[%s18375_s3 + $0x13c] ss:$12 sps:$4 sm:$0xff]  }
 0x13e   : > { %v905_v25 = vpop.permute.xlu0 %904  ;;  %v12418_v18 = vld [vmem:[%s18375_s3 + $0x138] ss:$12 sps:$4 sm:$0xff]   ;;  %v12421_v19 = vld [vmem:[%s18375_s3 + $0x140] ss:$12 sps:$4 sm:$0xff]   ;;  %v12423_v24 = vld [vmem:[%s18375_s3 + $0x150] ss:$12 sps:$4 sm:$0xff]  }
 0x13f   : > { %v910_v27 = vsel %vm18313_vm7, %v13360_v57, %v905_v25  ;;  %920 = vst.msk [vmem:[#allocation2 + $0x138] sm:$0xf] %vm545_vm11, %v905_v25  ;;  %v950_v28 = vpop.permute.xlu1 %949  ;;  %v989_v23 = vld [vmem:[#allocation2 + $0xb8] sm:$0xff]  ;;  %v12396_v57 = vld [vmem:[%s18375_s3 + $0xc8] ss:$12 sps:$4 sm:$0xff]   ;;  %vm3698_vm7 = vcmask 1043456  }
 0x140   : > { %919 = vst [vmem:[#allocation2 + $0x130] sm:$0xf] %v910_v27  ;;  %v955_v29 = vsel %vm951_vm0, %v13366_v61, %v950_v28  ;;  %965 = vst.msk [vmem:[#allocation2 + $0x138] sm:$0xf0] %vm604_vm12, %v950_v28  ;;  %1190 = vmatprep.subr.bf16.mxu1 %v989_v23  ;;  %v988_v32 = vld [vmem:[#allocation2 + $0xb0] sm:$0xff] }
 0x141   : > { %964 = vst [vmem:[#allocation2 + $0x130] sm:$0xf0] %v955_v29  ;;  %10551 = vmatmul.mubr.msk.bf16.gmra.mrb[20].mxu0 %vm1020_vm15, %v13245_v35  ;;  %1191 = vmatpush1.bf16.msra.mxu1 %v988_v32  ;;  %v12402_v61 = vld [vmem:[%s18375_s3 + $0x20] ss:$12 sps:$4 sm:$0xff]   ;;  %v12426_v16 = vld [vmem:[%s18375_s3 + $0x158] ss:$12 sps:$4 sm:$0xff]   ;;  %vm18380_vm0 = vmmov %vm18379_vm14 }
 0x142   : > { %v12422_v20 = vld [vmem:[%s18375_s3 + $0x80] ss:$12 sps:$4 sm:$0xff]   ;;  %v12427_v25 = vld [vmem:[%s18375_s3 + $0x98] ss:$12 sps:$4 sm:$0xff]   ;;  %v12428_v23 = vld [vmem:[%s18375_s3 + $0x168] ss:$12 sps:$4 sm:$0xff]  }
 0x143   : > { %v997_v33 = vld [vmem:[#allocation2 + $0xf8] sm:$0xff]  ;;  %v12425_v21 = vld [vmem:[%s18375_s3 + $0x154] ss:$12 sps:$4 sm:$0xff]   ;;  %vm18381_vm11 = vmmov %vm18380_vm0 }
 0x144   : > { %1192 = vmatprep.subr.bf16.mxu1 %v997_v33  ;;  %v996_v30 = vld [vmem:[#allocation2 + $0xf0] sm:$0xff]  ;;  %v12430_v27 = vld [vmem:[%s18375_s3 + $0x16c] ss:$12 sps:$4 sm:$0xff]   ;;  %vm18382_vm12 = vmmov %vm18380_vm0 }
 0x145   : > { %1193 = vmatpush1.bf16.msra.mxu1 %v996_v30  ;;  %v12431_v29 = vld [vmem:[%s18375_s3 + $0x170] ss:$12 sps:$4 sm:$0xff]  }
 0x146   : > { %v12432_v30 = vld [vmem:[%s18375_s3 + $0xb0] ss:$12 sps:$4 sm:$0xff]  }
 0x147   : > { %v1005_v34 = vld [vmem:[#allocation2 + $0x138] sm:$0xff] }
 0x148   : > { %1194 = vmatprep.subr.bf16.mxu1 %v1005_v34  ;;  %v1004_v22 = vld [vmem:[#allocation2 + $0x130] sm:$0xff] }
 0x149   : > { %1195 = vmatpush1.bf16.msra.mxu1 %v1004_v22 }
 0x14a   : > { %11156 = vmatprep.subr.bf16.mxu1 %v12396_v57 }
 0x14c   : > { %10552 = vmatmul.mubr.msk.bf16.vlgmr.msra.gmra.mrb[0].mxu1 %vm1020_vm15, %v13226_v26  ;;  %v12372_v26 = vld [vmem:[%s18375_s3 + $0x18] ss:$12 sps:$4 sm:$0xff]  }
 0x14d   : > { %1228 = vmatprep.mubr.bf16.mxu1 %v18309_v15  ;;  %11157 = vmatpush3.bf16.msra.mxu1 %v12397_v58 }
 0x14e   : > { %11158 = vmatprep.subr.bf16.mxu1 %v12401_v60 }
 0x151   : > { %11159 = vmatpush3.bf16.msra.mxu1 %v12402_v61 }
 0x152   : > { %11160 = vmatprep.subr.bf16.mxu1 %v12406_v63 }
 0x154   : > { %10553 = vmatmul.mubr.msk.bf16.gmra.mrb[4].mxu1 %vm1020_vm15, %v13245_v35  ;;  %v12374_v35 = vld [vmem:[%s18375_s3 + $0x1c] ss:$12 sps:$4 sm:$0xff]  }
 0x155   : > { %2853 = vmatprep.subr.bf16.mxu0 %v12374_v35  ;;  %11161 = vmatpush3.bf16.msra.mxu1 %v12407_v59 }
 0x156   : > { %2854 = vmatpush1.bf16.msra.mxu0 %v12372_v26  ;;  %11162 = vmatprep.subr.bf16.mxu1 %v12411_v2 }
 0x157   : > { %2855 = vmatprep.subr.bf16.mxu0 %v12377_v43 }
 0x159   : > { %11163 = vmatpush3.bf16.msra.mxu1 %v12412_v5 }
 0x15a   : > { %2856 = vmatpush1.bf16.msra.mxu0 %v12375_v45  ;;  %11164 = vmatprep.subr.bf16.mxu1 %v12416_v8 }
 0x15b   : > { %2857 = vmatprep.subr.bf16.mxu0 %v12380_v48 }
 0x15d   : > { %11165 = vmatpush3.bf16.msra.mxu1 %v12417_v14  ;;  %v1847_v14 = vld [vmem:[%s18378_s2 + $0x10] sm:$0xff] }
 0x15e   : > { %2858 = vmatpush1.bf16.msra.mxu0 %v12378_v47  ;;  %11166 = vmatprep.subr.bf16.mxu1 %v12421_v19  ;;  %v12439_v47 = vld [vmem:[%s18375_s3 + $0x248] ss:$12 sps:$4 sm:$0xff]  }
 0x15f   : > { %2859 = vmatprep.subr.bf16.mxu0 %v12383_v44 }
 0x161   : > { %11167 = vmatpush3.bf16.msra.mxu1 %v12422_v20 }
 0x162   : > { %2860 = vmatpush1.bf16.msra.mxu0 %v12381_v52  ;;  %11168 = vmatprep.subr.bf16.mxu1 %v12426_v16 }
 0x163   : > { %2861 = vmatprep.subr.bf16.mxu0 %v12386_v53 }
 0x165   : > { %11169 = vmatpush3.bf16.msra.mxu1 %v12427_v25 }
 0x166   : > { %2862 = vmatpush1.bf16.msra.mxu0 %v12384_v55  ;;  %11170 = vmatprep.subr.bf16.mxu1 %v12431_v29 }
 0x167   : > { %2863 = vmatprep.subr.bf16.mxu0 %v12389_v56 }
 0x169   : > { %11171 = vmatpush3.bf16.msra.mxu1 %v12432_v30 }
 0x16a   : > { %2864 = vmatpush1.bf16.msra.mxu0 %v12387_v54  ;;  %11184 = vmatprep.subr.bf16.mxu1 %v12439_v47 }
 0x16b   : > { %2865 = vmatprep.subr.bf16.mxu0 %v12392_v62 }
 0x16e   : > { %2866 = vmatpush1.bf16.msra.mxu0 %v12390_v0 }
 0x16f   : > { %2867 = vmatprep.subr.bf16.mxu0 %v12395_v1 }
 0x172   : > { %2868 = vmatpush1.bf16.msra.mxu0 %v12393_v4 }
 0x173   : > { %2869 = vmatprep.subr.bf16.mxu0 %v12400_v6 }
 0x176   : > { %2870 = vmatpush1.bf16.msra.mxu0 %v12398_v3 }
 0x177   : > { %2871 = vmatprep.subr.bf16.mxu0 %v12405_v9 }
 0x17a   : > { %2872 = vmatpush1.bf16.msra.mxu0 %v12403_v10 }
 0x17b   : > { %2873 = vmatprep.subr.bf16.mxu0 %v12410_v11 }
 0x17e   : > { %2874 = vmatpush1.bf16.msra.mxu0 %v12408_v12 }
 0x17f   : > { %2875 = vmatprep.subr.bf16.mxu0 %v12415_v7  ;;  %v1845_v7 = vld [vmem:[%s18378_s2] sm:$0xff] }
 0x182   : > { %2876 = vmatpush1.bf16.msra.mxu0 %v12413_v13  ;;  %v1846_v13 = vld [vmem:[%s18378_s2 + $0x8] sm:$0xff] }
 0x183   : > { %2877 = vmatprep.subr.bf16.mxu0 %v12420_v17  ;;  %v1848_v17 = vld [vmem:[%s18378_s2 + $0x18] sm:$0x1]  ;;  %s18436_s2 = smov 125  }
 0x186   : > { %2878 = vmatpush1.bf16.msra.mxu0 %v12418_v18 }
 0x187   : > { %2879 = vmatprep.subr.bf16.mxu0 %v12425_v21 }
 0x18a   : > { %2880 = vmatpush1.bf16.msra.mxu0 %v12423_v24 }
 0x18b   : > { %2881 = vmatprep.subr.bf16.mxu0 %v12430_v27 }
 0x18e   : > { %2882 = vmatpush1.bf16.msra.mxu0 %v12428_v23 }
 0x18f   : > { %2904 = vmatprep.subr.bf16.mxu0 %v12435_v37 }
 0x1aa   : > { %v13416_v31 = vpop.f32.mrb[0].mxu0 }
 0x1ab   : > { %v13424_v38 = vpop.f32.mrb[1].mxu0 }
 0x1ac   : > { %v13426_v39 = vpop.f32.mrb[2].mxu0 }
 0x1ad   : > { %v13430_v41 = vpack.i.bf16 %v13426_v39, %v13416_v31  ;;  %v13432_v42 = vpop.f32.mrb[3].mxu0 }
 0x1af   : > { %11926 = vrot.lane.b32.xlu0 %v13430_v41, %s18376_s24 }
 0x1b2   : > { %v13442_v46 = vpop.f32.mrb[4].mxu0 }
 0x1b3   : > { %v13450_v40 = vpop.f32.mrb[5].mxu0 }
 0x1b4   : > { %v13452_v49 = vpop.f32.mrb[6].mxu0 }
 0x1b5   : > { %v13456_v50 = vpack.i.bf16 %v13452_v49, %v13442_v46  ;;  %v13458_v51 = vpop.f32.mrb[7].mxu0 }
 0x1e3   : > { %v13571_v28 = vpop.f32.mrb[8].mxu0 }
 0x1e4   : > { %v11935_v32 = vpack.i.bf16 %v13571_v28, %v13424_v38  ;;  %v13581_v33 = vpop.f32.mrb[9].mxu0 }
 0x1e5   : > { %v13586_v34 = vpop.f32.mrb[10].mxu0 }
 0x1e6   : > { %v11945_v22 = vpack.i.bf16 %v13586_v34, %v13432_v42  ;;  %11936 = vrot.lane.b32.xlu1 %v11935_v32, %s18377_s16  ;;  %11931 = vrot.lane.b32.xlu0 %v11935_v32, %s18376_s24  ;;  %v13592_v36 = vpop.f32.mrb[11].mxu0 }
 0x1ea   : > { %11946 = vrot.lane.b32.xlu0 %v11945_v22, %s18377_s16  ;;  %11941 = vrot.lane.b32.xlu1 %v11945_v22, %s18376_s24 }
 0x1eb   : > { %v13599_v26 = vpop.f32.mrb[12].mxu0 }
 0x1ec   : > { %v11965_v35 = vpack.i.bf16 %v13599_v26, %v13450_v40  ;;  %v13603_v45 = vpop.f32.mrb[13].mxu0 }
 0x1ed   : > { %v13605_v43 = vpop.f32.mrb[14].mxu0 }
 0x1ee   : > { %v11980_v48 = vpack.i.bf16 %v13605_v43, %v13458_v51  ;;  %11956 = vrot.lane.b32.xlu0 %v13456_v50, %s18376_s24  ;;  %11951 = vrot.lane.b32.xlu1 %v13430_v41, %s18377_s16  ;;  %v13616_v52 = vpop.f32.mrb[15].mxu0 }
 0x1f2   : > { %11966 = vrot.lane.b32.xlu1 %v11965_v35, %s18377_s16  ;;  %11961 = vrot.lane.b32.xlu0 %v11965_v35, %s18376_s24 }
 0x1f6   : > { %11981 = vrot.lane.b32.xlu0 %v11980_v48, %s18377_s16  ;;  %11971 = vrot.lane.b32.xlu1 %v11980_v48, %s18376_s24 }
 0x1fa   : > { %11976 = vrot.lane.b32.xlu1 %v13456_v50, %s18377_s16 }
 0x20c   : > { %v13624_v44 = vpop.f32.mrb[16].mxu0 }
 0x20d   : > { %v11990_v53 = vpack.i.bf16 %v13624_v44, %v13581_v33  ;;  %v13628_v41 = vpop.f32.mrb[17].mxu0 }
 0x20e   : > { %v13630_v55 = vpop.f32.mrb[18].mxu0 }
 0x20f   : > { %v12000_v56 = vpack.i.bf16 %v13630_v55, %v13592_v36  ;;  %11986 = vrot.lane.b32.xlu0 %v11990_v53, %s18376_s24  ;;  %v13635_v57 = vpop.f32.mrb[19].mxu0 }
 0x211   : > { %11996 = vrot.lane.b32.xlu1 %v12000_v56, %s18376_s24 }
 0x213   : > { %11991 = vrot.lane.b32.xlu0 %v11990_v53, %s18377_s16 }
 0x214   : > { %v13639_v50 = vpop.f32.mrb[20].mxu0 }
 0x215   : > { %v12010_v58 = vpack.i.bf16 %v13639_v50, %v13603_v45  ;;  %12001 = vrot.lane.b32.xlu1 %v12000_v56, %s18377_s16  ;;  %v13644_v60 = vpop.f32.mrb[21].mxu0 }
 0x216   : > { %v13646_v54 = vpop.f32.mrb[22].mxu0 }
 0x217   : > { %v12025_v61 = vpack.i.bf16 %v13646_v54, %v13616_v52  ;;  %12006 = vrot.lane.b32.xlu0 %v12010_v58, %s18376_s24  ;;  %v13651_v62 = vpop.f32.mrb[23].mxu0 }
 0x219   : > { %12021 = vrot.lane.b32.xlu1 %v12025_v61, %s18376_s24 }
 0x21b   : > { %12011 = vrot.lane.b32.xlu0 %v12010_v58, %s18377_s16 }
 0x21d   : > { %12026 = vrot.lane.b32.xlu1 %v12025_v61, %s18377_s16 }
 0x21f   : > { %v13656_v63 = vpop.f32.mrb[0].mxu1 }
 0x220   : > { %v13658_v0 = vpop.f32.mrb[1].mxu1  ;;  %v12015_v59 = vpack.i.bf16 %v13656_v63, %v13628_v41 }
 0x221   : > { %v13662_v1 = vpop.f32.mrb[2].mxu1  ;;  %v11927_v18 = vpop.permute.xlu0 %11926 }
 0x222   : > { %12016 = vrot.lane.b32.xlu0 %v12015_v59, %s18376_s24  ;;  %v12030_v2 = vpack.i.bf16 %v13662_v1, %v13635_v57  ;;  %v13667_v4 = vpop.f32.mrb[3].mxu1  ;;  %v11929_v25 = vunpack.i.h.bf16 %v11927_v18  ;;  %v11928_v27 = vunpack.i.l.bf16 %v11927_v18 }
 0x223   : > { %v12065_v5 = vpack.i.bf16 %v13667_v4, %v13658_v0 }
 0x224   : > { %12031 = vrot.lane.b32.xlu1 %v12030_v2, %s18376_s24 }
 0x226   : > { %12036 = vrot.lane.b32.xlu0 %v12015_v59, %s18377_s16 }
 0x227   : > { %v13673_v6 = vpop.f32.mrb[4].mxu1 }
 0x228   : > { %v13675_v8 = vpop.f32.mrb[5].mxu1  ;;  %12041 = vrot.lane.b32.xlu1 %v12030_v2, %s18377_s16  ;;  %v12045_v3 = vpack.i.bf16 %v13673_v6, %v13644_v60 }
 0x229   : > { %v13680_v9 = vpop.f32.mrb[6].mxu1 }
 0x22a   : > { %12046 = vrot.lane.b32.xlu0 %v12045_v3, %s18376_s24  ;;  %v12055_v10 = vpack.i.bf16 %v13680_v9, %v13651_v62  ;;  %v13685_v11 = vpop.f32.mrb[7].mxu1 }
 0x22b   : > { %v12075_v12 = vpack.i.bf16 %v13685_v11, %v13675_v8 }
 0x22c   : > { %12056 = vrot.lane.b32.xlu1 %v12055_v10, %s18376_s24 }
 0x22e   : > { %12051 = vrot.lane.b32.xlu0 %v12045_v3, %s18377_s16 }
 0x230   : > { %12061 = vrot.lane.b32.xlu1 %v12055_v10, %s18377_s16 }
 0x232   : > { %12066 = vrot.lane.b32.xlu0 %v12065_v5, %s18376_s24 }
 0x234   : > { %12071 = vrot.lane.b32.xlu1 %v12065_v5, %s18377_s16 }
 0x236   : > { %12076 = vrot.lane.b32.xlu0 %v12075_v12, %s18376_s24 }
 0x238   : > { %12081 = vrot.lane.b32.xlu1 %v12075_v12, %s18377_s16 }
 0x23a   : > { %1851 = vperm.xlu0 %12085, %v1845_v7  }
 0x23c   : > { %1856 = vperm.xlu1 %12086, %v1846_v13  }
 0x23e   : > { %1866 = vperm.xlu0 %12085, %v1848_v17  }
 0x240   : > { %1861 = vperm.xlu1 %12086, %v1847_v14  }
 0x258   : > { %v13708_v19 = vpop.permute.xlu1 %11936  ;;  %v13710_v20 = vpop.permute.xlu0 %11931 }
 0x259   : > { %v11934_v21 = vunpack.i.h.bf16 %v13710_v20  ;;  %v11933_v24 = vunpack.i.l.bf16 %v13710_v20  ;;  %v11939_v23 = vunpack.i.h.bf16 %v13708_v19  ;;  %v11938_v29 = vunpack.i.l.bf16 %v13708_v19  ;;  %v12475_v19 = vld [vmem:[%s18375_s3 + $0x258] ss:$12 sps:$4 sm:$0xff]  }
 0x25b   : > { %v1337_v16 = vsel %vm18379_vm14, %v11933_v24, %v11934_v21  ;;  %v1336_v53 = vsel %vm18380_vm0, %v11928_v27, %v11933_v24  ;;  %vm18383_vm14 = vcmask 1031168  }
 0x25c   : > { %v13719_v32 = vpop.permute.xlu0 %11946  ;;  %v13721_v30 = vpop.permute.xlu1 %11941  ;;  %v1397_v48 = vmax.f32 %v13424_v38, %v1337_v16  ;;  %v1494_v10 = vsel %vm18383_vm14, %v11938_v29, %v11939_v23  ;;  %vm18384_vm9 = vmmov %vm18383_vm14  ;;  %v1396_v12 = vmax.f32 %v13416_v31, %v1336_v53  ;;  %v12433_v31 = vld [vmem:[%s18375_s3 + $0x180] ss:$12 sps:$4 sm:$0xff]  }
 0x25d   : > { %v11949_v22 = vunpack.i.h.bf16 %v13719_v32  ;;  %v11948_v37 = vunpack.i.l.bf16 %v13719_v32  ;;  %v11944_v35 = vunpack.i.h.bf16 %v13721_v30  ;;  %v11943_v47 = vunpack.i.l.bf16 %v13721_v30  ;;  %vm18385_vm0 = vmmov %vm18384_vm9 }
 0x25e   : > { %v1554_v13 = vmax.f32 %v1397_v48, %v1494_v10  ;;  %v12444_v48 = vld [vmem:[%s18375_s3 + $0x260] ss:$12 sps:$4 sm:$0xff]  }
 0x25f   : > { %v1343_v56 = vsel %vm18381_vm11, %v11929_v25, %v11943_v47  ;;  %v1344_v58 = vsel %vm18382_vm12, %v11943_v47, %v11944_v35  ;;  %v1501_v38 = vsel %vm18384_vm9, %v11948_v37, %v11949_v22  ;;  %vm18386_vm11 = vmmov %vm18385_vm0 }
 0x260   : > { %v11957_v61 = vpop.permute.xlu0 %11956  ;;  %v11952_v59 = vpop.permute.xlu1 %11951  ;;  %v1405_v2 = vmax.f32 %v13432_v42, %v1344_v58  ;;  %v1404_v7 = vmax.f32 %v13426_v39, %v1343_v56  ;;  %v12443_v39 = vld [vmem:[%s18375_s3 + $0x188] ss:$12 sps:$4 sm:$0xff]   ;;  %vm18387_vm9 = vmmov %vm18382_vm12 }
 0x261   : > { %v11954_v5 = vunpack.i.h.bf16 %v11952_v59  ;;  %v11953_v3 = vunpack.i.l.bf16 %v11952_v59  ;;  %v11959_v56 = vunpack.i.h.bf16 %v11957_v61  ;;  %v11958_v59 = vunpack.i.l.bf16 %v11957_v61  ;;  %v12436_v61 = vld [vmem:[%s18375_s3 + $0x198] ss:$12 sps:$4 sm:$0xff]   ;;  %vm18388_vm12 = vmmov %vm18387_vm9 }
 0x262   : > { %v1562_v14 = vmax.f32 %v1405_v2, %v1501_v38  ;;  %vm18389_vm14 = vmmov %vm18387_vm9 }
 0x263   : > { %v1500_v17 = vsel %vm18385_vm0, %v11954_v5, %v11948_v37  ;;  %v1493_v42 = vsel %vm18386_vm11, %v11953_v3, %v11938_v29  ;;  %v12438_v37 = vld [vmem:[%s18375_s3 + $0x19c] ss:$12 sps:$4 sm:$0xff]   ;;  %vm18390_vm0 = vmmov %vm18387_vm9 }
 0x264   : > { %v1553_v18 = vmax.f32 %v1396_v12, %v1493_v42  ;;  %v1561_v24 = vmax.f32 %v1404_v7, %v1500_v17  ;;  %v13744_v16 = vpop.permute.xlu1 %11966  ;;  %v13746_v25 = vpop.permute.xlu0 %11961  ;;  %v1586_v27 = vpack.c.bf16 %v1562_v14, %v1554_v13  ;;  %v12448_v14 = vld [vmem:[%s18375_s3 + $0x1a0] ss:$12 sps:$4 sm:$0xff]  }
 0x265   : > { %v11964_v47 = vunpack.i.h.bf16 %v13746_v25  ;;  %v11963_v58 = vunpack.i.l.bf16 %v13746_v25  ;;  %v11969_v2 = vunpack.i.h.bf16 %v13744_v16  ;;  %v11968_v5 = vunpack.i.l.bf16 %v13744_v16  ;;  %v12442_v42 = vld [vmem:[%s18375_s3 + $0x1b4] ss:$12 sps:$4 sm:$0xff]  }
 0x266   : > { %v1585_v29 = vpack.c.bf16 %v1561_v24, %v1553_v18  ;;  %2883 = vmatprep.mubr.bf16.mxu0 %v1586_v27  ;;  %3095 = vmatprep.mubr.bf16.mxu1 %v1586_v27  ;;  %v12449_v24 = vld [vmem:[%s18375_s3 + $0x278] ss:$12 sps:$4 sm:$0xff]  }
 0x267   : > { %v1351_v53 = vsel %vm18387_vm9, %v11963_v58, %v11964_v47  ;;  %v1350_v17 = vsel %vm18388_vm12, %v11958_v59, %v11963_v58  ;;  %vm18391_vm9 = vmmov %vm18386_vm11 }
 0x268   : > { %2884 = vmatmul.mubr.bf16.vlgmr.msra.gmra.mrb[24].mxu0 %v1585_v29  ;;  %3096 = vmatmul.mubr.bf16.vlgmr.msra.gmra.mrb[8].mxu1 %v1585_v29  ;;  %v13767_v3 = vpop.permute.xlu0 %11981  ;;  %v13769_v10 = vpop.permute.xlu1 %11971  ;;  %v1413_v18 = vmax.f32 %v13450_v40, %v1351_v53  ;;  %v1508_v29 = vsel %vm18386_vm11, %v11968_v5, %v11969_v2  ;;  %vm18392_vm12 = vmmov %vm18391_vm9 }
 0x269   : > { %2905 = vmatpush1.bf16.msra.mxu0 %v12433_v31  ;;  %v11984_v38 = vunpack.i.h.bf16 %v13767_v3  ;;  %v11983_v12 = vunpack.i.l.bf16 %v13767_v3  ;;  %v11974_v7 = vunpack.i.h.bf16 %v13769_v10  ;;  %v11973_v13 = vunpack.i.l.bf16 %v13769_v10  ;;  %11185 = vmatpush3.bf16.msra.mxu1 %v12443_v39  ;;  %vm18394_vm11 = vmmov %vm18390_vm0  ;;  %v12490_v3 = vld [vmem:[%s18375_s3 + $0x2a0] ss:$12 sps:$4 sm:$0xff]  }
 0x26a   : > { %2906 = vmatprep.subr.bf16.mxu0 %v12438_v37  ;;  %11186 = vmatprep.subr.bf16.mxu1 %v12444_v48  ;;  %v12440_v48 = vld [vmem:[%s18375_s3 + $0x1b0] ss:$12 sps:$4 sm:$0xff]   ;;  %v1570_v59 = vmax.f32 %v1413_v18, %v1508_v29  ;;  %v12464_v29 = vld [vmem:[%s18375_s3 + $0x2c0] ss:$12 sps:$4 sm:$0xff]  }
 0x26b   : > { %v1357_v27 = vsel %vm18389_vm14, %v11959_v56, %v11973_v13  ;;  %v1358_v31 = vsel %vm18390_vm0, %v11973_v13, %v11974_v7  ;;  %v1515_v53 = vsel %vm18391_vm9, %v11983_v12, %v11984_v38  ;;  %v1412_v56 = vmax.f32 %v13442_v46, %v1350_v17  ;;  %vm18393_vm14 = vmmov %vm18391_vm9  ;;  %v12454_v46 = vld [vmem:[%s18375_s3 + $0x290] ss:$12 sps:$4 sm:$0xff]  }
 0x26c   : > { %v11977_v39 = vpop.permute.xlu1 %11976  ;;  %v1421_v58 = vmax.f32 %v13458_v51, %v1358_v31  ;;  %v12453_v51 = vld [vmem:[%s18375_s3 + $0x1b8] ss:$12 sps:$4 sm:$0xff]   ;;  %v12458_v18 = vld [vmem:[%s18375_s3 + $0x1d0] ss:$12 sps:$4 sm:$0xff]   ;;  %vm18395_vm9 = vmmov %vm18390_vm0 }
 0x26d   : > { %2907 = vmatpush1.bf16.msra.mxu0 %v12436_v61  ;;  %v11979_v40 = vunpack.i.h.bf16 %v11977_v39  ;;  %v11978_v37 = vunpack.i.l.bf16 %v11977_v39  ;;  %11187 = vmatpush3.bf16.msra.mxu1 %v12448_v14  ;;  %v1420_v61 = vmax.f32 %v13452_v49, %v1357_v27  ;;  %v12447_v31 = vld [vmem:[%s18375_s3 + $0x1cc] ss:$12 sps:$4 sm:$0xff]   ;;  %v12445_v49 = vld [vmem:[%s18375_s3 + $0x1c8] ss:$12 sps:$4 sm:$0xff]  }
 0x26e   : > { %2908 = vmatprep.subr.bf16.mxu0 %v12442_v42  ;;  %v1578_v13 = vmax.f32 %v1421_v58, %v1515_v53  ;;  %11188 = vmatprep.subr.bf16.mxu1 %v12449_v24  ;;  %v12459_v24 = vld [vmem:[%s18375_s3 + $0x2a8] ss:$12 sps:$4 sm:$0xff]   ;;  %v12450_v27 = vld [vmem:[%s18375_s3 + $0x1e0] ss:$12 sps:$4 sm:$0xff]   ;;  %v12469_v53 = vld [vmem:[%s18375_s3 + $0x2d8] ss:$12 sps:$4 sm:$0xff]  }
 0x26f   : > { %v1507_v39 = vsel %vm18392_vm12, %v11978_v37, %v11968_v5  ;;  %v1514_v14 = vsel %vm18393_vm14, %v11979_v40, %v11983_v12  ;;  %v12452_v12 = vld [vmem:[%s18375_s3 + $0x1e4] ss:$12 sps:$4 sm:$0xff]   ;;  %v12457_v58 = vld [vmem:[%s18375_s3 + $0x1fc] ss:$12 sps:$4 sm:$0xff]   ;;  %v12468_v37 = vld [vmem:[%s18375_s3 + $0x200] ss:$12 sps:$4 sm:$0xff]  }
 0x270   : > { %v1594_v17 = vpack.c.bf16 %v1578_v13, %v1570_v59  ;;  %v1569_v15 = vmax.f32 %v1412_v56, %v1507_v39  ;;  %v1577_v42 = vmax.f32 %v1420_v61, %v1514_v14  ;;  %v12455_v40 = vld [vmem:[%s18375_s3 + $0x1f8] ss:$12 sps:$4 sm:$0xff]   ;;  %v12460_v56 = vld [vmem:[%s18375_s3 + $0x210] ss:$12 sps:$4 sm:$0xff]   ;;  %vm18396_vm12 = vmmov %vm18390_vm0 }
 0x271   : > { %2909 = vmatpush1.bf16.msra.mxu0 %v12440_v48  ;;  %11189 = vmatpush3.bf16.msra.mxu1 %v12453_v51  ;;  %v12462_v48 = vld [vmem:[%s18375_s3 + $0x214] ss:$12 sps:$4 sm:$0xff]   ;;  %v12473_v51 = vld [vmem:[%s18375_s3 + $0x218] ss:$12 sps:$4 sm:$0xff]   ;;  %v12474_v13 = vld [vmem:[%s18375_s3 + $0x2f0] ss:$12 sps:$4 sm:$0xff]  }
 0x272   : > { %2893 = vmatprep.mubr.bf16.mxu0 %v1594_v17  ;;  %3103 = vmatprep.mubr.bf16.mxu1 %v1594_v17  ;;  %v1593_v5 = vpack.c.bf16 %v1577_v42, %v1569_v15  ;;  %v12463_v15 = vld [vmem:[%s18375_s3 + $0x1e8] ss:$12 sps:$4 sm:$0xff]   ;;  %v12467_v59 = vld [vmem:[%s18375_s3 + $0x22c] ss:$12 sps:$4 sm:$0xff]   ;;  %v12478_v39 = vld [vmem:[%s18375_s3 + $0x230] ss:$12 sps:$4 sm:$0xff]  }
 0x273   : > { %2910 = vmatprep.subr.bf16.mxu0 %v12447_v31  ;;  %11190 = vmatprep.subr.bf16.mxu1 %v12454_v46  ;;  %v12465_v31 = vld [vmem:[%s18375_s3 + $0x228] ss:$12 sps:$4 sm:$0xff]   ;;  %v12472_v17 = vld [vmem:[%s18375_s3 + $0x244] ss:$12 sps:$4 sm:$0xff]  }
 0x274   : > { %2894 = vmatmul.mubr.bf16.gmra.mrb[28].mxu0 %v1593_v5  ;;  %3104 = vmatmul.mubr.bf16.gmra.mrb[12].mxu1 %v1593_v5  ;;  %v12479_v42 = vld [vmem:[%s18375_s3 + $0x3c8] ss:$12 sps:$4 sm:$0xff]  }
 0x275   : > { %2911 = vmatpush1.bf16.msra.mxu0 %v12445_v49  ;;  %11191 = vmatpush3.bf16.msra.mxu1 %v12458_v18 }
 0x276   : > { %2912 = vmatprep.subr.bf16.mxu0 %v12452_v12  ;;  %11192 = vmatprep.subr.bf16.mxu1 %v12459_v24 }
 0x279   : > { %2913 = vmatpush1.bf16.msra.mxu0 %v12450_v27  ;;  %11193 = vmatpush3.bf16.msra.mxu1 %v12463_v15  ;;  %v12470_v15 = vld [vmem:[%s18375_s3 + $0x240] ss:$12 sps:$4 sm:$0xff]  }
 0x27a   : > { %2914 = vmatprep.subr.bf16.mxu0 %v12457_v58  ;;  %11194 = vmatprep.subr.bf16.mxu1 %v12464_v29 }
 0x27d   : > { %2915 = vmatpush1.bf16.msra.mxu0 %v12455_v40  ;;  %11195 = vmatpush3.bf16.msra.mxu1 %v12468_v37  ;;  %v12477_v40 = vld [vmem:[%s18375_s3 + $0x25c] ss:$12 sps:$4 sm:$0xff]  }
 0x27e   : > { %2916 = vmatprep.subr.bf16.mxu0 %v12462_v48  ;;  %11196 = vmatprep.subr.bf16.mxu1 %v12469_v53 }
 0x281   : > { %2917 = vmatpush1.bf16.msra.mxu0 %v12460_v56  ;;  %v13864_v61 = vpop.permute.xlu0 %11986  ;;  %11197 = vmatpush3.bf16.msra.mxu1 %v12473_v51 }
 0x282   : > { %v11989_v14 = vunpack.i.h.bf16 %v13864_v61  ;;  %v11988_v46 = vunpack.i.l.bf16 %v13864_v61  ;;  %2918 = vmatprep.subr.bf16.mxu0 %v12467_v59  ;;  %11198 = vmatprep.subr.bf16.mxu1 %v12474_v13 }
 0x283   : > { %v13880_v49 = vpop.permute.xlu1 %11996 }
 0x284   : > { %v11999_v18 = vunpack.i.h.bf16 %v13880_v49  ;;  %v11998_v5 = vunpack.i.l.bf16 %v13880_v49  ;;  %v1338_v12 = vsel %vm18390_vm0, %v11934_v21, %v11988_v46  ;;  %v1339_v24 = vsel %vm18394_vm11, %v11988_v46, %v11989_v14  ;;  %vm18397_vm0 = vmmov %vm18393_vm14  ;;  %v12482_v46 = vld [vmem:[%s18375_s3 + $0x274] ss:$12 sps:$4 sm:$0xff]   ;;  %v12498_v49 = vld [vmem:[%s18375_s3 + $0x350] ss:$12 sps:$4 sm:$0xff]  }
 0x285   : > { %2919 = vmatpush1.bf16.msra.mxu0 %v12465_v31  ;;  %v13890_v27 = vpop.permute.xlu0 %11991  ;;  %11199 = vmatpush3.bf16.msra.mxu1 %v12478_v39  ;;  %v1398_v56 = vmax.f32 %v13571_v28, %v1338_v12  ;;  %vm18398_vm11 = vmmov %vm18397_vm0 }
 0x286   : > { %v1345_v58 = vsel %vm18395_vm9, %v11944_v35, %v11998_v5  ;;  %v1346_v20 = vsel %vm18396_vm12, %v11998_v5, %v11999_v18  ;;  %v11994_v21 = vunpack.i.h.bf16 %v13890_v27  ;;  %v11993_v29 = vunpack.i.l.bf16 %v13890_v27  ;;  %2920 = vmatprep.subr.bf16.mxu0 %v12472_v17  ;;  %11212 = vmatprep.subr.bf16.mxu1 %v12479_v42  ;;  %vm18399_vm9 = vmmov %vm18397_vm0 }
 0x287   : > { %v13906_v37 = vpop.permute.xlu1 %12001  ;;  %v1406_v51 = vmax.f32 %v13586_v34, %v1345_v58  ;;  %v1407_v13 = vmax.f32 %v13592_v36, %v1346_v20 }
 0x288   : > { %v1495_v30 = vsel %vm18393_vm14, %v11939_v23, %v11993_v29  ;;  %v12004_v35 = vunpack.i.h.bf16 %v13906_v37  ;;  %v12003_v48 = vunpack.i.l.bf16 %v13906_v37  ;;  %v1496_v53 = vsel %vm18397_vm0, %v11993_v29, %v11994_v21  ;;  %vm18400_vm14 = vmmov %vm18396_vm12  ;;  %v12480_v29 = vld [vmem:[%s18375_s3 + $0x270] ss:$12 sps:$4 sm:$0xff]  }
 0x289   : > { %2921 = vmatpush1.bf16.msra.mxu0 %v12470_v15  ;;  %v13918_v59 = vpop.permute.xlu0 %12006  ;;  %v1399_v23 = vmax.f32 %v13581_v33, %v1339_v24  ;;  %v1555_v33 = vmax.f32 %v1398_v56, %v1495_v30  ;;  %vm18401_vm0 = vmmov %vm18396_vm12  ;;  %v12487_v56 = vld [vmem:[%s18375_s3 + $0x28c] ss:$12 sps:$4 sm:$0xff]  }
 0x28a   : > { %v1502_v31 = vsel %vm18398_vm11, %v11949_v22, %v12003_v48  ;;  %v12009_v39 = vunpack.i.h.bf16 %v13918_v59  ;;  %v12008_v28 = vunpack.i.l.bf16 %v13918_v59  ;;  %2922 = vmatprep.subr.bf16.mxu0 %v12477_v40  ;;  %v1503_v34 = vsel %vm18399_vm9, %v12003_v48, %v12004_v35  ;;  %v12483_v40 = vld [vmem:[%s18375_s3 + $0x308] ss:$12 sps:$4 sm:$0xff]   ;;  %vm18402_vm11 = vmmov %vm18401_vm0 }
 0x28b   : > { %v1563_v17 = vmax.f32 %v1406_v51, %v1502_v31  ;;  %v13936_v36 = vpop.permute.xlu1 %12021  ;;  %v1556_v32 = vmax.f32 %v1399_v23, %v1496_v53  ;;  %v1564_v42 = vmax.f32 %v1407_v13, %v1503_v34  ;;  %v12484_v53 = vld [vmem:[%s18375_s3 + $0x3e0] ss:$12 sps:$4 sm:$0xff]   ;;  %v12505_v59 = vld [vmem:[%s18375_s3 + $0x2e8] ss:$12 sps:$4 sm:$0xff]  }
 0x28c   : > { %v1353_v22 = vsel %vm18396_vm12, %v12008_v28, %v12009_v39  ;;  %v12024_v5 = vunpack.i.h.bf16 %v13936_v36  ;;  %v12023_v12 = vunpack.i.l.bf16 %v13936_v36  ;;  %v1352_v15 = vsel %vm18400_vm14, %v11964_v47, %v12008_v28  ;;  %vm18403_vm12 = vmmov %vm18399_vm9  ;;  %v12488_v31 = vld [vmem:[%s18375_s3 + $0x320] ss:$12 sps:$4 sm:$0xff]  }
 0x28d   : > { %v13943_v24 = vpack.c.bf16 %v1563_v17, %v1555_v33  ;;  %2923 = vmatpush1.bf16.msra.mxu0 %v12475_v19  ;;  %v13948_v58 = vpop.permute.xlu0 %12011  ;;  %v1588_v20 = vpack.c.bf16 %v1564_v42, %v1556_v32  ;;  %v1414_v34 = vmax.f32 %v13599_v26, %v1352_v15  ;;  %vm18404_vm14 = vmmov %vm18399_vm9  ;;  %v12492_v33 = vld [vmem:[%s18375_s3 + $0x2a4] ss:$12 sps:$4 sm:$0xff]  }
 0x28e   : > { %v1359_v30 = vsel %vm18401_vm0, %v11974_v7, %v12023_v12  ;;  %v1360_v25 = vsel %vm18402_vm11, %v12023_v12, %v12024_v5  ;;  %v12014_v47 = vunpack.i.h.bf16 %v13948_v58  ;;  %v12013_v48 = vunpack.i.l.bf16 %v13948_v58  ;;  %2924 = vmatprep.subr.bf16.mxu0 %v12482_v46  ;;  %vm18405_vm0 = vmmov %vm18399_vm9 }
 0x28f   : > { %2936 = vmatprep.mubr.bf16.mxu0 %v1588_v20  ;;  %3144 = vmatprep.mubr.bf16.mxu1 %v1588_v20  ;;  %v13970_v10 = vpop.permute.xlu1 %12026  ;;  %v1415_v7 = vmax.f32 %v13603_v45, %v1353_v22  ;;  %v12485_v45 = vld [vmem:[%s18375_s3 + $0x288] ss:$12 sps:$4 sm:$0xff]   ;;  %v1423_v28 = vmax.f32 %v13616_v52, %v1360_v25  ;;  %v1422_v46 = vmax.f32 %v13605_v43, %v1359_v30 }
 0x290   : > { %v12029_v51 = vunpack.i.h.bf16 %v13970_v10  ;;  %v12028_v19 = vunpack.i.l.bf16 %v13970_v10  ;;  %3145 = vmatmul.mubr.bf16.vlgmr.msra.gmra.mrb[16].mxu1 %v13943_v24  ;;  %v1510_v23 = vsel %vm18399_vm9, %v12013_v48, %v12014_v47  ;;  %v1509_v13 = vsel %vm18403_vm12, %v11969_v2, %v12013_v48  ;;  %v12489_v2 = vld [vmem:[%s18375_s3 + $0x3f8] ss:$12 sps:$4 sm:$0xff]   ;;  %v12497_v30 = vld [vmem:[%s18375_s3 + $0x2bc] ss:$12 sps:$4 sm:$0xff]   ;;  %vm18406_vm9 = vmmov %vm18402_vm11 }
 0x291   : > { %11213 = vmatpush3.bf16.msra.mxu1 %v12483_v40  ;;  %2925 = vmatpush1.bf16.msra.mxu0 %v12480_v29  ;;  %v1572_v52 = vmax.f32 %v1415_v7, %v1510_v23  ;;  %v1571_v17 = vmax.f32 %v1414_v34, %v1509_v13  ;;  %v12494_v40 = vld [vmem:[%s18375_s3 + $0x410] ss:$12 sps:$4 sm:$0xff]   ;;  %vm18407_vm12 = vmmov %vm18406_vm9  ;;  %v12495_v13 = vld [vmem:[%s18375_s3 + $0x2b8] ss:$12 sps:$4 sm:$0xff]  }
 0x292   : > { %11214 = vmatprep.subr.bf16.mxu1 %v12484_v53  ;;  %2926 = vmatprep.subr.bf16.mxu0 %v12487_v56  ;;  %v1517_v16 = vsel %vm18404_vm14, %v12028_v19, %v12029_v51  ;;  %v1516_v26 = vsel %vm18405_vm0, %v11984_v38, %v12028_v19  ;;  %v12493_v38 = vld [vmem:[%s18375_s3 + $0x338] ss:$12 sps:$4 sm:$0xff]   ;;  %vm18408_vm14 = vmmov %vm18406_vm9 }
 0x293   : > { %v1580_v43 = vmax.f32 %v1423_v28, %v1517_v16  ;;  %v1579_v32 = vmax.f32 %v1422_v46, %v1516_v26  ;;  %v12502_v28 = vld [vmem:[%s18375_s3 + $0x2d4] ss:$12 sps:$4 sm:$0xff]  }
 0x294   : > { %v14003_v42 = vpop.permute.xlu0 %12016 }
 0x295   : > { %11215 = vmatpush3.bf16.msra.mxu1 %v12488_v31  ;;  %v12019_v22 = vunpack.i.h.bf16 %v14003_v42  ;;  %v12018_v12 = vunpack.i.l.bf16 %v14003_v42  ;;  %2927 = vmatpush1.bf16.msra.mxu0 %v12485_v45  ;;  %v14007_v15 = vpack.c.bf16 %v1580_v43, %v1572_v52  ;;  %v14015_v20 = vpack.c.bf16 %v1579_v32, %v1571_v17  ;;  %v12499_v31 = vld [vmem:[%s18375_s3 + $0x428] ss:$12 sps:$4 sm:$0xff]  }
 0x296   : > { %v14017_v29 = vpop.permute.xlu1 %12031  ;;  %11216 = vmatprep.subr.bf16.mxu1 %v12489_v2  ;;  %2928 = vmatprep.subr.bf16.mxu0 %v12492_v33 }
 0x297   : > { %v1340_v25 = vsel %vm18402_vm11, %v11989_v14, %v12018_v12  ;;  %v12034_v48 = vunpack.i.h.bf16 %v14017_v29  ;;  %v12033_v53 = vunpack.i.l.bf16 %v14017_v29  ;;  %3152 = vmatprep.mubr.bf16.mxu1 %v14007_v15  ;;  %v1341_v56 = vsel %vm18406_vm9, %v12018_v12, %v12019_v22  ;;  %vm18409_vm11 = vmmov %vm18405_vm0 }
 0x298   : > { %v14034_v7 = vpop.permute.xlu0 %12036  ;;  %3153 = vmatmul.mubr.bf16.gmra.mrb[20].mxu1 %v14015_v20  ;;  %v1401_v52 = vmax.f32 %v13628_v41, %v1341_v56  ;;  %vm18410_vm9 = vmmov %vm18405_vm0  ;;  %v12503_v41 = vld [vmem:[%s18375_s3 + $0x368] ss:$12 sps:$4 sm:$0xff]  }
 0x299   : > { %v1347_v61 = vsel %vm18407_vm12, %v11999_v18, %v12033_v53  ;;  %v1348_v14 = vsel %vm18408_vm14, %v12033_v53, %v12034_v48  ;;  %11217 = vmatpush3.bf16.msra.mxu1 %v12493_v38  ;;  %v12039_v19 = vunpack.i.h.bf16 %v14034_v7  ;;  %v12038_v23 = vunpack.i.l.bf16 %v14034_v7  ;;  %2929 = vmatpush1.bf16.msra.mxu0 %v12490_v3  ;;  %vm18411_vm12 = vmmov %vm18405_vm0  ;;  %v12504_v3 = vld [vmem:[%s18375_s3 + $0x440] ss:$12 sps:$4 sm:$0xff]  }
 0x29a   : > { %v1400_v18 = vmax.f32 %v13624_v44, %v1340_v25  ;;  %v14052_v45 = vpop.permute.xlu1 %12041  ;;  %11218 = vmatprep.subr.bf16.mxu1 %v12494_v40  ;;  %2930 = vmatprep.subr.bf16.mxu0 %v12497_v30  ;;  %v1408_v2 = vmax.f32 %v13630_v55, %v1347_v61  ;;  %v1409_v43 = vmax.f32 %v13635_v57, %v1348_v14  ;;  %v12500_v55 = vld [vmem:[%s18375_s3 + $0x2d0] ss:$12 sps:$4 sm:$0xff]   ;;  %v12507_v25 = vld [vmem:[%s18375_s3 + $0x2ec] ss:$12 sps:$4 sm:$0xff]   ;;  %v12521_v7 = vld [vmem:[%s18375_s3 + $0x334] ss:$12 sps:$4 sm:$0xff]  }
 0x29b   : > { %v1497_v34 = vsel %vm18405_vm0, %v11994_v21, %v12038_v23  ;;  %v12044_v46 = vunpack.i.h.bf16 %v14052_v45  ;;  %v12043_v44 = vunpack.i.l.bf16 %v14052_v45  ;;  %v1498_v16 = vsel %vm18409_vm11, %v12038_v23, %v12039_v19  ;;  %vm18412_vm0 = vmmov %vm18408_vm14 }
 0x29c   : > { %v1557_v33 = vmax.f32 %v1400_v18, %v1497_v34  ;;  %v14069_v26 = vpop.permute.xlu0 %12046  ;;  %v1558_v32 = vmax.f32 %v1401_v52, %v1498_v16  ;;  %vm18413_vm11 = vmmov %vm18412_vm0 }
 0x29d   : > { %v1504_v27 = vsel %vm18410_vm9, %v12004_v35, %v12043_v44  ;;  %11219 = vmatpush3.bf16.msra.mxu1 %v12498_v49  ;;  %v12049_v21 = vunpack.i.h.bf16 %v14069_v26  ;;  %v12048_v17 = vunpack.i.l.bf16 %v14069_v26  ;;  %2931 = vmatpush1.bf16.msra.mxu0 %v12495_v13  ;;  %v1505_v57 = vsel %vm18411_vm12, %v12043_v44, %v12044_v46  ;;  %vm18414_vm9 = vmmov %vm18412_vm0 }
 0x29e   : > { %v1565_v37 = vmax.f32 %v1408_v2, %v1504_v27  ;;  %v14087_v35 = vpop.permute.xlu1 %12056  ;;  %11220 = vmatprep.subr.bf16.mxu1 %v12499_v31  ;;  %2932 = vmatprep.subr.bf16.mxu0 %v12502_v28  ;;  %v1566_v12 = vmax.f32 %v1409_v43, %v1505_v57  ;;  %v12512_v31 = vld [vmem:[%s18375_s3 + $0x304] ss:$12 sps:$4 sm:$0xff]  }
 0x29f   : > { %v1355_v38 = vsel %vm18408_vm14, %v12048_v17, %v12049_v21  ;;  %v12059_v40 = vunpack.i.h.bf16 %v14087_v35  ;;  %v12058_v30 = vunpack.i.l.bf16 %v14087_v35  ;;  %v1354_v56 = vsel %vm18412_vm0, %v12009_v39, %v12048_v17  ;;  %v12508_v39 = vld [vmem:[%s18375_s3 + $0x380] ss:$12 sps:$4 sm:$0xff]   ;;  %vm18415_vm14 = vmmov %vm18411_vm12 }
 0x2a0   : > { %v14100_v53 = vpack.c.bf16 %v1565_v37, %v1557_v33  ;;  %v14105_v61 = vpop.permute.xlu0 %12051  ;;  %v14107_v14 = vpack.c.bf16 %v1566_v12, %v1558_v32  ;;  %v1417_v28 = vmax.f32 %v13644_v60, %v1355_v38  ;;  %v1416_v27 = vmax.f32 %v13639_v50, %v1354_v56  ;;  %vm18416_vm0 = vmmov %vm18411_vm12  ;;  %v12510_v50 = vld [vmem:[%s18375_s3 + $0x300] ss:$12 sps:$4 sm:$0xff]  }
 0x2a1   : > { %v1361_v23 = vsel %vm18413_vm11, %v12024_v5, %v12058_v30  ;;  %v1362_v13 = vsel %vm18414_vm9, %v12058_v30, %v12059_v40  ;;  %11221 = vmatpush3.bf16.msra.mxu1 %v12503_v41  ;;  %v12054_v49 = vunpack.i.h.bf16 %v14105_v61  ;;  %v12053_v18 = vunpack.i.l.bf16 %v14105_v61  ;;  %2933 = vmatpush1.bf16.msra.mxu0 %v12500_v55  ;;  %v12509_v5 = vld [vmem:[%s18375_s3 + $0x458] ss:$12 sps:$4 sm:$0xff]   ;;  %vm18417_vm11 = vmmov %vm18416_vm0  ;;  %v12526_v61 = vld [vmem:[%s18375_s3 + $0x4a0] ss:$12 sps:$4 sm:$0xff]  }
 0x2a2   : > { %3193 = vmatprep.mubr.bf16.mxu1 %v14107_v14  ;;  %v14124_v36 = vpop.permute.xlu1 %12061  ;;  %11222 = vmatprep.subr.bf16.mxu1 %v12504_v3  ;;  %v1425_v52 = vmax.f32 %v13651_v62, %v1362_v13  ;;  %v1424_v60 = vmax.f32 %v13646_v54, %v1361_v23  ;;  %v12513_v41 = vld [vmem:[%s18375_s3 + $0x398] ss:$12 sps:$4 sm:$0xff]   ;;  %v12514_v3 = vld [vmem:[%s18375_s3 + $0x470] ss:$12 sps:$4 sm:$0xff]  }
 0x2a3   : > { %v12064_v34 = vunpack.i.h.bf16 %v14124_v36  ;;  %v12063_v44 = vunpack.i.l.bf16 %v14124_v36  ;;  %2934 = vmatprep.subr.bf16.mxu0 %v12507_v25  ;;  %v1512_v16 = vsel %vm18411_vm12, %v12053_v18, %v12054_v49  ;;  %v1511_v2 = vsel %vm18415_vm14, %v12014_v47, %v12053_v18  ;;  %vm18418_vm12 = vmmov %vm18414_vm9  ;;  %v12515_v18 = vld [vmem:[%s18375_s3 + $0x318] ss:$12 sps:$4 sm:$0xff]  }
 0x2a4   : > { %v12067_v33 = vpop.permute.xlu0 %12066  ;;  %v1574_v43 = vmax.f32 %v1417_v28, %v1512_v16  ;;  %v1573_v57 = vmax.f32 %v1416_v27, %v1511_v2  ;;  %vm18419_vm14 = vmmov %vm18416_vm0  ;;  %v12519_v2 = vld [vmem:[%s18375_s3 + $0x330] ss:$12 sps:$4 sm:$0xff]  }
 0x2a5   : > { %11223 = vmatpush3.bf16.msra.mxu1 %v12508_v39  ;;  %v12069_v17 = vunpack.i.h.bf16 %v12067_v33  ;;  %v12068_v55 = vunpack.i.l.bf16 %v12067_v33  ;;  %2935 = vmatpush1.bf16.msra.mxu0 %v12505_v59  ;;  %v1519_v58 = vsel %vm18416_vm0, %v12063_v44, %v12064_v34  ;;  %v1518_v62 = vsel %vm18417_vm11, %v12029_v51, %v12063_v44  ;;  %vm18420_vm11 = vmmov %vm18414_vm9 }
 0x2a6   : > { %v12072_v47 = vpop.permute.xlu1 %12071  ;;  %11224 = vmatprep.subr.bf16.mxu1 %v12509_v5  ;;  %2957 = vmatprep.subr.bf16.mxu0 %v12512_v31  ;;  %v1582_v54 = vmax.f32 %v1425_v52, %v1519_v58  ;;  %v1581_v37 = vmax.f32 %v1424_v60, %v1518_v62  ;;  %v12533_v60 = vld [vmem:[%s18375_s3 + $0x37c] ss:$12 sps:$4 sm:$0xff]  }
 0x2a7   : > { %v1411_v32 = vmax.f32 %v13667_v4, %v12069_v17  ;;  %v1342_v12 = vsel %vm18414_vm9, %v12019_v22, %v12068_v55  ;;  %v1349_v10 = vsel %vm18418_vm12, %v12034_v48, %v12069_v17  ;;  %v1403_v51 = vmax.f32 %v13658_v0, %v12068_v55  ;;  %v12517_v22 = vld [vmem:[%s18375_s3 + $0x31c] ss:$12 sps:$4 sm:$0xff]   ;;  %vm18422_vm12 = vmmov %vm18416_vm0  ;;  %v12531_v55 = vld [vmem:[%s18375_s3 + $0x378] ss:$12 sps:$4 sm:$0xff]  }
 0x2a8   : > { %v1402_v38 = vmax.f32 %v13656_v63, %v1342_v12  ;;  %v1410_v30 = vmax.f32 %v13662_v1, %v1349_v10  ;;  %v12074_v25 = vunpack.i.h.bf16 %v12072_v47  ;;  %v12073_v4 = vunpack.i.l.bf16 %v12072_v47  ;;  %2937 = vmatmul.mubr.bf16.vlgmr.msra.gmra.mrb[24].mxu0 %v13943_v24  ;;  %v12077_v42 = vpop.permute.xlu0 %12076  ;;  %v12518_v63 = vld [vmem:[%s18375_s3 + $0x3b0] ss:$12 sps:$4 sm:$0xff]   ;;  %v12538_v58 = vld [vmem:[%s18375_s3 + $0x4e8] ss:$12 sps:$4 sm:$0xff]   ;;  %v12541_v47 = vld [vmem:[%s18375_s3 + $0x3ac] ss:$12 sps:$4 sm:$0xff]  }
 0x2a9   : > { %11225 = vmatpush3.bf16.msra.mxu1 %v12513_v41  ;;  %v12079_v29 = vunpack.i.h.bf16 %v12077_v42  ;;  %v12078_v0 = vunpack.i.l.bf16 %v12077_v42  ;;  %2946 = vmatprep.mubr.bf16.mxu0 %v14007_v15  ;;  %v14177_v48 = vpack.c.bf16 %v1582_v54, %v1574_v43  ;;  %v14179_v1 = vpack.c.bf16 %v1581_v37, %v1573_v57  ;;  %v12534_v17 = vld [vmem:[%s18375_s3 + $0x4d0] ss:$12 sps:$4 sm:$0xff]   ;;  %v12537_v41 = vld [vmem:[%s18375_s3 + $0x394] ss:$12 sps:$4 sm:$0xff]   ;;  %v12546_v37 = vld [vmem:[%s18375_s3 + $0x518] ss:$12 sps:$4 sm:$0xff]  }
 0x2aa   : > { %v1506_v24 = vsel %vm18419_vm14, %v12044_v46, %v12074_v25  ;;  %v1568_v56 = vmax.f32 %v1411_v32, %v12074_v25  ;;  %v1499_v23 = vsel %vm18416_vm0, %v12039_v19, %v12073_v4  ;;  %v1560_v13 = vmax.f32 %v1403_v51, %v12073_v4  ;;  %2958 = vmatpush1.bf16.msra.mxu0 %v12510_v50  ;;  %v12082_v15 = vpop.permute.xlu1 %12081  ;;  %vm18423_vm14 = vmmov %vm18416_vm0  ;;  %v12535_v62 = vld [vmem:[%s18375_s3 + $0x390] ss:$12 sps:$4 sm:$0xff]   ;;  %v12542_v50 = vld [vmem:[%s18375_s3 + $0x500] ss:$12 sps:$4 sm:$0xff]  }
 0x2ab   : > { %v1567_v59 = vmax.f32 %v1410_v30, %v1506_v24  ;;  %v1559_v39 = vmax.f32 %v1402_v38, %v1499_v23  ;;  %v1427_v5 = vmax.f32 %v13685_v11, %v12079_v29  ;;  %v1356_v45 = vsel %vm18420_vm11, %v12049_v21, %v12078_v0  ;;  %11226 = vmatprep.subr.bf16.mxu1 %v12514_v3  ;;  %v12522_v11 = vld [vmem:[%s18375_s3 + $0x488] ss:$12 sps:$4 sm:$0xff]   ;;  %v12545_v57 = vld [vmem:[%s18375_s3 + $0x3c4] ss:$12 sps:$4 sm:$0xff]   ;;  %v12543_v32 = vld [vmem:[%s18375_s3 + $0x3c0] ss:$12 sps:$4 sm:$0xff]  }
 0x2ac   : > { %v1363_v19 = vsel %vm18414_vm9, %v12059_v40, %v12079_v29  ;;  %v1419_v46 = vmax.f32 %v13675_v8, %v12078_v0  ;;  %v12084_v31 = vunpack.i.h.bf16 %v12082_v15  ;;  %v12083_v28 = vunpack.i.l.bf16 %v12082_v15  ;;  %2959 = vmatprep.subr.bf16.mxu0 %v12517_v22  ;;  %v12539_v54 = vld [vmem:[%s18375_s3 + $0x3a8] ss:$12 sps:$4 sm:$0xff]   ;;  %v12550_v10 = vld [vmem:[%s18375_s3 + $0x530] ss:$12 sps:$4 sm:$0xff]   ;;  %v12547_v51 = vld [vmem:[%s18375_s3 + $0x3d8] ss:$12 sps:$4 sm:$0xff]  }
 0x2ad   : > { %v14201_v44 = vpack.c.bf16 %v1567_v59, %v1559_v39  ;;  %11227 = vmatpush3.bf16.msra.mxu1 %v12518_v63  ;;  %v14206_v26 = vpack.c.bf16 %v1568_v56, %v1560_v13  ;;  %v1418_v21 = vmax.f32 %v13673_v6, %v1356_v45  ;;  %v1426_v35 = vmax.f32 %v13680_v9, %v1363_v19  ;;  %v12525_v6 = vld [vmem:[%s18375_s3 + $0x34c] ss:$12 sps:$4 sm:$0xff]   ;;  %v12549_v12 = vld [vmem:[%s18375_s3 + $0x3dc] ss:$12 sps:$4 sm:$0xff]   ;;  %v12553_v3 = vld [vmem:[%s18375_s3 + $0x3f4] ss:$12 sps:$4 sm:$0xff]  }
 0x2ae   : > { %v1584_v16 = vmax.f32 %v1427_v5, %v12084_v31  ;;  %v1576_v40 = vmax.f32 %v1419_v46, %v12083_v28  ;;  %2960 = vmatpush1.bf16.msra.mxu0 %v12515_v18  ;;  %v18421_v8 = vmov 0   ;;  %v1513_v33 = vsel %vm18422_vm12, %v12054_v49, %v12083_v28  ;;  %v12523_v49 = vld [vmem:[%s18375_s3 + $0x348] ss:$12 sps:$4 sm:$0xff]   ;;  %v12551_v30 = vld [vmem:[%s18375_s3 + $0x3f0] ss:$12 sps:$4 sm:$0xff]  }
 0x2af   : > { %3210 = vmatprep.subr.bf16.mxu1 %v18421_v8  ;;  %2961 = vmatprep.subr.bf16.mxu0 %v12521_v7  ;;  %v1520_v9 = vsel %vm18423_vm14, %v12064_v34, %v12084_v31  ;;  %v1575_v52 = vmax.f32 %v1418_v21, %v1513_v33  ;;  %v12530_v34 = vld [vmem:[%s18375_s3 + $0x4b8] ss:$12 sps:$4 sm:$0xff]   ;;  %v12554_v38 = vld [vmem:[%s18375_s3 + $0x548] ss:$12 sps:$4 sm:$0xff]   ;;  %v12558_v4 = vld [vmem:[%s18375_s3 + $0x560] ss:$12 sps:$4 sm:$0xff]  }
 0x2b0   : > { %3194 = vmatmul.mubr.bf16.vlgmr.msra.gmra.mrb[24].mxu1 %v14100_v53  ;;  %2947 = vmatmul.mubr.bf16.gmra.mrb[28].mxu0 %v14015_v20  ;;  %v14225_v43 = vpack.c.bf16 %v1584_v16, %v1576_v40  ;;  %v1583_v27 = vmax.f32 %v1426_v35, %v1520_v9  ;;  %v12529_v20 = vld [vmem:[%s18375_s3 + $0x364] ss:$12 sps:$4 sm:$0xff]   ;;  %v12557_v25 = vld [vmem:[%s18375_s3 + $0x40c] ss:$12 sps:$4 sm:$0xff]   ;;  %v12555_v42 = vld [vmem:[%s18375_s3 + $0x408] ss:$12 sps:$4 sm:$0xff]  }
 0x2b1   : > { %3201 = vmatprep.mubr.bf16.mxu1 %v14177_v48  ;;  %3211 = vmatpush1.bf16.msra.mxu1 %v12522_v11  ;;  %v12561_v22 = vld [vmem:[%s18375_s3 + $0x424] ss:$12 sps:$4 sm:$0xff]   ;;  %v12559_v0 = vld [vmem:[%s18375_s3 + $0x420] ss:$12 sps:$4 sm:$0xff]   ;;  %v12565_v63 = vld [vmem:[%s18375_s3 + $0x43c] ss:$12 sps:$4 sm:$0xff]  }
 0x2b2   : > { %2962 = vmatpush1.bf16.msra.mxu0 %v12519_v2  ;;  %2989 = vmatprep.mubr.bf16.mxu0 %v14107_v14  ;;  %v14235_v36 = vpack.c.bf16 %v1583_v27, %v1575_v52  ;;  %v12527_v14 = vld [vmem:[%s18375_s3 + $0x360] ss:$12 sps:$4 sm:$0xff]   ;;  %v12562_v29 = vld [vmem:[%s18375_s3 + $0x578] ss:$12 sps:$4 sm:$0xff]   ;;  %v12566_v24 = vld [vmem:[%s18375_s3 + $0x590] ss:$12 sps:$4 sm:$0xff]  }
 0x2b3   : > { %3212 = vmatprep.subr.bf16.mxu1 %v18421_v8  ;;  %2963 = vmatprep.subr.bf16.mxu0 %v12525_v6  ;;  %v12563_v56 = vld [vmem:[%s18375_s3 + $0x438] ss:$12 sps:$4 sm:$0xff]   ;;  %v12569_v23 = vld [vmem:[%s18375_s3 + $0x454] ss:$12 sps:$4 sm:$0xff]   ;;  %v12567_v15 = vld [vmem:[%s18375_s3 + $0x450] ss:$12 sps:$4 sm:$0xff]  }
 0x2b4   : > { %v12570_v13 = vld [vmem:[%s18375_s3 + $0x5a8] ss:$12 sps:$4 sm:$0xff]   ;;  %v12573_v18 = vld [vmem:[%s18375_s3 + $0x46c] ss:$12 sps:$4 sm:$0xff]   ;;  %v12576_v39 = vld [vmem:[%s18375_s3 + $0x484] ss:$12 sps:$4 sm:$0xff]  }
 0x2b5   : > { %3213 = vmatpush1.bf16.msra.mxu1 %v12526_v61  ;;  %v12571_v59 = vld [vmem:[%s18375_s3 + $0x468] ss:$12 sps:$4 sm:$0xff]   ;;  %v12574_v5 = vld [vmem:[%s18375_s3 + $0x480] ss:$12 sps:$4 sm:$0xff]   ;;  %v12577_v7 = vld [vmem:[%s18375_s3 + $0x498] ss:$12 sps:$4 sm:$0xff]  }
 0x2b6   : > { %2964 = vmatpush1.bf16.msra.mxu0 %v12523_v49  ;;  %3214 = vmatprep.subr.bf16.mxu1 %v18421_v8  ;;  %v12579_v45 = vld [vmem:[%s18375_s3 + $0x49c] ss:$12 sps:$4 sm:$0xff]   ;;  %v12582_v19 = vld [vmem:[%s18375_s3 + $0x4b4] ss:$12 sps:$4 sm:$0xff]   ;;  %v12588_v31 = vld [vmem:[%s18375_s3 + $0x4e4] ss:$12 sps:$4 sm:$0xff]  }
 0x2b7   : > { %2965 = vmatprep.subr.bf16.mxu0 %v12529_v20  ;;  %v12580_v46 = vld [vmem:[%s18375_s3 + $0x4b0] ss:$12 sps:$4 sm:$0xff]   ;;  %v12586_v28 = vld [vmem:[%s18375_s3 + $0x4e0] ss:$12 sps:$4 sm:$0xff]   ;;  %v12589_v11 = vld [vmem:[%s18375_s3 + $0x4f8] ss:$12 sps:$4 sm:$0xff]  }
 0x2b8   : > { %3202 = vmatmul.mubr.bf16.gmra.mrb[28].mxu1 %v14179_v1  ;;  %v12592_v21 = vld [vmem:[%s18375_s3 + $0x510] ss:$12 sps:$4 sm:$0xff]   ;;  %v12597_v35 = vld [vmem:[%s18375_s3 + $0x52c] ss:$12 sps:$4 sm:$0xff]   ;;  %v12595_v16 = vld [vmem:[%s18375_s3 + $0x528] ss:$12 sps:$4 sm:$0xff]  }
 0x2b9   : > { %3215 = vmatpush1.bf16.msra.mxu1 %v12530_v34  ;;  %10739 = vmatprep.mubr.msk.bf16.mxu1 %vm1020_vm15, %v14206_v26  ;;  %v12600_v40 = vld [vmem:[%s18375_s3 + $0x544] ss:$12 sps:$4 sm:$0xff]   ;;  %v12598_v2 = vld [vmem:[%s18375_s3 + $0x540] ss:$12 sps:$4 sm:$0xff]   ;;  %v12603_v33 = vld [vmem:[%s18375_s3 + $0x55c] ss:$12 sps:$4 sm:$0xff]  }
 0x2ba   : > { %2966 = vmatpush1.bf16.msra.mxu0 %v12527_v14  ;;  %3216 = vmatprep.subr.bf16.mxu1 %v18421_v8  ;;  %v12601_v6 = vld [vmem:[%s18375_s3 + $0x558] ss:$12 sps:$4 sm:$0xff]   ;;  %v12606_v9 = vld [vmem:[%s18375_s3 + $0x574] ss:$12 sps:$4 sm:$0xff]   ;;  %v12604_v52 = vld [vmem:[%s18375_s3 + $0x570] ss:$12 sps:$4 sm:$0xff]  }
 0x2bb   : > { %2967 = vmatprep.subr.bf16.mxu0 %v12533_v60  ;;  %v12609_v27 = vld [vmem:[%s18375_s3 + $0x58c] ss:$12 sps:$4 sm:$0xff]   ;;  %v12607_v61 = vld [vmem:[%s18375_s3 + $0x588] ss:$12 sps:$4 sm:$0xff]   ;;  %v12612_v49 = vld [vmem:[%s18375_s3 + $0x5a4] ss:$12 sps:$4 sm:$0xff]  }
 0x2bc   : > { %v12610_v20 = vld [vmem:[%s18375_s3 + $0x5a0] ss:$12 sps:$4 sm:$0xff]   ;;  %vm3596_vm0 = vcmask 1042432   ;;  %vm3800_vm9 = vcmask 1044480   ;;  %vm4004_vm12 = vcmask 1046528   ;;  %vm3495_vm14 = vcmask 1041408  }
 0x2bd   : > { %3217 = vmatpush1.bf16.msra.mxu1 %v12534_v17 }
 0x2be   : > { %2968 = vmatpush1.bf16.msra.mxu0 %v12531_v55  ;;  %3218 = vmatprep.subr.bf16.mxu1 %v18421_v8 }
 0x2bf   : > { %2969 = vmatprep.subr.bf16.mxu0 %v12537_v41 }
 0x2c1   : > { %3219 = vmatpush1.bf16.msra.mxu1 %v12538_v58 }
 0x2c2   : > { %2970 = vmatpush1.bf16.msra.mxu0 %v12535_v62  ;;  %3220 = vmatprep.subr.bf16.mxu1 %v18421_v8 }
 0x2c3   : > { %2971 = vmatprep.subr.bf16.mxu0 %v12541_v47 }
 0x2c5   : > { %3221 = vmatpush1.bf16.msra.mxu1 %v12542_v50 }
 0x2c6   : > { %2972 = vmatpush1.bf16.msra.mxu0 %v12539_v54  ;;  %3222 = vmatprep.subr.bf16.mxu1 %v18421_v8 }
 0x2c7   : > { %2973 = vmatprep.subr.bf16.mxu0 %v12545_v57 }
 0x2c9   : > { %3223 = vmatpush1.bf16.msra.mxu1 %v12546_v37  ;;  %v14448_v37 = vpop.permute.xlu0 %1851 }
 0x2ca   : > { %2974 = vmatpush1.bf16.msra.mxu0 %v12543_v32  ;;  %3224 = vmatprep.subr.bf16.mxu1 %v18421_v8  ;;  %v14450_v32 = vpop.permute.xlu1 %1856 }
 0x2cb   : > { %2975 = vmatprep.subr.bf16.mxu0 %v12549_v12 }
 0x2cd   : > { %3225 = vmatpush1.bf16.msra.mxu1 %v12550_v10 }
 0x2ce   : > { %2976 = vmatpush1.bf16.msra.mxu0 %v12547_v51  ;;  %3226 = vmatprep.subr.bf16.mxu1 %v18421_v8 }
 0x2cf   : > { %2977 = vmatprep.subr.bf16.mxu0 %v12553_v3 }
 0x2d1   : > { %3227 = vmatpush1.bf16.msra.mxu1 %v12554_v38 }
 0x2d2   : > { %2978 = vmatpush1.bf16.msra.mxu0 %v12551_v30  ;;  %3228 = vmatprep.subr.bf16.mxu1 %v18421_v8 }
 0x2d3   : > { %2979 = vmatprep.subr.bf16.mxu0 %v12557_v25 }
 0x2d5   : > { %3229 = vmatpush1.bf16.msra.mxu1 %v12558_v4  ;;  %v14454_v4 = vpop.permute.xlu1 %1861 }
 0x2d6   : > { %2980 = vmatpush1.bf16.msra.mxu0 %v12555_v42  ;;  %3230 = vmatprep.subr.bf16.mxu1 %v18421_v8 }
 0x2d7   : > { %2981 = vmatprep.subr.bf16.mxu0 %v12561_v22  ;;  %v14456_v22 = vpop.permute.xlu0 %1866 }
 0x2d9   : > { %3231 = vmatpush1.bf16.msra.mxu1 %v12562_v29 }
 0x2da   : > { %2982 = vmatpush1.bf16.msra.mxu0 %v12559_v0  ;;  %3232 = vmatprep.subr.bf16.mxu1 %v18421_v8 }
 0x2db   : > { %2983 = vmatprep.subr.bf16.mxu0 %v12565_v63 }
 0x2dd   : > { %3233 = vmatpush1.bf16.msra.mxu1 %v12566_v24 }
 0x2de   : > { %2984 = vmatpush1.bf16.msra.mxu0 %v12563_v56  ;;  %3234 = vmatprep.subr.bf16.mxu1 %v18421_v8 }
 0x2df   : > { %2985 = vmatprep.subr.bf16.mxu0 %v12569_v23 }
 0x2e1   : > { %3235 = vmatpush1.bf16.msra.mxu1 %v12570_v13 }
 0x2e2   : > { %2986 = vmatpush1.bf16.msra.mxu0 %v12567_v15 }
 0x2e3   : > { %2987 = vmatprep.subr.bf16.mxu0 %v12573_v18 }
 0x2e4   : > { %3243 = vmatmul.mubr.bf16.vlgmr.msra.gmra.mrb[32].mxu1 %v14201_v44 }
 0x2e5   : > { %10740 = vmatprep.mubr.msk.bf16.mxu1 %vm1020_vm15, %v14225_v43 }
 0x2e6   : > { %2988 = vmatpush1.bf16.msra.mxu0 %v12571_v59 }
 0x2e7   : > { %3010 = vmatprep.subr.bf16.mxu0 %v12576_v39 }
 0x2e9   : > { %2990 = vmatmul.mubr.bf16.vlgmr.msra.gmra.mrb[24].mxu0 %v14100_v53  ;;  %v12585_v53 = vld [vmem:[%s18375_s3 + $0x4cc] ss:$12 sps:$4 sm:$0xff]  }
 0x2ea   : > { %2999 = vmatprep.mubr.bf16.mxu0 %v14177_v48  ;;  %3011 = vmatpush1.bf16.msra.mxu0 %v12574_v5  ;;  %v12583_v48 = vld [vmem:[%s18375_s3 + $0x4c8] ss:$12 sps:$4 sm:$0xff]  }
 0x2eb   : > { %3012 = vmatprep.subr.bf16.mxu0 %v12579_v45 }
 0x2ec   : > { %3251 = vmatmul.mubr.bf16.gmra.mrb[36].mxu1 %v14235_v36 }
 0x2ee   : > { %3013 = vmatpush1.bf16.msra.mxu0 %v12577_v7 }
 0x2ef   : > { %3014 = vmatprep.subr.bf16.mxu0 %v12582_v19 }
 0x2f1   : > { %3000 = vmatmul.mubr.bf16.gmra.mrb[28].mxu0 %v14179_v1  ;;  %v12591_v1 = vld [vmem:[%s18375_s3 + $0x4fc] ss:$12 sps:$4 sm:$0xff]  }
 0x2f2   : > { %3015 = vmatpush1.bf16.msra.mxu0 %v12580_v46  ;;  %10737 = vmatprep.mubr.msk.bf16.mxu0 %vm1020_vm15, %v14206_v26  ;;  %v12594_v26 = vld [vmem:[%s18375_s3 + $0x514] ss:$12 sps:$4 sm:$0xff]   ;;  %s18437_s3 = smov 123  }
 0x2f3   : > { %3016 = vmatprep.subr.bf16.mxu0 %v12585_v53 }
 0x2f6   : > { %3017 = vmatpush1.bf16.msra.mxu0 %v12583_v48 }
 0x2f7   : > { %3018 = vmatprep.subr.bf16.mxu0 %v12588_v31 }
 0x2fa   : > { %3019 = vmatpush1.bf16.msra.mxu0 %v12586_v28 }
 0x2fb   : > { %3020 = vmatprep.subr.bf16.mxu0 %v12591_v1 }
 0x2fe   : > { %3021 = vmatpush1.bf16.msra.mxu0 %v12589_v11 }
 0x2ff   : > { %3022 = vmatprep.subr.bf16.mxu0 %v12594_v26 }
 0x302   : > { %3023 = vmatpush1.bf16.msra.mxu0 %v12592_v21 }
 0x303   : > { %3024 = vmatprep.subr.bf16.mxu0 %v12597_v35 }
 0x306   : > { %3025 = vmatpush1.bf16.msra.mxu0 %v12595_v16 }
 0x307   : > { %3026 = vmatprep.subr.bf16.mxu0 %v12600_v40 }
 0x30a   : > { %3027 = vmatpush1.bf16.msra.mxu0 %v12598_v2 }
 0x30b   : > { %3028 = vmatprep.subr.bf16.mxu0 %v12603_v33 }
 0x30e   : > { %3029 = vmatpush1.bf16.msra.mxu0 %v12601_v6 }
 0x30f   : > { %3030 = vmatprep.subr.bf16.mxu0 %v12606_v9 }
 0x312   : > { %3031 = vmatpush1.bf16.msra.mxu0 %v12604_v52 }
 0x313   : > { %3032 = vmatprep.subr.bf16.mxu0 %v12609_v27 }
 0x316   : > { %3033 = vmatpush1.bf16.msra.mxu0 %v12607_v61 }
 0x317   : > { %3034 = vmatprep.subr.bf16.mxu0 %v12612_v49 }
 0x31a   : > { %3035 = vmatpush1.bf16.msra.mxu0 %v12610_v20 }
 0x31d   : > { %3043 = vmatmul.mubr.bf16.vlgmr.msra.gmra.mrb[24].mxu0 %v14201_v44 }
 0x31e   : > { %10738 = vmatprep.mubr.msk.bf16.mxu0 %vm1020_vm15, %v14225_v43  ;;  %vm3394_vm15 = vcmask 1040384  }
 0x325   : > { %3053 = vmatmul.mubr.bf16.gmra.mrb[28].mxu0 %v14235_v36 }
 0x33b   : > { %v11172_v34 = vpop.f32.mrb[8].mxu1 }
 0x33c   : > { %v11173_v14 = vpop.f32.mrb[9].mxu1 }
 0x33d   : > { %v11174_v60 = vadd.f32 %v11173_v14, %v11172_v34  ;;  %v11175_v17 = vpop.f32.mrb[10].mxu1 }
 0x33e   : > { %v11176_v55 = vpop.f32.mrb[11].mxu1 }
 0x33f   : > { %v11177_v41 = vadd.f32 %v11176_v55, %v11175_v17  ;;  %v3098_v36 = vadd.f32 %v11174_v60, %v14448_v37 }
 0x341   : > { %v3101_v38 = vadd.f32 %v11177_v41, %v14450_v32 }
 0x347   : > { %v11178_v58 = vpop.f32.mrb[12].mxu1 }
 0x348   : > { %v11179_v62 = vpop.f32.mrb[13].mxu1 }
 0x349   : > { %v11180_v47 = vadd.f32 %v11179_v62, %v11178_v58  ;;  %v11181_v50 = vpop.f32.mrb[14].mxu1 }
 0x34a   : > { %v11182_v54 = vpop.f32.mrb[15].mxu1 }
 0x34b   : > { %v11183_v57 = vadd.f32 %v11182_v54, %v11181_v50  ;;  %v3106_v0 = vadd.f32 %v11180_v47, %v14454_v4 }
 0x34d   : > { %v3109_v13 = vadd.f32 %v11183_v57, %v14456_v22 }
 0x363   : > { %v11200_v44 = vpop.f32.mrb[16].mxu1 }
 0x364   : > { %v11201_v43 = vpop.f32.mrb[17].mxu1 }
 0x365   : > { %v11202_v12 = vadd.f32 %v11201_v43, %v11200_v44  ;;  %v11203_v10 = vpop.f32.mrb[18].mxu1 }
 0x366   : > { %v11204_v51 = vpop.f32.mrb[19].mxu1 }
 0x367   : > { %v3147_v3 = vadd.f32 %v11202_v12, %v3098_v36  ;;  %v11205_v30 = vadd.f32 %v11204_v51, %v11203_v10 }
 0x369   : > { %v3150_v25 = vadd.f32 %v11205_v30, %v3101_v38 }
 0x36b   : > { %v11206_v42 = vpop.f32.mrb[20].mxu1 }
 0x36c   : > { %v11207_v29 = vpop.f32.mrb[21].mxu1 }
 0x36d   : > { %v11208_v63 = vadd.f32 %v11207_v29, %v11206_v42  ;;  %v11209_v24 = vpop.f32.mrb[22].mxu1 }
 0x36e   : > { %v11210_v56 = vpop.f32.mrb[23].mxu1 }
 0x36f   : > { %v3155_v23 = vadd.f32 %v11208_v63, %v3106_v0  ;;  %v11211_v15 = vadd.f32 %v11210_v56, %v11209_v24 }
 0x371   : > { %v3158_v18 = vadd.f32 %v11211_v15, %v3109_v13 }
 0x383   : > { %v11228_v59 = vpop.f32.mrb[24].mxu1 }
 0x384   : > { %v11229_v39 = vpop.f32.mrb[25].mxu1 }
 0x385   : > { %v11230_v5 = vadd.f32 %v11229_v39, %v11228_v59  ;;  %v11231_v45 = vpop.f32.mrb[26].mxu1 }
 0x386   : > { %v11232_v7 = vpop.f32.mrb[27].mxu1 }
 0x387   : > { %v11233_v19 = vadd.f32 %v11232_v7, %v11231_v45  ;;  %v3196_v46 = vadd.f32 %v11230_v5, %v3147_v3 }
 0x389   : > { %v3199_v53 = vadd.f32 %v11233_v19, %v3150_v25 }
 0x38b   : > { %v11234_v48 = vpop.f32.mrb[28].mxu1 }
 0x38c   : > { %v11235_v31 = vpop.f32.mrb[29].mxu1 }
 0x38d   : > { %v11236_v28 = vadd.f32 %v11235_v31, %v11234_v48  ;;  %v11237_v1 = vpop.f32.mrb[30].mxu1 }
 0x38e   : > { %v11238_v11 = vpop.f32.mrb[31].mxu1 }
 0x38f   : > { %v11239_v26 = vadd.f32 %v11238_v11, %v11237_v1  ;;  %v3204_v21 = vadd.f32 %v11236_v28, %v3155_v23 }
 0x391   : > { %v3207_v35 = vadd.f32 %v11239_v26, %v3158_v18 }
 0x3b7   : > { %v3244_v16 = vpop.f32.mrb[32].mxu1 }
 0x3b8   : > { %v3245_v40 = vadd.f32 %v3244_v16, %v3196_v46  ;;  %v3246_v2 = vpop.f32.mrb[33].mxu1 }
 0x3b9   : > { %v3247_v33 = vpop.f32.mrb[34].mxu1 }
 0x3ba   : > { %v3273_v6 = vmin.f32 %v3245_v40, 0.0  ;;  %v3248_v9 = vadd.f32 %v3247_v33, %v3199_v53  ;;  %v3249_v52 = vpop.f32.mrb[35].mxu1  ;;  %vm3261_vm11 = vcmp.gt.f32.partialorder %v3245_v40, 0.0 }
 0x3bc   : > { %v3287_v27 = vmul.f32 1.442695, %v3273_v6  ;;  %v3276_v61 = vmin.f32 %v3248_v9, 0.0  ;;  %vm3264_vm4 = vcmp.gt.f32.partialorder %v3248_v9, 0.0 }
 0x3be   : > { %12792 = vpow2.f32 %v3287_v27  ;;  %v3293_v49 = vmul.f32 1.442695, %v3276_v61 }
 0x3bf   : > { %v3252_v20 = vpop.f32.mrb[36].mxu1 }
 0x3c0   : > { %12794 = vpow2.f32 %v3293_v49  ;;  %v3253_v34 = vadd.f32 %v3252_v20, %v3204_v21  ;;  %v3254_v14 = vpop.f32.mrb[37].mxu1 }
 0x3c1   : > { %v3255_v60 = vpop.f32.mrb[38].mxu1 }
 0x3c2   : > { %v3279_v17 = vmin.f32 %v3253_v34, 0.0  ;;  %v3256_v55 = vadd.f32 %v3255_v60, %v3207_v35  ;;  %v3257_v41 = vpop.f32.mrb[39].mxu1 }
 0x3c4   : > { %v3299_v58 = vmul.f32 1.442695, %v3279_v17  ;;  %v3282_v62 = vmin.f32 %v3256_v55, 0.0 }
 0x3c6   : > { %12796 = vpow2.f32 %v3299_v58  ;;  %v3305_v47 = vmul.f32 1.442695, %v3282_v62 }
 0x3c8   : > { %v12793_v50 = vpop.eup %12792  ;;  %12798 = vpow2.f32 %v3305_v47 }
 0x3c9   : > { %v10743_v54 = vadd.f32 -1.0, %v12793_v50 }
 0x3ca   : > { %v12795_v57 = vpop.eup %12794 }
 0x3cb   : > { %v14460_v44 = vsel %vm3261_vm11, %v3245_v40, %v10743_v54  ;;  %v10746_v43 = vadd.f32 -1.0, %v12795_v57  ;;  %vm3270_vm11 = vcmp.gt.f32.partialorder %v3256_v55, 0.0 }
 0x3cc   : > { %3351 = vrot.lane.b32.xlu0 %v14460_v44, %s18323_s25  ;;  %v14465_v36 = vrot.slane %v14460_v44, 7  ;;  %v3548_v12 = vrot.slane %v14460_v44, 6  ;;  %v3650_v10 = vrot.slane %v14460_v44, 5  ;;  %v3752_v3 = vrot.slane %v14460_v44, 4 }
 0x3cd   : > { %v3324_v51 = vsel %vm3264_vm4, %v3248_v9, %v10746_v43  ;;  %v3854_v38 = vrot.slane %v14460_v44, 3  ;;  %v4057_v30 = vrot.slane %v14460_v44, 1  ;;  %v3956_v63 = vrot.slane %v14460_v44, 2 }
 0x3ce   : > { %3456 = vrot.lane.b32.xlu1 %v14465_v36, %s18373_s30  ;;  %v3448_v25 = vrot.slane %v3324_v51, 7  ;;  %v3651_v42 = vrot.slane %v3324_v51, 5  ;;  %v3855_v29 = vrot.slane %v3324_v51, 3  ;;  %v4058_v0 = vrot.slane %v3324_v51, 1 }
 0x3cf   : > { %v3549_v24 = vrot.slane %v3324_v51, 6  ;;  %v3753_v56 = vrot.slane %v3324_v51, 4  ;;  %v3957_v23 = vrot.slane %v3324_v51, 2  ;;  %vm3267_vm4 = vcmp.gt.f32.partialorder %v3253_v34, 0.0 }
 0x3d0   : > { %v12797_v13 = vpop.eup %12796  ;;  %4142 = vrot.lane.b32.xlu0 %v14460_v44, %s18424_s20  ;;  %v14479_v15 = vsel %vm3394_vm15, %v14465_v36, %v3448_v25  ;;  %v3652_v18 = vsel %vm3596_vm0, %v3650_v10, %v3651_v42  ;;  %v3856_v59 = vsel %vm3800_vm9, %v3854_v38, %v3855_v29  ;;  %v4059_v39 = vsel %vm4004_vm12, %v4057_v30, %v4058_v0 }
 0x3d1   : > { %v10749_v5 = vadd.f32 -1.0, %v12797_v13  ;;  %v3550_v45 = vsel %vm3495_vm14, %v3548_v12, %v3549_v24  ;;  %v3754_v7 = vsel %vm3698_vm7, %v3752_v3, %v3753_v56  ;;  %v14489_v19 = vsel %vm3902_vm5, %v3956_v63, %v3957_v23 }
 0x3d2   : > { %v12799_v46 = vpop.eup %12798  ;;  %3557 = vrot.lane.b32.xlu1 %v3548_v12, %s18425_s29 }
 0x3d3   : > { %v3327_v53 = vsel %vm3267_vm4, %v3253_v34, %v10749_v5  ;;  %v10752_v48 = vadd.f32 -1.0, %v12799_v46 }
 0x3d4   : > { %3355 = vrot.lane.b32.xlu0 %v3324_v51, %s18323_s25  ;;  %v3450_v31 = vrot.slane %v3327_v53, 7  ;;  %v3551_v28 = vrot.slane %v3327_v53, 6  ;;  %v3653_v1 = vrot.slane %v3327_v53, 5  ;;  %v3755_v11 = vrot.slane %v3327_v53, 4 }
 0x3d5   : > { %v14493_v26 = vsel %vm3270_vm11, %v3256_v55, %v10752_v48  ;;  %v3857_v21 = vrot.slane %v3327_v53, 3  ;;  %v4060_v35 = vrot.slane %v3327_v53, 1  ;;  %v3959_v16 = vrot.slane %v3327_v53, 2 }
 0x3d6   : > { %3659 = vrot.lane.b32.xlu1 %v3650_v10, %s18426_s23  ;;  %v14497_v40 = vsel %vm3394_vm15, %v3448_v25, %v3450_v31  ;;  %v14500_v2 = vsel %vm3495_vm14, %v3549_v24, %v3551_v28  ;;  %v3452_v33 = vrot.slane %v14493_v26, 7  ;;  %v14504_v6 = vsel %vm3596_vm0, %v3651_v42, %v3653_v1 }
 0x3d7   : > { %v3655_v9 = vrot.slane %v14493_v26, 5  ;;  %v14508_v52 = vsel %vm3698_vm7, %v3753_v56, %v3755_v11  ;;  %v3859_v27 = vrot.slane %v14493_v26, 3  ;;  %v14512_v61 = vsel %vm3800_vm9, %v3855_v29, %v3857_v21 }
 0x3d8   : > { %4146 = vrot.lane.b32.xlu0 %v3324_v51, %s18424_s20  ;;  %v14516_v49 = vsel %vm3394_vm15, %v3450_v31, %v3452_v33  ;;  %v4062_v20 = vrot.slane %v14493_v26, 1  ;;  %v14520_v34 = vsel %vm3902_vm5, %v3957_v23, %v3959_v16  ;;  %v14523_v14 = vsel %vm4004_vm12, %v4058_v0, %v4060_v35 }
 0x3d9   : > { %v14526_v60 = vsel %vm3596_vm0, %v3653_v1, %v3655_v9  ;;  %v14529_v17 = vsel %vm3800_vm9, %v3857_v21, %v3859_v27  ;;  %v3553_v55 = vrot.slane %v14493_v26, 6  ;;  %v3757_v41 = vrot.slane %v14493_v26, 4 }
 0x3da   : > { %3761 = vrot.lane.b32.xlu1 %v3752_v3, %s18427_s27  ;;  %v14535_v58 = vsel %vm4004_vm12, %v4060_v35, %v4062_v20  ;;  %v3961_v62 = vrot.slane %v14493_v26, 2 }
 0x3db   : > { %v14539_v47 = vsel %vm3495_vm14, %v3551_v28, %v3553_v55  ;;  %v14542_v50 = vsel %vm3698_vm7, %v3755_v11, %v3757_v41 }
 0x3dc   : > { %3460 = vrot.lane.b32.xlu0 %v14479_v15, %s18373_s30  ;;  %v14547_v54 = vsel %vm3902_vm5, %v3959_v16, %v3961_v62 }
 0x3de   : > { %3863 = vrot.lane.b32.xlu1 %v3854_v38, %s18428_s21 }
 0x3e0   : > { %3663 = vrot.lane.b32.xlu0 %v3652_v18, %s18426_s23 }
 0x3e2   : > { %3965 = vrot.lane.b32.xlu1 %v3956_v63, %s18429_s22 }
 0x3e4   : > { %3867 = vrot.lane.b32.xlu0 %v3856_v59, %s18428_s21 }
 0x3e6   : > { %4066 = vrot.lane.b32.xlu1 %v4057_v30, %s18430_s17 }
 0x3e8   : > { %4070 = vrot.lane.b32.xlu0 %v4059_v39, %s18430_s17 }
 0x3ea   : > { %4216 = vrot.lane.b32.xlu1 %v14465_v36, %s18431_s26 }
 0x3ec   : > { %3359 = vrot.lane.b32.xlu0 %v3327_v53, %s18323_s25 }
 0x3ee   : > { %3561 = vrot.lane.b32.xlu1 %v3550_v45, %s18425_s29 }
 0x3f0   : > { %4150 = vrot.lane.b32.xlu0 %v3327_v53, %s18424_s20  ;;  %v3044_v57 = vpop.f32.mrb[24].mxu0 }
 0x3f1   : > { %v11860_v43 = vadd.f32 %v3044_v57, %v14448_v37  ;;  %v3046_v12 = vpop.f32.mrb[25].mxu0 }
 0x3f2   : > { %v11861_v10 = vadd.f32 %v3046_v12, %v14448_v37  ;;  %3765 = vrot.lane.b32.xlu1 %v3754_v7, %s18427_s27  ;;  %v3048_v44 = vpop.f32.mrb[26].mxu0 }
 0x3f3   : > { %v3271_v51 = vmin.f32 %v11860_v43, 0.0  ;;  %v11862_v3 = vadd.f32 %v3048_v44, %v14450_v32  ;;  %v3050_v38 = vpop.f32.mrb[27].mxu0  ;;  %vm3259_vm4 = vcmp.gt.f32.partialorder %v11860_v43, 0.0 }
 0x3f4   : > { %v3272_v36 = vmin.f32 %v11861_v10, 0.0  ;;  %v14567_v30 = vadd.f32 %v3050_v38, %v14450_v32  ;;  %3363 = vrot.lane.b32.xlu0 %v14493_v26, %s18323_s25  ;;  %vm3260_vm11 = vcmp.gt.f32.partialorder %v11861_v10, 0.0 }
 0x3f5   : > { %v3283_v25 = vmul.f32 1.442695, %v3271_v51  ;;  %v3274_v42 = vmin.f32 %v11862_v3, 0.0  ;;  %vm3262_vm1 = vcmp.gt.f32.partialorder %v11862_v3, 0.0 }
 0x3f6   : > { %v3285_v29 = vmul.f32 1.442695, %v3272_v36  ;;  %v3275_v0 = vmin.f32 %v14567_v30, 0.0  ;;  %3969 = vrot.lane.b32.xlu1 %v14489_v19, %s18429_s22  ;;  %vm3263_vm2 = vcmp.gt.f32.partialorder %v14567_v30, 0.0 }
 0x3f7   : > { %12800 = vpow2.f32 %v3283_v25  ;;  %v3289_v37 = vmul.f32 1.442695, %v3274_v42 }
 0x3f8   : > { %12802 = vpow2.f32 %v3285_v29  ;;  %v3291_v63 = vmul.f32 1.442695, %v3275_v0  ;;  %3464 = vrot.lane.b32.xlu0 %v14497_v40, %s18373_s30  ;;  %v3054_v32 = vpop.f32.mrb[28].mxu0 }
 0x3f9   : > { %12804 = vpow2.f32 %v3289_v37  ;;  %v14577_v24 = vadd.f32 %v3054_v32, %v14454_v4  ;;  %v3056_v56 = vpop.f32.mrb[29].mxu0 }
 0x3fa   : > { %12806 = vpow2.f32 %v3291_v63  ;;  %v14580_v23 = vadd.f32 %v3056_v56, %v14454_v4  ;;  %4154 = vrot.lane.b32.xlu1 %v14493_v26, %s18424_s20  ;;  %v3058_v13 = vpop.f32.mrb[30].mxu0 }
 0x3fb   : > { %v3277_v18 = vmin.f32 %v14577_v24, 0.0  ;;  %v14586_v59 = vadd.f32 %v3058_v13, %v14456_v22  ;;  %v3060_v39 = vpop.f32.mrb[31].mxu0  ;;  %vm3265_vm13 = vcmp.gt.f32.partialorder %v14577_v24, 0.0 }
 0x3fc   : > { %v3278_v5 = vmin.f32 %v14580_v23, 0.0  ;;  %v14590_v45 = vadd.f32 %v3060_v39, %v14456_v22  ;;  %3565 = vrot.lane.b32.xlu0 %v14500_v2, %s18425_s29  ;;  %vm3266_vm10 = vcmp.gt.f32.partialorder %v14580_v23, 0.0 }
 0x3fd   : > { %v3295_v4 = vmul.f32 1.442695, %v3277_v18  ;;  %v3280_v7 = vmin.f32 %v14586_v59, 0.0 }
 0x3fe   : > { %v3297_v19 = vmul.f32 1.442695, %v3278_v5  ;;  %v3281_v46 = vmin.f32 %v14590_v45, 0.0  ;;  %3468 = vrot.lane.b32.xlu1 %v14516_v49, %s18373_s30  ;;  %vm3269_vm6 = vcmp.gt.f32.partialorder %v14590_v45, 0.0 }
 0x3ff   : > { %12808 = vpow2.f32 %v3295_v4  ;;  %v3301_v53 = vmul.f32 1.442695, %v3280_v7 }
 0x400   : > { %12810 = vpow2.f32 %v3297_v19  ;;  %v3303_v48 = vmul.f32 1.442695, %v3281_v46  ;;  %3667 = vrot.lane.b32.xlu0 %v14504_v6, %s18426_s23 }
 0x401   : > { %v12801_v22 = vpop.eup %12800  ;;  %12812 = vpow2.f32 %v3301_v53 }
 0x402   : > { %v12803_v31 = vpop.eup %12802  ;;  %v10741_v28 = vadd.f32 -1.0, %v12801_v22  ;;  %12814 = vpow2.f32 %v3303_v48  ;;  %3671 = vrot.lane.b32.xlu1 %v14526_v60, %s18426_s23 }
 0x403   : > { %v12805_v1 = vpop.eup %12804  ;;  %v10742_v11 = vadd.f32 -1.0, %v12803_v31 }
 0x404   : > { %v12807_v26 = vpop.eup %12806  ;;  %v14602_v21 = vsel %vm3259_vm4, %v11860_v43, %v10741_v28  ;;  %v10744_v35 = vadd.f32 -1.0, %v12805_v1  ;;  %3769 = vrot.lane.b32.xlu0 %v14508_v52, %s18427_s27  ;;  %vm3268_vm4 = vcmp.gt.f32.partialorder %v14586_v59, 0.0 }
 0x405   : > { %v14607_v16 = vsel %vm3260_vm11, %v11861_v10, %v10742_v11  ;;  %v10745_v2 = vadd.f32 -1.0, %v12807_v26  ;;  %v3496_v6 = vrot.slane %v14602_v21, 6  ;;  %v3699_v52 = vrot.slane %v14602_v21, 4 }
 0x406   : > { %v14611_v33 = vsel %vm3262_vm1, %v11862_v3, %v10744_v35  ;;  %3875 = vrot.lane.b32.xlu1 %v14529_v17, %s18428_s21  ;;  %3333 = vst.msk [vmem:[#allocation3 + $0x8] sm:$0xff] %vm3332_vm3, %v14607_v16  ;;  %v3903_v27 = vrot.slane %v14602_v21, 2  ;;  %v14626_v20 = vrot.slane %v14607_v16, 7  ;;  %v3597_v60 = vrot.slane %v14602_v21, 5 }
 0x407   : > { %v14621_v9 = vsel %vm3263_vm2, %v14567_v30, %v10745_v2  ;;  %v14632_v17 = vrot.slane %v14607_v16, 5  ;;  %v3801_v55 = vrot.slane %v14602_v21, 3  ;;  %v14636_v41 = vrot.slane %v14607_v16, 3 }
 0x408   : > { %3871 = vrot.lane.b32.xlu0 %v14512_v61, %s18428_s21  ;;  %3335 = vst.msk [vmem:[#allocation3 + $0x20] sm:$0xff] %vm3332_vm3, %v14621_v9  ;;  %v4005_v57 = vrot.slane %v14602_v21, 1  ;;  %v14642_v43 = vrot.slane %v14607_v16, 1  ;;  %v3599_v61 = vrot.slane %v14611_v33, 5  ;;  %v18334_v12 = vrot.slane %v14611_v33, 3 }
 0x409   : > { %v12809_v62 = vpop.eup %12808  ;;  %v14649_v51 = vrot.slane %v14607_v16, 6  ;;  %v18329_v3 = vrot.slane %v14611_v33, 1  ;;  %v3399_v38 = vrot.slane %v14621_v9, 7  ;;  %v14661_v42 = vrot.slane %v14607_v16, 4 }
 0x40a   : > { %v12811_v10 = vpop.eup %12810  ;;  %v10747_v44 = vadd.f32 -1.0, %v12809_v62  ;;  %4078 = vrot.lane.b32.xlu1 %v14535_v58, %s18430_s17  ;;  %v14658_v25 = vsel %vm3596_vm0, %v3597_v60, %v3599_v61  ;;  %v14668_v58 = vsel %vm3800_vm9, %v3801_v55, %v18334_v12  ;;  %v18336_v56 = vrot.slane %v14621_v9, 6 }
 0x40b   : > { %v12813_v36 = vpop.eup %12812  ;;  %v10748_v30 = vadd.f32 -1.0, %v12811_v10  ;;  %v14682_v63 = vsel %vm4004_vm12, %v4005_v57, %v18329_v3  ;;  %v14688_v32 = vsel %vm3394_vm15, %v14626_v20, %v3399_v38  ;;  %v18333_v13 = vrot.slane %v14621_v9, 5 }
 0x40c   : > { %v12815_v29 = vpop.eup %12814  ;;  %v14673_v0 = vsel %vm3265_vm13, %v14577_v24, %v10747_v44  ;;  %v10750_v37 = vadd.f32 -1.0, %v12813_v36  ;;  %3973 = vrot.lane.b32.xlu0 %v14520_v34, %s18429_s22  ;;  %v18330_v39 = vrot.slane %v14621_v9, 4  ;;  %v3498_v5 = vrot.slane %v14611_v33, 6 }
 0x40d   : > { %3336 = vst [vmem:[#allocation3 + $0x30] sm:$0xff] %v14673_v0  ;;  %v14694_v24 = vsel %vm3266_vm10, %v14580_v23, %v10748_v30  ;;  %v10751_v34 = vadd.f32 -1.0, %v12815_v29  ;;  %v18328_v23 = vrot.slane %v14621_v9, 3  ;;  %v14726_v7 = vsel %vm3596_vm0, %v14632_v17, %v18333_v13 }
 0x40e   : > { %v14701_v18 = vsel %vm3268_vm4, %v14586_v59, %v10750_v37  ;;  %3349 = vrot.lane.b32.xlu1 %v14607_v16, %s18323_s25  ;;  %3337 = vst.msk [vmem:[#allocation3 + $0x38] sm:$0xff] %vm3332_vm3, %v14694_v24  ;;  %v14720_v59 = vsel %vm3495_vm14, %v14649_v51, %v18336_v56  ;;  %v18335_v19 = vrot.slane %v14611_v33, 4  ;;  %v14742_v46 = vsel %vm3495_vm14, %v3496_v6, %v3498_v5  ;;  %s18433_s25 = smov 122  }
 0x40f   : > { %3338 = vst [vmem:[#allocation3 + $0x48] sm:$0x1] %v14701_v18  ;;  %v14714_v4 = vsel %vm3269_vm6, %v14590_v45, %v10751_v34  ;;  %v14735_v45 = vsel %vm3698_vm7, %v14661_v42, %v18330_v39  ;;  %v14748_v53 = vsel %vm3800_vm9, %v14636_v41, %v18328_v23  ;;  %v14754_v48 = vrot.slane %v14607_v16, 2 }
 0x410   : > { %4074 = vrot.lane.b32.xlu0 %v14523_v14, %s18430_s17  ;;  %v18331_v14 = vrot.slane %v14611_v33, 2  ;;  %3340 = vst.msk [vmem:[#allocation3 + $0x50] sm:$0x1] %vm18350_vm8, %v14714_v4  ;;  %v14761_v22 = vsel %vm3698_vm7, %v3699_v52, %v18335_v19  ;;  %v18327_v31 = vrot.slane %v14621_v9, 2  ;;  %v18326_v28 = vrot.slane %v14621_v9, 1 }
 0x411   : > { %vm18349_vm1 = vcmask 408576   ;;  %vm3485_vm2 = vcmask 408577   ;;  %vm3586_vm6 = vcmask 408578   ;;  %vm3688_vm10 = vcmask 408579  }
 0x412   : > { %4140 = vrot.lane.b32.xlu1 %v14607_v16, %s18424_s20  ;;  %v14772_v1 = vsel %vm3902_vm5, %v3903_v27, %v18331_v14  ;;  %v14778_v11 = vsel %vm3902_vm5, %v14754_v48, %v18327_v31  ;;  %v14784_v26 = vsel %vm4004_vm12, %v14642_v43, %v18326_v28  ;;  %vm3790_vm13 = vcmask 408580  }
 0x413   : > { %vm3892_vm11 = vcmask 408581   ;;  %vm3994_vm4 = vcmask 408582   ;;  %v18337_v35 = vrot.slane %v14673_v0, 6  ;;  %v18338_v39 = vrot.slane %v14694_v24, 7 }
 0x414   : > { %3569 = vrot.lane.b32.xlu0 %v14539_v47, %s18425_s29  ;;  %v14812_v47 = vrot.slane %v14602_v21, 7  ;;  %v18344_v19 = vrot.slane %v14694_v24, 6  ;;  %vm3584_vm8 = vcmask 1047754  }
 0x415   : > { %v15094_v12 = vsel %vm3394_vm15, %v3399_v38, %v18338_v39  ;;  %v18442_v38 = vrot.slane %v14621_v9, 6 }
 0x416   : > { %3510 = vrot.lane.b32.xlu1 %v3496_v6, %s18377_s16 }
 0x417   : > { %v3505_v39 = vsel %vm3495_vm14, %v18442_v38, %v18344_v19 }
 0x418   : > { %3773 = vrot.lane.b32.xlu0 %v14542_v50, %s18427_s27  ;;  %v3397_v50 = vrot.slane %v14611_v33, 7 }
 0x41a   : > { %3713 = vrot.lane.b32.xlu1 %v3699_v52, %s18432_s28  ;;  %v14856_v2 = vsel %vm3394_vm15, %v14812_v47, %v3397_v50 }
 0x41c   : > { %3977 = vrot.lane.b32.xlu0 %v14547_v54, %s18429_s22 }
 0x41e   : > { %3917 = vrot.lane.b32.xlu1 %v3903_v27, %s18433_s25 }
 0x420   : > { %4103 = vrot.lane.b32.xlu0 %v14602_v21, %s18434_s0 }
 0x422   : > { %4107 = vrot.lane.b32.xlu1 %v14611_v33, %s18434_s0 }
 0x424   : > { %4105 = vrot.lane.b32.xlu0 %v14607_v16, %s18434_s0 }
 0x426   : > { %3353 = vrot.lane.b32.xlu1 %v14621_v9, %s18435_s1 }
 0x428   : > { %3409 = vrot.lane.b32.xlu0 %v14812_v47, %s18376_s24 }
 0x42a   : > { %3411 = vrot.lane.b32.xlu1 %v14626_v20, %s18376_s24 }
 0x42c   : > { %3611 = vrot.lane.b32.xlu0 %v3597_v60, %s18436_s2 }
 0x42e   : > { %3613 = vrot.lane.b32.xlu1 %v14632_v17, %s18436_s2 }
 0x430   : > { %3815 = vrot.lane.b32.xlu0 %v3801_v55, %s18437_s3 }
 0x432   : > { %3817 = vrot.lane.b32.xlu1 %v14636_v41, %s18437_s3 }
 0x434   : > { %4019 = vrot.lane.b32.xlu0 %v4005_v57, %s18438_s18 }
 0x436   : > { %4021 = vrot.lane.b32.xlu1 %v14642_v43, %s18438_s18 }
 0x438   : > { %3454 = vrot.lane.b32.xlu0 %v14626_v20, %s18373_s30 }
 0x43a   : > { %4109 = vrot.lane.b32.xlu1 %v14621_v9, %s18434_s0 }
 0x43c   : > { %3512 = vrot.lane.b32.xlu0 %v14649_v51, %s18377_s16 }
 0x43e   : > { %v14840_v54 = vpop.permute.xlu0 %3351  ;;  %4144 = vrot.lane.b32.xlu1 %v14621_v9, %s18424_s20 }
 0x43f   : > { %3381 = vst.msk [vmem:[#allocation3 + $0x10] sm:$0xff] %vm18349_vm1, %v14840_v54 }
 0x440   : > { %v14846_v16 = vpop.permute.xlu1 %3456  ;;  %3555 = vrot.lane.b32.xlu0 %v14649_v51, %s18425_s29 }
 0x441   : > { %3486 = vst.msk [vmem:[#allocation3 + $0x58] sm:$0xfe] %vm3485_vm2, %v14846_v16 }
 0x442   : > { %v14858_v6 = vpop.permute.xlu0 %4142  ;;  %3413 = vrot.lane.b32.xlu1 %v14856_v2, %s18376_s24 }
 0x443   : > { %4170 = vst.msk [vmem:[#allocation3 + $0x268] sm:$0xff] %vm18349_vm1, %v14858_v6 }
 0x444   : > { %v14864_v52 = vpop.permute.xlu1 %3557  ;;  %3657 = vrot.lane.b32.xlu0 %v14632_v17, %s18426_s23 }
 0x445   : > { %3587 = vst.msk [vmem:[#allocation3 + $0xa0] sm:$0xfc] %vm3586_vm6, %v14864_v52  ;;  %vm4095_vm6 = vcmask 408583  }
 0x446   : > { %v14869_v27 = vpop.permute.xlu0 %3355  ;;  %3615 = vrot.lane.b32.xlu1 %v14658_v25, %s18436_s2 }
 0x447   : > { %3383 = vst.msk [vmem:[#allocation3 + $0x28] sm:$0xff] %vm18349_vm1, %v14869_v27 }
 0x448   : > { %v14875_v60 = vpop.permute.xlu1 %3659  ;;  %3715 = vrot.lane.b32.xlu0 %v14661_v42, %s18432_s28 }
 0x449   : > { %3689 = vst.msk [vmem:[#allocation3 + $0xe8] sm:$0xf8] %vm3688_vm10, %v14875_v60  ;;  %vm18347_vm10 = vcmask 402432  }
 0x44a   : > { %v14880_v55 = vpop.permute.xlu0 %4146  ;;  %3819 = vrot.lane.b32.xlu1 %v14668_v58, %s18437_s3 }
 0x44b   : > { %4172 = vst.msk [vmem:[#allocation3 + $0x280] sm:$0xff] %vm18349_vm1, %v14880_v55 }
 0x44c   : > { %v14886_v17 = vpop.permute.xlu1 %3761  ;;  %3759 = vrot.lane.b32.xlu0 %v14661_v42, %s18427_s27 }
 0x44d   : > { %3791 = vst.msk [vmem:[#allocation3 + $0x130] sm:$0xf0] %vm3790_vm13, %v14886_v17  ;;  %vm3696_vm13 = vcmask 404480  }
 0x44e   : > { %v14891_v62 = vpop.permute.xlu0 %3460  ;;  %4023 = vrot.lane.b32.xlu1 %v14682_v63, %s18438_s18 }
 0x44f   : > { %3488 = vst.msk [vmem:[#allocation3 + $0x70] sm:$0xff] %vm18349_vm1, %v14891_v62 }
 0x450   : > { %v14897_v57 = vpop.permute.xlu1 %3863  ;;  %3861 = vrot.lane.b32.xlu0 %v14636_v41, %s18428_s21 }
 0x451   : > { %3893 = vst.msk [vmem:[#allocation3 + $0x178] sm:$0xe0] %vm3892_vm11, %v14897_v57  ;;  %vm3900_vm11 = vcmask 406528  }
 0x452   : > { %v14902_v10 = vpop.permute.xlu0 %3663  ;;  %3415 = vrot.lane.b32.xlu1 %v14688_v32, %s18376_s24 }
 0x453   : > { %3691 = vst.msk [vmem:[#allocation3 + $0x100] sm:$0xff] %vm18349_vm1, %v14902_v10 }
 0x454   : > { %v14908_v44 = vpop.permute.xlu1 %3965  ;;  %3919 = vrot.lane.b32.xlu0 %v14754_v48, %s18433_s25 }
 0x455   : > { %3995 = vst.msk [vmem:[#allocation3 + $0x1c0] sm:$0xc0] %vm3994_vm4, %v14908_v44  ;;  %vm18351_vm4 = vcmask 965632  }
 0x456   : > { %v14913_v51 = vpop.permute.xlu0 %3867  ;;  %3458 = vrot.lane.b32.xlu1 %v14688_v32, %s18373_s30 }
 0x457   : > { %3895 = vst.msk [vmem:[#allocation3 + $0x190] sm:$0xff] %vm18349_vm1, %v14913_v51 }
 0x458   : > { %v14919_v41 = vpop.permute.xlu1 %4066  ;;  %3963 = vrot.lane.b32.xlu0 %v14754_v48, %s18429_s22 }
 0x459   : > { %4096 = vst.msk [vmem:[#allocation3 + $0x208] sm:$0x80] %vm4095_vm6, %v14919_v41  ;;  %vm3378_vm6 = vcmask 1047752  }
 0x45a   : > { %v14924_v36 = vpop.permute.xlu0 %4070  ;;  %3516 = vrot.lane.b32.xlu1 %v14720_v59, %s18377_s16 }
 0x45b   : > { %4098 = vst.msk [vmem:[#allocation3 + $0x220] sm:$0xff] %vm18349_vm1, %v14924_v36 }
 0x45c   : > { %v14930_v30 = vpop.permute.xlu1 %4216  ;;  %4064 = vrot.lane.b32.xlu0 %v14642_v43, %s18430_s17 }
 0x45d   : > { %4244 = vst.msk [vmem:[#allocation3 + $0x2b0] sm:$0xfe] %vm3485_vm2, %v14930_v30  ;;  %vm3388_vm2 = vcmask 401408  }
 0x45e   : > { %v14936_v25 = vpop.permute.xlu0 %3359  ;;  %3617 = vrot.lane.b32.xlu1 %v14726_v7, %s18436_s2 }
 0x45f   : > { %3385 = vst.msk [vmem:[#allocation3 + $0x40] sm:$0xff] %vm18349_vm1, %v14936_v25 }
 0x460   : > { %v14942_v42 = vpop.permute.xlu1 %3561  ;;  %4179 = vrot.lane.b32.xlu0 %v14626_v20, %s18439_s15 }
 0x461   : > { %3589 = vst.msk [vmem:[#allocation3 + $0xb8] sm:$0xff] %vm18349_vm1, %v14942_v42 }
 0x462   : > { %v14948_v43 = vpop.permute.xlu0 %4150  ;;  %3661 = vrot.lane.b32.xlu1 %v14726_v7, %s18426_s23 }
 0x463   : > { %4174 = vst.msk [vmem:[#allocation3 + $0x298] sm:$0xff] %vm18349_vm1, %v14948_v43 }
 0x464   : > { %v14954_v58 = vpop.permute.xlu1 %3765  ;;  %4214 = vrot.lane.b32.xlu0 %v14626_v20, %s18431_s26 }
 0x465   : > { %3793 = vst.msk [vmem:[#allocation3 + $0x148] sm:$0xff] %vm18349_vm1, %v14954_v58 }
 0x466   : > { %v14960_v29 = vpop.permute.xlu0 %3363  ;;  %3719 = vrot.lane.b32.xlu1 %v14735_v45, %s18432_s28 }
 0x467   : > { %3389 = vst.msk [vmem:[#allocation3 + $0x58] sm:$0x1] %vm3388_vm2, %v14960_v29 }
 0x468   : > { %v14965_v37 = vpop.permute.xlu1 %3969  ;;  %3514 = vrot.lane.b32.xlu0 %v14742_v46, %s18377_s16 }
 0x469   : > { %3997 = vst.msk [vmem:[#allocation3 + $0x1d8] sm:$0xff] %vm18349_vm1, %v14965_v37 }
 0x46a   : > { %v14971_v20 = vpop.permute.xlu0 %3464  ;;  %3821 = vrot.lane.b32.xlu1 %v14748_v53, %s18437_s3 }
 0x46b   : > { %3490 = vst.msk [vmem:[#allocation3 + $0x88] sm:$0xff] %vm18349_vm1, %v14971_v20 }
 0x46c   : > { %v14977_v63 = vpop.permute.xlu1 %4154  ;;  %3717 = vrot.lane.b32.xlu0 %v14761_v22, %s18432_s28 }
 0x46d   : > { %4176 = vst.msk [vmem:[#allocation3 + $0x2b0] sm:$0x1] %vm3388_vm2, %v14977_v63  ;;  %vm3594_vm2 = vcmask 403456  }
 0x46e   : > { %v14982_v34 = vpop.permute.xlu0 %3565  ;;  %3865 = vrot.lane.b32.xlu1 %v14748_v53, %s18428_s21 }
 0x46f   : > { %3591 = vst.msk [vmem:[#allocation3 + $0xd0] sm:$0xff] %vm18349_vm1, %v14982_v34 }
 0x470   : > { %v14988_v7 = vpop.permute.xlu1 %3468  ;;  %3921 = vrot.lane.b32.xlu0 %v14772_v1, %s18433_s25 }
 0x471   : > { %3494 = vst.msk [vmem:[#allocation3 + $0xa0] sm:$0x3] %vm18347_vm10, %v14988_v7  ;;  %vm3845_vm10 = vcmask 203781  }
 0x472   : > { %v14994_v46 = vpop.permute.xlu0 %3667  ;;  %3923 = vrot.lane.b32.xlu1 %v14778_v11, %s18433_s25 }
 0x473   : > { %3693 = vst.msk [vmem:[#allocation3 + $0x118] sm:$0xff] %vm18349_vm1, %v14994_v46 }
 0x474   : > { %v15000_v53 = vpop.permute.xlu1 %3671  ;;  %3559 = vrot.lane.b32.xlu0 %v14720_v59, %s18425_s29 }
 0x475   : > { %3697 = vst.msk [vmem:[#allocation3 + $0x130] sm:$0xf] %vm3696_vm13, %v15000_v53  ;;  %vm3798_vm13 = vcmask 405504  }
 0x476   : > { %v15005_v48 = vpop.permute.xlu0 %3769  ;;  %4025 = vrot.lane.b32.xlu1 %v14784_v26, %s18438_s18 }
 0x477   : > { %3795 = vst.msk [vmem:[#allocation3 + $0x160] sm:$0xff] %vm18349_vm1, %v15005_v48 }
 0x478   : > { %v15011_v22 = vpop.permute.xlu1 %3875  ;;  %3763 = vrot.lane.b32.xlu0 %v14735_v45, %s18427_s27 }
 0x479   : > { %3901 = vst.msk [vmem:[#allocation3 + $0x1c0] sm:$0x3f] %vm3900_vm11, %v15011_v22  ;;  %vm4002_vm11 = vcmask 407552  }
 0x47a   : > { %v15016_v1 = vpop.permute.xlu0 %3871  ;;  %4068 = vrot.lane.b32.xlu1 %v14784_v26, %s18430_s17 }
 0x47b   : > { %3897 = vst.msk [vmem:[#allocation3 + $0x1a8] sm:$0xff] %vm18349_vm1, %v15016_v1 }
 0x47c   : > { %v15022_v59 = vpop.permute.xlu1 %4078  ;;  %3967 = vrot.lane.b32.xlu0 %v14778_v11, %s18429_s22 }
 0x47d   : > { %18440 = vst [vmem:[#allocation8_spill] sm:$0xff] %v15022_v59  ;;  %4102 = vst.msk [vmem:[#allocation3 + $0x250] sm:$0xff] %vm18349_vm1, %v15022_v59 }
 0x47e   : > { %v15028_v28 = vpop.permute.xlu0 %3973  ;;  %4183 = vrot.lane.b32.xlu1 %v14688_v32, %s18439_s15 }
 0x47f   : > { %3999 = vst.msk [vmem:[#allocation3 + $0x1f0] sm:$0xff] %vm18349_vm1, %v15028_v28 }
 0x480   : > { %v3350_v45 = vpop.permute.xlu1 %3349  ;;  %4218 = vrot.lane.b32.xlu0 %v14688_v32, %s18431_s26  ;;  %v18332_v32 = vrot.slane %v14673_v0, 7 }
 0x481   : > { %v3366_v11 = vsel %vm18351_vm4, %v3350_v45, %v14840_v54 }
 0x482   : > { %3379 = vst.msk [vmem:[#allocation3 + $0x8] sm:$0xff] %vm3378_vm6, %v3366_v11  ;;  %v15039_v26 = vpop.permute.xlu0 %4074  ;;  %3357 = vrot.lane.b32.xlu1 %v14694_v24, %s18435_s1  ;;  %v15067_v11 = vsel %vm3394_vm15, %v3397_v50, %v18332_v32  ;;  %v3503_v50 = vsel %vm3495_vm14, %v3498_v5, %v18337_v35  ;;  %v18341_v32 = vrot.slane %v14673_v0, 5 }
 0x483   : > { %4100 = vst.msk [vmem:[#allocation3 + $0x238] sm:$0xff] %vm18349_vm1, %v15039_v26  ;;  %vm18455_vm1 = vcmask 990208  }
 0x484   : > { %v4141_v31 = vpop.permute.xlu1 %4140  ;;  %4111 = vrot.lane.b32.xlu0 %v14673_v0, %s18434_s0  ;;  %v3604_v5 = vsel %vm3596_vm0, %v3599_v61, %v18341_v32 }
 0x486   : > { %v15047_v23 = vpop.permute.xlu0 %3569  ;;  %4148 = vrot.lane.b32.xlu1 %v14694_v24, %s18424_s20 }
 0x487   : > { %3595 = vst.msk [vmem:[#allocation3 + $0xe8] sm:$0x7] %vm3594_vm2, %v15047_v23  ;;  %vm18443_vm2 = vcmask 900096  }
 0x488   : > { %v15053_v54 = vpop.permute.xlu1 %3510  ;;  %4113 = vrot.lane.b32.xlu0 %v14694_v24, %s18434_s0  ;;  %v4157_v59 = vsel %vm18443_vm2, %v4141_v31, %v14858_v6  ;;  %v18446_v6 = vrot.slane %v14611_v33, 3  ;;  %vm18447_vm2 = vcmask 1039360  }
 0x489   : > { %v4252_v19 = vld [vmem:[#allocation3 + $0x8] sm:$0xff] }
 0x48a   : > { %v15057_v45 = vpop.permute.xlu0 %3773  ;;  %3361 = vrot.lane.b32.xlu1 %v14714_v4, %s18435_s1 }
 0x48b   : > { %3799 = vst.msk [vmem:[#allocation3 + $0x178] sm:$0x1f] %vm3798_vm13, %v15057_v45  ;;  %vm18444_vm13 = vcmask 982016  }
 0x48c   : > { %v15070_v3 = vpop.permute.xlu1 %3713  ;;  %3417 = vrot.lane.b32.xlu0 %v15067_v11, %s18376_s24 }
 0x48e   : > { %v15075_v14 = vpop.permute.xlu0 %3977  ;;  %4117 = vrot.lane.b32.xlu1 %v14714_v4, %s18434_s0 }
 0x48f   : > { %18441 = vst [vmem:[#allocation9_spill] sm:$0xff] %v15075_v14  ;;  %4003 = vst.msk [vmem:[#allocation3 + $0x208] sm:$0x7f] %vm4002_vm11, %v15075_v14  ;;  %v18345_v14 = vrot.slane %v14673_v0, 3  ;;  %vm3438_vm11 = vcmask 203777  }
 0x490   : > { %v15086_v13 = vpop.permute.xlu1 %3917  ;;  %3518 = vrot.lane.b32.xlu0 %v3503_v50, %s18377_s16  ;;  %v18346_v50 = vrot.slane %v14673_v0, 4 }
 0x492   : > { %v4104_v56 = vpop.permute.xlu0 %4103  ;;  %3462 = vrot.lane.b32.xlu1 %v15094_v12, %s18373_s30 }
 0x494   : > { %v15105_v35 = vpop.permute.xlu1 %4107  ;;  %3619 = vrot.lane.b32.xlu0 %v3604_v5, %s18436_s2  ;;  %v18445_v5 = vrot.slane %v14611_v33, 4 }
 0x496   : > { %v4106_v8 = vpop.permute.xlu0 %4105  ;;  %3520 = vrot.lane.b32.xlu1 %v3505_v39, %s18377_s16  ;;  %v3706_v32 = vsel %vm3698_vm7, %v18445_v5, %v18346_v50 }
 0x497   : > { %v4120_v61 = vsel %vm18444_vm13, %v4104_v56, %v4106_v8  ;;  %4133 = vst.msk [vmem:[#allocation3 + $0x260] sm:$0xff] %vm3332_vm3, %v4106_v8  ;;  %v18343_v56 = vrot.slane %v14694_v24, 5  ;;  %vm3641_vm13 = vcmask 203779  }
 0x498   : > { %4132 = vst [vmem:[#allocation3 + $0x258] sm:$0xff] %v4120_v61  ;;  %4169 = vst.msk [vmem:[#allocation3 + $0x260] sm:$0xff] %vm3378_vm6, %v4157_v59  ;;  %v3354_v38 = vpop.permute.xlu1 %3353  ;;  %3721 = vrot.lane.b32.xlu0 %v3706_v32, %s18432_s28  ;;  %v3808_v59 = vsel %vm3800_vm9, %v18446_v6, %v18345_v14  ;;  %v3909_v61 = vrot.slane %v14673_v0, 2  ;;  %v18449_v6 = vrot.slane %v14611_v33, 2 }
 0x499   : > { %v3367_v31 = vsel %vm18351_vm4, %v3354_v38, %v14869_v27  ;;  %v18348_v38 = vrot.slane %v14694_v24, 4  ;;  %vm18462_vm4 = vcmask 949248  }
 0x49a   : > { %3382 = vst.msk [vmem:[#allocation3 + $0x20] sm:$0xff] %vm3378_vm6, %v3367_v31  ;;  %v3410_v8 = vpop.permute.xlu0 %3409  ;;  %3563 = vrot.lane.b32.xlu1 %v3505_v39, %s18425_s29  ;;  %v18448_v39 = vrot.slane %v14621_v9, 5 }
 0x49c   : > { %v3412_v32 = vpop.permute.xlu1 %3411  ;;  %3823 = vrot.lane.b32.xlu0 %v3808_v59, %s18437_s3  ;;  %v3606_v5 = vsel %vm3596_vm0, %v18448_v39, %v18343_v56  ;;  %v4011_v59 = vrot.slane %v14673_v0, 1 }
 0x49d   : > { %v3425_v27 = vsel %vm18447_vm2, %v3410_v8, %v3412_v32  ;;  %3439 = vst.msk [vmem:[#allocation3 + $0x50] sm:$0xfe] %vm3438_vm11, %v3412_v32  ;;  %v3910_v8 = vsel %vm3902_vm5, %v18449_v6, %v3909_v61  ;;  %vm18450_vm2 = vcmask 1022976  }
 0x49e   : > { %3437 = vst [vmem:[#allocation3 + $0x48] sm:$0xfe] %v3425_v27  ;;  %v3612_v31 = vpop.permute.xlu0 %3611  ;;  %3665 = vrot.lane.b32.xlu1 %v3606_v5, %s18426_s23  ;;  %v18451_v27 = vrot.slane %v14621_v9, 4 }
 0x4a0   : > { %v3614_v32 = vpop.permute.xlu1 %3613  ;;  %3925 = vrot.lane.b32.xlu0 %v3910_v8, %s18433_s25  ;;  %v3708_v56 = vsel %vm3698_vm7, %v18451_v27, %v18348_v38  ;;  %v18452_v8 = vrot.slane %v14611_v33, 1 }
 0x4a1   : > { %v3628_v39 = vsel %vm18450_vm2, %v3612_v31, %v3614_v32  ;;  %3642 = vst.msk [vmem:[#allocation3 + $0xe0] sm:$0xf8] %vm3641_vm13, %v3614_v32  ;;  %v4255_v14 = vld [vmem:[#allocation3 + $0x20] sm:$0xff]  ;;  %vm18453_vm13 = vcmask 1006592   ;;  %vm4049_vm2 = vcmask 203783  }
 0x4a2   : > { %3640 = vst [vmem:[#allocation3 + $0xd8] sm:$0xf8] %v3628_v39  ;;  %v3816_v50 = vpop.permute.xlu0 %3815  ;;  %3723 = vrot.lane.b32.xlu1 %v3708_v56, %s18432_s28  ;;  %v4348_v6 = vpack.c.bf16 %v4255_v14, %v4252_v19  ;;  %v4012_v31 = vsel %vm4004_vm12, %v18452_v8, %v4011_v59  ;;  %v18454_v39 = vpack.c.bf16 %v14611_v33, %v14602_v21  ;;  %v3809_v19 = vrot.slane %v14694_v24, 3 }
 0x4a3   : > { %v18456_v21 = vrot.slane %v14621_v9, 3 }
 0x4a4   : > { %4456 = vmatprep.subr.bf16.mxu1 %v4348_v6  ;;  %v3818_v32 = vpop.permute.xlu1 %3817  ;;  %4027 = vrot.lane.b32.xlu0 %v4012_v31, %s18438_s18 }
 0x4a5   : > { %v3832_v27 = vsel %vm18453_vm13, %v3816_v50, %v3818_v32  ;;  %3846 = vst.msk [vmem:[#allocation3 + $0x170] sm:$0xe0] %vm3845_vm10, %v3818_v32  ;;  %4457 = vmatpush1.bf16.msra.mxu1 %v18454_v39  ;;  %vm3483_vm13 = vcmask 1047753   ;;  %v3810_v33 = vsel %vm3800_vm9, %v18456_v21, %v3809_v19  ;;  %v3911_v50 = vrot.slane %v14694_v24, 2 }
 0x4a6   : > { %3844 = vst [vmem:[#allocation3 + $0x168] sm:$0xe0] %v3832_v27  ;;  %v4020_v14 = vpop.permute.xlu0 %4019  ;;  %3767 = vrot.lane.b32.xlu1 %v3708_v56, %s18427_s27  ;;  %vm18457_vm10 = vcmask 957440   ;;  %v18459_v32 = vrot.slane %v14621_v9, 2 }
 0x4a8   : > { %v4022_v38 = vpop.permute.xlu1 %4021  ;;  %4152 = vrot.lane.b32.xlu0 %v14714_v4, %s18424_s20  ;;  %v3912_v27 = vsel %vm3902_vm5, %v18459_v32, %v3911_v50 }
 0x4a9   : > { %v4036_v6 = vsel %vm18455_vm1, %v4020_v14, %v4022_v38  ;;  %4050 = vst.msk [vmem:[#allocation3 + $0x200] sm:$0x80] %vm4049_vm2, %v4022_v38  ;;  %vm3539_vm1 = vcmask 203778   ;;  %vm18458_vm2 = vcmask 982016  }
 0x4aa   : > { %4048 = vst [vmem:[#allocation3 + $0x1f8] sm:$0x80] %v4036_v6  ;;  %v3455_v8 = vpop.permute.xlu0 %3454  ;;  %3869 = vrot.lane.b32.xlu1 %v3810_v33, %s18428_s21  ;;  %v4013_v6 = vrot.slane %v14694_v24, 1 }
 0x4ab   : > { %v3471_v56 = vsel %vm18457_vm10, %v3455_v8, %v14846_v16  ;;  %vm18460_vm10 = vcmask 1031168  }
 0x4ac   : > { %3484 = vst.msk [vmem:[#allocation3 + $0x50] sm:$0xfe] %vm3483_vm13, %v3471_v56  ;;  %v4110_v31 = vpop.permute.xlu1 %4109  ;;  %3419 = vrot.lane.b32.xlu0 %v15094_v12, %s18376_s24  ;;  %v3506_v56 = vrot.slane %v14701_v18, 6 }
 0x4ad   : > { %v15190_v38 = vsel %vm18458_vm2, %v15105_v35, %v4110_v31  ;;  %4135 = vst.msk [vmem:[#allocation3 + $0x278] sm:$0xff] %vm3332_vm3, %v4110_v31  ;;  %vm18461_vm2 = vcmask 900096  }
 0x4ae   : > { %v3513_v16 = vpop.permute.xlu0 %3512  ;;  %3927 = vrot.lane.b32.xlu1 %v3912_v27, %s18433_s25 }
 0x4af   : > { %v3526_v39 = vsel %vm18460_vm10, %v15053_v54, %v3513_v16  ;;  %3540 = vst.msk [vmem:[#allocation3 + $0x98] sm:$0xfc] %vm3539_vm1, %v3513_v16  ;;  %vm3686_vm1 = vcmask 1047755   ;;  %vm18464_vm10 = vcmask 941056   ;;  %v3709_v16 = vrot.slane %v14701_v18, 4 }
 0x4b0   : > { %3538 = vst [vmem:[#allocation3 + $0x90] sm:$0xfc] %v3526_v39  ;;  %v4145_v14 = vpop.permute.xlu1 %4144  ;;  %3621 = vrot.lane.b32.xlu0 %v3606_v5, %s18436_s2 }
 0x4b1   : > { %v4158_v35 = vsel %vm18461_vm2, %v4145_v14, %v14880_v55  ;;  %v18463_v55 = vrot.slane %v14621_v9, 1  ;;  %v18465_v9 = vrot.slane %v14673_v0, 6  ;;  %v18467_v14 = vrot.slane %v14673_v0, 7 }
 0x4b2   : > { %4171 = vst.msk [vmem:[#allocation3 + $0x278] sm:$0xff] %vm3378_vm6, %v4158_v35  ;;  %v3556_v21 = vpop.permute.xlu0 %3555  ;;  %3971 = vrot.lane.b32.xlu1 %v3912_v27, %s18429_s22  ;;  %vm3788_vm2 = vcmask 1047756  }
 0x4b3   : > { %v3572_v8 = vsel %vm18462_vm4, %v3556_v21, %v14864_v52  ;;  %v4014_v5 = vsel %vm4004_vm12, %v18463_v55, %v4013_v6  ;;  %v3405_v52 = vrot.slane %v14701_v18, 7  ;;  %v3507_v27 = vsel %vm3495_vm14, %v18465_v9, %v3506_v56 }
 0x4b4   : > { %3585 = vst.msk [vmem:[#allocation3 + $0x98] sm:$0xfc] %vm3584_vm8, %v3572_v8  ;;  %3825 = vrot.lane.b32.xlu0 %v3810_v33, %s18437_s3  ;;  %v3414_v54 = vpop.permute.xlu1 %3413  ;;  %vm3743_vm8 = vcmask 203780   ;;  %vm18466_vm4 = vcmask 1014784   ;;  %v3607_v21 = vrot.slane %v14701_v18, 5  ;;  %v18468_v55 = vrot.slane %v14673_v0, 4 }
 0x4b5   : > { %v15233_v35 = vsel %vm3394_vm15, %v18467_v14, %v3405_v52  ;;  %v3811_v9 = vrot.slane %v14701_v18, 3  ;;  %v18472_v14 = vrot.slane %v14673_v0, 3 }
 0x4b6   : > { %v3658_v31 = vpop.permute.xlu0 %3657  ;;  %4072 = vrot.lane.b32.xlu1 %v4014_v5, %s18430_s17 }
 0x4b7   : > { %v3674_v32 = vsel %vm18464_vm10, %v3658_v31, %v14875_v60  ;;  %vm3890_vm10 = vcmask 1047757  }
 0x4b8   : > { %3687 = vst.msk [vmem:[#allocation3 + $0xe0] sm:$0xf8] %vm3686_vm1, %v3674_v32  ;;  %4029 = vrot.lane.b32.xlu0 %v4014_v5, %s18438_s18  ;;  %v15221_v33 = vpop.permute.xlu1 %3615  ;;  %v3710_v5 = vsel %vm3698_vm7, %v18468_v55, %v3709_v16  ;;  %vm18469_vm1 = vcmask 932864   ;;  %v18470_v32 = vrot.slane %v14673_v0, 5  ;;  %v3407_v55 = vrot.slane %v14714_v4, 7 }
 0x4ba   : > { %v3716_v39 = vpop.permute.xlu0 %3715  ;;  %3522 = vrot.lane.b32.xlu1 %v3507_v27, %s18377_s16  ;;  %v3608_v52 = vsel %vm3596_vm0, %v18470_v32, %v3607_v21  ;;  %v3812_v21 = vsel %vm3800_vm9, %v18472_v14, %v3811_v9  ;;  %v18478_v9 = vrot.slane %v14694_v24, 6 }
 0x4bb   : > { %v3730_v60 = vsel %vm18466_vm4, %v15070_v3, %v3716_v39  ;;  %3744 = vst.msk [vmem:[#allocation3 + $0x128] sm:$0xf0] %vm3743_vm8, %v3716_v39  ;;  %v3913_v3 = vrot.slane %v14701_v18, 2  ;;  %v4015_v39 = vrot.slane %v14701_v18, 1  ;;  %vm18471_vm8 = vcmask 924672  }
 0x4bc   : > { %3742 = vst [vmem:[#allocation3 + $0x120] sm:$0xf0] %v3730_v60  ;;  %3421 = vrot.lane.b32.xlu0 %v15233_v35, %s18376_s24  ;;  %v15238_v8 = vpop.permute.xlu1 %3819  ;;  %vm3947_vm4 = vcmask 203782  }
 0x4bd   : > { %v3914_v16 = vsel %vm3902_vm5, %v3909_v61, %v3913_v3 }
 0x4be   : > { %v3760_v56 = vpop.permute.xlu0 %3759  ;;  %3725 = vrot.lane.b32.xlu1 %v3710_v5, %s18432_s28 }
 0x4bf   : > { %v3776_v31 = vsel %vm18469_vm1, %v3760_v56, %v14886_v17  ;;  %vm18474_vm1 = vcmask 998400  }
 0x4c0   : > { %3789 = vst.msk [vmem:[#allocation3 + $0x128] sm:$0xf0] %vm3788_vm2, %v3776_v31  ;;  %3623 = vrot.lane.b32.xlu0 %v3608_v52, %s18436_s2  ;;  %v15252_v27 = vpop.permute.xlu1 %4023  ;;  %vm18473_vm2 = vcmask 1039360   ;;  %v18475_v31 = vrot.slane %v14694_v24, 7 }
 0x4c2   : > { %v3862_v60 = vpop.permute.xlu0 %3861  ;;  %3929 = vrot.lane.b32.xlu1 %v3914_v16, %s18433_s25  ;;  %v15279_v32 = vsel %vm3394_vm15, %v18475_v31, %v3407_v55 }
 0x4c3   : > { %v3878_v17 = vsel %vm18471_vm8, %v3862_v60, %v14897_v57  ;;  %v4016_v57 = vsel %vm4004_vm12, %v4011_v59, %v4015_v39  ;;  %vm3992_vm8 = vcmask 1047758  }
 0x4c4   : > { %3891 = vst.msk [vmem:[#allocation3 + $0x170] sm:$0xe0] %vm3890_vm10, %v3878_v17  ;;  %3827 = vrot.lane.b32.xlu0 %v3812_v21, %s18437_s3  ;;  %v3416_v5 = vpop.permute.xlu1 %3415  ;;  %vm18476_vm10 = vcmask 957440   ;;  %v3609_v17 = vrot.slane %v14714_v4, 5 }
 0x4c5   : > { %v15267_v61 = vsel %vm18473_vm2, %v3414_v54, %v3416_v5  ;;  %3441 = vst.msk [vmem:[#allocation3 + $0x68] sm:$0xff] %vm3332_vm3, %v3416_v5  ;;  %v3508_v54 = vrot.slane %v14714_v4, 6  ;;  %vm4093_vm2 = vcmask 1047759  }
 0x4c6   : > { %v3920_v3 = vpop.permute.xlu0 %3919  ;;  %4031 = vrot.lane.b32.xlu1 %v4016_v57, %s18438_s18 }
 0x4c7   : > { %v3934_v56 = vsel %vm18474_vm1, %v15086_v13, %v3920_v3  ;;  %3948 = vst.msk [vmem:[#allocation3 + $0x1b8] sm:$0xc0] %vm3947_vm4, %v3920_v3  ;;  %vm18477_vm4 = vcmask 916480   ;;  %v3509_v16 = vsel %vm3495_vm14, %v18478_v9, %v3508_v54  ;;  %vm18479_vm1 = vcmask 908288  }
 0x4c8   : > { %3946 = vst [vmem:[#allocation3 + $0x1b0] sm:$0xc0] %v3934_v56  ;;  %3466 = vrot.lane.b32.xlu0 %v15279_v32, %s18373_s30  ;;  %v3459_v0 = vpop.permute.xlu1 %3458  ;;  %v18484_v3 = vrot.slane %v14694_v24, 4 }
 0x4c9   : > { %v3472_v59 = vsel %vm18476_vm10, %v3459_v0, %v14891_v62  ;;  %vm18480_vm10 = vcmask 1022976   ;;  %v3813_v0 = vrot.slane %v14714_v4, 3 }
 0x4ca   : > { %3487 = vst.msk [vmem:[#allocation3 + $0x68] sm:$0xff] %vm3378_vm6, %v3472_v59  ;;  %v3964_v13 = vpop.permute.xlu0 %3963  ;;  %3423 = vrot.lane.b32.xlu1 %v15279_v32, %s18376_s24 }
 0x4cb   : > { %v3980_v52 = vsel %vm18477_vm4, %v3964_v13, %v14908_v44  ;;  %vm18483_vm4 = vcmask 891904   ;;  %v3814_v9 = vsel %vm3800_vm9, %v3809_v19, %v3813_v0 }
 0x4cc   : > { %3993 = vst.msk [vmem:[#allocation3 + $0x1b8] sm:$0xc0] %vm3992_vm8, %v3980_v52  ;;  %3524 = vrot.lane.b32.xlu0 %v3509_v16, %s18377_s16  ;;  %v3517_v39 = vpop.permute.xlu1 %3516  ;;  %vm18482_vm8 = vcmask 941056  }
 0x4cd   : > { %3542 = vst.msk [vmem:[#allocation3 + $0xb0] sm:$0xff] %vm3332_vm3, %v3517_v39 }
 0x4ce   : > { %v4065_v62 = vpop.permute.xlu0 %4064  ;;  %3567 = vrot.lane.b32.xlu1 %v3509_v16, %s18425_s29 }
 0x4cf   : > { %v4081_v60 = vsel %vm18479_vm1, %v4065_v62, %v14919_v41  ;;  %v18481_v41 = vrot.slane %v14694_v24, 5  ;;  %vm18488_vm1 = vcmask 924672  }
 0x4d0   : > { %4094 = vst.msk [vmem:[#allocation3 + $0x200] sm:$0x80] %vm4093_vm2, %v4081_v60  ;;  %4115 = vrot.lane.b32.xlu0 %v14701_v18, %s18434_s0  ;;  %v3618_v44 = vpop.permute.xlu1 %3617  ;;  %v3711_v18 = vrot.slane %v14714_v4, 4  ;;  %vm18486_vm2 = vcmask 1006592  }
 0x4d1   : > { %v15304_v14 = vsel %vm18480_vm10, %v15221_v33, %v3618_v44  ;;  %3644 = vst.msk [vmem:[#allocation3 + $0xf8] sm:$0xff] %vm3332_vm3, %v3618_v44  ;;  %v3610_v55 = vsel %vm3596_vm0, %v18481_v41, %v3609_v17  ;;  %vm18489_vm10 = vcmask 998400   ;;  %v4017_v17 = vrot.slane %v14714_v4, 1 }
 0x4d2   : > { %v15307_v21 = vpop.permute.xlu0 %4179  ;;  %4220 = vrot.lane.b32.xlu1 %v14479_v15, %s18431_s26  ;;  %v3712_v56 = vsel %vm3698_vm7, %v18484_v3, %v3711_v18  ;;  %v4260_v3 = vld [vmem:[#allocation3 + $0x48] sm:$0xff] }
 0x4d3   : > { %4207 = vst.msk [vmem:[#allocation3 + $0x2a8] sm:$0xfe] %vm3438_vm11, %v15307_v21  ;;  %vm18485_vm11 = vcmask 1031168  }
 0x4d4   : > { %3669 = vrot.lane.b32.xlu0 %v3610_v55, %s18426_s23  ;;  %v3662_v33 = vpop.permute.xlu1 %3661 }
 0x4d5   : > { %v3675_v5 = vsel %vm18482_vm8, %v3662_v33, %v14902_v10  ;;  %vm18490_vm8 = vcmask 949248  }
 0x4d6   : > { %3690 = vst.msk [vmem:[#allocation3 + $0xf8] sm:$0xff] %vm3378_vm6, %v3675_v5  ;;  %v4215_v57 = vpop.permute.xlu0 %4214  ;;  %3625 = vrot.lane.b32.xlu1 %v3610_v55, %s18436_s2 }
 0x4d7   : > { %v4231_v15 = vsel %vm18483_vm4, %v4215_v57, %v14930_v30  ;;  %vm18492_vm4 = vcmask 932864  }
 0x4d8   : > { %4243 = vst.msk [vmem:[#allocation3 + $0x2a8] sm:$0xfe] %vm3483_vm13, %v4231_v15  ;;  %3727 = vrot.lane.b32.xlu0 %v3712_v56, %s18432_s28  ;;  %v3720_v31 = vpop.permute.xlu1 %3719  ;;  %vm18487_vm13 = vcmask 1014784  }
 0x4d9   : > { %3746 = vst.msk [vmem:[#allocation3 + $0x140] sm:$0xff] %vm3332_vm3, %v3720_v31 }
 0x4da   : > { %v3515_v10 = vpop.permute.xlu0 %3514  ;;  %3771 = vrot.lane.b32.xlu1 %v3712_v56, %s18427_s27 }
 0x4db   : > { %v15332_v54 = vsel %vm18485_vm11, %v3515_v10, %v3517_v39  ;;  %vm18493_vm11 = vcmask 908288  }
 0x4dc   : > { %4181 = vrot.lane.b32.xlu0 %v14856_v2, %s18439_s15  ;;  %v3822_v30 = vpop.permute.xlu1 %3821  ;;  %v3915_v2 = vrot.slane %v14714_v4, 2  ;;  %v4018_v4 = vsel %vm4004_vm12, %v4013_v6, %v4017_v17  ;;  %vm18495_vm12 = vcmask 965632  }
 0x4dd   : > { %v15339_v59 = vsel %vm18486_vm2, %v15238_v8, %v3822_v30  ;;  %3848 = vst.msk [vmem:[#allocation3 + $0x188] sm:$0xff] %vm3332_vm3, %v3822_v30  ;;  %vm18494_vm2 = vcmask 916480   ;;  %v4257_v30 = vld [vmem:[#allocation3 + $0x30] sm:$0xff] }
 0x4de   : > { %v3718_v13 = vpop.permute.xlu0 %3717  ;;  %4177 = vrot.lane.b32.xlu1 %v14812_v47, %s18439_s15  ;;  %v3916_v47 = vsel %vm3902_vm5, %v3911_v50, %v3915_v2  ;;  %vm18491_vm5 = vcmask 990208  }
 0x4df   : > { %v15345_v52 = vsel %vm18487_vm13, %v3718_v13, %v3720_v31  ;;  %vm18497_vm13 = vcmask 900096   ;;  %v4350_v13 = vpack.c.bf16 %v4260_v3, %v4257_v30 }
 0x4e0   : > { %3873 = vrot.lane.b32.xlu0 %v3814_v9, %s18428_s21  ;;  %v3866_v16 = vpop.permute.xlu1 %3865 }
 0x4e1   : > { %v3879_v8 = vsel %vm18488_vm1, %v3866_v16, %v14913_v51  ;;  %vm18498_vm1 = vcmask 982016  }
 0x4e2   : > { %3894 = vst.msk [vmem:[#allocation3 + $0x188] sm:$0xff] %vm3378_vm6, %v3879_v8  ;;  %v3922_v39 = vpop.permute.xlu0 %3921  ;;  %3829 = vrot.lane.b32.xlu1 %v3814_v9, %s18437_s3 }
 0x4e4   : > { %3931 = vrot.lane.b32.xlu0 %v3916_v47, %s18433_s25  ;;  %v3924_v19 = vpop.permute.xlu1 %3923 }
 0x4e5   : > { %v15361_v62 = vsel %vm18489_vm10, %v3922_v39, %v3924_v19  ;;  %3950 = vst.msk [vmem:[#allocation3 + $0x1d0] sm:$0xff] %vm3332_vm3, %v3924_v19  ;;  %vm3386_vm10 = vcmask 1040584  }
 0x4e6   : > { %v3560_v60 = vpop.permute.xlu0 %3559  ;;  %3975 = vrot.lane.b32.xlu1 %v3916_v47, %s18429_s22 }
 0x4e7   : > { %v3573_v51 = vsel %vm18490_vm8, %v3560_v60, %v14942_v42  ;;  %vm18499_vm8 = vcmask 998400  }
 0x4e8   : > { %3588 = vst.msk [vmem:[#allocation3 + $0xb0] sm:$0xff] %vm3378_vm6, %v3573_v51  ;;  %4187 = vrot.lane.b32.xlu0 %v15094_v12, %s18439_s15  ;;  %v4026_v50 = vpop.permute.xlu1 %4025 }
 0x4e9   : > { %v15373_v44 = vsel %vm18491_vm5, %v15252_v27, %v4026_v50  ;;  %4052 = vst.msk [vmem:[#allocation3 + $0x218] sm:$0xff] %vm3332_vm3, %v4026_v50  ;;  %vm18500_vm5 = vmmov %vm18495_vm12 }
 0x4ea   : > { %v3764_v41 = vpop.permute.xlu0 %3763  ;;  %4185 = vrot.lane.b32.xlu1 %v15067_v11, %s18439_s15 }
 0x4eb   : > { %v3777_v42 = vsel %vm18492_vm4, %v3764_v41, %v14954_v58  ;;  %vm18501_vm4 = vcmask 196608  }
 0x4ec   : > { %3792 = vst.msk [vmem:[#allocation3 + $0x140] sm:$0xff] %vm3378_vm6, %v3777_v42  ;;  %4076 = vrot.lane.b32.xlu0 %v4018_v4, %s18430_s17  ;;  %v4069_v55 = vpop.permute.xlu1 %4068 }
 0x4ed   : > { %v4082_v27 = vsel %vm18493_vm11, %v4069_v55, %v14924_v36  ;;  %vm18502_vm11 = vcmask 1031168  }
 0x4ee   : > { %4097 = vst.msk [vmem:[#allocation3 + $0x218] sm:$0xff] %vm3378_vm6, %v4082_v27  ;;  %v3968_v18 = vpop.permute.xlu0 %3967  ;;  %4033 = vrot.lane.b32.xlu1 %v4018_v4, %s18438_s18 }
 0x4ef   : > { %v3981_v58 = vsel %vm18494_vm2, %v3968_v18, %v14965_v37  ;;  %vm18503_vm2 = vcmask 949248  }
 0x4f0   : > { %3996 = vst.msk [vmem:[#allocation3 + $0x1d0] sm:$0xff] %vm3378_vm6, %v3981_v58  ;;  %4224 = vrot.lane.b32.xlu0 %v14497_v40, %s18431_s26  ;;  %v15394_v24 = vpop.permute.xlu1 %4183 }
 0x4f1   : > { %4209 = vst.msk [vmem:[#allocation3 + $0x2c0] sm:$0xff] %vm3332_vm3, %v15394_v24 }
 0x4f2   : > { %v15398_v11 = vpop.permute.xlu0 %4218  ;;  %4189 = vrot.lane.b32.xlu1 %v15233_v35, %s18439_s15  ;;  %v15416_v35 = vld [vmem:[%s18496_s4 + $0x4] ss:$8 sps:$4 sm:$0xff]  }
 0x4f3   : > { %10762 = vmatprep.mubr.msk.bf16.mxu1 %vm18499_vm8, %v15416_v35  ;;  %vm18507_vm8 = vcmask 957440  }
 0x4f4   : > { %4191 = vrot.lane.b32.xlu0 %v15279_v32, %s18439_s15  ;;  %v3358_v36 = vpop.permute.xlu1 %3357 }
 0x4f5   : > { %v3368_v37 = vsel %vm18495_vm12, %v3358_v36, %v14936_v25  ;;  %vm18504_vm12 = vcmask 1014784  }
 0x4f6   : > { %3384 = vst.msk [vmem:[#allocation3 + $0x38] sm:$0xff] %vm3378_vm6, %v3368_v37  ;;  %v4112_v40 = vpop.permute.xlu0 %4111  ;;  %4222 = vrot.lane.b32.xlu1 %v15094_v12, %s18431_s26 }
 0x4f8   : > { %4228 = vrot.lane.b32.xlu0 %v14516_v49, %s18431_s26  ;;  %v4149_v6 = vpop.permute.xlu1 %4148 }
 0x4f9   : > { %v4159_v25 = vsel %vm18497_vm13, %v4149_v6, %v14948_v43  ;;  %vm18505_vm13 = vcmask 932864  }
 0x4fa   : > { %v4114_v33 = vpop.permute.xlu0 %4113  ;;  %4226 = vrot.lane.b32.xlu1 %v15279_v32, %s18431_s26  ;;  %s18594_s26 = smov 109  }
 0x4fb   : > { %v15421_v5 = vsel %vm18498_vm1, %v4112_v40, %v4114_v33  ;;  %4137 = vst.msk [vmem:[#allocation3 + $0x290] sm:$0xff] %vm3332_vm3, %v4114_v33  ;;  %vm18506_vm1 = vcmask 900096  }
 0x4fc   : > { %4173 = vst.msk [vmem:[#allocation3 + $0x290] sm:$0xff] %vm3378_vm6, %v4159_v25  ;;  %v3362_v49 = vpop.permute.xlu1 %3361 }
 0x4fd   : > { %v3369_v12 = vsel %vm18500_vm5, %v3362_v49, %v14960_v29  ;;  %v4258_v56 = vld [vmem:[#allocation3 + $0x38] sm:$0xff]  ;;  %vm18508_vm5 = vcmask 1039360  }
 0x4fe   : > { %3387 = vst.msk [vmem:[#allocation3 + $0x50] sm:$0x1] %vm3386_vm10, %v3369_v12  ;;  %v3418_v32 = vpop.permute.xlu0 %3417 }
 0x500   : > { %v15430_v57 = vpop.permute.xlu1 %4117 }
 0x501   : > { %4139 = vst.msk [vmem:[#allocation3 + $0x2a8] sm:$0x1] %vm18501_vm4, %v15430_v57  ;;  %vm18509_vm4 = vcmask 998400  }
 0x502   : > { %v3519_v43 = vpop.permute.xlu0 %3518 }
 0x504   : > { %v3463_v15 = vpop.permute.xlu1 %3462 }
 0x505   : > { %v4261_v31 = vld [vmem:[#allocation3 + $0x50] sm:$0xff]  ;;  %v3473_v27 = vsel %vm18507_vm8, %v3463_v15, %v14971_v20  ;;  %vm18516_vm8 = vcmask 990208  }
 0x506   : > { %v3620_v10 = vpop.permute.xlu0 %3619  ;;  %v4351_v0 = vpack.c.bf16 %v4261_v31, %v4258_v56 }
 0x508   : > { %v3521_v9 = vpop.permute.xlu1 %3520  ;;  %4458 = vmatprep.subr.bf16.mxu1 %v4351_v0 }
 0x509   : > { %v15435_v29 = vsel %vm18502_vm11, %v3519_v43, %v3521_v9  ;;  %3544 = vst.msk [vmem:[#allocation3 + $0xc8] sm:$0xff] %vm3332_vm3, %v3521_v9  ;;  %4459 = vmatpush1.bf16.msra.mxu1 %v4350_v13  ;;  %vm18511_vm11 = vcmask 1022976  }
 0x50a   : > { %v3722_v2 = vpop.permute.xlu0 %3721 }
 0x50c   : > { %v3564_v16 = vpop.permute.xlu1 %3563 }
 0x50d   : > { %v3574_v8 = vsel %vm18503_vm2, %v3564_v16, %v14982_v34  ;;  %vm18512_vm2 = vcmask 916480  }
 0x50e   : > { %3590 = vst.msk [vmem:[#allocation3 + $0xc8] sm:$0xff] %vm3378_vm6, %v3574_v8  ;;  %v3824_v39 = vpop.permute.xlu0 %3823 }
 0x510   : > { %v3666_v47 = vpop.permute.xlu1 %3665 }
 0x512   : > { %v3926_v19 = vpop.permute.xlu0 %3925 }
 0x514   : > { %v3724_v60 = vpop.permute.xlu1 %3723 }
 0x515   : > { %v15442_v51 = vsel %vm18504_vm12, %v3722_v2, %v3724_v60  ;;  %3748 = vst.msk [vmem:[#allocation3 + $0x158] sm:$0xff] %vm3332_vm3, %v3724_v60  ;;  %vm18513_vm12 = vcmask 924672  }
 0x516   : > { %v4028_v17 = vpop.permute.xlu0 %4027 }
 0x518   : > { %v3768_v50 = vpop.permute.xlu1 %3767 }
 0x519   : > { %v3778_v41 = vsel %vm18505_vm13, %v3768_v50, %v15005_v48  ;;  %vm18514_vm13 = vcmask 1006592  }
 0x51a   : > { %3794 = vst.msk [vmem:[#allocation3 + $0x158] sm:$0xff] %vm3378_vm6, %v3778_v41  ;;  %v4153_v42 = vpop.permute.xlu0 %4152  ;;  %v4273_v41 = vld [vmem:[#allocation3 + $0xb0] sm:$0xff] }
 0x51b   : > { %v4160_v34 = vsel %vm18506_vm1, %v4153_v42, %v14977_v63  ;;  %vm18515_vm1 = vcmask 908288  }
 0x51c   : > { %4175 = vst.msk [vmem:[#allocation3 + $0x2a8] sm:$0x1] %vm3386_vm10, %v4160_v34  ;;  %v3870_v4 = vpop.permute.xlu1 %3869  ;;  %vm18510_vm10 = vcmask 941056  }
 0x51d   : > { %v3676_v36 = vsel %vm18510_vm10, %v3666_v47, %v14994_v46  ;;  %v3880_v33 = vsel %vm18513_vm12, %v3870_v4, %v15016_v1  ;;  %v4264_v46 = vld [vmem:[#allocation3 + $0x68] sm:$0xff]  ;;  %vm3546_vm10 = vcmask 198656   ;;  %vm18519_vm12 = vcmask 1031168  }
 0x51e   : > { %v3420_v55 = vpop.permute.xlu0 %3419 }
 0x51f   : > { %v3427_v18 = vsel %vm18508_vm5, %v3418_v32, %v3420_v55  ;;  %3443 = vst.msk [vmem:[#allocation3 + $0x80] sm:$0xff] %vm3332_vm3, %v3420_v55  ;;  %vm3445_vm5 = vcmask 197632  }
 0x520   : > { %3489 = vst.msk [vmem:[#allocation3 + $0x80] sm:$0xff] %vm3378_vm6, %v3473_v27  ;;  %v3928_v48 = vpop.permute.xlu1 %3927  ;;  %v4353_v43 = vpack.c.bf16 %v3427_v18, %v15267_v61  ;;  %v4276_v18 = vld [vmem:[#allocation3 + $0xc8] sm:$0xff] }
 0x521   : > { %v15457_v58 = vsel %vm18509_vm4, %v3926_v19, %v3928_v48  ;;  %3952 = vst.msk [vmem:[#allocation3 + $0x1e8] sm:$0xff] %vm3332_vm3, %v3928_v48  ;;  %vm3491_vm4 = vcmask 1041608  }
 0x522   : > { %v3622_v63 = vpop.permute.xlu0 %3621 }
 0x523   : > { %v15463_v37 = vsel %vm18511_vm11, %v3620_v10, %v3622_v63  ;;  %3646 = vst.msk [vmem:[#allocation3 + $0x110] sm:$0xff] %vm3332_vm3, %v3622_v63  ;;  %vm18517_vm11 = vcmask 957440  }
 0x524   : > { %3692 = vst.msk [vmem:[#allocation3 + $0x110] sm:$0xff] %vm3378_vm6, %v3676_v36  ;;  %v3972_v20 = vpop.permute.xlu1 %3971 }
 0x525   : > { %v3982_v40 = vsel %vm18512_vm2, %v3972_v20, %v15028_v28  ;;  %vm18518_vm2 = vcmask 1039360  }
 0x526   : > { %3998 = vst.msk [vmem:[#allocation3 + $0x1e8] sm:$0xff] %vm3378_vm6, %v3982_v40  ;;  %v3826_v6 = vpop.permute.xlu0 %3825 }
 0x527   : > { %v15473_v25 = vsel %vm18514_vm13, %v3824_v39, %v3826_v6  ;;  %3850 = vst.msk [vmem:[#allocation3 + $0x1a0] sm:$0xff] %vm3332_vm3, %v3826_v6  ;;  %v4267_v49 = vld [vmem:[#allocation3 + $0x80] sm:$0xff]  ;;  %vm3592_vm13 = vcmask 1042632   ;;  %v4282_v6 = vld [vmem:[#allocation3 + $0xf8] sm:$0xff] }
 0x528   : > { %3896 = vst.msk [vmem:[#allocation3 + $0x1a0] sm:$0xff] %vm3378_vm6, %v3880_v33  ;;  %v4073_v12 = vpop.permute.xlu1 %4072  ;;  %v4354_v32 = vpack.c.bf16 %v4267_v49, %v4264_v46 }
 0x529   : > { %v4083_v15 = vsel %vm18515_vm1, %v4073_v12, %v15039_v26  ;;  %vm18520_vm1 = vcmask 949248  }
 0x52a   : > { %v4030_v28 = vpop.permute.xlu0 %4029  ;;  %4460 = vmatprep.subr.bf16.mxu1 %v4354_v32  ;;  %v4362_v32 = vpack.c.bf16 %v15463_v37, %v15304_v14  ;;  %v4294_v37 = vld [vmem:[#allocation3 + $0x158] sm:$0xff] }
 0x52b   : > { %v15481_v1 = vsel %vm18516_vm8, %v4028_v17, %v4030_v28  ;;  %4054 = vst.msk [vmem:[#allocation3 + $0x230] sm:$0xff] %vm3332_vm3, %v4030_v28  ;;  %4461 = vmatpush1.bf16.msra.mxu1 %v4353_v43  ;;  %vm18521_vm8 = vcmask 982016   ;;  %v4285_v63 = vld [vmem:[#allocation3 + $0x110] sm:$0xff] }
 0x52c   : > { %4099 = vst.msk [vmem:[#allocation3 + $0x230] sm:$0xff] %vm3378_vm6, %v4083_v15  ;;  %v3523_v3 = vpop.permute.xlu1 %3522  ;;  %v4363_v33 = vpack.c.bf16 %v4285_v63, %v4282_v6  ;;  %v4291_v15 = vld [vmem:[#allocation3 + $0x140] sm:$0xff]  ;;  %v4318_v63 = vld [vmem:[#allocation3 + $0x218] sm:$0xff] }
 0x52e   : > { %v3422_v56 = vpop.permute.xlu0 %3421 }
 0x530   : > { %v3726_v31 = vpop.permute.xlu1 %3725 }
 0x532   : > { %v3624_v10 = vpop.permute.xlu0 %3623 }
 0x534   : > { %v15485_v0 = vpop.permute.xlu1 %3929 }
 0x536   : > { %v15487_v61 = vpop.permute.xlu0 %3827 }
 0x538   : > { %v15489_v30 = vpop.permute.xlu1 %4031 }
 0x53a   : > { %v3467_v13 = vpop.permute.xlu0 %3466 }
 0x53b   : > { %v3474_v9 = vsel %vm18517_vm11, %v3467_v13, %v14988_v7  ;;  %vm18522_vm11 = vcmask 891904  }
 0x53c   : > { %v3424_v26 = vpop.permute.xlu1 %3423 }
 0x53d   : > { %v3428_v2 = vsel %vm18518_vm2, %v3422_v56, %v3424_v26  ;;  %3446 = vst.msk [vmem:[#allocation3 + $0x98] sm:$0x3] %vm3445_vm5, %v3424_v26  ;;  %vm18523_vm2 = vcmask 408576   ;;  %v4303_v26 = vld [vmem:[#allocation3 + $0x1a0] sm:$0xff] }
 0x53e   : > { %3444 = vst [vmem:[#allocation3 + $0x90] sm:$0x3] %v3428_v2  ;;  %3492 = vst.msk [vmem:[#allocation3 + $0x98] sm:$0x3] %vm3491_vm4, %v3474_v9  ;;  %v3525_v16 = vpop.permute.xlu0 %3524 }
 0x53f   : > { %v3529_v8 = vsel %vm18519_vm12, %v3523_v3, %v3525_v16  ;;  %3547 = vst.msk [vmem:[#allocation3 + $0xe0] sm:$0x7] %vm3546_vm10, %v3525_v16  ;;  %vm3648_vm10 = vcmask 199680   ;;  %vm3694_vm12 = vcmask 1043656  }
 0x540   : > { %3545 = vst [vmem:[#allocation3 + $0xd8] sm:$0x7] %v3529_v8  ;;  %v3568_v39 = vpop.permute.xlu1 %3567 }
 0x541   : > { %v3575_v47 = vsel %vm18520_vm1, %v3568_v39, %v15047_v23  ;;  %vm18524_vm1 = vcmask 941056   ;;  %v18533_v39 = vld [vmem:[#allocation9_spill] sm:$0xff] }
 0x542   : > { %3593 = vst.msk [vmem:[#allocation3 + $0xe0] sm:$0x7] %vm3592_vm13, %v3575_v47  ;;  %v4116_v19 = vpop.permute.xlu0 %4115  ;;  %vm3750_vm13 = vcmask 200704  }
 0x543   : > { %v4123_v7 = vsel %vm18521_vm8, %v4116_v19, %v15430_v57  ;;  %vm18525_vm8 = vcmask 1022976  }
 0x544   : > { %4138 = vst [vmem:[#allocation3 + $0x2a0] sm:$0x1] %v4123_v7  ;;  %v4221_v60 = vpop.permute.xlu1 %4220 }
 0x545   : > { %v4232_v17 = vsel %vm18522_vm11, %v15398_v11, %v4221_v60  ;;  %4246 = vst.msk [vmem:[#allocation3 + $0x2c8] sm:$0xff] %vm18523_vm2, %v4221_v60  ;;  %v4270_v50 = vld [vmem:[#allocation3 + $0x98] sm:$0xff]  ;;  %v4269_v42 = vld [vmem:[#allocation3 + $0x90] sm:$0xff]  ;;  %vm18526_vm11 = vcmask 1014784   ;;  %vm3796_vm2 = vcmask 1044680  }
 0x546   : > { %4245 = vst.msk [vmem:[#allocation3 + $0x2c0] sm:$0xff] %vm3378_vm6, %v4232_v17  ;;  %v3670_v34 = vpop.permute.xlu0 %3669  ;;  %v4357_v23 = vpack.c.bf16 %v4273_v41, %v4270_v50  ;;  %v4356_v4 = vpack.c.bf16 %v15332_v54, %v4269_v42  ;;  %v4309_v17 = vld [vmem:[#allocation3 + $0x1d0] sm:$0xff] }
 0x547   : > { %v4278_v57 = vld [vmem:[#allocation3 + $0xd8] sm:$0xff]  ;;  %v3677_v11 = vsel %vm18524_vm1, %v3670_v34, %v15000_v53  ;;  %vm3852_vm1 = vcmask 201728  }
 0x548   : > { %v3626_v55 = vpop.permute.xlu1 %3625  ;;  %4462 = vmatprep.subr.bf16.mxu1 %v4357_v23  ;;  %v4359_v40 = vpack.c.bf16 %v4278_v57, %v15435_v29 }
 0x549   : > { %v3631_v27 = vsel %vm18525_vm8, %v3624_v10, %v3626_v55  ;;  %3649 = vst.msk [vmem:[#allocation3 + $0x128] sm:$0xf] %vm3648_vm10, %v3626_v55  ;;  %4463 = vmatpush1.bf16.msra.mxu1 %v4356_v4  ;;  %v4279_v48 = vld [vmem:[#allocation3 + $0xe0] sm:$0xff]  ;;  %vm18527_vm10 = vcmask 932864   ;;  %vm3898_vm8 = vcmask 1045704   ;;  %v18536_v55 = vld [vmem:[#allocation8_spill] sm:$0xff] }
 0x54a   : > { %3647 = vst [vmem:[#allocation3 + $0x120] sm:$0xf] %v3631_v27  ;;  %3695 = vst.msk [vmem:[#allocation3 + $0x128] sm:$0xf] %vm3694_vm12, %v3677_v11  ;;  %v3728_v36 = vpop.permute.xlu0 %3727  ;;  %v4360_v20 = vpack.c.bf16 %v4279_v48, %v4276_v18  ;;  %vm18528_vm12 = vcmask 973824   ;;  %v4321_v27 = vld [vmem:[#allocation3 + $0x230] sm:$0xff] }
 0x54b   : > { %v3733_v54 = vsel %vm18526_vm11, %v3726_v31, %v3728_v36  ;;  %3751 = vst.msk [vmem:[#allocation3 + $0x170] sm:$0x1f] %vm3750_vm13, %v3728_v36  ;;  %vm18529_vm13 = vmmov %vm18528_vm12  ;;  %vm3954_vm11 = vcmask 202752  }
 0x54c   : > { %3749 = vst [vmem:[#allocation3 + $0x168] sm:$0x1f] %v3733_v54  ;;  %v3772_v53 = vpop.permute.xlu1 %3771  ;;  %4464 = vmatprep.subr.bf16.mxu1 %v4360_v20  ;;  %v4381_v20 = vpack.c.bf16 %v4321_v27, %v4318_v63  ;;  %v4401_v27 = vld [vmem:[%s18496_s4 + $0x30] sm:$0x11]  ;;  %v12621_v63 = vld [vmem:[%s18496_s4 + $0x20] ss:$8 sps:$4 sm:$0xff]  }
 0x54d   : > { %v3779_v46 = vsel %vm18527_vm10, %v3772_v53, %v15057_v45  ;;  %4465 = vmatpush1.bf16.msra.mxu1 %v4359_v40  ;;  %vm18531_vm10 = vcmask 1006592   ;;  %v4380_v40 = vpack.c.bf16 %v15481_v1, %v15373_v44 }
 0x54e   : > { %3797 = vst.msk [vmem:[#allocation3 + $0x170] sm:$0x1f] %vm3796_vm2, %v3779_v46  ;;  %v4182_v49 = vpop.permute.xlu0 %4181  ;;  %4466 = vmatprep.subr.bf16.mxu1 %v4363_v33  ;;  %vm18530_vm2 = vcmask 924672   ;;  %v4327_v33 = vld [vmem:[#allocation3 + $0x260] sm:$0xff]  ;;  %v4333_v46 = vld [vmem:[#allocation3 + $0x290] sm:$0xff] }
 0x54f   : > { %v15515_v12 = vsel %vm18528_vm12, %v4182_v49, %v15394_v24  ;;  %vm18532_vm12 = vcmask 998400  }
 0x550   : > { %v4178_v29 = vpop.permute.xlu1 %4177 }
 0x551   : > { %v4194_v43 = vsel %vm18529_vm13, %v4178_v29, %v15307_v21  ;;  %4467 = vmatpush1.bf16.msra.mxu1 %v4362_v32  ;;  %v4288_v28 = vld [vmem:[#allocation3 + $0x128] sm:$0xff]  ;;  %v4287_v3 = vld [vmem:[#allocation3 + $0x120] sm:$0xff]  ;;  %vm4000_vm13 = vcmask 1046728   ;;  %v4326_v29 = vld [vmem:[#allocation3 + $0x258] sm:$0xff] }
 0x552   : > { %4206 = vst [vmem:[#allocation3 + $0x2a0] sm:$0xfe] %v4194_v43  ;;  %v3874_v45 = vpop.permute.xlu0 %3873  ;;  %v4366_v56 = vpack.c.bf16 %v4291_v15, %v4288_v28  ;;  %v4365_v31 = vpack.c.bf16 %v15345_v52, %v4287_v3  ;;  %v4330_v28 = vld [vmem:[#allocation3 + $0x278] sm:$0xff]  ;;  %v4339_v3 = vld [vmem:[#allocation3 + $0x2c0] sm:$0xff] }
 0x553   : > { %v4296_v10 = vld [vmem:[#allocation3 + $0x168] sm:$0xff]  ;;  %v3881_v14 = vsel %vm18530_vm2, %v3874_v45, %v15011_v22  ;;  %vm18538_vm2 = vcmask 990208   ;;  %v4387_v44 = vpack.c.bf16 %v4333_v46, %v4330_v28  ;;  %v4386_v45 = vpack.c.bf16 %v15421_v5, %v15190_v38  ;;  %v4283_v46 = vld [vmem:[#allocation3 + $0x100] sm:$0xff]  ;;  %v4289_v28 = vld [vmem:[#allocation3 + $0x130] sm:$0xff] }
 0x554   : > { %v3830_v24 = vpop.permute.xlu1 %3829  ;;  %4468 = vmatprep.subr.bf16.mxu1 %v4366_v56  ;;  %v4368_v16 = vpack.c.bf16 %v4296_v10, %v15442_v51  ;;  %v4300_v22 = vld [vmem:[#allocation3 + $0x188] sm:$0xff] }
 0x555   : > { %v3835_v21 = vsel %vm18531_vm10, %v15487_v61, %v3830_v24  ;;  %3853 = vst.msk [vmem:[#allocation3 + $0x1b8] sm:$0x3f] %vm3852_vm1, %v3830_v24  ;;  %4469 = vmatpush1.bf16.msra.mxu1 %v4365_v31  ;;  %v4297_v13 = vld [vmem:[#allocation3 + $0x170] sm:$0xff]  ;;  %v4372_v61 = vpack.c.bf16 %v4303_v26, %v4300_v22  ;;  %vm18534_vm1 = vcmask 916480   ;;  %vm18539_vm10 = vcmask 408576   ;;  %v4336_v56 = vld [vmem:[#allocation3 + $0x2a8] sm:$0xff] }
 0x556   : > { %3851 = vst [vmem:[#allocation3 + $0x1b0] sm:$0x3f] %v3835_v21  ;;  %3899 = vst.msk [vmem:[#allocation3 + $0x1b8] sm:$0x3f] %vm3898_vm8, %v3881_v14  ;;  %v3932_v9 = vpop.permute.xlu0 %3931  ;;  %v4369_v52 = vpack.c.bf16 %v4297_v13, %v4294_v37  ;;  %vm18535_vm8 = vcmask 973824   ;;  %v4390_v31 = vpack.c.bf16 %v4339_v3, %v4336_v56  ;;  %v4304_v26 = vld [vmem:[#allocation3 + $0x1a8] sm:$0xff] }
 0x557   : > { %v3937_v2 = vsel %vm18532_vm12, %v15485_v0, %v3932_v9  ;;  %3955 = vst.msk [vmem:[#allocation3 + $0x200] sm:$0x7f] %vm3954_vm11, %v3932_v9  ;;  %v4371_v0 = vpack.c.bf16 %v15473_v25, %v15339_v59  ;;  %vm18537_vm11 = vcmask 908288   ;;  %v4312_v25 = vld [vmem:[#allocation3 + $0x1e8] sm:$0xff]  ;;  %vm18541_vm12 = vcmask 891904   ;;  %v4298_v56 = vld [vmem:[#allocation3 + $0x178] sm:$0xff] }
 0x558   : > { %3953 = vst [vmem:[#allocation3 + $0x1f8] sm:$0x7f] %v3937_v2  ;;  %v3976_v8 = vpop.permute.xlu1 %3975  ;;  %4470 = vmatprep.subr.bf16.mxu1 %v4369_v52  ;;  %v4301_v52 = vld [vmem:[#allocation3 + $0x190] sm:$0xff]  ;;  %v15564_v2 = vld [vmem:[%s18496_s4] ss:$8 sps:$4 sm:$0xff]  }
 0x559   : > { %v3983_v47 = vsel %vm18534_vm1, %v3976_v8, %v18533_v39  ;;  %4471 = vmatpush1.bf16.msra.mxu1 %v4368_v16  ;;  %v4335_v24 = vld [vmem:[#allocation3 + $0x2a0] sm:$0xff]  ;;  %v4373_v5 = vpack.c.bf16 %v4304_v26, %v4301_v52  ;;  %v4256_v16 = vld [vmem:[#allocation3 + $0x28] sm:$0xff]  ;;  %v15569_v22 = vld [vmem:[%s18496_s4 + $0x14] ss:$8 sps:$4 sm:$0xff]  }
 0x55a   : > { %4001 = vst.msk [vmem:[#allocation3 + $0x200] sm:$0x7f] %vm4000_vm13, %v3983_v47  ;;  %v4188_v19 = vpop.permute.xlu0 %4187  ;;  %4472 = vmatprep.subr.bf16.mxu1 %v4372_v61  ;;  %vm18542_vm13 = vcmask 402432   ;;  %v4389_v14 = vpack.c.bf16 %v15515_v12, %v4335_v24  ;;  %v4307_v12 = vld [vmem:[#allocation3 + $0x1c0] sm:$0xff]  ;;  %v4253_v8 = vld [vmem:[#allocation3 + $0x10] sm:$0xff]  ;;  %v4310_v39 = vld [vmem:[#allocation3 + $0x1d8] sm:$0xff] }
 0x55b   : > { %4211 = vst.msk [vmem:[#allocation3 + $0x2d8] sm:$0xff] %vm3332_vm3, %v4188_v19  ;;  %v4349_v61 = vpack.c.bf16 %v4256_v16, %v4253_v8  ;;  %v4376_v47 = vpack.c.bf16 %v4310_v39, %v4307_v12  ;;  %v12626_v52 = vld [vmem:[%s18551_s6 + $0x48] sm:$0xff]   ;;  %v12629_v8 = vld [vmem:[%s18551_s6 + $0x10] sm:$0xff]  }
 0x55c   : > { %v4186_v7 = vpop.permute.xlu1 %4185 }
 0x55d   : > { %v15535_v51 = vsel %vm18535_vm8, %v4186_v7, %v4188_v19  ;;  %4473 = vmatpush1.bf16.msra.mxu1 %v4371_v0  ;;  %v4306_v60 = vld [vmem:[#allocation3 + $0x1b8] sm:$0xff]  ;;  %v4305_v50 = vld [vmem:[#allocation3 + $0x1b0] sm:$0xff]  ;;  %v4316_v0 = vld [vmem:[#allocation3 + $0x208] sm:$0xff] }
 0x55e   : > { %v4077_v41 = vpop.permute.xlu0 %4076  ;;  %v4375_v42 = vpack.c.bf16 %v4309_v17, %v4306_v60  ;;  %v4374_v34 = vpack.c.bf16 %v15361_v62, %v4305_v50  ;;  %v4262_v19 = vld [vmem:[#allocation3 + $0x58] sm:$0xff]  ;;  %v4259_v7 = vld [vmem:[#allocation3 + $0x40] sm:$0xff]  ;;  %v4313_v60 = vld [vmem:[#allocation3 + $0x1f0] sm:$0xff] }
 0x55f   : > { %v4314_v4 = vld [vmem:[#allocation3 + $0x1f8] sm:$0xff]  ;;  %v4084_v57 = vsel %vm18537_vm11, %v4077_v41, %v18536_v55  ;;  %v4379_v17 = vpack.c.bf16 %v4316_v0, %v4313_v60  ;;  %v4268_v41 = vld [vmem:[#allocation3 + $0x88] sm:$0xff]  ;;  %v4319_v55 = vld [vmem:[#allocation3 + $0x220] sm:$0xff] }
 0x560   : > { %v4034_v23 = vpop.permute.xlu1 %4033  ;;  %4474 = vmatprep.subr.bf16.mxu1 %v4375_v42  ;;  %v4377_v62 = vpack.c.bf16 %v4314_v4, %v15457_v58  ;;  %v12618_v50 = vld [vmem:[%s18496_s4 + $0x10] ss:$8 sps:$4 sm:$0xff]   ;;  %v12632_v60 = vld [vmem:[%s18551_s6 + $0x60] sm:$0xff]  }
 0x561   : > { %v4039_v59 = vsel %vm18538_vm2, %v15489_v30, %v4034_v23  ;;  %4056 = vst.msk [vmem:[#allocation3 + $0x248] sm:$0xff] %vm3332_vm3, %v4034_v23  ;;  %4475 = vmatpush1.bf16.msra.mxu1 %v4374_v34  ;;  %v4315_v11 = vld [vmem:[#allocation3 + $0x200] sm:$0xff]  ;;  %vm18540_vm3 = vmmov %vm18535_vm8  ;;  %v4322_v42 = vld [vmem:[#allocation3 + $0x238] sm:$0xff] }
 0x562   : > { %4101 = vst.msk [vmem:[#allocation3 + $0x248] sm:$0xff] %vm3378_vm6, %v4084_v57  ;;  %v4225_v18 = vpop.permute.xlu0 %4224  ;;  %v4378_v48 = vpack.c.bf16 %v4315_v11, %v4312_v25  ;;  %v4383_v43 = vpack.c.bf16 %v4326_v29, %v4039_v59  ;;  %v12619_v34 = vld [vmem:[%s18496_s4 + $0x24] ss:$8 sps:$4 sm:$0xff]   ;;  %v4265_v23 = vld [vmem:[#allocation3 + $0x70] sm:$0xff]  ;;  %v4382_v57 = vpack.c.bf16 %v4322_v42, %v4319_v55  ;;  %v4274_v11 = vld [vmem:[#allocation3 + $0xb8] sm:$0xff]  ;;  %s18601_s4 = sld [smem:[#allocation20_spill]] }
 0x563   : > { %4248 = vst.msk [vmem:[#allocation3 + $0x2e0] sm:$0xff] %vm18539_vm10, %v4225_v18  ;;  %v4355_v4 = vpack.c.bf16 %v4268_v41, %v4265_v23  ;;  %v4271_v59 = vld [vmem:[#allocation3 + $0xa0] sm:$0xff]  ;;  %v4325_v25 = vld [vmem:[#allocation3 + $0x250] sm:$0xff]  ;;  %v12631_v0 = vld [vmem:[%s18551_s6 + $0x18] sm:$0xff]  }
 0x564   : > { %v4190_v36 = vpop.permute.xlu1 %4189  ;;  %4476 = vmatprep.subr.bf16.mxu1 %v4378_v48  ;;  %v4328_v48 = vld [vmem:[#allocation3 + $0x268] sm:$0xff] }
 0x565   : > { %4477 = vmatpush1.bf16.msra.mxu1 %v4377_v62  ;;  %v4385_v62 = vpack.c.bf16 %v4328_v48, %v4325_v25  ;;  %v12634_v23 = vld [vmem:[%s18551_s6 + $0x68] sm:$0xff]   ;;  %v12636_v48 = vld [vmem:[%s18551_s6 + $0x70] sm:$0xff]  }
 0x566   : > { %v4192_v30 = vpop.permute.xlu0 %4191  ;;  %4478 = vmatprep.subr.bf16.mxu1 %v4381_v20  ;;  %v4334_v20 = vld [vmem:[#allocation3 + $0x298] sm:$0xff] }
 0x567   : > { %v4197_v54 = vsel %vm18540_vm3, %v4190_v36, %v4192_v30  ;;  %4213 = vst.msk [vmem:[#allocation3 + $0x2f0] sm:$0x3] %vm3445_vm5, %v4192_v30  ;;  %vm18543_vm5 = vmmov %vm18541_vm12  ;;  %v4280_v36 = vld [vmem:[#allocation3 + $0xe8] sm:$0xff]  ;;  %v10760_v30 = vcombine.high %v4401_v27, %v4401_v27  ;;  %vm18552_vm3 = vcmask 1039360  }
 0x568   : > { %4212 = vst [vmem:[#allocation3 + $0x2e8] sm:$0x3] %v4197_v54  ;;  %v4223_v6 = vpop.permute.xlu1 %4222  ;;  %v4277_v54 = vld [vmem:[#allocation3 + $0xd0] sm:$0xff] }
 0x569   : > { %v4233_v53 = vsel %vm18541_vm12, %v4223_v6, %v4225_v18  ;;  %4479 = vmatpush1.bf16.msra.mxu1 %v4380_v40  ;;  %v4324_v58 = vld [vmem:[#allocation3 + $0x248] sm:$0xff]  ;;  %v4358_v18 = vpack.c.bf16 %v4274_v11, %v4271_v59  ;;  %v4361_v40 = vpack.c.bf16 %v4280_v36, %v4277_v54  ;;  %v4331_v6 = vld [vmem:[#allocation3 + $0x280] sm:$0xff]  ;;  %v12639_v36 = vld [vmem:[%s18551_s6 + $0x78] sm:$0xff]  }
 0x56a   : > { %4247 = vst.msk [vmem:[#allocation3 + $0x2d8] sm:$0xff] %vm3378_vm6, %v4233_v53  ;;  %v4229_v49 = vpop.permute.xlu0 %4228  ;;  %v4384_v32 = vpack.c.bf16 %v4327_v33, %v4324_v58  ;;  %vm18544_vm6 = vcmask 998400   ;;  %v4388_v53 = vpack.c.bf16 %v4334_v20, %v4331_v6  ;;  %v4286_v58 = vld [vmem:[#allocation3 + $0x118] sm:$0xff]  ;;  %v4340_v33 = vld [vmem:[#allocation3 + $0x2c8] sm:$0xff]  ;;  %v4343_v3 = vld [vmem:[#allocation3 + $0x2e0] sm:$0xff] }
 0x56b   : > { %4250 = vst.msk [vmem:[#allocation3 + $0x2f8] sm:$0x3] %vm18542_vm13, %v4229_v49  ;;  %v12640_v54 = vld [vmem:[%s18551_s6 + $0x38] sm:$0xff]   ;;  %vm18553_vm12 = vmmov %vm18552_vm3  ;;  %vm18554_vm13 = vcmask 1031168  }
 0x56c   : > { %v4227_v15 = vpop.permute.xlu1 %4226  ;;  %4480 = vmatprep.subr.bf16.mxu1 %v4384_v32  ;;  %v4337_v32 = vld [vmem:[#allocation3 + $0x2b0] sm:$0xff] }
 0x56d   : > { %v4234_v1 = vsel %vm18543_vm5, %v4227_v15, %v4229_v49  ;;  %4481 = vmatpush1.bf16.msra.mxu1 %v4383_v43  ;;  %v4364_v49 = vpack.c.bf16 %v4286_v58, %v4283_v46  ;;  %v4391_v29 = vpack.c.bf16 %v4340_v33, %v4337_v32  ;;  %v10759_v43 = vcombine.low %v4401_v27, %v4401_v27  ;;  %v12641_v33 = vld [vmem:[%s18551_s6 + $0x88] sm:$0xff]   ;;  %v12642_v32 = vld [vmem:[%s18551_s6 + $0x90] sm:$0xff]   ;;  %vm18555_vm5 = vmmov %vm18552_vm3 }
 0x56e   : > { %4249 = vst.msk [vmem:[#allocation3 + $0x2f0] sm:$0x3] %vm3491_vm4, %v4234_v1  ;;  %4482 = vmatprep.subr.bf16.mxu1 %v4387_v44  ;;  %vm18545_vm4 = vmmov %vm18544_vm6  ;;  %v4292_v44 = vld [vmem:[#allocation3 + $0x148] sm:$0xff] }
 0x56f   : > { %v4344_v10 = vld [vmem:[#allocation3 + $0x2e8] sm:$0x3]  ;;  %vm18546_vm1 = vmmov %vm18545_vm4  ;;  %v4367_v1 = vpack.c.bf16 %v4292_v44, %v4289_v28 }
 0x570   : > { %v4392_v21 = vpack.c.bf16 %v4344_v10, %v15535_v51  ;;  %v4352_v51 = vpack.c.bf16 %v4262_v19, %v4259_v7  ;;  %vm18547_vm8 = vmmov %vm18546_vm1 }
 0x571   : > { %4483 = vmatpush1.bf16.msra.mxu1 %v4386_v45  ;;  %v4342_v37 = vld [vmem:[#allocation3 + $0x2d8] sm:$0xff]  ;;  %vm18548_vm11 = vmmov %vm18546_vm1 }
 0x572   : > { %4484 = vmatprep.subr.bf16.mxu1 %v4390_v31  ;;  %v4448_v38 = vsel %vm3800_vm9, %v4392_v21, 0  ;;  %v4346_v15 = vld [vmem:[#allocation3 + $0x2f8] sm:$0x3]  ;;  %v4295_v31 = vld [vmem:[#allocation3 + $0x160] sm:$0xff]  ;;  %vm18549_vm2 = vmmov %vm18546_vm1 }
 0x573   : > { %v4394_v45 = vpack.c.bf16 %v4346_v15, %v4343_v3  ;;  %v4370_v24 = vpack.c.bf16 %v4298_v56, %v4295_v31  ;;  %vm18550_vm10 = vmmov %vm18546_vm1 }
 0x575   : > { %4485 = vmatpush1.bf16.msra.mxu1 %v4389_v14  ;;  %v4345_v13 = vld [vmem:[#allocation3 + $0x2f0] sm:$0x3] }
 0x576   : > { %v4393_v9 = vpack.c.bf16 %v4345_v13, %v4342_v37 }
 0x578   : > { %10761 = vmatprep.subr.msk.bf16.mxu1 %vm3800_vm9, %v4393_v9  ;;  %v12625_v9 = vld [vmem:[%s18551_s6] sm:$0xff]  }
 0x579   : > { %4487 = vmatpush1.bf16.msra.mxu1 %v4448_v38 }
 0x57a   : > { %11240 = vmatprep.subr.bf16.mxu1 %v4373_v5 }
 0x57c   : > { %4489 = vmatmul.mubr.bf16.vlgmr.msra.gmra.mrb[40].mxu1 %v15564_v2 }
 0x57d   : > { %11241 = vmatpush3.bf16.msra.mxu1 %v4349_v61  ;;  %10763 = vmatprep.mubr.msk.bf16.mxu1 %vm18544_vm6, %v15569_v22  ;;  %v12630_v61 = vld [vmem:[%s18551_s6 + $0x58] sm:$0xff]   ;;  %vm18556_vm6 = vmmov %vm18552_vm3 }
 0x57e   : > { %11242 = vmatprep.subr.bf16.mxu1 %v4376_v47 }
 0x581   : > { %11243 = vmatpush3.bf16.msra.mxu1 %v4352_v51 }
 0x582   : > { %11244 = vmatprep.subr.bf16.mxu1 %v4379_v17  ;;  %v12633_v17 = vld [vmem:[%s18551_s6 + $0x20] sm:$0xff]  }
 0x584   : > { %4499 = vmatmul.mubr.bf16.gmra.mrb[44].mxu1 %v12618_v50 }
 0x585   : > { %11245 = vmatpush3.bf16.msra.mxu1 %v4355_v4  ;;  %10764 = vmatprep.mubr.msk.bf16.mxu1 %vm18545_vm4, %v12619_v34  ;;  %v12635_v4 = vld [vmem:[%s18551_s6 + $0x28] sm:$0xff]   ;;  %vm18557_vm4 = vmmov %vm18554_vm13 }
 0x586   : > { %11246 = vmatprep.subr.bf16.mxu1 %v4382_v57 }
 0x589   : > { %11247 = vmatpush3.bf16.msra.mxu1 %v4358_v18 }
 0x58a   : > { %11248 = vmatprep.subr.bf16.mxu1 %v4385_v62  ;;  %v12637_v62 = vld [vmem:[%s18551_s6 + $0x30] sm:$0xff]  }
 0x58c   : > { %4509 = vmatmul.mubr.bf16.gmra.mrb[48].mxu1 %v12621_v63 }
 0x58d   : > { %11249 = vmatpush3.bf16.msra.mxu1 %v4361_v40  ;;  %10765 = vmatprep.mubr.msk.bf16.mxu1 %vm18546_vm1, %v10760_v30  ;;  %vm18558_vm1 = vmmov %vm18557_vm4 }
 0x58e   : > { %11250 = vmatprep.subr.bf16.mxu1 %v4388_v53 }
 0x591   : > { %11251 = vmatpush3.bf16.msra.mxu1 %v4364_v49 }
 0x592   : > { %11252 = vmatprep.subr.bf16.mxu1 %v4391_v29 }
 0x594   : > { %4519 = vmatmul.mubr.bf16.gmra.mrb[52].mxu1 %v10759_v43 }
 0x595   : > { %11253 = vmatpush3.bf16.msra.mxu1 %v4367_v1  ;;  %10766 = vmatprep.mubr.msk.bf16.mxu1 %vm18547_vm8, %v15416_v35  ;;  %v12624_v35 = vld [vmem:[%s18551_s6 + $0x40] sm:$0xff]   ;;  %vm18559_vm8 = vmmov %vm18558_vm1 }
 0x596   : > { %11892 = vmatprep.subr.msk.bf16.mxu1 %vm3800_vm9, %v4394_v45  ;;  %11280 = vmatprep.subr.bf16.mxu0 %v12624_v35  ;;  %vm5014_vm9 = vcmask 392192  }
 0x597   : > { %11281 = vmatpush3.bf16.msra.mxu0 %v12625_v9 }
 0x598   : > { %11282 = vmatprep.subr.bf16.mxu0 %v12626_v52 }
 0x599   : > { %11255 = vmatpush3.bf16.msra.mxu1 %v4370_v24 }
 0x59c   : > { %4560 = vmatmul.mubr.bf16.vlgmr.msra.gmra.mrb[56].mxu1 %v15564_v2  ;;  %v12627_v2 = vld [vmem:[%s18551_s6 + $0x8] sm:$0xff]  }
 0x59d   : > { %10767 = vmatprep.mubr.msk.bf16.mxu1 %vm18548_vm11, %v15569_v22  ;;  %v12628_v22 = vld [vmem:[%s18551_s6 + $0x50] sm:$0xff]   ;;  %11283 = vmatpush3.bf16.msra.mxu0 %v12627_v2  ;;  %v4861_v2 = vld [vmem:[%s18254_s5 + $0x18] sm:$0xff]  ;;  %vm18560_vm11 = vmmov %vm18552_vm3 }
 0x59e   : > { %11284 = vmatprep.subr.bf16.mxu0 %v12628_v22  ;;  %v4863_v22 = vld [vmem:[%s18254_s5 + $0x28] sm:$0xff] }
 0x5a1   : > { %11285 = vmatpush3.bf16.msra.mxu0 %v12629_v8  ;;  %v4858_v8 = vld [vmem:[%s18254_s5] sm:$0xff] }
 0x5a2   : > { %11286 = vmatprep.subr.bf16.mxu0 %v12630_v61  ;;  %v4859_v61 = vld [vmem:[%s18254_s5 + $0x8] sm:$0xff] }
 0x5a4   : > { %4568 = vmatmul.mubr.bf16.gmra.mrb[60].mxu1 %v12618_v50 }
 0x5a5   : > { %10768 = vmatprep.mubr.msk.bf16.mxu1 %vm18549_vm2, %v12619_v34  ;;  %11287 = vmatpush3.bf16.msra.mxu0 %v12631_v0  ;;  %v4864_v0 = vld [vmem:[%s18254_s5 + $0x30] sm:$0x3]  ;;  %vm18561_vm2 = vmmov %vm18552_vm3 }
 0x5a6   : > { %11288 = vmatprep.subr.bf16.mxu0 %v12632_v60 }
 0x5a9   : > { %11289 = vmatpush3.bf16.msra.mxu0 %v12633_v17 }
 0x5aa   : > { %11290 = vmatprep.subr.bf16.mxu0 %v12634_v23 }
 0x5ac   : > { %4576 = vmatmul.mubr.bf16.gmra.mrb[64].mxu1 %v12621_v63  ;;  %v12638_v63 = vld [vmem:[%s18551_s6 + $0x80] sm:$0xff]  }
 0x5ad   : > { %10769 = vmatprep.mubr.msk.bf16.mxu1 %vm18550_vm10, %v10760_v30  ;;  %11291 = vmatpush3.bf16.msra.mxu0 %v12635_v4  ;;  %vm18562_vm10 = vmmov %vm18561_vm2 }
 0x5ae   : > { %11292 = vmatprep.subr.bf16.mxu0 %v12636_v48  ;;  %11752 = vmatprep.subr.bf16.mxu1 %v12638_v63 }
 0x5af   : > { %11753 = vmatpush3.bf16.msra.mxu1 %v12638_v63 }
 0x5b0   : > { %11754 = vmatprep.subr.bf16.mxu1 %v12641_v33 }
 0x5b1   : > { %11293 = vmatpush3.bf16.msra.mxu0 %v12637_v62 }
 0x5b2   : > { %11294 = vmatprep.subr.bf16.mxu0 %v12639_v36 }
 0x5b3   : > { %11755 = vmatpush3.bf16.msra.mxu1 %v12641_v33 }
 0x5b4   : > { %4584 = vmatmul.mubr.bf16.gmra.mrb[68].mxu1 %v10759_v43  ;;  %11756 = vmatprep.subr.bf16.mxu1 %v12642_v32 }
 0x5b5   : > { %11295 = vmatpush3.bf16.msra.mxu0 %v12640_v54 }
 0x5b7   : > { %11757 = vmatpush3.bf16.msra.mxu1 %v12642_v32 }
 0x64f   : > { %v15596_v10 = vpop.f32.mrb[40].mxu1 }
 0x650   : > { %v15601_v14 = vpop.f32.mrb[41].mxu1 }
 0x651   : > { %v15603_v21 = vpop.f32.mrb[42].mxu1 }
 0x652   : > { %v12092_v37 = vpack.i.bf16 %v15603_v21, %v15596_v10  ;;  %v15607_v13 = vpop.f32.mrb[43].mxu1 }
 0x654   : > { %12093 = vrot.lane.b32.xlu0 %v12092_v37, %s18377_s16  ;;  %12088 = vrot.lane.b32.xlu1 %v12092_v37, %s18376_s24 }
 0x657   : > { %v15611_v26 = vpop.f32.mrb[44].mxu1 }
 0x658   : > { %v15619_v38 = vpop.f32.mrb[45].mxu1 }
 0x659   : > { %v15621_v5 = vpop.f32.mrb[46].mxu1 }
 0x65a   : > { %v12102_v16 = vpack.i.bf16 %v15621_v5, %v15611_v26  ;;  %v15628_v12 = vpop.f32.mrb[47].mxu1 }
 0x65c   : > { %12103 = vrot.lane.b32.xlu0 %v12102_v16, %s18377_s16  ;;  %12098 = vrot.lane.b32.xlu1 %v12102_v16, %s18376_s24  ;;  %v4862_v16 = vld [vmem:[%s18254_s5 + $0x20] sm:$0xff] }
 0x65f   : > { %v15641_v39 = vpop.f32.mrb[48].mxu1 }
 0x660   : > { %v15643_v47 = vpop.f32.mrb[49].mxu1 }
 0x661   : > { %v15645_v19 = vpop.f32.mrb[50].mxu1 }
 0x662   : > { %v15652_v7 = vpack.i.bf16 %v15645_v19, %v15641_v39  ;;  %v15654_v51 = vpop.f32.mrb[51].mxu1 }
 0x664   : > { %12108 = vrot.lane.b32.xlu1 %v15652_v7, %s18376_s24 }
 0x667   : > { %v15664_v50 = vpop.f32.mrb[52].mxu1 }
 0x668   : > { %v15666_v41 = vpop.f32.mrb[53].mxu1 }
 0x669   : > { %v4524_v42 = vpop.f32.mrb[54].mxu1 }
 0x66a   : > { %v4525_v34 = vpop.f32.mrb[55].mxu1 }
 0x66f   : > { %v11256_v55 = vpop.f32.mrb[56].mxu1 }
 0x670   : > { %v11257_v57 = vpop.f32.mrb[57].mxu1 }
 0x671   : > { %v15674_v59 = vadd.f32 %v11257_v57, %v11256_v55  ;;  %v11259_v25 = vpop.f32.mrb[58].mxu1 }
 0x672   : > { %v11260_v11 = vpop.f32.mrb[59].mxu1 }
 0x673   : > { %v12117_v27 = vpack.i.bf16 %v15674_v59, %v15601_v14  ;;  %v15678_v18 = vadd.f32 %v11260_v11, %v11259_v25 }
 0x675   : > { %12118 = vrot.lane.b32.xlu0 %v12117_v27, %s18377_s16  ;;  %12113 = vrot.lane.b32.xlu1 %v12117_v27, %s18376_s24  ;;  %v12127_v20 = vpack.i.bf16 %v15678_v18, %v15607_v13 }
 0x677   : > { %v11262_v30 = vpop.f32.mrb[60].mxu1 }
 0x678   : > { %v11263_v40 = vpop.f32.mrb[61].mxu1 }
 0x679   : > { %v15699_v6 = vadd.f32 %v11263_v40, %v11262_v30  ;;  %v11265_v53 = vpop.f32.mrb[62].mxu1  ;;  %12123 = vrot.lane.b32.xlu0 %v12127_v20, %s18376_s24  ;;  %12128 = vrot.lane.b32.xlu1 %v12127_v20, %s18377_s16 }
 0x67a   : > { %v11266_v58 = vpop.f32.mrb[63].mxu1 }
 0x67b   : > { %v12137_v46 = vpack.i.bf16 %v15699_v6, %v15619_v38  ;;  %v15708_v49 = vadd.f32 %v11266_v58, %v11265_v53 }
 0x67d   : > { %12138 = vrot.lane.b32.xlu0 %v12137_v46, %s18377_s16  ;;  %12133 = vrot.lane.b32.xlu1 %v12137_v46, %s18376_s24  ;;  %v12147_v29 = vpack.i.bf16 %v15708_v49, %v15628_v12 }
 0x67f   : > { %v11268_v43 = vpop.f32.mrb[64].mxu1 }
 0x680   : > { %v11269_v28 = vpop.f32.mrb[65].mxu1 }
 0x681   : > { %v15717_v15 = vadd.f32 %v11269_v28, %v11268_v43  ;;  %v11271_v44 = vpop.f32.mrb[66].mxu1  ;;  %12143 = vrot.lane.b32.xlu0 %v12147_v29, %s18376_s24  ;;  %12148 = vrot.lane.b32.xlu1 %v12147_v29, %s18377_s16 }
 0x682   : > { %v11272_v1 = vpop.f32.mrb[67].mxu1 }
 0x683   : > { %v12157_v3 = vpack.i.bf16 %v15717_v15, %v15643_v47  ;;  %v15723_v45 = vadd.f32 %v11272_v1, %v11271_v44 }
 0x685   : > { %12158 = vrot.lane.b32.xlu0 %v12157_v3, %s18377_s16  ;;  %12153 = vrot.lane.b32.xlu1 %v12157_v3, %s18376_s24  ;;  %v12172_v56 = vpack.i.bf16 %v15723_v45, %v15654_v51 }
 0x687   : > { %v11274_v31 = vpop.f32.mrb[68].mxu1 }
 0x688   : > { %v11275_v24 = vpop.f32.mrb[69].mxu1 }
 0x689   : > { %v15729_v35 = vadd.f32 %v11275_v24, %v11274_v31  ;;  %12163 = vrot.lane.b32.xlu0 %v12172_v56, %s18376_s24  ;;  %12173 = vrot.lane.b32.xlu1 %v12172_v56, %s18377_s16  ;;  %v11277_v37 = vpop.f32.mrb[70].mxu1 }
 0x68a   : > { %v11278_v9 = vpop.f32.mrb[71].mxu1 }
 0x68b   : > { %v12177_v52 = vpack.i.bf16 %v15729_v35, %v15666_v41 }
 0x68d   : > { %12168 = vrot.lane.b32.xlu0 %v15652_v7, %s18377_s16  ;;  %12178 = vrot.lane.b32.xlu1 %v12177_v52, %s18376_s24  ;;  %v4860_v7 = vld [vmem:[%s18254_s5 + $0x10] sm:$0xff] }
 0x691   : > { %4648 = vrot.lane.b32.xlu0 %v15664_v50, %s18376_s24  ;;  %12183 = vrot.lane.b32.xlu1 %v12177_v52, %s18377_s16 }
 0x695   : > { %4746 = vrot.lane.b32.xlu0 %v15664_v50, %s18377_s16  ;;  %4882 = vperm.xlu1 %12086, %v4861_v2  }
 0x699   : > { %4887 = vperm.xlu0 %12085, %v4862_v16   ;;  %4892 = vperm.xlu1 %12086, %v4863_v22  }
 0x69d   : > { %4867 = vperm.xlu0 %12085, %v4858_v8   ;;  %4872 = vperm.xlu1 %12086, %v4859_v61  }
 0x6a1   : > { %4897 = vperm.xlu0 %12085, %v4864_v0   ;;  %4877 = vperm.xlu1 %12086, %v4860_v7  }
 0x6c6   : > { %v12089_v60 = vpop.permute.xlu1 %12088  ;;  %v12094_v17 = vpop.permute.xlu0 %12093 }
 0x6c7   : > { %v12090_v57 = vunpack.i.l.bf16 %v12089_v60  ;;  %v12096_v27 = vunpack.i.h.bf16 %v12094_v17  ;;  %v12095_v62 = vunpack.i.l.bf16 %v12094_v17  ;;  %v12091_v30 = vunpack.i.h.bf16 %v12089_v60 }
 0x6ce   : > { %v15764_v42 = vpop.permute.xlu1 %12098  ;;  %v15766_v34 = vpop.permute.xlu0 %12103 }
 0x6cf   : > { %v12106_v54 = vunpack.i.h.bf16 %v15766_v34  ;;  %v12105_v46 = vunpack.i.l.bf16 %v15766_v34  ;;  %v12101_v28 = vunpack.i.h.bf16 %v15764_v42  ;;  %v12100_v17 = vunpack.i.l.bf16 %v15764_v42 }
 0x6d6   : > { %v15768_v23 = vpop.permute.xlu1 %12108 }
 0x6d7   : > { %v12111_v42 = vunpack.i.h.bf16 %v15768_v23 }
 0x6e7   : > { %v12119_v4 = vpop.permute.xlu0 %12118  ;;  %v12114_v55 = vpop.permute.xlu1 %12113 }
 0x6e8   : > { %v12116_v25 = vunpack.i.h.bf16 %v12114_v55  ;;  %v12115_v11 = vunpack.i.l.bf16 %v12114_v55  ;;  %v12120_v48 = vunpack.i.l.bf16 %v12119_v4  ;;  %v12121_v63 = vunpack.i.h.bf16 %v12119_v4 }
 0x6ea   : > { %v4654_v36 = vsel %vm18552_vm3, %v12090_v57, %v12115_v11  ;;  %v4655_v20 = vsel %vm18553_vm12, %v12115_v11, %v12116_v25  ;;  %v4691_v40 = vmax.f32 %v15674_v59, %v12116_v25  ;;  %v4752_v44 = vsel %vm18554_vm13, %v12095_v62, %v12120_v48  ;;  %vm18563_vm3 = vmmov %vm18561_vm2 }
 0x6eb   : > { %v4689_v53 = vmax.f32 %v15596_v10, %v4654_v36  ;;  %v12124_v58 = vpop.permute.xlu0 %12123  ;;  %v12129_v33 = vpop.permute.xlu1 %12128  ;;  %v4690_v3 = vmax.f32 %v15601_v14, %v4655_v20  ;;  %v4753_v31 = vsel %vm18557_vm4, %v12120_v48, %v12121_v63  ;;  %vm18564_vm12 = vmmov %vm18558_vm1 }
 0x6ec   : > { %v12126_v32 = vunpack.i.h.bf16 %v12124_v58  ;;  %v12125_v29 = vunpack.i.l.bf16 %v12124_v58  ;;  %v12131_v43 = vunpack.i.h.bf16 %v12129_v33  ;;  %v12130_v1 = vunpack.i.l.bf16 %v12129_v33  ;;  %vm18565_vm13 = vmmov %vm18558_vm1 }
 0x6ed   : > { %v4789_v24 = vmax.f32 %v4691_v40, %v12121_v63  ;;  %v4787_v37 = vmax.f32 %v4689_v53, %v4752_v44  ;;  %v4788_v7 = vmax.f32 %v4690_v3, %v4753_v31  ;;  %vm18568_vm4 = vmmov %vm18561_vm2 }
 0x6ee   : > { %v4694_v56 = vmax.f32 %v15678_v18, %v12126_v32  ;;  %v4656_v59 = vsel %vm18555_vm5, %v12091_v30, %v12125_v29  ;;  %v4657_v10 = vsel %vm18556_vm6, %v12125_v29, %v12126_v32  ;;  %v4754_v8 = vsel %vm18558_vm1, %v12096_v27, %v12130_v1  ;;  %vm18566_vm5 = vmmov %vm18558_vm1 }
 0x6ef   : > { %v4692_v9 = vmax.f32 %v15603_v21, %v4656_v59  ;;  %v12139_v52 = vpop.permute.xlu0 %12138  ;;  %v12134_v2 = vpop.permute.xlu1 %12133  ;;  %v4693_v16 = vmax.f32 %v15607_v13, %v4657_v10  ;;  %v4755_v18 = vsel %vm18559_vm8, %v12130_v1, %v12131_v43  ;;  %v12110_v30 = vunpack.i.l.bf16 %v15768_v23  ;;  %vm18567_vm6 = vmmov %vm18558_vm1 }
 0x6f0   : > { %v4792_v22 = vmax.f32 %v4694_v56, %v12131_v43  ;;  %v12136_v14 = vunpack.i.h.bf16 %v12134_v2  ;;  %v12135_v0 = vunpack.i.l.bf16 %v12134_v2  ;;  %v12141_v4 = vunpack.i.h.bf16 %v12139_v52  ;;  %vm18569_vm1 = vmmov %vm18561_vm2 }
 0x6f1   : > { %v4790_v61 = vmax.f32 %v4692_v9, %v4754_v8  ;;  %v4791_v60 = vmax.f32 %v4693_v16, %v4755_v18  ;;  %v12140_v55 = vunpack.i.l.bf16 %v12139_v52  ;;  %vm18570_vm8 = vmmov %vm18569_vm1 }
 0x6f2   : > { %v4810_v57 = vpack.c.bf16 %v4792_v22, %v4789_v24  ;;  %v4697_v25 = vmax.f32 %v15699_v6, %v12136_v14  ;;  %v4659_v13 = vsel %vm18560_vm11, %v12135_v0, %v12136_v14  ;;  %v4658_v62 = vsel %vm18561_vm2, %v12100_v17, %v12135_v0  ;;  %vm18571_vm11 = vmmov %vm18569_vm1 }
 0x6f3   : > { %v4808_v21 = vpack.c.bf16 %v4790_v61, %v4787_v37  ;;  %v12144_v11 = vpop.permute.xlu0 %12143  ;;  %v12149_v48 = vpop.permute.xlu1 %12148  ;;  %v4809_v27 = vpack.c.bf16 %v4791_v60, %v4788_v7  ;;  %v4696_v6 = vmax.f32 %v15619_v38, %v4659_v13  ;;  %v4757_v32 = vsel %vm18564_vm12, %v12140_v55, %v12141_v4  ;;  %vm18572_vm2 = vmmov %vm18566_vm5 }
 0x6f4   : > { %v12146_v63 = vunpack.i.h.bf16 %v12144_v11  ;;  %v12145_v36 = vunpack.i.l.bf16 %v12144_v11  ;;  %v12151_v20 = vunpack.i.h.bf16 %v12149_v48  ;;  %11758 = vmatprep.mubr.msk.bf16.mxu1 %vm5014_vm9, %v4810_v57  ;;  %v12150_v40 = vunpack.i.l.bf16 %v12149_v48  ;;  %vm18575_vm12 = vmmov %vm18572_vm2 }
 0x6f5   : > { %5059 = vmatprep.mubr.bf16.mxu0 %v4809_v27  ;;  %v4695_v1 = vmax.f32 %v15611_v26, %v4658_v62  ;;  %v4756_v3 = vsel %vm18565_vm13, %v12105_v46, %v12140_v55  ;;  %v4795_v38 = vmax.f32 %v4697_v25, %v12141_v4  ;;  %v4794_v10 = vmax.f32 %v4696_v6, %v4757_v32  ;;  %vm18576_vm13 = vmmov %vm18569_vm1 }
 0x6f6   : > { %v4700_v53 = vmax.f32 %v15708_v49, %v12146_v63  ;;  %v4660_v58 = vsel %vm18562_vm10, %v12101_v28, %v12145_v36  ;;  %v4661_v33 = vsel %vm18563_vm3, %v12145_v36, %v12146_v63  ;;  %5060 = vmatmul.mubr.bf16.vlgmr.msra.gmra.mrb[32].mxu0 %v4808_v21  ;;  %v4759_v28 = vsel %vm18566_vm5, %v12150_v40, %v12151_v20  ;;  %vm18573_vm10 = vmmov %vm18572_vm2 }
 0x6f7   : > { %v12159_v29 = vpop.permute.xlu0 %12158  ;;  %v12154_v43 = vpop.permute.xlu1 %12153  ;;  %v4699_v44 = vmax.f32 %v15628_v12, %v4661_v33  ;;  %v4698_v23 = vmax.f32 %v15621_v5, %v4660_v58  ;;  %v4758_v24 = vsel %vm18567_vm6, %v12106_v54, %v12150_v40  ;;  %v4793_v22 = vmax.f32 %v4695_v1, %v4756_v3  ;;  %vm18574_vm3 = vmmov %vm18572_vm2 }
 0x6f8   : > { %v4798_v56 = vmax.f32 %v4700_v53, %v12151_v20  ;;  %v12156_v49 = vunpack.i.h.bf16 %v12154_v43  ;;  %v12155_v59 = vunpack.i.l.bf16 %v12154_v43  ;;  %v12161_v12 = vunpack.i.h.bf16 %v12159_v29  ;;  %vm18577_vm5 = vmmov %vm18569_vm1 }
 0x6f9   : > { %v4797_v31 = vmax.f32 %v4699_v44, %v4759_v28  ;;  %v12160_v9 = vunpack.i.l.bf16 %v12159_v29  ;;  %v4796_v26 = vmax.f32 %v4698_v23, %v4758_v24  ;;  %vm18578_vm6 = vmmov %vm18572_vm2 }
 0x6fa   : > { %v4813_v37 = vpack.c.bf16 %v4798_v56, %v4795_v38  ;;  %v4703_v5 = vmax.f32 %v15717_v15, %v12156_v49  ;;  %v4663_v46 = vsel %vm18568_vm4, %v12155_v59, %v12156_v49  ;;  %v4662_v8 = vsel %vm18569_vm1, %v12110_v30, %v12155_v59  ;;  %vm18579_vm4 = vmmov %vm18572_vm2 }
 0x6fb   : > { %v12164_v52 = vpop.permute.xlu0 %12163  ;;  %v12174_v2 = vpop.permute.xlu1 %12173  ;;  %v4812_v16 = vpack.c.bf16 %v4797_v31, %v4794_v10  ;;  %v4811_v54 = vpack.c.bf16 %v4796_v26, %v4793_v22  ;;  %v4702_v0 = vmax.f32 %v15643_v47, %v4663_v46  ;;  %v4761_v17 = vsel %vm18572_vm2, %v12160_v9, %v12161_v12 }
 0x6fc   : > { %v12166_v14 = vunpack.i.h.bf16 %v12164_v52  ;;  %v12165_v18 = vunpack.i.l.bf16 %v12164_v52  ;;  %v12176_v61 = vunpack.i.h.bf16 %v12174_v2  ;;  %11759 = vmatmul.mubr.msk.bf16.vlgmr.msra.gmra.mrb[72].mxu1 %vm5014_vm9, %v4813_v37  ;;  %v12175_v34 = vunpack.i.l.bf16 %v12174_v2 }
 0x6fd   : > { %5067 = vmatprep.mubr.bf16.mxu0 %v4812_v16  ;;  %v4801_v4 = vmax.f32 %v4703_v5, %v12161_v12  ;;  %v4701_v13 = vmax.f32 %v15641_v39, %v4662_v8  ;;  %v4800_v62 = vmax.f32 %v4702_v0, %v4761_v17  ;;  %vm5226_vm1 = vcmask 338944  }
 0x6fe   : > { %v4706_v15 = vmax.f32 %v15723_v45, %v12166_v14  ;;  %v4664_v7 = vsel %vm18570_vm8, %v12111_v42, %v12165_v18  ;;  %v4665_v60 = vsel %vm18571_vm11, %v12165_v18, %v12166_v14  ;;  %5068 = vmatmul.mubr.bf16.gmra.mrb[36].mxu0 %v4811_v54  ;;  %v4763_v25 = vsel %vm18573_vm10, %v12175_v34, %v12176_v61 }
 0x6ff   : > { %v12169_v55 = vpop.permute.xlu0 %12168  ;;  %v12179_v57 = vpop.permute.xlu1 %12178  ;;  %v4705_v21 = vmax.f32 %v15654_v51, %v4665_v60  ;;  %v4704_v36 = vmax.f32 %v15645_v19, %v4664_v7  ;;  %vm5266_vm8 = vcmask 1044484   ;;  %vm5430_vm2 = vcmask 1046532  }
 0x700   : > { %v4804_v11 = vmax.f32 %v4706_v15, %v12176_v61  ;;  %v12171_v47 = vunpack.i.h.bf16 %v12169_v55  ;;  %v12170_v48 = vunpack.i.l.bf16 %v12169_v55  ;;  %v12181_v45 = vunpack.i.h.bf16 %v12179_v57 }
 0x701   : > { %v12180_v27 = vunpack.i.l.bf16 %v12179_v57  ;;  %v4803_v63 = vmax.f32 %v4705_v21, %v4763_v25  ;;  %vm5348_vm10 = vcmask 1045508  }
 0x702   : > { %v4816_v20 = vpack.c.bf16 %v4804_v11, %v4801_v4  ;;  %v4760_v42 = vsel %vm18574_vm3, %v12170_v48, %v12160_v9  ;;  %v4762_v30 = vsel %vm18575_vm12, %v12171_v47, %v12175_v34  ;;  %v4709_v33 = vmax.f32 %v15729_v35, %v12181_v45  ;;  %vm15857_vm12 = vmor %vm3394_vm15, %vm5266_vm8 }
 0x703   : > { %v4649_v40 = vpop.permute.xlu0 %4648  ;;  %v12184_v51 = vpop.permute.xlu1 %12183  ;;  %v4815_v6 = vpack.c.bf16 %v4803_v63, %v4800_v62  ;;  %v4799_v53 = vmax.f32 %v4701_v13, %v4760_v42  ;;  %v4802_v58 = vmax.f32 %v4704_v36, %v4762_v30  ;;  %v4667_v39 = vsel %vm18576_vm13, %v12180_v27, %v12181_v45  ;;  %vm15864_vm13 = vmor %vm3596_vm0, %vm5430_vm2 }
 0x704   : > { %v4666_v32 = vsel %vm18577_vm5, %v4649_v40, %v12180_v27  ;;  %v12186_v29 = vunpack.i.h.bf16 %v12184_v51  ;;  %v12185_v43 = vunpack.i.l.bf16 %v12184_v51  ;;  %11762 = vmatprep.mubr.msk.bf16.mxu1 %vm5014_vm9, %v4816_v20  ;;  %v4708_v44 = vmax.f32 %v15666_v41, %v4667_v39  ;;  %vm15876_vm5 = vmor %vm3495_vm14, %vm5348_vm10 }
 0x705   : > { %5075 = vmatprep.mubr.bf16.mxu0 %v4815_v6  ;;  %v4814_v19 = vpack.c.bf16 %v4802_v58, %v4799_v53  ;;  %v4707_v3 = vmax.f32 %v15664_v50, %v4666_v32  ;;  %vm5233_vm8 = vcmask 335872   ;;  %vm5472_vm2 = vcmask 338947  }
 0x706   : > { %v4807_v1 = vmax.f32 %v4709_v33, %v12186_v29  ;;  %v4765_v23 = vsel %vm18578_vm6, %v12185_v43, %v12186_v29  ;;  %vm5501_vm10 = vcmask 683347  }
 0x707   : > { %v4747_v38 = vpop.permute.xlu0 %4746  ;;  %5076 = vmatmul.mubr.bf16.gmra.mrb[40].mxu0 %v4814_v19  ;;  %v4806_v56 = vmax.f32 %v4708_v44, %v4765_v23 }
 0x708   : > { %v4819_v49 = vpack.c.bf16 %v4807_v1, %v4807_v1  ;;  %v4764_v35 = vsel %vm18579_vm4, %v4747_v38, %v12185_v43 }
 0x709   : > { %v4805_v28 = vmax.f32 %v4707_v3, %v4764_v35  ;;  %v4818_v59 = vpack.c.bf16 %v4806_v56, %v4806_v56 }
 0x70a   : > { %11763 = vmatmul.mubr.msk.bf16.gmra.mrb[76].mxu1 %vm5014_vm9, %v4819_v49 }
 0x70b   : > { %5083 = vmatprep.mubr.bf16.mxu0 %v4818_v59  ;;  %v4817_v10 = vpack.c.bf16 %v4805_v28, %v4805_v28 }
 0x70f   : > { %5084 = vmatmul.mubr.bf16.gmra.mrb[44].mxu0 %v4817_v10 }
 0x714   : > { %v4883_v31 = vpop.permute.xlu1 %4882 }
 0x718   : > { %v4888_v41 = vpop.permute.xlu0 %4887  ;;  %v4893_v24 = vpop.permute.xlu1 %4892 }
 0x71c   : > { %v4868_v46 = vpop.permute.xlu0 %4867  ;;  %v4873_v52 = vpop.permute.xlu1 %4872 }
 0x720   : > { %v4878_v17 = vpop.permute.xlu1 %4877 }
 0x7c9   : > { %v11296_v37 = vpop.f32.mrb[32].mxu0 }
 0x7ca   : > { %v11297_v12 = vpop.f32.mrb[33].mxu0 }
 0x7cb   : > { %v11298_v9 = vadd.f32 %v11297_v12, %v11296_v37  ;;  %v11299_v50 = vpop.f32.mrb[34].mxu0 }
 0x7cc   : > { %v11300_v26 = vpop.f32.mrb[35].mxu0 }
 0x7cd   : > { %v11301_v5 = vadd.f32 %v11300_v26, %v11299_v50  ;;  %v5062_v16 = vadd.f32 %v11298_v9, %v4868_v46 }
 0x7cf   : > { %v11760_v2 = vpop.f32.mrb[72].mxu1  ;;  %v5065_v18 = vadd.f32 %v11301_v5, %v4873_v52 }
 0x7d0   : > { %v5125_v22 = vpop.f32.mrb[73].mxu1 }
 0x7d1   : > { %v5126_v8 = vadd.f32 %v5125_v22, %v5062_v16  ;;  %v11761_v14 = vpop.f32.mrb[74].mxu1  ;;  %v11302_v61 = vpop.f32.mrb[36].mxu0 }
 0x7d2   : > { %v5128_v34 = vpop.f32.mrb[75].mxu1  ;;  %v11303_v0 = vpop.f32.mrb[37].mxu0 }
 0x7d3   : > { %v5162_v54 = vmin.f32 %v5126_v8, 0.0  ;;  %v5129_v15 = vadd.f32 %v5128_v34, %v5065_v18  ;;  %v11304_v7 = vadd.f32 %v11303_v0, %v11302_v61  ;;  %v11305_v60 = vpop.f32.mrb[38].mxu0  ;;  %vm5155_vm9 = vcmp.gt.f32.partialorder %v5126_v8, 0.0 }
 0x7d4   : > { %v11306_v57 = vpop.f32.mrb[39].mxu0 }
 0x7d5   : > { %v5169_v4 = vmul.f32 1.442695, %v5162_v54  ;;  %v5163_v55 = vmin.f32 %v5129_v15, 0.0  ;;  %v5070_v21 = vadd.f32 %v11304_v7, %v4878_v17  ;;  %v11307_v25 = vadd.f32 %v11306_v57, %v11305_v60 }
 0x7d6   : > { %vm5156_vm11 = vcmp.gt.f32.partialorder %v5129_v15, 0.0 }
 0x7d7   : > { %12816 = vpow2.f32 %v5169_v4  ;;  %v5171_v13 = vmul.f32 1.442695, %v5163_v55  ;;  %v15831_v11 = vadd.f32 %v11760_v2, %v5070_v21  ;;  %v5073_v47 = vadd.f32 %v11307_v25, %v4883_v31 }
 0x7d9   : > { %12818 = vpow2.f32 %v5171_v13  ;;  %v5164_v48 = vmin.f32 %v15831_v11, 0.0  ;;  %v15834_v45 = vadd.f32 %v11761_v14, %v5073_v47  ;;  %vm5157_vm3 = vcmp.gt.f32.partialorder %v15831_v11, 0.0 }
 0x7da   : > { %v11308_v27 = vpop.f32.mrb[40].mxu0 }
 0x7db   : > { %v11309_v62 = vpop.f32.mrb[41].mxu0  ;;  %v5173_v63 = vmul.f32 1.442695, %v5164_v48  ;;  %v5165_v36 = vmin.f32 %v15834_v45, 0.0  ;;  %vm5158_vm0 = vcmp.gt.f32.partialorder %v15834_v45, 0.0 }
 0x7dc   : > { %v11310_v20 = vadd.f32 %v11309_v62, %v11308_v27  ;;  %v11311_v42 = vpop.f32.mrb[42].mxu0 }
 0x7dd   : > { %v11312_v30 = vpop.f32.mrb[43].mxu0  ;;  %v11764_v40 = vpop.f32.mrb[76].mxu1  ;;  %12820 = vpow2.f32 %v5173_v63  ;;  %v5175_v51 = vmul.f32 1.442695, %v5165_v36 }
 0x7de   : > { %v11313_v6 = vadd.f32 %v11312_v30, %v11311_v42  ;;  %v5078_v53 = vadd.f32 %v11310_v20, %v4888_v41  ;;  %v5141_v58 = vpop.f32.mrb[77].mxu1 }
 0x7df   : > { %v11765_v39 = vpop.f32.mrb[78].mxu1  ;;  %12822 = vpow2.f32 %v5175_v51 }
 0x7e0   : > { %v15837_v33 = vadd.f32 %v5141_v58, %v5078_v53  ;;  %v5081_v32 = vadd.f32 %v11313_v6, %v4893_v24  ;;  %v5144_v29 = vpop.f32.mrb[79].mxu1  ;;  %v4898_v24 = vpop.permute.xlu0 %4897 }
 0x7e1   : > { %v12817_v43 = vpop.eup %12816 }
 0x7e2   : > { %v10793_v19 = vadd.f32 -1.0, %v12817_v43  ;;  %v5166_v44 = vmin.f32 %v15837_v33, 0.0  ;;  %v15840_v1 = vadd.f32 %v5144_v29, %v5081_v32  ;;  %v11314_v23 = vpop.f32.mrb[44].mxu0  ;;  %vm5159_vm6 = vcmp.gt.f32.partialorder %v15837_v33, 0.0 }
 0x7e3   : > { %v12819_v3 = vpop.eup %12818  ;;  %v11315_v38 = vpop.f32.mrb[45].mxu0 }
 0x7e4   : > { %v5190_v56 = vsel %vm5155_vm9, %v5126_v8, %v10793_v19  ;;  %v10794_v49 = vadd.f32 -1.0, %v12819_v3  ;;  %v5177_v35 = vmul.f32 1.442695, %v5166_v44  ;;  %v11317_v28 = vpop.f32.mrb[46].mxu0  ;;  %v5167_v10 = vmin.f32 %v15840_v1, 0.0 }
 0x7e5   : > { %v11136_v59 = vpack.c.bf16 %v5190_v56, %v5190_v56  ;;  %v11316_v31 = vadd.f32 %v11315_v38, %v11314_v23  ;;  %v11318_v41 = vpop.f32.mrb[47].mxu0  ;;  %vm5160_vm4 = vcmp.gt.f32.partialorder %v15840_v1, 0.0 }
 0x7e6   : > { %v5191_v37 = vsel %vm5156_vm11, %v5129_v15, %v10794_v49  ;;  %12824 = vpow2.f32 %v5177_v35  ;;  %v5179_v9 = vmul.f32 1.442695, %v5167_v10  ;;  %vm5256_vm11 = vcmask 683344  }
 0x7e7   : > { %v15843_v12 = vpack.c.bf16 %v5191_v37, %v5191_v37  ;;  %v5086_v50 = vadd.f32 %v11316_v31, %v4898_v24  ;;  %5733 = vrot.lane.b32.xlu1 %v11136_v59, %s18434_s0  ;;  %5235 = vrot.lane.b32.xlu0 %v11136_v59, %s18439_s15  ;;  %v15847_v26 = vrot.slane %v11136_v59, 5  ;;  %5227 = vst.msk [vmem:[#allocation4] sm:$0xf] %vm5226_vm1, %v11136_v59  ;;  %v12821_v5 = vpop.eup %12820  ;;  %v15851_v46 = vrot.slane %v11136_v59, 6 }
 0x7e8   : > { %v15853_v52 = vrot.slane %v11136_v59, 7  ;;  %v10795_v16 = vadd.f32 -1.0, %v12821_v5  ;;  %12826 = vpow2.f32 %v5179_v9 }
 0x7e9   : > { %v5150_v22 = vadd.f32 %v11764_v40, %v5086_v50  ;;  %v5270_v8 = vrot.slane %v15843_v12, 7  ;;  %5228 = vst.msk [vmem:[#allocation4 + $0x4] sm:$0xf] %vm5226_vm1, %v15843_v12  ;;  %v12823_v18 = vpop.eup %12822  ;;  %v5433_v34 = vrot.slane %v15847_v26, 4  ;;  %v5434_v54 = vrot.slane %v15843_v12, 5 }
 0x7ea   : > { %v5269_v61 = vrot.slane %v15853_v52, 4  ;;  %v5351_v0 = vrot.slane %v15851_v46, 4  ;;  %v5192_v7 = vsel %vm5157_vm3, %v15831_v11, %v10795_v16  ;;  %v10796_v60 = vadd.f32 -1.0, %v12823_v18 }
 0x7eb   : > { %v5168_v17 = vmin.f32 %v5150_v22, 0.0  ;;  %5537 = vrot.lane.b32.xlu1 %v11136_v59, %s18426_s23  ;;  %5761 = vrot.lane.b32.xlu0 %v11136_v59, %s18430_s17  ;;  %v15886_v4 = vpack.c.bf16 %v5192_v7, %v5192_v7  ;;  %v5435_v57 = vsel %vm15864_vm13, %v5433_v34, %v5434_v54  ;;  %v5352_v21 = vrot.slane %v15843_v12, 6 }
 0x7ec   : > { %v5271_v55 = vsel %vm15857_vm12, %v5269_v61, %v5270_v8  ;;  %v5193_v25 = vsel %vm5158_vm0, %v15834_v45, %v10796_v60  ;;  %vm5161_vm9 = vcmp.gt.f32.partialorder %v5150_v22, 0.0  ;;  %v5272_v39 = vrot.slane %v5270_v8, 4 }
 0x7ed   : > { %v5181_v13 = vmul.f32 1.442695, %v5168_v17  ;;  %v15898_v11 = vpack.c.bf16 %v5193_v25, %v5193_v25  ;;  %v5353_v47 = vsel %vm15876_vm5, %v5351_v0, %v5352_v21  ;;  %5229 = vst.msk [vmem:[#allocation4 + $0x8] sm:$0xf] %vm5226_vm1, %v15886_v4  ;;  %v5273_v53 = vrot.slane %v15886_v4, 7 }
 0x7ee   : > { %v5437_v58 = vrot.slane %v15886_v4, 5  ;;  %v5355_v43 = vrot.slane %v15886_v4, 6  ;;  %v5354_v19 = vrot.slane %v5352_v21, 4  ;;  %vm5390_vm3 = vcmask 338946  }
 0x7ef   : > { %12828 = vpow2.f32 %v5181_v13  ;;  %5237 = vrot.lane.b32.xlu1 %v15843_v12, %s18439_s15  ;;  %5509 = vrot.lane.b32.xlu0 %v11136_v59, %s18432_s28  ;;  %5230 = vst.msk [vmem:[#allocation4 + $0xc] sm:$0xf] %vm5226_vm1, %v15898_v11  ;;  %v5274_v32 = vsel %vm15857_vm12, %v5272_v39, %v5273_v53  ;;  %v5275_v3 = vrot.slane %v5273_v53, 4  ;;  %v5276_v38 = vrot.slane %v15898_v11, 7 }
 0x7f0   : > { %v12825_v48 = vpop.eup %12824  ;;  %v16016_v44 = vsel %vm15876_vm5, %v5354_v19, %v5355_v43  ;;  %v5439_v28 = vrot.slane %v5437_v58, 4  ;;  %v5440_v59 = vrot.slane %v15898_v11, 5  ;;  %v5357_v24 = vrot.slane %v5355_v43, 4 }
 0x7f1   : > { %v10797_v45 = vadd.f32 -1.0, %v12825_v48  ;;  %v5277_v35 = vsel %vm15857_vm12, %v5275_v3, %v5276_v38  ;;  %v5358_v37 = vrot.slane %v15898_v11, 6  ;;  %vm5420_vm0 = vcmask 683346  }
 0x7f2   : > { %v12827_v27 = vpop.eup %12826  ;;  %v16046_v41 = vsel %vm15864_vm13, %v5439_v28, %v5440_v59  ;;  %v5278_v48 = vrot.slane %v5276_v38, 4 }
 0x7f3   : > { %v5194_v62 = vsel %vm5159_vm6, %v15837_v33, %v10797_v45  ;;  %5735 = vrot.lane.b32.xlu0 %v15843_v12, %s18434_s0  ;;  %5451 = vrot.lane.b32.xlu1 %v15847_v26, %s18436_s2  ;;  %v10798_v36 = vadd.f32 -1.0, %v12827_v27  ;;  %v5436_v33 = vrot.slane %v5434_v54, 4  ;;  %v16059_v50 = vsel %vm15876_vm5, %v5357_v24, %v5358_v37 }
 0x7f4   : > { %v15917_v63 = vpack.c.bf16 %v5194_v62, %v5194_v62  ;;  %vm5308_vm6 = vcmask 338945  }
 0x7f5   : > { %v5195_v20 = vsel %vm5160_vm4, %v15840_v1, %v10798_v36  ;;  %v5438_v29 = vsel %vm15864_vm13, %v5436_v33, %v5437_v58  ;;  %vm5338_vm4 = vcmask 683345  }
 0x7f6   : > { %5231 = vst.msk [vmem:[#allocation4 + $0x10] sm:$0xf] %vm5226_vm1, %v15917_v63  ;;  %v15923_v42 = vpack.c.bf16 %v5195_v20, %v5195_v20  ;;  %v5443_v36 = vrot.slane %v15917_v63, 5  ;;  %v5442_v20 = vrot.slane %v5440_v59, 4 }
 0x7f7   : > { %5480 = vrot.lane.b32.xlu0 %v15847_v26, %s18425_s29  ;;  %5763 = vrot.lane.b32.xlu1 %v15843_v12, %s18430_s17 }
 0x7f8   : > { %5232 = vst.msk [vmem:[#allocation4 + $0x14] sm:$0xf] %vm5226_vm1, %v15923_v42  ;;  %v5446_v3 = vrot.slane %v15923_v42, 5  ;;  %v5282_v28 = vrot.slane %v15923_v42, 7 }
 0x7f9   : > { %v12829_v30 = vpop.eup %12828 }
 0x7fa   : > { %v10799_v40 = vadd.f32 -1.0, %v12829_v30 }
 0x7fb   : > { %5649 = vrot.lane.b32.xlu1 %v15851_v46, %s18428_s21  ;;  %5621 = vrot.lane.b32.xlu0 %v15851_v46, %s18433_s25 }
 0x7fc   : > { %v5196_v51 = vsel %vm5161_vm9, %v5150_v22, %v10799_v40  ;;  %vm5397_vm9 = vcmask 337920  }
 0x7fd   : > { %v15935_v6 = vpack.c.bf16 %v5196_v51, %v5196_v51  ;;  %v16134_v51 = vsel %vm15864_vm13, %v5442_v20, %v5443_v36 }
 0x7ff   : > { %5317 = vrot.lane.b32.xlu1 %v15853_v52, %s18435_s1  ;;  %5287 = vrot.lane.b32.xlu0 %v15853_v52, %s18376_s24  ;;  %5234 = vst.msk [vmem:[#allocation4 + $0x18] sm:$0x1] %vm5233_vm8, %v15935_v6 }
 0x803   : > { %5817 = vrot.lane.b32.xlu1 %v15853_v52, %s18424_s20  ;;  %5789 = vrot.lane.b32.xlu0 %v15853_v52, %s18439_s15 }
 0x807   : > { %5511 = vrot.lane.b32.xlu1 %v15843_v12, %s18432_s28  ;;  %5705 = vrot.lane.b32.xlu0 %v15847_v26, %s18429_s22 }
 0x80b   : > { %5539 = vrot.lane.b32.xlu1 %v15843_v12, %s18426_s23  ;;  %5369 = vrot.lane.b32.xlu0 %v15851_v46, %s18377_s16 }
 0x80f   : > { %5677 = vrot.lane.b32.xlu1 %v15847_v26, %s18438_s18  ;;  %5567 = vrot.lane.b32.xlu0 %v5271_v55, %s18437_s3 }
 0x813   : > { %5399 = vrot.lane.b32.xlu1 %v15851_v46, %s18373_s30  ;;  %5595 = vrot.lane.b32.xlu0 %v5271_v55, %s18427_s27 }
 0x817   : > { %5565 = vrot.lane.b32.xlu1 %v15853_v52, %s18437_s3  ;;  %5453 = vrot.lane.b32.xlu0 %v5435_v57, %s18436_s2 }
 0x81b   : > { %5593 = vrot.lane.b32.xlu1 %v15853_v52, %s18427_s27  ;;  %5623 = vrot.lane.b32.xlu0 %v5353_v47, %s18433_s25 }
 0x81f   : > { %5482 = vrot.lane.b32.xlu1 %v5435_v57, %s18425_s29  ;;  %5319 = vrot.lane.b32.xlu0 %v5271_v55, %s18435_s1 }
 0x823   : > { %5289 = vrot.lane.b32.xlu1 %v5271_v55, %s18376_s24  ;;  %5819 = vrot.lane.b32.xlu0 %v5271_v55, %s18424_s20 }
 0x827   : > { %5651 = vrot.lane.b32.xlu1 %v5353_v47, %s18428_s21  ;;  %5679 = vrot.lane.b32.xlu0 %v5435_v57, %s18438_s18 }
 0x82b   : > { %5791 = vrot.lane.b32.xlu1 %v5271_v55, %s18439_s15  ;;  %5401 = vrot.lane.b32.xlu0 %v5353_v47, %s18373_s30  ;;  %v5361_v55 = vrot.slane %v15917_v63, 6 }
 0x82f   : > { %5371 = vrot.lane.b32.xlu1 %v5353_v47, %s18377_s16  ;;  %5239 = vrot.lane.b32.xlu0 %v15886_v4, %s18439_s15  ;;  %v5279_v47 = vrot.slane %v15917_v63, 7 }
 0x831   : > { %v5280_v62 = vsel %vm15857_vm12, %v5278_v48, %v5279_v47 }
 0x833   : > { %5707 = vrot.lane.b32.xlu1 %v5435_v57, %s18429_s22  ;;  %5737 = vrot.lane.b32.xlu0 %v15886_v4, %s18434_s0  ;;  %v5360_v57 = vrot.slane %v5358_v37, 4 }
 0x835   : > { %v5362_v13 = vsel %vm15876_vm5, %v5360_v57, %v5361_v55 }
 0x837   : > { %5765 = vrot.lane.b32.xlu1 %v15886_v4, %s18430_s17  ;;  %5513 = vrot.lane.b32.xlu0 %v15886_v4, %s18432_s28 }
 0x83b   : > { %5241 = vrot.lane.b32.xlu1 %v15898_v11, %s18439_s15  ;;  %5541 = vrot.lane.b32.xlu0 %v15886_v4, %s18426_s23 }
 0x83f   : > { %5739 = vrot.lane.b32.xlu1 %v15898_v11, %s18434_s0  ;;  %5767 = vrot.lane.b32.xlu0 %v15898_v11, %s18430_s17 }
 0x843   : > { %5515 = vrot.lane.b32.xlu1 %v15898_v11, %s18432_s28  ;;  %5543 = vrot.lane.b32.xlu0 %v15898_v11, %s18426_s23 }
 0x847   : > { %5569 = vrot.lane.b32.xlu1 %v5274_v32, %s18437_s3  ;;  %5455 = vrot.lane.b32.xlu0 %v5438_v29, %s18436_s2 }
 0x84b   : > { %5597 = vrot.lane.b32.xlu1 %v5274_v32, %s18427_s27  ;;  %5484 = vrot.lane.b32.xlu0 %v5438_v29, %s18425_s29 }
 0x84f   : > { %5625 = vrot.lane.b32.xlu1 %v16016_v44, %s18433_s25  ;;  %5653 = vrot.lane.b32.xlu0 %v16016_v44, %s18428_s21 }
 0x853   : > { %5321 = vrot.lane.b32.xlu1 %v5274_v32, %s18435_s1  ;;  %5291 = vrot.lane.b32.xlu0 %v5274_v32, %s18376_s24 }
 0x857   : > { %5793 = vrot.lane.b32.xlu1 %v5274_v32, %s18439_s15  ;;  %5821 = vrot.lane.b32.xlu0 %v5274_v32, %s18424_s20  ;;  %v5363_v32 = vrot.slane %v5361_v55, 4 }
 0x859   : > { %v5734_v1 = vpop.permute.xlu1 %5733  ;;  %v5236_v23 = vpop.permute.xlu0 %5235 }
 0x85a   : > { %5754 = vst.msk [vmem:[#allocation4 + $0xc8] sm:$0xf] %vm5226_vm1, %v5734_v1 }
 0x85b   : > { %5257 = vst.msk [vmem:[#allocation4] sm:$0xf] %vm5256_vm11, %v5236_v23  ;;  %5681 = vrot.lane.b32.xlu1 %v5438_v29, %s18438_s18  ;;  %5709 = vrot.lane.b32.xlu0 %v5438_v29, %s18429_s22  ;;  %v5364_v29 = vrot.slane %v15923_v42, 6  ;;  %v5445_v23 = vrot.slane %v5443_v36, 4 }
 0x85d   : > { %v5538_v56 = vpop.permute.xlu1 %5537  ;;  %v5762_v49 = vpop.permute.xlu0 %5761  ;;  %v5365_v1 = vsel %vm15876_vm5, %v5363_v32, %v5364_v29  ;;  %v5366_v14 = vrot.slane %v5364_v29, 4  ;;  %v6589_v32 = vld [vmem:[%s18257_s8 + $0x20] sm:$0xff] }
 0x85e   : > { %5782 = vst.msk [vmem:[#allocation4 + $0xc8] sm:$0xf] %vm5256_vm11, %v5762_v49  ;;  %v5447_v49 = vsel %vm15864_vm13, %v5445_v23, %v5446_v3 }
 0x85f   : > { %5373 = vrot.lane.b32.xlu1 %v16016_v44, %s18377_s16  ;;  %5571 = vrot.lane.b32.xlu0 %v5277_v35, %s18437_s3 }
 0x861   : > { %v5238_v10 = vpop.permute.xlu1 %5237  ;;  %v5510_v31 = vpop.permute.xlu0 %5509 }
 0x862   : > { %5258 = vst.msk [vmem:[#allocation4 + $0x4] sm:$0xf] %vm5256_vm11, %v5238_v10 }
 0x863   : > { %5530 = vst.msk [vmem:[#allocation4 + $0x64] sm:$0xf] %vm5226_vm1, %v5510_v31  ;;  %5457 = vrot.lane.b32.xlu1 %v16046_v41, %s18436_s2  ;;  %5599 = vrot.lane.b32.xlu0 %v5277_v35, %s18427_s27 }
 0x864   : > { %5558 = vst.msk [vmem:[#allocation4 + $0x64] sm:$0xf] %vm5256_vm11, %v5538_v56 }
 0x865   : > { %v5736_v12 = vpop.permute.xlu0 %5735  ;;  %v5452_v9 = vpop.permute.xlu1 %5451 }
 0x866   : > { %5755 = vst.msk [vmem:[#allocation4 + $0xcc] sm:$0xf] %vm5226_vm1, %v5736_v12 }
 0x867   : > { %5473 = vst.msk [vmem:[#allocation4 + $0x48] sm:$0x8] %vm5472_vm2, %v5452_v9  ;;  %5486 = vrot.lane.b32.xlu1 %v16046_v41, %s18425_s29  ;;  %5627 = vrot.lane.b32.xlu0 %v16059_v50, %s18433_s25 }
 0x869   : > { %v5481_v26 = vpop.permute.xlu0 %5480  ;;  %v5764_v5 = vpop.permute.xlu1 %5763 }
 0x86a   : > { %5502 = vst.msk [vmem:[#allocation4 + $0x48] sm:$0x8] %vm5501_vm10, %v5481_v26 }
 0x86b   : > { %5783 = vst.msk [vmem:[#allocation4 + $0xcc] sm:$0xf] %vm5256_vm11, %v5764_v5  ;;  %5293 = vrot.lane.b32.xlu1 %v5277_v35, %s18376_s24  ;;  %5323 = vrot.lane.b32.xlu0 %v5277_v35, %s18435_s1 }
 0x86d   : > { %v5650_v46 = vpop.permute.xlu1 %5649  ;;  %v5622_v52 = vpop.permute.xlu0 %5621 }
 0x86e   : > { %5642 = vst.msk [vmem:[#allocation4 + $0x94] sm:$0xc] %vm5390_vm3, %v5622_v52 }
 0x86f   : > { %5670 = vst.msk [vmem:[#allocation4 + $0x94] sm:$0xc] %vm5420_vm0, %v5650_v46  ;;  %5655 = vrot.lane.b32.xlu1 %v16059_v50, %s18428_s21  ;;  %5795 = vrot.lane.b32.xlu0 %v5277_v35, %s18439_s15 }
 0x871   : > { %v5318_v16 = vpop.permute.xlu1 %5317  ;;  %v5288_v22 = vpop.permute.xlu0 %5287 }
 0x872   : > { %5309 = vst.msk [vmem:[#allocation4 + $0x18] sm:$0xe] %vm5308_vm6, %v5288_v22 }
 0x873   : > { %5339 = vst.msk [vmem:[#allocation4 + $0x18] sm:$0xe] %vm5338_vm4, %v5318_v16  ;;  %5823 = vrot.lane.b32.xlu1 %v5277_v35, %s18424_s20  ;;  %5375 = vrot.lane.b32.xlu0 %v16059_v50, %s18377_s16  ;;  %v5281_v35 = vrot.slane %v5279_v47, 4 }
 0x875   : > { %v5818_v8 = vpop.permute.xlu1 %5817  ;;  %v5790_v18 = vpop.permute.xlu0 %5789  ;;  %v5283_v31 = vsel %vm15857_vm12, %v5281_v35, %v5282_v28  ;;  %v6586_v35 = vld [vmem:[%s18257_s8 + $0x8] sm:$0xff] }
 0x876   : > { %5810 = vst.msk [vmem:[#allocation4 + $0xe0] sm:$0xe] %vm5308_vm6, %v5790_v18 }
 0x877   : > { %5838 = vst.msk [vmem:[#allocation4 + $0xe0] sm:$0xe] %vm5338_vm4, %v5818_v8  ;;  %5243 = vrot.lane.b32.xlu1 %v15917_v63, %s18439_s15  ;;  %5683 = vrot.lane.b32.xlu0 %v16046_v41, %s18438_s18 }
 0x879   : > { %v5512_v61 = vpop.permute.xlu1 %5511  ;;  %v5706_v34 = vpop.permute.xlu0 %5705 }
 0x87a   : > { %5531 = vst.msk [vmem:[#allocation4 + $0x68] sm:$0xf] %vm5226_vm1, %v5512_v61  ;;  %v5449_v61 = vrot.slane %v15935_v6, 5 }
 0x87b   : > { %5545 = vrot.lane.b32.xlu1 %v15917_v63, %s18426_s23  ;;  %5741 = vrot.lane.b32.xlu0 %v15917_v63, %s18434_s0 }
 0x87d   : > { %v5540_v54 = vpop.permute.xlu1 %5539  ;;  %v5370_v0 = vpop.permute.xlu0 %5369 }
 0x87e   : > { %5559 = vst.msk [vmem:[#allocation4 + $0x68] sm:$0xf] %vm5256_vm11, %v5540_v54 }
 0x87f   : > { %5391 = vst.msk [vmem:[#allocation4 + $0x30] sm:$0xc] %vm5390_vm3, %v5370_v0  ;;  %5743 = vrot.lane.b32.xlu1 %v15923_v42, %s18434_s0  ;;  %5769 = vrot.lane.b32.xlu0 %v15917_v63, %s18430_s17  ;;  %vm5345_vm3 = vcmask 681296  }
 0x881   : > { %v5678_v7 = vpop.permute.xlu1 %5677  ;;  %v5568_v60 = vpop.permute.xlu0 %5567 }
 0x882   : > { %5698 = vst.msk [vmem:[#allocation4 + $0xac] sm:$0x8] %vm5472_vm2, %v5678_v7  ;;  %vm5427_vm2 = vcmask 682320  }
 0x883   : > { %5587 = vst.msk [vmem:[#allocation4 + $0x80] sm:$0xf] %vm5226_vm1, %v5568_v60  ;;  %5771 = vrot.lane.b32.xlu1 %v15923_v42, %s18430_s17  ;;  %5517 = vrot.lane.b32.xlu0 %v15917_v63, %s18432_s28 }
 0x884   : > { %5726 = vst.msk [vmem:[#allocation4 + $0xac] sm:$0x8] %vm5501_vm10, %v5706_v34  ;;  %v5448_v34 = vrot.slane %v5446_v3, 4  ;;  %v6592_v3 = vld [vmem:[%s18257_s8 + $0x38] sm:$0xff]  ;;  %vm5315_vm10 = vcmask 336896  }
 0x885   : > { %v5400_v17 = vpop.permute.xlu1 %5399  ;;  %v5596_v4 = vpop.permute.xlu0 %5595 }
 0x886   : > { %5421 = vst.msk [vmem:[#allocation4 + $0x30] sm:$0xc] %vm5420_vm0, %v5400_v17  ;;  %v5450_v7 = vsel %vm15864_vm13, %v5448_v34, %v5449_v61  ;;  %vm5263_vm13 = vcmask 680272  }
 0x887   : > { %5615 = vst.msk [vmem:[#allocation4 + $0x80] sm:$0xf] %vm5256_vm11, %v5596_v4  ;;  %5519 = vrot.lane.b32.xlu1 %v15923_v42, %s18432_s28  ;;  %5245 = vrot.lane.b32.xlu0 %v15923_v42, %s18439_s15  ;;  %v5367_v4 = vrot.slane %v15935_v6, 6 }
 0x889   : > { %v5566_v21 = vpop.permute.xlu1 %5565  ;;  %v5454_v25 = vpop.permute.xlu0 %5453 }
 0x88a   : > { %5586 = vst.msk [vmem:[#allocation4 + $0x7c] sm:$0xe] %vm5308_vm6, %v5566_v21  ;;  %v5368_v21 = vsel %vm15876_vm5, %v5366_v14, %v5367_v4 }
 0x88b   : > { %5474 = vst.msk [vmem:[#allocation4 + $0x4c] sm:$0xf] %vm5226_vm1, %v5454_v25  ;;  %5547 = vrot.lane.b32.xlu1 %v15923_v42, %s18426_s23  ;;  %5377 = vrot.lane.b32.xlu0 %v5362_v13, %s18377_s16  ;;  %v5285_v25 = vrot.slane %v15935_v6, 7 }
 0x88d   : > { %v5594_v45 = vpop.permute.xlu1 %5593  ;;  %v5624_v27 = vpop.permute.xlu0 %5623 }
 0x88e   : > { %5614 = vst.msk [vmem:[#allocation4 + $0x7c] sm:$0xe] %vm5338_vm4, %v5594_v45 }
 0x88f   : > { %5643 = vst.msk [vmem:[#allocation4 + $0x98] sm:$0xf] %vm5226_vm1, %v5624_v27  ;;  %5573 = vrot.lane.b32.xlu1 %v5280_v62, %s18437_s3  ;;  %5407 = vrot.lane.b32.xlu0 %v5362_v13, %s18373_s30 }
 0x891   : > { %v5483_v30 = vpop.permute.xlu1 %5482  ;;  %v5320_v40 = vpop.permute.xlu0 %5319 }
 0x892   : > { %5503 = vst.msk [vmem:[#allocation4 + $0x4c] sm:$0xf] %vm5256_vm11, %v5483_v30 }
 0x893   : > { %5601 = vrot.lane.b32.xlu1 %v5280_v62, %s18427_s27  ;;  %5459 = vrot.lane.b32.xlu0 %v16134_v51, %s18436_s2 }
 0x895   : > { %v5290_v63 = vpop.permute.xlu1 %5289  ;;  %v5820_v53 = vpop.permute.xlu0 %5819 }
 0x896   : > { %5310 = vst.msk [vmem:[#allocation4 + $0x1c] sm:$0xf] %vm5226_vm1, %v5290_v63 }
 0x897   : > { %5340 = vst.msk [vmem:[#allocation4 + $0x1c] sm:$0xf] %vm5256_vm11, %v5320_v40  ;;  %5629 = vrot.lane.b32.xlu1 %v5362_v13, %s18433_s25  ;;  %5488 = vrot.lane.b32.xlu0 %v16134_v51, %s18425_s29 }
 0x899   : > { %v5652_v11 = vpop.permute.xlu1 %5651  ;;  %v5680_v58 = vpop.permute.xlu0 %5679 }
 0x89a   : > { %5671 = vst.msk [vmem:[#allocation4 + $0x98] sm:$0xf] %vm5256_vm11, %v5652_v11 }
 0x89b   : > { %5699 = vst.msk [vmem:[#allocation4 + $0xb0] sm:$0xf] %vm5226_vm1, %v5680_v58  ;;  %5295 = vrot.lane.b32.xlu1 %v5280_v62, %s18376_s24  ;;  %5657 = vrot.lane.b32.xlu0 %v5362_v13, %s18428_s21  ;;  %v5284_v13 = vrot.slane %v5282_v28, 4  ;;  %v6588_v58 = vld [vmem:[%s18257_s8 + $0x18] sm:$0xff]  ;;  %v6585_v28 = vld [vmem:[%s18257_s8] sm:$0xff] }
 0x89d   : > { %v5792_v39 = vpop.permute.xlu1 %5791  ;;  %v5402_v33 = vpop.permute.xlu0 %5401  ;;  %v5286_v45 = vsel %vm15857_vm12, %v5284_v13, %v5285_v25  ;;  %vm18586_vm12 = vcmask 949248  }
 0x89e   : > { %5811 = vst.msk [vmem:[#allocation4 + $0xe4] sm:$0xf] %vm5226_vm1, %v5792_v39 }
 0x89f   : > { %5839 = vst.msk [vmem:[#allocation4 + $0xe4] sm:$0xf] %vm5256_vm11, %v5820_v53  ;;  %5797 = vrot.lane.b32.xlu1 %v5280_v62, %s18439_s15  ;;  %5325 = vrot.lane.b32.xlu0 %v5280_v62, %s18435_s1 }
 0x8a1   : > { %v5372_v43 = vpop.permute.xlu1 %5371  ;;  %v5240_v19 = vpop.permute.xlu0 %5239 }
 0x8a2   : > { %5392 = vst.msk [vmem:[#allocation4 + $0x34] sm:$0xf] %vm5226_vm1, %v5372_v43 }
 0x8a3   : > { %5259 = vst.msk [vmem:[#allocation4 + $0x8] sm:$0xf] %vm5256_vm11, %v5240_v19  ;;  %5422 = vst.msk [vmem:[#allocation4 + $0x34] sm:$0xf] %vm5256_vm11, %v5402_v33  ;;  %5379 = vrot.lane.b32.xlu1 %v5365_v1, %s18377_s16  ;;  %5825 = vrot.lane.b32.xlu0 %v5280_v62, %s18424_s20  ;;  %v6591_v19 = vld [vmem:[%s18257_s8 + $0x30] sm:$0xff] }
 0x8a5   : > { %v5708_v38 = vpop.permute.xlu1 %5707  ;;  %v5738_v56 = vpop.permute.xlu0 %5737 }
 0x8a6   : > { %5727 = vst.msk [vmem:[#allocation4 + $0xb0] sm:$0xf] %vm5256_vm11, %v5708_v38  ;;  %v6596_v38 = vld [vmem:[%s18257_s8 + $0x58] sm:$0xff] }
 0x8a7   : > { %5756 = vst.msk [vmem:[#allocation4 + $0xd0] sm:$0xf] %vm5226_vm1, %v5738_v56  ;;  %5409 = vrot.lane.b32.xlu1 %v5365_v1, %s18373_s30  ;;  %5687 = vrot.lane.b32.xlu0 %v5447_v49, %s18438_s18 }
 0x8a9   : > { %v5766_v59 = vpop.permute.xlu1 %5765  ;;  %v5514_v10 = vpop.permute.xlu0 %5513 }
 0x8aa   : > { %5784 = vst.msk [vmem:[#allocation4 + $0xd0] sm:$0xf] %vm5256_vm11, %v5766_v59 }
 0x8ab   : > { %5532 = vst.msk [vmem:[#allocation4 + $0x6c] sm:$0xf] %vm5226_vm1, %v5514_v10  ;;  %5603 = vrot.lane.b32.xlu1 %v5283_v31, %s18427_s27  ;;  %5715 = vrot.lane.b32.xlu0 %v5447_v49, %s18429_s22 }
 0x8ad   : > { %v5242_v24 = vpop.permute.xlu1 %5241  ;;  %v5542_v37 = vpop.permute.xlu0 %5541 }
 0x8ae   : > { %5260 = vst.msk [vmem:[#allocation4 + $0xc] sm:$0xf] %vm5256_vm11, %v5242_v24  ;;  %5560 = vst.msk [vmem:[#allocation4 + $0x6c] sm:$0xf] %vm5256_vm11, %v5542_v37  ;;  %v6597_v24 = vld [vmem:[%s18257_s8 + $0x60] sm:$0xf] }
 0x8af   : > { %5461 = vrot.lane.b32.xlu1 %v5447_v49, %s18436_s2  ;;  %5575 = vrot.lane.b32.xlu0 %v5283_v31, %s18437_s3 }
 0x8b1   : > { %v5740_v12 = vpop.permute.xlu1 %5739  ;;  %v5768_v9 = vpop.permute.xlu0 %5767 }
 0x8b2   : > { %5757 = vst.msk [vmem:[#allocation4 + $0xd4] sm:$0xf] %vm5226_vm1, %v5740_v12 }
 0x8b3   : > { %5785 = vst.msk [vmem:[#allocation4 + $0xd4] sm:$0xf] %vm5256_vm11, %v5768_v9  ;;  %5490 = vrot.lane.b32.xlu1 %v5447_v49, %s18425_s29  ;;  %5297 = vrot.lane.b32.xlu0 %v5283_v31, %s18376_s24  ;;  %v6587_v9 = vld [vmem:[%s18257_s8 + $0x10] sm:$0xff] }
 0x8b5   : > { %v5516_v26 = vpop.permute.xlu1 %5515  ;;  %v5544_v5 = vpop.permute.xlu0 %5543 }
 0x8b6   : > { %5533 = vst.msk [vmem:[#allocation4 + $0x70] sm:$0xf] %vm5226_vm1, %v5516_v26  ;;  %v6594_v26 = vld [vmem:[%s18257_s8 + $0x48] sm:$0xff] }
 0x8b7   : > { %5561 = vst.msk [vmem:[#allocation4 + $0x70] sm:$0xf] %vm5256_vm11, %v5544_v5  ;;  %5631 = vrot.lane.b32.xlu1 %v5365_v1, %s18433_s25  ;;  %5659 = vrot.lane.b32.xlu0 %v5365_v1, %s18428_s21 }
 0x8b9   : > { %v5570_v46 = vpop.permute.xlu1 %5569  ;;  %v5456_v52 = vpop.permute.xlu0 %5455 }
 0x8ba   : > { %5588 = vst.msk [vmem:[#allocation4 + $0x84] sm:$0xf] %vm5226_vm1, %v5570_v46  ;;  %5475 = vst.msk [vmem:[#allocation4 + $0x50] sm:$0xf] %vm5226_vm1, %v5456_v52 }
 0x8bb   : > { %5327 = vrot.lane.b32.xlu1 %v5283_v31, %s18435_s1  ;;  %5799 = vrot.lane.b32.xlu0 %v5283_v31, %s18439_s15 }
 0x8bd   : > { %v5598_v16 = vpop.permute.xlu1 %5597  ;;  %v5485_v22 = vpop.permute.xlu0 %5484 }
 0x8be   : > { %5616 = vst.msk [vmem:[#allocation4 + $0x84] sm:$0xf] %vm5256_vm11, %v5598_v16  ;;  %5504 = vst.msk [vmem:[#allocation4 + $0x50] sm:$0xf] %vm5256_vm11, %v5485_v22 }
 0x8bf   : > { %5827 = vrot.lane.b32.xlu1 %v5283_v31, %s18424_s20  ;;  %5247 = vrot.lane.b32.xlu0 %v15935_v6, %s18439_s15  ;;  %v6593_v31 = vld [vmem:[%s18257_s8 + $0x40] sm:$0xff] }
 0x8c1   : > { %v5626_v8 = vpop.permute.xlu1 %5625  ;;  %v5654_v18 = vpop.permute.xlu0 %5653 }
 0x8c2   : > { %5644 = vst.msk [vmem:[#allocation4 + $0x9c] sm:$0xf] %vm5226_vm1, %v5626_v8 }
 0x8c3   : > { %5672 = vst.msk [vmem:[#allocation4 + $0x9c] sm:$0xf] %vm5256_vm11, %v5654_v18  ;;  %5745 = vrot.lane.b32.xlu1 %v15935_v6, %s18434_s0  ;;  %5773 = vrot.lane.b32.xlu0 %v15935_v6, %s18430_s17 }
 0x8c5   : > { %v5322_v54 = vpop.permute.xlu1 %5321  ;;  %v5292_v0 = vpop.permute.xlu0 %5291 }
 0x8c6   : > { %5311 = vst.msk [vmem:[#allocation4 + $0x20] sm:$0xf] %vm5226_vm1, %v5292_v0 }
 0x8c7   : > { %5341 = vst.msk [vmem:[#allocation4 + $0x20] sm:$0xf] %vm5256_vm11, %v5322_v54  ;;  %5689 = vrot.lane.b32.xlu1 %v5450_v7, %s18438_s18  ;;  %5521 = vrot.lane.b32.xlu0 %v15935_v6, %s18432_s28 }
 0x8c9   : > { %v5794_v60 = vpop.permute.xlu1 %5793  ;;  %v5822_v17 = vpop.permute.xlu0 %5821 }
 0x8ca   : > { %5812 = vst.msk [vmem:[#allocation4 + $0xe8] sm:$0xf] %vm5226_vm1, %v5794_v60 }
 0x8cb   : > { %5840 = vst.msk [vmem:[#allocation4 + $0xe8] sm:$0xf] %vm5256_vm11, %v5822_v17  ;;  %5717 = vrot.lane.b32.xlu1 %v5450_v7, %s18429_s22  ;;  %5549 = vrot.lane.b32.xlu0 %v15935_v6, %s18426_s23 }
 0x8cd   : > { %v5682_v55 = vpop.permute.xlu1 %5681  ;;  %v5710_v57 = vpop.permute.xlu0 %5709 }
 0x8ce   : > { %5700 = vst.msk [vmem:[#allocation4 + $0xb4] sm:$0xf] %vm5226_vm1, %v5682_v55 }
 0x8cf   : > { %5728 = vst.msk [vmem:[#allocation4 + $0xb4] sm:$0xf] %vm5256_vm11, %v5710_v57  ;;  %5411 = vrot.lane.b32.xlu1 %v5368_v21, %s18373_s30  ;;  %5381 = vrot.lane.b32.xlu0 %v5368_v21, %s18377_s16  ;;  %v12644_v57 = vld [vmem:[#allocation4] sm:$0xff]  }
 0x8d1   : > { %v5374_v47 = vpop.permute.xlu1 %5373  ;;  %v5572_v48 = vpop.permute.xlu0 %5571 }
 0x8d2   : > { %5393 = vst.msk [vmem:[#allocation4 + $0x38] sm:$0xf] %vm5226_vm1, %v5374_v47  ;;  %5589 = vst.msk [vmem:[#allocation4 + $0x88] sm:$0xf] %vm5226_vm1, %v5572_v48 }
 0x8d3   : > { %5577 = vrot.lane.b32.xlu1 %v5286_v45, %s18437_s3  ;;  %5605 = vrot.lane.b32.xlu0 %v5286_v45, %s18427_s27 }
 0x8d5   : > { %v5458_v6 = vpop.permute.xlu1 %5457  ;;  %v5600_v27 = vpop.permute.xlu0 %5599 }
 0x8d6   : > { %5476 = vst.msk [vmem:[#allocation4 + $0x54] sm:$0xf] %vm5226_vm1, %v5458_v6 }
 0x8d7   : > { %5617 = vst.msk [vmem:[#allocation4 + $0x88] sm:$0xf] %vm5256_vm11, %v5600_v27  ;;  %5685 = vrot.lane.b32.xlu1 %v16134_v51, %s18438_s18  ;;  %5492 = vrot.lane.b32.xlu0 %v5450_v7, %s18425_s29 }
 0x8d9   : > { %v5487_v42 = vpop.permute.xlu1 %5486  ;;  %v5628_v62 = vpop.permute.xlu0 %5627 }
 0x8da   : > { %5505 = vst.msk [vmem:[#allocation4 + $0x54] sm:$0xf] %vm5256_vm11, %v5487_v42 }
 0x8db   : > { %5645 = vst.msk [vmem:[#allocation4 + $0xa0] sm:$0xf] %vm5226_vm1, %v5628_v62  ;;  %5463 = vrot.lane.b32.xlu1 %v5450_v7, %s18436_s2  ;;  %5633 = vrot.lane.b32.xlu0 %v5368_v21, %s18433_s25 }
 0x8dd   : > { %v5294_v2 = vpop.permute.xlu1 %5293  ;;  %v5324_v36 = vpop.permute.xlu0 %5323 }
 0x8de   : > { %5312 = vst.msk [vmem:[#allocation4 + $0x24] sm:$0xf] %vm5226_vm1, %v5294_v2 }
 0x8df   : > { %5342 = vst.msk [vmem:[#allocation4 + $0x24] sm:$0xf] %vm5256_vm11, %v5324_v36  ;;  %5661 = vrot.lane.b32.xlu1 %v5368_v21, %s18428_s21  ;;  %5405 = vrot.lane.b32.xlu0 %v16059_v50, %s18373_s30  ;;  %v12676_v50 = vld [vmem:[%s18256_s7 + $0x4] ss:$16 sps:$4 sm:$0xff]  }
 0x8e0   : > { %6306 = vmatprep.mubr.bf16.mxu0 %v12676_v50 }
 0x8e1   : > { %v5656_v20 = vpop.permute.xlu1 %5655  ;;  %v5796_v30 = vpop.permute.xlu0 %5795 }
 0x8e2   : > { %5673 = vst.msk [vmem:[#allocation4 + $0xa0] sm:$0xf] %vm5256_vm11, %v5656_v20 }
 0x8e3   : > { %5813 = vst.msk [vmem:[#allocation4 + $0xec] sm:$0xf] %vm5226_vm1, %v5796_v30  ;;  %5299 = vrot.lane.b32.xlu1 %v5286_v45, %s18376_s24  ;;  %5329 = vrot.lane.b32.xlu0 %v5286_v45, %s18435_s1 }
 0x8e5   : > { %v5824_v40 = vpop.permute.xlu1 %5823  ;;  %v5376_v63 = vpop.permute.xlu0 %5375 }
 0x8e6   : > { %5841 = vst.msk [vmem:[#allocation4 + $0xec] sm:$0xf] %vm5256_vm11, %v5824_v40 }
 0x8e7   : > { %5394 = vst.msk [vmem:[#allocation4 + $0x3c] sm:$0xf] %vm5226_vm1, %v5376_v63  ;;  %5403 = vrot.lane.b32.xlu1 %v16016_v44, %s18373_s30  ;;  %5801 = vrot.lane.b32.xlu0 %v5286_v45, %s18439_s15  ;;  %v12680_v44 = vld [vmem:[%s18256_s7 + $0xc] ss:$16 sps:$4 sm:$0xff]  }
 0x8e8   : > { %10867 = vmatprep.mubr.msk.bf16.mxu1 %vm18586_vm12, %v12680_v44  ;;  %v12646_v44 = vld [vmem:[#allocation4 + $0x80] sm:$0xff]  }
 0x8e9   : > { %v5244_v53 = vpop.permute.xlu1 %5243  ;;  %v5684_v11 = vpop.permute.xlu0 %5683 }
 0x8ea   : > { %5261 = vst.msk [vmem:[#allocation4 + $0x10] sm:$0xf] %vm5256_vm11, %v5244_v53 }
 0x8eb   : > { %5701 = vst.msk [vmem:[#allocation4 + $0xb8] sm:$0xf] %vm5226_vm1, %v5684_v11  ;;  %5711 = vrot.lane.b32.xlu1 %v16046_v41, %s18429_s22  ;;  %5829 = vrot.lane.b32.xlu0 %v5286_v45, %s18424_s20  ;;  %v6590_v41 = vld [vmem:[%s18257_s8 + $0x28] sm:$0xff] }
 0x8ed   : > { %v5546_v39 = vpop.permute.xlu1 %5545  ;;  %v5742_v33 = vpop.permute.xlu0 %5741 }
 0x8ee   : > { %5758 = vst.msk [vmem:[#allocation4 + $0xd8] sm:$0xf] %vm5226_vm1, %v5742_v33 }
 0x8ef   : > { %6615 = vperm.xlu1 %12086, %v6588_v58   ;;  %5713 = vrot.lane.b32.xlu0 %v16134_v51, %s18429_s22  ;;  %v6595_v51 = vld [vmem:[%s18257_s8 + $0x50] sm:$0xff]  ;;  %v12647_v58 = vld [vmem:[#allocation4 + $0xc8] sm:$0xff]  }
 0x8f1   : > { %v5744_v29 = vpop.permute.xlu1 %5743  ;;  %v5770_v43 = vpop.permute.xlu0 %5769 }
 0x8f2   : > { %5759 = vst.msk [vmem:[#allocation4 + $0xdc] sm:$0xf] %vm5226_vm1, %v5744_v29  ;;  %v12650_v29 = vld [vmem:[#allocation4 + $0x8] sm:$0xff]  }
 0x8f3   : > { %5786 = vst.msk [vmem:[#allocation4 + $0xd8] sm:$0xf] %vm5256_vm11, %v5770_v43  ;;  %6625 = vperm.xlu1 %12086, %v6590_v41   ;;  %6620 = vperm.xlu0 %12085, %v6589_v32   ;;  %v12651_v43 = vld [vmem:[#allocation4 + $0xd0] sm:$0xff]  }
 0x8f5   : > { %v5772_v1 = vpop.permute.xlu1 %5771  ;;  %v5518_v23 = vpop.permute.xlu0 %5517 }
 0x8f6   : > { %5787 = vst.msk [vmem:[#allocation4 + $0xdc] sm:$0xf] %vm5256_vm11, %v5772_v1 }
 0x8f7   : > { %5534 = vst.msk [vmem:[#allocation4 + $0x74] sm:$0xf] %vm5226_vm1, %v5518_v23  ;;  %6650 = vperm.xlu1 %12086, %v6595_v51   ;;  %6630 = vperm.xlu0 %12085, %v6591_v19   ;;  %v12652_v51 = vld [vmem:[#allocation4 + $0x50] sm:$0xff]  }
 0x8f8   : > { %5562 = vst.msk [vmem:[#allocation4 + $0x74] sm:$0xf] %vm5256_vm11, %v5546_v39 }
 0x8f9   : > { %v5520_v56 = vpop.permute.xlu1 %5519  ;;  %v5246_v49 = vpop.permute.xlu0 %5245 }
 0x8fa   : > { %5535 = vst.msk [vmem:[#allocation4 + $0x78] sm:$0xf] %vm5226_vm1, %v5520_v56 }
 0x8fb   : > { %5262 = vst.msk [vmem:[#allocation4 + $0x14] sm:$0xf] %vm5256_vm11, %v5246_v49  ;;  %6635 = vperm.xlu1 %12086, %v6592_v3   ;;  %6655 = vperm.xlu0 %12085, %v6596_v38  }
 0x8fd   : > { %v5548_v59 = vpop.permute.xlu1 %5547  ;;  %v5378_v10 = vpop.permute.xlu0 %5377  ;;  %v12655_v38 = vld [vmem:[#allocation4 + $0xd8] sm:$0xff]  }
 0x8fe   : > { %5563 = vst.msk [vmem:[#allocation4 + $0x78] sm:$0xf] %vm5256_vm11, %v5548_v59 }
 0x8ff   : > { %5395 = vst.msk [vmem:[#allocation4 + $0x40] sm:$0xf] %vm5226_vm1, %v5378_v10  ;;  %6605 = vperm.xlu1 %12086, %v6586_v35   ;;  %6600 = vperm.xlu0 %12085, %v6585_v28   ;;  %v12657_v28 = vld [vmem:[#allocation4 + $0x98] sm:$0xff]  }
 0x901   : > { %v5574_v37 = vpop.permute.xlu1 %5573  ;;  %v5408_v12 = vpop.permute.xlu0 %5407 }
 0x902   : > { %5590 = vst.msk [vmem:[#allocation4 + $0x8c] sm:$0xf] %vm5226_vm1, %v5574_v37  ;;  %v12654_v3 = vld [vmem:[#allocation4 + $0x10] sm:$0xff]  }
 0x903   : > { %5425 = vst.msk [vmem:[#allocation4 + $0x40] sm:$0xf] %vm5256_vm11, %v5408_v12  ;;  %6640 = vperm.xlu1 %12086, %v6593_v31   ;;  %6660 = vperm.xlu0 %12085, %v6597_v24  }
 0x905   : > { %v5602_v5 = vpop.permute.xlu1 %5601  ;;  %v5460_v46 = vpop.permute.xlu0 %5459 }
 0x906   : > { %5618 = vst.msk [vmem:[#allocation4 + $0x8c] sm:$0xf] %vm5256_vm11, %v5602_v5  ;;  %v12664_v5 = vld [vmem:[#allocation4 + $0x68] sm:$0xff]  }
 0x907   : > { %5477 = vst.msk [vmem:[#allocation4 + $0x58] sm:$0xf] %vm5226_vm1, %v5460_v46  ;;  %6610 = vperm.xlu1 %12086, %v6587_v9   ;;  %6645 = vperm.xlu0 %12085, %v6594_v26   ;;  %v12662_v9 = vld [vmem:[#allocation4 + $0x20] sm:$0xff]   ;;  %v12663_v26 = vld [vmem:[#allocation4 + $0xe8] sm:$0xff]  }
 0x909   : > { %v5630_v52 = vpop.permute.xlu1 %5629  ;;  %v5489_v16 = vpop.permute.xlu0 %5488 }
 0x90a   : > { %5646 = vst.msk [vmem:[#allocation4 + $0xa4] sm:$0xf] %vm5226_vm1, %v5630_v52 }
 0x90b   : > { %5506 = vst.msk [vmem:[#allocation4 + $0x58] sm:$0xf] %vm5256_vm11, %v5489_v16 }
 0x90d   : > { %v5296_v22 = vpop.permute.xlu1 %5295  ;;  %v5658_v8 = vpop.permute.xlu0 %5657  ;;  %v12648_v41 = vld [vmem:[#allocation4 + $0x88] sm:$0xff]  }
 0x90e   : > { %5313 = vst.msk [vmem:[#allocation4 + $0x28] sm:$0xf] %vm5226_vm1, %v5296_v22 }
 0x90f   : > { %5674 = vst.msk [vmem:[#allocation4 + $0xa4] sm:$0xf] %vm5256_vm11, %v5658_v8 }
 0x911   : > { %v5798_v18 = vpop.permute.xlu1 %5797  ;;  %v5326_v61 = vpop.permute.xlu0 %5325 }
 0x912   : > { %5814 = vst.msk [vmem:[#allocation4 + $0xf0] sm:$0xf] %vm5226_vm1, %v5798_v18  ;;  %v12668_v18 = vld [vmem:[#allocation4 + $0x70] sm:$0xff]  }
 0x913   : > { %5343 = vst.msk [vmem:[#allocation4 + $0x28] sm:$0xf] %vm5256_vm11, %v5326_v61 }
 0x915   : > { %v5380_v34 = vpop.permute.xlu1 %5379  ;;  %v5826_v54 = vpop.permute.xlu0 %5825 }
 0x916   : > { %5396 = vst.msk [vmem:[#allocation4 + $0x44] sm:$0xf] %vm5226_vm1, %v5380_v34  ;;  %v12660_v37 = vld [vmem:[#allocation4 + $0xa0] sm:$0xff]  }
 0x917   : > { %5842 = vst.msk [vmem:[#allocation4 + $0xf0] sm:$0xf] %vm5256_vm11, %v5826_v54  ;;  %v12669_v54 = vld [vmem:[#allocation4 + $0xb0] sm:$0xff]  }
 0x919   : > { %v5410_v0 = vpop.permute.xlu1 %5409  ;;  %v5688_v7 = vpop.permute.xlu0 %5687 }
 0x91a   : > { %5426 = vst.msk [vmem:[#allocation4 + $0x44] sm:$0xf] %vm5256_vm11, %v5410_v0 }
 0x91b   : > { %5703 = vst.msk [vmem:[#allocation4 + $0xc0] sm:$0xf] %vm5226_vm1, %v5688_v7 }
 0x91d   : > { %v5604_v60 = vpop.permute.xlu1 %5603  ;;  %v5716_v17 = vpop.permute.xlu0 %5715 }
 0x91e   : > { %5731 = vst.msk [vmem:[#allocation4 + $0xc0] sm:$0xf] %vm5256_vm11, %v5716_v17 }
 0x921   : > { %v5462_v4 = vpop.permute.xlu1 %5461  ;;  %v5576_v14 = vpop.permute.xlu0 %5575  ;;  %v12643_v55 = vld [vmem:[#allocation4 + $0x40] sm:$0xff]  }
 0x922   : > { %5478 = vst.msk [vmem:[#allocation4 + $0x5c] sm:$0xf] %vm5226_vm1, %v5462_v4  ;;  %5591 = vst.msk [vmem:[#allocation4 + $0x90] sm:$0xf] %vm5226_vm1, %v5576_v14  ;;  %11327 = vmatprep.subr.bf16.mxu0 %v12643_v55  ;;  %v12674_v4 = vld [vmem:[%s18256_s7] ss:$16 sps:$4 sm:$0xff]  }
 0x923   : > { %5619 = vst.msk [vmem:[#allocation4 + $0x90] sm:$0xf] %vm5256_vm11, %v5604_v60  ;;  %11328 = vmatpush3.bf16.msra.mxu0 %v12644_v57  ;;  %v12683_v14 = vld [vmem:[%s18256_s7 + $0x24] ss:$16 sps:$4 sm:$0xff]  }
 0x925   : > { %v5491_v21 = vpop.permute.xlu1 %5490  ;;  %v5298_v25 = vpop.permute.xlu0 %5297 }
 0x926   : > { %5507 = vst.msk [vmem:[#allocation4 + $0x5c] sm:$0xf] %vm5256_vm11, %v5491_v21  ;;  %v12678_v21 = vld [vmem:[%s18256_s7 + $0x8] ss:$16 sps:$4 sm:$0xff]  }
 0x927   : > { %5314 = vst.msk [vmem:[#allocation4 + $0x2c] sm:$0xf] %vm5226_vm1, %v5298_v25  ;;  %v12681_v25 = vld [vmem:[%s18256_s7 + $0x2c] ss:$16 sps:$4 sm:$0xff]  }
 0x929   : > { %v5632_v13 = vpop.permute.xlu1 %5631  ;;  %v5660_v47 = vpop.permute.xlu0 %5659 }
 0x92a   : > { %5647 = vst.msk [vmem:[#allocation4 + $0xa8] sm:$0xf] %vm5226_vm1, %v5632_v13  ;;  %v12685_v13 = vld [vmem:[%s18256_s7 + $0x20] ss:$16 sps:$4 sm:$0xff]  }
 0x92b   : > { %5675 = vst.msk [vmem:[#allocation4 + $0xa8] sm:$0xf] %vm5256_vm11, %v5660_v47  ;;  %v12689_v47 = vld [vmem:[%s18256_s7 + $0x44] ss:$16 sps:$4 sm:$0xff]  }
 0x92d   : > { %v5328_v48 = vpop.permute.xlu1 %5327  ;;  %v5800_v45 = vpop.permute.xlu0 %5799  ;;  %v12656_v56 = vld [vmem:[#allocation4 + $0x58] sm:$0xff]  }
 0x92e   : > { %5344 = vst.msk [vmem:[#allocation4 + $0x2c] sm:$0xf] %vm5256_vm11, %v5328_v48  ;;  %v12686_v48 = vld [vmem:[%s18256_s7 + $0x28] ss:$16 sps:$4 sm:$0xff]  }
 0x92f   : > { %5815 = vst.msk [vmem:[#allocation4 + $0xf4] sm:$0xf] %vm5226_vm1, %v5800_v45  ;;  %v12687_v45 = vld [vmem:[%s18256_s7 + $0x4c] ss:$16 sps:$4 sm:$0xff]  }
 0x931   : > { %v5828_v6 = vpop.permute.xlu1 %5827  ;;  %v5248_v27 = vpop.permute.xlu0 %5247 }
 0x932   : > { %5843 = vst.msk [vmem:[#allocation4 + $0xf4] sm:$0xf] %vm5256_vm11, %v5828_v6  ;;  %v12691_v6 = vld [vmem:[%s18256_s7 + $0x40] ss:$16 sps:$4 sm:$0xff]  }
 0x933   : > { %5264 = vst.msk [vmem:[#allocation4 + $0x18] sm:$0x1] %vm5263_vm13, %v5248_v27  ;;  %v12695_v27 = vld [vmem:[%s18256_s7 + $0x64] ss:$16 sps:$4 sm:$0xff]  }
 0x935   : > { %v5746_v42 = vpop.permute.xlu1 %5745  ;;  %v5774_v62 = vpop.permute.xlu0 %5773  ;;  %v12666_v22 = vld [vmem:[#allocation4 + $0x28] sm:$0xff]  }
 0x936   : > { %5760 = vst.msk [vmem:[#allocation4 + $0xe0] sm:$0x1] %vm5233_vm8, %v5746_v42  ;;  %v12692_v42 = vld [vmem:[%s18256_s7 + $0x48] ss:$16 sps:$4 sm:$0xff]  }
 0x937   : > { %5788 = vst.msk [vmem:[#allocation4 + $0xe0] sm:$0x1] %vm5263_vm13, %v5774_v62  ;;  %v12693_v62 = vld [vmem:[%s18256_s7 + $0x6c] ss:$16 sps:$4 sm:$0xff]  }
 0x939   : > { %v5690_v2 = vpop.permute.xlu1 %5689  ;;  %v5522_v36 = vpop.permute.xlu0 %5521  ;;  %v12667_v8 = vld [vmem:[#allocation4 + $0xf0] sm:$0xff]  }
 0x93a   : > { %5704 = vst.msk [vmem:[#allocation4 + $0xc4] sm:$0xf] %vm5226_vm1, %v5690_v2  ;;  %v12658_v59 = vld [vmem:[#allocation4 + $0x18] sm:$0xff]   ;;  %v12697_v2 = vld [vmem:[%s18256_s7 + $0x60] ss:$16 sps:$4 sm:$0xff]  }
 0x93b   : > { %5536 = vst.msk [vmem:[#allocation4 + $0x7c] sm:$0x1] %vm5233_vm8, %v5522_v36  ;;  %v12699_v36 = vld [vmem:[%s18256_s7 + $0x84] ss:$16 sps:$4 sm:$0xff]  }
 0x93d   : > { %v5718_v20 = vpop.permute.xlu1 %5717  ;;  %v5550_v30 = vpop.permute.xlu0 %5549 }
 0x93e   : > { %5732 = vst.msk [vmem:[#allocation4 + $0xc4] sm:$0xf] %vm5256_vm11, %v5718_v20  ;;  %v12659_v10 = vld [vmem:[#allocation4 + $0xe0] sm:$0xff]   ;;  %v12698_v20 = vld [vmem:[%s18256_s7 + $0x68] ss:$16 sps:$4 sm:$0xff]  }
 0x93f   : > { %5564 = vst.msk [vmem:[#allocation4 + $0x7c] sm:$0x1] %vm5263_vm13, %v5550_v30  ;;  %v12701_v30 = vld [vmem:[%s18256_s7 + $0x8c] ss:$16 sps:$4 sm:$0xff]  }
 0x941   : > { %v5412_v40 = vpop.permute.xlu1 %5411  ;;  %v5382_v63 = vpop.permute.xlu0 %5381 }
 0x942   : > { %5398 = vst.msk [vmem:[#allocation4 + $0x48] sm:$0x7] %vm5397_vm9, %v5382_v63  ;;  %v12705_v63 = vld [vmem:[%s18256_s7 + $0xa4] ss:$16 sps:$4 sm:$0xff]  }
 0x943   : > { %5428 = vst.msk [vmem:[#allocation4 + $0x48] sm:$0x7] %vm5427_vm2, %v5412_v40  ;;  %v12703_v40 = vld [vmem:[%s18256_s7 + $0x80] ss:$16 sps:$4 sm:$0xff]  }
 0x945   : > { %v5578_v50 = vpop.permute.xlu1 %5577  ;;  %v5606_v53 = vpop.permute.xlu0 %5605  ;;  %v12645_v11 = vld [vmem:[#allocation4 + $0xc0] sm:$0xff]  }
 0x946   : > { %5592 = vst.msk [vmem:[#allocation4 + $0x94] sm:$0x3] %vm5315_vm10, %v5578_v50  ;;  %11385 = vmatprep.subr.bf16.mxu1 %v12645_v11  ;;  %v12671_v7 = vld [vmem:[#allocation4 + $0x78] sm:$0xff]  }
 0x947   : > { %5620 = vst.msk [vmem:[#allocation4 + $0x94] sm:$0x3] %vm5345_vm3, %v5606_v53  ;;  %11386 = vmatpush3.bf16.msra.mxu1 %v12646_v44  ;;  %v12704_v50 = vld [vmem:[%s18256_s7 + $0x88] ss:$16 sps:$4 sm:$0xff]   ;;  %v5932_v53 = vld [vmem:[%s18256_s7 + $0xc0] sm:$0x33] }
 0x948   : > { %11387 = vmatprep.subr.bf16.mxu1 %v12647_v58  ;;  %v12707_v11 = vld [vmem:[%s18256_s7 + $0xac] ss:$16 sps:$4 sm:$0xff]   ;;  %v12709_v44 = vld [vmem:[%s18256_s7 + $0xa0] ss:$16 sps:$4 sm:$0xff]   ;;  %v10832_v58 = vcombine.high %v5932_v53, %v5932_v53 }
 0x949   : > { %v5686_v39 = vpop.permute.xlu1 %5685  ;;  %v5493_v33 = vpop.permute.xlu0 %5492 }
 0x94a   : > { %5702 = vst.msk [vmem:[#allocation4 + $0xbc] sm:$0xf] %vm5226_vm1, %v5686_v39  ;;  %v12649_v32 = vld [vmem:[#allocation4 + $0x48] sm:$0xff]  }
 0x94b   : > { %11388 = vmatpush3.bf16.msra.mxu1 %v12648_v41  ;;  %11329 = vmatprep.subr.bf16.mxu0 %v12649_v32  ;;  %v5933_v39 = vld [vmem:[%s18256_s7 + $0xc8] sm:$0x33]  ;;  %v10831_v32 = vcombine.low %v5932_v53, %v5932_v53 }
 0x94c   : > { %11330 = vmatpush3.bf16.msra.mxu0 %v12650_v29  ;;  %11389 = vmatprep.subr.bf16.mxu1 %v12651_v43  ;;  %v10834_v41 = vcombine.high %v5933_v39, %v5933_v39  ;;  %v10833_v29 = vcombine.low %v5933_v39, %v5933_v39  ;;  %v12715_v43 = vld [vmem:[%s18593_s10] sm:$0xff]  }
 0x94d   : > { %v5464_v19 = vpop.permute.xlu1 %5463  ;;  %v5634_v1 = vpop.permute.xlu0 %5633  ;;  %11331 = vmatprep.subr.bf16.mxu0 %v12652_v51  ;;  %v12939_v51 = vmov 0.0  }
 0x94e   : > { %5479 = vst.msk [vmem:[#allocation4 + $0x60] sm:$0xf] %vm5226_vm1, %v5464_v19  ;;  %v12653_v23 = vld [vmem:[#allocation4 + $0x90] sm:$0xff]   ;;  %vm18587_vm1 = vmmov %vm18586_vm12  ;;  %v12716_v19 = vld [vmem:[%s18593_s10 + $0x8] sm:$0xff]   ;;  %vm12940_vm12 = vmmov 0  }
 0x94f   : > { %5648 = vst.msk [vmem:[#allocation4 + $0xac] sm:$0x7] %vm5397_vm9, %v5634_v1  ;;  %11390 = vmatpush3.bf16.msra.mxu1 %v12653_v23  ;;  %vm18588_vm8 = vmmov %vm18587_vm1  ;;  %v12717_v1 = vld [vmem:[%s18593_s10 + $0x10] sm:$0xff]   ;;  %v12718_v23 = vld [vmem:[%s18593_s10 + $0x18] sm:$0xff]   ;;  %vm6940_vm9 = vcmask 19456  }
 0x950   : > { %5508 = vst.msk [vmem:[#allocation4 + $0x60] sm:$0xf] %vm5256_vm11, %v5493_v33  ;;  %11332 = vmatpush3.bf16.msra.mxu0 %v12654_v3  ;;  %11391 = vmatprep.subr.bf16.mxu1 %v12655_v38  ;;  %vm18590_vm0 = vmmov %vm18587_vm1  ;;  %v12710_v33 = vld [vmem:[%s18256_s7 + $0xa8] ss:$16 sps:$4 sm:$0xff]  }
 0x951   : > { %v5662_v49 = vpop.permute.xlu1 %5661  ;;  %v5406_v35 = vpop.permute.xlu0 %5405  ;;  %11333 = vmatprep.subr.bf16.mxu0 %v12656_v56  ;;  %vm18591_vm6 = vmmov %vm18590_vm0 }
 0x952   : > { %5676 = vst.msk [vmem:[#allocation4 + $0xac] sm:$0x7] %vm5427_vm2, %v5662_v49  ;;  %vm18592_vm4 = vmmov %vm18590_vm0 }
 0x953   : > { %5424 = vst.msk [vmem:[#allocation4 + $0x3c] sm:$0xf] %vm5256_vm11, %v5406_v35  ;;  %11392 = vmatpush3.bf16.msra.mxu1 %v12657_v28 }
 0x954   : > { %11334 = vmatpush3.bf16.msra.mxu0 %v12658_v59  ;;  %11393 = vmatprep.subr.bf16.mxu1 %v12659_v10 }
 0x955   : > { %v5300_v31 = vpop.permute.xlu1 %5299  ;;  %v5330_v24 = vpop.permute.xlu0 %5329 }
 0x956   : > { %5316 = vst.msk [vmem:[#allocation4 + $0x30] sm:$0x3] %vm5315_vm10, %v5300_v31 }
 0x957   : > { %v12661_v12 = vld [vmem:[#allocation4 + $0x60] sm:$0xff]   ;;  %5346 = vst.msk [vmem:[#allocation4 + $0x30] sm:$0x3] %vm5345_vm3, %v5330_v24  ;;  %11394 = vmatpush3.bf16.msra.mxu1 %v12660_v37 }
 0x958   : > { %11335 = vmatprep.subr.bf16.mxu0 %v12661_v12  ;;  %11395 = vmatprep.subr.bf16.mxu1 %v12663_v26  ;;  %v12719_v26 = vld [vmem:[%s18593_s10 + $0x20] sm:$0xff]  }
 0x959   : > { %v5404_v46 = vpop.permute.xlu1 %5403  ;;  %v5802_v52 = vpop.permute.xlu0 %5801  ;;  %11336 = vmatpush3.bf16.msra.mxu0 %v12662_v9  ;;  %v12665_v16 = vld [vmem:[#allocation4 + $0xa8] sm:$0xff]  }
 0x95a   : > { %5423 = vst.msk [vmem:[#allocation4 + $0x38] sm:$0xf] %vm5256_vm11, %v5404_v46  ;;  %11337 = vmatprep.subr.bf16.mxu0 %v12664_v5  ;;  %v12720_v5 = vld [vmem:[%s18593_s10 + $0x28] ss:$0 sps:$4 sm:$0x11]  }
 0x95b   : > { %5816 = vst.msk [vmem:[#allocation4 + $0xf8] sm:$0x3] %vm5315_vm10, %v5802_v52  ;;  %11396 = vmatpush3.bf16.msra.mxu1 %v12665_v16 }
 0x95c   : > { %11397 = vmatprep.subr.bf16.mxu1 %v12667_v8 }
 0x95d   : > { %v5712_v61 = vpop.permute.xlu1 %5711  ;;  %v5830_v34 = vpop.permute.xlu0 %5829  ;;  %11338 = vmatpush3.bf16.msra.mxu0 %v12666_v22 }
 0x95e   : > { %5729 = vst.msk [vmem:[#allocation4 + $0xb8] sm:$0xf] %vm5256_vm11, %v5712_v61  ;;  %11339 = vmatprep.subr.bf16.mxu0 %v12668_v18  ;;  %v12670_v0 = vld [vmem:[#allocation4 + $0x30] sm:$0xff]  }
 0x95f   : > { %5844 = vst.msk [vmem:[#allocation4 + $0xf8] sm:$0x3] %vm5345_vm3, %v5830_v34  ;;  %11398 = vmatpush3.bf16.msra.mxu1 %v12669_v54  ;;  %v6719_v34 = vsel %vm3394_vm15, %v12720_v5, 0  ;;  %vm6696_vm15 = vcmask 670720  }
 0x961   : > { %v5714_v60 = vpop.permute.xlu0 %5713  ;;  %11340 = vmatpush3.bf16.msra.mxu0 %v12670_v0  ;;  %v12672_v17 = vld [vmem:[#allocation4 + $0x38] sm:$0xff]  }
 0x962   : > { %5730 = vst.msk [vmem:[#allocation4 + $0xbc] sm:$0xf] %vm5256_vm11, %v5714_v60  ;;  %11341 = vmatprep.subr.bf16.mxu0 %v12671_v7  ;;  %vm18589_vm11 = vmmov %vm18587_vm1 }
 0x965   : > { %11342 = vmatpush3.bf16.msra.mxu0 %v12672_v17 }
 0x966   : > { %v12673_v55 = vld [vmem:[#allocation4 + $0xf8] ss:$0 sps:$4 sm:$0x33]   ;;  %11766 = vmatprep.subr.bf16.mxu0 %v12939_v51 }
 0x967   : > { %11893 = vmatprep.subr.msk.bf16.mxu1 %vm3495_vm14, %v12673_v55 }
 0x968   : > { %6307 = vmatmul.mubr.bf16.vlgmr.msra.gmra.mrb[48].mxu0 %v12674_v4 }
 0x969   : > { %v12677_v57 = vld [vmem:[#allocation4 + $0xb8] sm:$0xff]   ;;  %6314 = vmatprep.mubr.bf16.mxu0 %v12683_v14  ;;  %11767 = vmatpush3.bf16.msra.mxu0 %v12715_v43 }
 0x96a   : > { %11400 = vmatpush3.bf16.msra.mxu1 %v12677_v57  ;;  %11768 = vmatprep.subr.bf16.mxu0 %v12939_v51 }
 0x96d   : > { %6395 = vmatmul.mubr.bf16.vlgmr.msra.gmra.mrb[80].mxu1 %v12678_v21  ;;  %11769 = vmatpush3.bf16.msra.mxu0 %v12716_v19 }
 0x96e   : > { %10868 = vmatprep.mubr.msk.bf16.mxu1 %vm18587_vm1, %v12681_v25  ;;  %11770 = vmatprep.subr.bf16.mxu0 %v12939_v51 }
 0x970   : > { %6315 = vmatmul.mubr.bf16.gmra.mrb[52].mxu0 %v12685_v13 }
 0x971   : > { %6322 = vmatprep.mubr.bf16.mxu0 %v12689_v47  ;;  %11771 = vmatpush3.bf16.msra.mxu0 %v12717_v1 }
 0x972   : > { %11772 = vmatprep.subr.bf16.mxu0 %v12939_v51 }
 0x975   : > { %6403 = vmatmul.mubr.bf16.gmra.mrb[84].mxu1 %v12686_v48  ;;  %11773 = vmatpush3.bf16.msra.mxu0 %v12718_v23 }
 0x976   : > { %10869 = vmatprep.mubr.msk.bf16.mxu1 %vm18588_vm8, %v12687_v45  ;;  %11774 = vmatprep.subr.bf16.mxu0 %v12939_v51 }
 0x978   : > { %6323 = vmatmul.mubr.bf16.gmra.mrb[56].mxu0 %v12691_v6 }
 0x979   : > { %6330 = vmatprep.mubr.bf16.mxu0 %v12695_v27  ;;  %11775 = vmatpush3.bf16.msra.mxu0 %v12719_v26 }
 0x97a   : > { %11776 = vmatprep.subr.bf16.mxu0 %v12939_v51 }
 0x97d   : > { %6411 = vmatmul.mubr.bf16.gmra.mrb[88].mxu1 %v12692_v42  ;;  %11777 = vmatpush3.bf16.msra.mxu0 %v6719_v34 }
 0x97e   : > { %10870 = vmatprep.mubr.msk.bf16.mxu1 %vm18589_vm11, %v12693_v62 }
 0x980   : > { %6331 = vmatmul.mubr.bf16.gmra.mrb[60].mxu0 %v12697_v2 }
 0x981   : > { %6338 = vmatprep.mubr.bf16.mxu0 %v12699_v36 }
 0x985   : > { %6419 = vmatmul.mubr.bf16.gmra.mrb[92].mxu1 %v12698_v20 }
 0x986   : > { %10871 = vmatprep.mubr.msk.bf16.mxu1 %vm18590_vm0, %v12701_v30 }
 0x988   : > { %6339 = vmatmul.mubr.bf16.gmra.mrb[64].mxu0 %v12703_v40 }
 0x989   : > { %6346 = vmatprep.mubr.bf16.mxu0 %v12705_v63 }
 0x98d   : > { %6427 = vmatmul.mubr.bf16.gmra.mrb[96].mxu1 %v12704_v50 }
 0x98e   : > { %10872 = vmatprep.mubr.msk.bf16.mxu1 %vm18591_vm6, %v12707_v11 }
 0x990   : > { %6347 = vmatmul.mubr.bf16.gmra.mrb[68].mxu0 %v12709_v44 }
 0x991   : > { %6354 = vmatprep.mubr.bf16.mxu0 %v10832_v58 }
 0x995   : > { %6435 = vmatmul.mubr.bf16.gmra.mrb[100].mxu1 %v12710_v33 }
 0x996   : > { %10873 = vmatprep.mubr.msk.bf16.mxu1 %vm18592_vm4, %v10834_v41 }
 0x998   : > { %6355 = vmatmul.mubr.bf16.gmra.mrb[72].mxu0 %v10831_v32 }
 0x999   : > { %11778 = vmatprep.mubr.msk.bf16.mxu0 %vm12940_vm12, %v12939_v51 }
 0x99d   : > { %6443 = vmatmul.mubr.bf16.gmra.mrb[104].mxu1 %v10833_v29 }
 0xa3b   : > { %v11343_v3 = vpop.f32.mrb[48].mxu0 }
 0xa3c   : > { %v11344_v38 = vpop.f32.mrb[49].mxu0 }
 0xa3d   : > { %v11345_v56 = vadd.f32 %v11344_v38, %v11343_v3  ;;  %v11346_v49 = vpop.f32.mrb[50].mxu0 }
 0xa3e   : > { %v11347_v35 = vpop.f32.mrb[51].mxu0 }
 0xa3f   : > { %v11348_v28 = vadd.f32 %v11347_v35, %v11346_v49 }
 0xa40   : > { %v11401_v59 = vpop.f32.mrb[80].mxu1 }
 0xa41   : > { %v11402_v10 = vpop.f32.mrb[81].mxu1 }
 0xa42   : > { %v11403_v31 = vadd.f32 %v11402_v10, %v11401_v59  ;;  %v11404_v24 = vpop.f32.mrb[82].mxu1 }
 0xa43   : > { %v11349_v37 = vpop.f32.mrb[52].mxu0  ;;  %v11405_v12 = vpop.f32.mrb[83].mxu1 }
 0xa44   : > { %v11350_v9 = vpop.f32.mrb[53].mxu0  ;;  %v16473_v46 = vadd.f32 %v11403_v31, %v11345_v56  ;;  %v11406_v52 = vadd.f32 %v11405_v12, %v11404_v24 }
 0xa45   : > { %v11351_v16 = vadd.f32 %v11350_v9, %v11349_v37  ;;  %v11352_v22 = vpop.f32.mrb[54].mxu0 }
 0xa46   : > { %v11353_v8 = vpop.f32.mrb[55].mxu0  ;;  %v16477_v18 = vadd.f32 %v11406_v52, %v11348_v28 }
 0xa47   : > { %v11354_v61 = vadd.f32 %v11353_v8, %v11352_v22 }
 0xa48   : > { %v12192_v54 = vpack.i.bf16 %v16477_v18, %v16473_v46  ;;  %v11407_v0 = vpop.f32.mrb[84].mxu1 }
 0xa49   : > { %v11408_v7 = vpop.f32.mrb[85].mxu1 }
 0xa4a   : > { %v11409_v60 = vadd.f32 %v11408_v7, %v11407_v0  ;;  %v11410_v17 = vpop.f32.mrb[86].mxu1  ;;  %12193 = vrot.lane.b32.xlu0 %v12192_v54, %s18377_s16  ;;  %12188 = vrot.lane.b32.xlu1 %v12192_v54, %s18376_s24 }
 0xa4b   : > { %v11355_v4 = vpop.f32.mrb[56].mxu0  ;;  %v11411_v14 = vpop.f32.mrb[87].mxu1 }
 0xa4c   : > { %v11356_v55 = vpop.f32.mrb[57].mxu0  ;;  %v16485_v57 = vadd.f32 %v11409_v60, %v11351_v16  ;;  %v11412_v21 = vadd.f32 %v11411_v14, %v11410_v17 }
 0xa4d   : > { %v11357_v25 = vadd.f32 %v11356_v55, %v11355_v4  ;;  %v11358_v13 = vpop.f32.mrb[58].mxu0 }
 0xa4e   : > { %v11359_v47 = vpop.f32.mrb[59].mxu0  ;;  %v16487_v48 = vadd.f32 %v11412_v21, %v11354_v61 }
 0xa4f   : > { %v11360_v45 = vadd.f32 %v11359_v47, %v11358_v13 }
 0xa50   : > { %v12202_v6 = vpack.i.bf16 %v16487_v48, %v16485_v57  ;;  %v11413_v27 = vpop.f32.mrb[88].mxu1 }
 0xa51   : > { %v11414_v42 = vpop.f32.mrb[89].mxu1 }
 0xa52   : > { %v11415_v62 = vadd.f32 %v11414_v42, %v11413_v27  ;;  %v11416_v2 = vpop.f32.mrb[90].mxu1  ;;  %12198 = vrot.lane.b32.xlu1 %v12202_v6, %s18376_s24  ;;  %12203 = vrot.lane.b32.xlu0 %v12202_v6, %s18377_s16 }
 0xa53   : > { %v11361_v36 = vpop.f32.mrb[60].mxu0  ;;  %v11417_v20 = vpop.f32.mrb[91].mxu1 }
 0xa54   : > { %v11362_v30 = vpop.f32.mrb[61].mxu0  ;;  %v16493_v40 = vadd.f32 %v11415_v62, %v11357_v25  ;;  %v11418_v63 = vadd.f32 %v11417_v20, %v11416_v2 }
 0xa55   : > { %v11363_v50 = vadd.f32 %v11362_v30, %v11361_v36  ;;  %v11364_v53 = vpop.f32.mrb[62].mxu0 }
 0xa56   : > { %v11365_v11 = vpop.f32.mrb[63].mxu0  ;;  %v16495_v44 = vadd.f32 %v11418_v63, %v11360_v45  ;;  %v16531_v63 = vpop.permute.xlu1 %6615 }
 0xa57   : > { %v11366_v58 = vadd.f32 %v11365_v11, %v11364_v53  ;;  %v16535_v53 = vpop.permute.xlu0 %6620 }
 0xa58   : > { %v12212_v39 = vpack.i.bf16 %v16495_v44, %v16493_v40  ;;  %v11419_v33 = vpop.f32.mrb[92].mxu1 }
 0xa59   : > { %v11420_v41 = vpop.f32.mrb[93].mxu1 }
 0xa5a   : > { %v11421_v32 = vadd.f32 %v11420_v41, %v11419_v33  ;;  %v11422_v29 = vpop.f32.mrb[94].mxu1  ;;  %12208 = vrot.lane.b32.xlu1 %v12212_v39, %s18376_s24  ;;  %12213 = vrot.lane.b32.xlu0 %v12212_v39, %s18377_s16 }
 0xa5b   : > { %v11367_v43 = vpop.f32.mrb[64].mxu0  ;;  %v11423_v19 = vpop.f32.mrb[95].mxu1 }
 0xa5c   : > { %v11368_v1 = vpop.f32.mrb[65].mxu0  ;;  %v16501_v23 = vadd.f32 %v11421_v32, %v11363_v50  ;;  %v11424_v3 = vadd.f32 %v11423_v19, %v11422_v29  ;;  %v16533_v50 = vpop.permute.xlu1 %6625 }
 0xa5d   : > { %v11369_v38 = vadd.f32 %v11368_v1, %v11367_v43  ;;  %v11370_v56 = vpop.f32.mrb[66].mxu0 }
 0xa5e   : > { %v11371_v49 = vpop.f32.mrb[67].mxu0  ;;  %v16503_v35 = vadd.f32 %v11424_v3, %v11366_v58  ;;  %v16539_v58 = vpop.permute.xlu0 %6630 }
 0xa5f   : > { %v11372_v28 = vadd.f32 %v11371_v49, %v11370_v56 }
 0xa60   : > { %v12222_v59 = vpack.i.bf16 %v16503_v35, %v16501_v23  ;;  %v11425_v10 = vpop.f32.mrb[96].mxu1  ;;  %v16537_v11 = vpop.permute.xlu1 %6650 }
 0xa61   : > { %v11426_v31 = vpop.f32.mrb[97].mxu1 }
 0xa62   : > { %v11427_v24 = vadd.f32 %v11426_v31, %v11425_v10  ;;  %v11428_v37 = vpop.f32.mrb[98].mxu1  ;;  %12218 = vrot.lane.b32.xlu1 %v12222_v59, %s18376_s24  ;;  %12223 = vrot.lane.b32.xlu0 %v12222_v59, %s18377_s16  ;;  %v16543_v33 = vpop.permute.xlu0 %6655 }
 0xa63   : > { %v11373_v12 = vpop.f32.mrb[68].mxu0  ;;  %v11429_v9 = vpop.f32.mrb[99].mxu1 }
 0xa64   : > { %v11374_v26 = vpop.f32.mrb[69].mxu0  ;;  %v16509_v5 = vadd.f32 %v11427_v24, %v11369_v38  ;;  %v11430_v52 = vadd.f32 %v11429_v9, %v11428_v37  ;;  %v16541_v39 = vpop.permute.xlu1 %6635 }
 0xa65   : > { %v11375_v16 = vadd.f32 %v11374_v26, %v11373_v12  ;;  %v11376_v22 = vpop.f32.mrb[70].mxu0 }
 0xa66   : > { %v11377_v8 = vpop.f32.mrb[71].mxu0  ;;  %v16511_v61 = vadd.f32 %v11430_v52, %v11372_v28  ;;  %v16547_v32 = vpop.permute.xlu0 %6600 }
 0xa67   : > { %v11378_v34 = vadd.f32 %v11377_v8, %v11376_v22 }
 0xa68   : > { %v12232_v54 = vpack.i.bf16 %v16511_v61, %v16509_v5  ;;  %v11431_v0 = vpop.f32.mrb[100].mxu1  ;;  %v16545_v41 = vpop.permute.xlu1 %6605 }
 0xa69   : > { %v11432_v7 = vpop.f32.mrb[101].mxu1 }
 0xa6a   : > { %v11433_v60 = vadd.f32 %v11432_v7, %v11431_v0  ;;  %v11434_v17 = vpop.f32.mrb[102].mxu1  ;;  %12228 = vrot.lane.b32.xlu1 %v12232_v54, %s18376_s24  ;;  %12233 = vrot.lane.b32.xlu0 %v12232_v54, %s18377_s16  ;;  %v16551_v43 = vpop.permute.xlu0 %6660 }
 0xa6b   : > { %v11379_v4 = vpop.f32.mrb[72].mxu0  ;;  %v11435_v14 = vpop.f32.mrb[103].mxu1 }
 0xa6c   : > { %v11380_v55 = vpop.f32.mrb[73].mxu0  ;;  %v16517_v21 = vadd.f32 %v11433_v60, %v11375_v16  ;;  %v11436_v25 = vadd.f32 %v11435_v14, %v11434_v17  ;;  %v16549_v29 = vpop.permute.xlu1 %6640 }
 0xa6d   : > { %v11381_v13 = vadd.f32 %v11380_v55, %v11379_v4  ;;  %v11382_v47 = vpop.f32.mrb[74].mxu0 }
 0xa6e   : > { %v11383_v45 = vpop.f32.mrb[75].mxu0  ;;  %v16519_v6 = vadd.f32 %v11436_v25, %v11378_v34  ;;  %v16555_v1 = vpop.permute.xlu0 %6645 }
 0xa70   : > { %v12242_v27 = vpack.i.bf16 %v16519_v6, %v16517_v21  ;;  %v11437_v42 = vpop.f32.mrb[104].mxu1  ;;  %v16553_v19 = vpop.permute.xlu1 %6610 }
 0xa71   : > { %v11438_v62 = vpop.f32.mrb[105].mxu1 }
 0xa72   : > { %12238 = vrot.lane.b32.xlu1 %v12242_v27, %s18376_s24  ;;  %12243 = vrot.lane.b32.xlu0 %v12242_v27, %s18377_s16  ;;  %v11439_v2 = vadd.f32 %v11438_v62, %v11437_v42  ;;  %v11440_v36 = vpop.f32.mrb[106].mxu1 }
 0xa73   : > { %v11441_v20 = vpop.f32.mrb[107].mxu1 }
 0xa74   : > { %v16525_v30 = vadd.f32 %v11439_v2, %v11381_v13 }
 0xa76   : > { %6487 = vrot.lane.b32.xlu1 %v16525_v30, %s18376_s24  ;;  %6539 = vrot.lane.b32.xlu0 %v16525_v30, %s18377_s16 }
 0xabc   : > { %v12194_v3 = vpop.permute.xlu0 %12193  ;;  %v12189_v38 = vpop.permute.xlu1 %12188 }
 0xabd   : > { %v12191_v56 = vunpack.i.h.bf16 %v12189_v38  ;;  %v12190_v49 = vunpack.i.l.bf16 %v12189_v38  ;;  %v12196_v28 = vunpack.i.h.bf16 %v12194_v3  ;;  %v12195_v59 = vunpack.i.l.bf16 %v12194_v3 }
 0xabf   : > { %v6503_v10 = vmax.f32 %v16477_v18, %v12191_v56  ;;  %v6502_v31 = vmax.f32 %v16473_v46, %v12190_v49 }
 0xac1   : > { %v6555_v24 = vmax.f32 %v6503_v10, %v12196_v28  ;;  %v6554_v37 = vmax.f32 %v6502_v31, %v12195_v59 }
 0xac3   : > { %v6567_v12 = vpack.c.bf16 %v6555_v24, %v6554_v37 }
 0xac4   : > { %v12199_v9 = vpop.permute.xlu1 %12198  ;;  %v12204_v26 = vpop.permute.xlu0 %12203 }
 0xac5   : > { %v12201_v52 = vunpack.i.h.bf16 %v12199_v9  ;;  %v12200_v16 = vunpack.i.l.bf16 %v12199_v9  ;;  %11779 = vmatmul.mubr.msk.bf16.vlgmr.msra.gmra.mrb[76].mxu0 %vm6696_vm15, %v6567_v12  ;;  %v12206_v22 = vunpack.i.h.bf16 %v12204_v26  ;;  %v12205_v8 = vunpack.i.l.bf16 %v12204_v26 }
 0xac6   : > { %11782 = vmatprep.mubr.msk.bf16.mxu0 %vm12940_vm12, %v12939_v51 }
 0xac7   : > { %v6505_v34 = vmax.f32 %v16487_v48, %v12201_v52  ;;  %v6504_v18 = vmax.f32 %v16485_v57, %v12200_v16 }
 0xac9   : > { %v6556_v46 = vmax.f32 %v6504_v18, %v12205_v8  ;;  %v6557_v54 = vmax.f32 %v6505_v34, %v12206_v22 }
 0xacb   : > { %v6568_v0 = vpack.c.bf16 %v6557_v54, %v6556_v46 }
 0xacc   : > { %v12209_v7 = vpop.permute.xlu1 %12208  ;;  %v12214_v60 = vpop.permute.xlu0 %12213 }
 0xacd   : > { %v12211_v17 = vunpack.i.h.bf16 %v12209_v7  ;;  %v12210_v4 = vunpack.i.l.bf16 %v12209_v7  ;;  %11783 = vmatmul.mubr.msk.bf16.gmra.mrb[80].mxu0 %vm6696_vm15, %v6568_v0  ;;  %v12216_v14 = vunpack.i.h.bf16 %v12214_v60  ;;  %v12215_v55 = vunpack.i.l.bf16 %v12214_v60 }
 0xace   : > { %11786 = vmatprep.mubr.msk.bf16.mxu0 %vm12940_vm12, %v12939_v51 }
 0xacf   : > { %v6507_v25 = vmax.f32 %v16495_v44, %v12211_v17  ;;  %v6506_v48 = vmax.f32 %v16493_v40, %v12210_v4 }
 0xad1   : > { %v6558_v13 = vmax.f32 %v6506_v48, %v12215_v55  ;;  %v6559_v57 = vmax.f32 %v6507_v25, %v12216_v14 }
 0xad3   : > { %v6569_v47 = vpack.c.bf16 %v6559_v57, %v6558_v13 }
 0xad4   : > { %v12219_v45 = vpop.permute.xlu1 %12218  ;;  %v12224_v27 = vpop.permute.xlu0 %12223 }
 0xad5   : > { %v12221_v42 = vunpack.i.h.bf16 %v12219_v45  ;;  %v12220_v62 = vunpack.i.l.bf16 %v12219_v45  ;;  %11787 = vmatmul.mubr.msk.bf16.gmra.mrb[84].mxu0 %vm6696_vm15, %v6569_v47  ;;  %v12226_v2 = vunpack.i.h.bf16 %v12224_v27  ;;  %v12225_v36 = vunpack.i.l.bf16 %v12224_v27 }
 0xad6   : > { %11790 = vmatprep.mubr.msk.bf16.mxu0 %vm12940_vm12, %v12939_v51 }
 0xad7   : > { %v6509_v20 = vmax.f32 %v16503_v35, %v12221_v42  ;;  %v6508_v44 = vmax.f32 %v16501_v23, %v12220_v62 }
 0xad9   : > { %v6560_v3 = vmax.f32 %v6508_v44, %v12225_v36  ;;  %v6561_v40 = vmax.f32 %v6509_v20, %v12226_v2 }
 0xadb   : > { %v6570_v38 = vpack.c.bf16 %v6561_v40, %v6560_v3 }
 0xadc   : > { %v12229_v56 = vpop.permute.xlu1 %12228  ;;  %v12234_v49 = vpop.permute.xlu0 %12233 }
 0xadd   : > { %v12231_v28 = vunpack.i.h.bf16 %v12229_v56  ;;  %v12230_v59 = vunpack.i.l.bf16 %v12229_v56  ;;  %11791 = vmatmul.mubr.msk.bf16.gmra.mrb[88].mxu0 %vm6696_vm15, %v6570_v38  ;;  %v12236_v10 = vunpack.i.h.bf16 %v12234_v49  ;;  %v12235_v31 = vunpack.i.l.bf16 %v12234_v49 }
 0xade   : > { %11794 = vmatprep.mubr.msk.bf16.mxu0 %vm12940_vm12, %v12939_v51 }
 0xadf   : > { %v6511_v24 = vmax.f32 %v16511_v61, %v12231_v28  ;;  %v6510_v35 = vmax.f32 %v16509_v5, %v12230_v59 }
 0xae1   : > { %v6562_v37 = vmax.f32 %v6510_v35, %v12235_v31  ;;  %v6563_v23 = vmax.f32 %v6511_v24, %v12236_v10 }
 0xae3   : > { %v6571_v12 = vpack.c.bf16 %v6563_v23, %v6562_v37 }
 0xae4   : > { %v12239_v9 = vpop.permute.xlu1 %12238  ;;  %v12244_v26 = vpop.permute.xlu0 %12243 }
 0xae5   : > { %v12241_v52 = vunpack.i.h.bf16 %v12239_v9  ;;  %v12240_v16 = vunpack.i.l.bf16 %v12239_v9  ;;  %11795 = vmatmul.mubr.msk.bf16.gmra.mrb[92].mxu0 %vm6696_vm15, %v6571_v12  ;;  %v12246_v22 = vunpack.i.h.bf16 %v12244_v26  ;;  %v12245_v8 = vunpack.i.l.bf16 %v12244_v26 }
 0xae6   : > { %11798 = vmatprep.mubr.msk.bf16.mxu0 %vm12940_vm12, %v12939_v51 }
 0xae7   : > { %v6513_v34 = vmax.f32 %v16519_v6, %v12241_v52  ;;  %v6512_v61 = vmax.f32 %v16517_v21, %v12240_v16 }
 0xae8   : > { %v6488_v18 = vpop.permute.xlu1 %6487  ;;  %v6540_v0 = vpop.permute.xlu0 %6539 }
 0xae9   : > { %v6564_v5 = vmax.f32 %v6512_v61, %v12245_v8  ;;  %v6565_v46 = vmax.f32 %v6513_v34, %v12246_v22  ;;  %v6514_v54 = vmax.f32 %v16525_v30, %v6488_v18 }
 0xaeb   : > { %v6572_v7 = vpack.c.bf16 %v6565_v46, %v6564_v5  ;;  %v6566_v60 = vmax.f32 %v6514_v54, %v6540_v0 }
 0xaed   : > { %11799 = vmatmul.mubr.msk.bf16.gmra.mrb[96].mxu0 %vm6696_vm15, %v6572_v7  ;;  %v6573_v17 = vpack.c.bf16 %v6566_v60, %v6566_v60 }
 0xaee   : > { %11802 = vmatprep.mubr.msk.bf16.mxu0 %vm12940_vm12, %v12939_v51 }
 0xaf5   : > { %11803 = vmatmul.mubr.msk.bf16.gmra.mrb[100].mxu0 %vm6696_vm15, %v6573_v17 }
 0xb98   : > { %v6755_v4 = vpop.f32.mrb[76].mxu0 }
 0xb99   : > { %v6756_v6 = vadd.f32 %v6755_v4, %v16547_v32  ;;  %v11780_v21 = vpop.f32.mrb[77].mxu0 }
 0xb9a   : > { %v6758_v14 = vpop.f32.mrb[78].mxu0 }
 0xb9b   : > { %v6822_v55 = vmin.f32 %v6756_v6, 0.0  ;;  %v6759_v25 = vadd.f32 %v6758_v14, %v16545_v41  ;;  %v11781_v30 = vpop.f32.mrb[79].mxu0  ;;  %vm6809_vm13 = vcmp.gt.f32.partialorder %v6756_v6, 0.0 }
 0xb9d   : > { %v6835_v48 = vmul.f32 1.442695, %v6822_v55  ;;  %v6823_v13 = vmin.f32 %v6759_v25, 0.0  ;;  %vm6810_vm2 = vcmp.gt.f32.partialorder %v6759_v25, 0.0 }
 0xb9f   : > { %12830 = vpow2.f32 %v6835_v48  ;;  %v6837_v57 = vmul.f32 1.442695, %v6823_v13 }
 0xba0   : > { %v6763_v47 = vpop.f32.mrb[80].mxu0 }
 0xba1   : > { %12832 = vpow2.f32 %v6837_v57  ;;  %v6764_v45 = vadd.f32 %v6763_v47, %v16553_v19  ;;  %v11784_v27 = vpop.f32.mrb[81].mxu0 }
 0xba2   : > { %v6766_v42 = vpop.f32.mrb[82].mxu0 }
 0xba3   : > { %v6824_v62 = vmin.f32 %v6764_v45, 0.0  ;;  %v6767_v2 = vadd.f32 %v6766_v42, %v16531_v63  ;;  %v11785_v32 = vpop.f32.mrb[83].mxu0  ;;  %vm6811_vm10 = vcmp.gt.f32.partialorder %v6764_v45, 0.0 }
 0xba5   : > { %v6839_v36 = vmul.f32 1.442695, %v6824_v62  ;;  %v6825_v20 = vmin.f32 %v6767_v2, 0.0  ;;  %vm6812_vm3 = vcmp.gt.f32.partialorder %v6767_v2, 0.0 }
 0xba7   : > { %12834 = vpow2.f32 %v6839_v36  ;;  %v6841_v44 = vmul.f32 1.442695, %v6825_v20 }
 0xba8   : > { %v6771_v41 = vpop.f32.mrb[84].mxu0 }
 0xba9   : > { %v12831_v3 = vpop.eup %12830  ;;  %12836 = vpow2.f32 %v6841_v44  ;;  %v16594_v40 = vadd.f32 %v6771_v41, %v16535_v53  ;;  %v11788_v38 = vpop.f32.mrb[85].mxu0 }
 0xbaa   : > { %v10887_v56 = vadd.f32 -1.0, %v12831_v3  ;;  %v6774_v49 = vpop.f32.mrb[86].mxu0 }
 0xbab   : > { %v12833_v19 = vpop.eup %12832  ;;  %v6826_v28 = vmin.f32 %v16594_v40, 0.0  ;;  %v16598_v63 = vadd.f32 %v6774_v49, %v16533_v50  ;;  %v11789_v59 = vpop.f32.mrb[87].mxu0  ;;  %vm6813_vm1 = vcmp.gt.f32.partialorder %v16594_v40, 0.0 }
 0xbac   : > { %v6874_v10 = vsel %vm6809_vm13, %v6756_v6, %v10887_v56  ;;  %v10888_v31 = vadd.f32 -1.0, %v12833_v19 }
 0xbad   : > { %v16600_v24 = vpack.c.bf16 %v6874_v10, %v6874_v10  ;;  %v6843_v35 = vmul.f32 1.442695, %v6826_v28  ;;  %v6827_v53 = vmin.f32 %v16598_v63, 0.0  ;;  %vm6814_vm8 = vcmp.gt.f32.partialorder %v16598_v63, 0.0 }
 0xbae   : > { %v6875_v37 = vsel %vm6810_vm2, %v6759_v25, %v10888_v31 }
 0xbaf   : > { %v16603_v23 = vpack.c.bf16 %v6875_v37, %v6875_v37  ;;  %12838 = vpow2.f32 %v6843_v35  ;;  %v6845_v12 = vmul.f32 1.442695, %v6827_v53  ;;  %7152 = vrot.lane.b32.xlu1 %v16600_v24, %s18377_s16  ;;  %6955 = vrot.lane.b32.xlu0 %v16600_v24, %s18373_s30  ;;  %6941 = vst.msk [vmem:[#allocation5] sm:$0xf] %vm6940_vm9, %v16600_v24  ;;  %v16639_v14 = vrot.slane %v16600_v24, 6 }
 0xbb0   : > { %v6779_v50 = vpop.f32.mrb[88].mxu0 }
 0xbb1   : > { %v12835_v9 = vpop.eup %12834  ;;  %12840 = vpow2.f32 %v6845_v12  ;;  %v16612_v26 = vadd.f32 %v6779_v50, %v16539_v58  ;;  %v11792_v52 = vpop.f32.mrb[89].mxu0  ;;  %6942 = vst.msk [vmem:[#allocation5 + $0x4] sm:$0xf] %vm6940_vm9, %v16603_v23 }
 0xbb2   : > { %v10889_v16 = vadd.f32 -1.0, %v12835_v9  ;;  %v6782_v22 = vpop.f32.mrb[90].mxu0 }
 0xbb3   : > { %v12837_v8 = vpop.eup %12836  ;;  %v6828_v34 = vmin.f32 %v16612_v26, 0.0  ;;  %v16618_v61 = vadd.f32 %v6782_v22, %v16541_v39  ;;  %7204 = vrot.lane.b32.xlu1 %v16600_v24, %s18426_s23  ;;  %7360 = vrot.lane.b32.xlu0 %v16600_v24, %s18432_s28  ;;  %v11793_v58 = vpop.f32.mrb[91].mxu0  ;;  %vm6815_vm11 = vcmp.gt.f32.partialorder %v16612_v26, 0.0 }
 0xbb4   : > { %v6876_v18 = vsel %vm6811_vm10, %v6764_v45, %v10889_v16  ;;  %v10890_v5 = vadd.f32 -1.0, %v12837_v8  ;;  %vm6953_vm10 = vcmask 17408  }
 0xbb5   : > { %v16624_v46 = vpack.c.bf16 %v6876_v18, %v6876_v18  ;;  %v6847_v54 = vmul.f32 1.442695, %v6828_v34  ;;  %v6829_v0 = vmin.f32 %v16618_v61, 0.0  ;;  %vm6816_vm0 = vcmp.gt.f32.partialorder %v16618_v61, 0.0 }
 0xbb6   : > { %v6877_v7 = vsel %vm6812_vm3, %v6767_v2, %v10890_v5  ;;  %vm6994_vm3 = vcmask 44056  }
 0xbb7   : > { %v16627_v60 = vpack.c.bf16 %v6877_v7, %v6877_v7  ;;  %12842 = vpow2.f32 %v6847_v54  ;;  %v6849_v39 = vmul.f32 1.442695, %v6829_v0  ;;  %7776 = vrot.lane.b32.xlu1 %v16600_v24, %s18434_s0  ;;  %7412 = vrot.lane.b32.xlu0 %v16600_v24, %s18428_s21  ;;  %6943 = vst.msk [vmem:[#allocation5 + $0x8] sm:$0xf] %vm6940_vm9, %v16624_v46  ;;  %v7010_v54 = vrot.slane %v16639_v14, 4 }
 0xbb8   : > { %v6787_v17 = vpop.f32.mrb[92].mxu0  ;;  %v7011_v0 = vrot.slane %v16603_v23, 6 }
 0xbb9   : > { %v12839_v4 = vpop.eup %12838  ;;  %12844 = vpow2.f32 %v6849_v39  ;;  %v16636_v6 = vadd.f32 %v6787_v17, %v16549_v29  ;;  %v11796_v21 = vpop.f32.mrb[93].mxu0  ;;  %6944 = vst.msk [vmem:[#allocation5 + $0xc] sm:$0xf] %vm6940_vm9, %v16627_v60 }
 0xbba   : > { %v10891_v55 = vadd.f32 -1.0, %v12839_v4  ;;  %v6790_v25 = vpop.f32.mrb[94].mxu0  ;;  %v16721_v21 = vsel %vm15876_vm5, %v7010_v54, %v7011_v0 }
 0xbbb   : > { %v12841_v30 = vpop.eup %12840  ;;  %v6830_v48 = vmin.f32 %v16636_v6, 0.0  ;;  %v16646_v13 = vadd.f32 %v6790_v25, %v16555_v1  ;;  %7828 = vrot.lane.b32.xlu1 %v16600_v24, %s18594_s26  ;;  %7256 = vrot.lane.b32.xlu0 %v16639_v14, %s18436_s2  ;;  %v11797_v29 = vpop.f32.mrb[95].mxu0  ;;  %vm6817_vm6 = vcmp.gt.f32.partialorder %v16636_v6, 0.0 }
 0xbbc   : > { %v6878_v57 = vsel %vm6813_vm1, %v16594_v40, %v10891_v55  ;;  %v10892_v47 = vadd.f32 -1.0, %v12841_v30  ;;  %v7014_v29 = vrot.slane %v16624_v46, 6  ;;  %vm7085_vm1 = vcmask 19458  }
 0xbbd   : > { %v16653_v45 = vpack.c.bf16 %v6878_v57, %v6878_v57  ;;  %v6851_v27 = vmul.f32 1.442695, %v6830_v48  ;;  %v6831_v42 = vmin.f32 %v16646_v13, 0.0  ;;  %vm6818_vm4 = vcmp.gt.f32.partialorder %v16646_v13, 0.0 }
 0xbbe   : > { %v6879_v1 = vsel %vm6814_vm8, %v16598_v63, %v10892_v47  ;;  %v7013_v57 = vrot.slane %v7011_v0, 4  ;;  %vm7138_vm8 = vcmask 44058  }
 0xbbf   : > { %v16658_v62 = vpack.c.bf16 %v6879_v1, %v6879_v1  ;;  %12846 = vpow2.f32 %v6851_v27  ;;  %v6853_v2 = vmul.f32 1.442695, %v6831_v42  ;;  %7154 = vrot.lane.b32.xlu0 %v16603_v23, %s18377_s16  ;;  %6957 = vrot.lane.b32.xlu1 %v16603_v23, %s18373_s30  ;;  %6945 = vst.msk [vmem:[#allocation5 + $0x10] sm:$0xf] %vm6940_vm9, %v16653_v45  ;;  %v7016_v27 = vrot.slane %v7014_v29, 4 }
 0xbc0   : > { %v6795_v32 = vpop.f32.mrb[96].mxu0  ;;  %v16776_v47 = vsel %vm15876_vm5, %v7013_v57, %v7014_v29  ;;  %v7017_v42 = vrot.slane %v16627_v60, 6 }
 0xbc1   : > { %v12843_v36 = vpop.eup %12842  ;;  %12848 = vpow2.f32 %v6853_v2  ;;  %v6796_v20 = vadd.f32 %v6795_v32, %v16537_v11  ;;  %v11800_v44 = vpop.f32.mrb[97].mxu0  ;;  %6946 = vst.msk [vmem:[#allocation5 + $0x14] sm:$0xf] %vm6940_vm9, %v16658_v62 }
 0xbc2   : > { %v10893_v41 = vadd.f32 -1.0, %v12843_v36  ;;  %v6798_v3 = vpop.f32.mrb[98].mxu0  ;;  %v16789_v1 = vsel %vm15876_vm5, %v7016_v27, %v7017_v42 }
 0xbc3   : > { %v12845_v40 = vpop.eup %12844  ;;  %v6832_v38 = vmin.f32 %v6796_v20, 0.0  ;;  %v6799_v56 = vadd.f32 %v6798_v3, %v16543_v33  ;;  %7206 = vrot.lane.b32.xlu0 %v16603_v23, %s18426_s23  ;;  %7362 = vrot.lane.b32.xlu1 %v16603_v23, %s18432_s28  ;;  %v11801_v49 = vpop.f32.mrb[99].mxu0  ;;  %vm6819_vm15 = vcmp.gt.f32.partialorder %v6796_v20, 0.0 }
 0xbc4   : > { %v6880_v11 = vsel %vm6815_vm11, %v16612_v26, %v10893_v41  ;;  %v10894_v19 = vadd.f32 -1.0, %v12845_v40  ;;  %vm10414_vm11 = vcmask 588800  }
 0xbc5   : > { %v16676_v28 = vpack.c.bf16 %v6880_v11, %v6880_v11  ;;  %v6855_v63 = vmul.f32 1.442695, %v6832_v38  ;;  %v6833_v59 = vmin.f32 %v6799_v56, 0.0  ;;  %vm6820_vm13 = vcmp.gt.f32.partialorder %v6799_v56, 0.0 }
 0xbc6   : > { %v6881_v10 = vsel %vm6816_vm0, %v16618_v61, %v10894_v19  ;;  %v7020_v38 = vrot.slane %v16653_v45, 6 }
 0xbc7   : > { %v16680_v31 = vpack.c.bf16 %v6881_v10, %v6881_v10  ;;  %12850 = vpow2.f32 %v6855_v63  ;;  %v6857_v33 = vmul.f32 1.442695, %v6833_v59  ;;  %7046 = vrot.lane.b32.xlu0 %v16639_v14, %s18376_s24  ;;  %7414 = vrot.lane.b32.xlu1 %v16603_v23, %s18428_s21  ;;  %6947 = vst.msk [vmem:[#allocation5 + $0x18] sm:$0xf] %vm6940_vm9, %v16676_v28 }
 0xbc8   : > { %v6803_v35 = vpop.f32.mrb[100].mxu0  ;;  %v7022_v10 = vrot.slane %v7020_v38, 4 }
 0xbc9   : > { %v12847_v53 = vpop.eup %12846  ;;  %12852 = vpow2.f32 %v6857_v33  ;;  %v6804_v37 = vadd.f32 %v6803_v35, %v16551_v43  ;;  %6948 = vst.msk [vmem:[#allocation5 + $0x1c] sm:$0xf] %vm6940_vm9, %v16680_v31  ;;  %v11804_v12 = vpop.f32.mrb[101].mxu0  ;;  %v7023_v33 = vrot.slane %v16658_v62, 6 }
 0xbca   : > { %v10895_v50 = vadd.f32 -1.0, %v12847_v53  ;;  %v6806_v9 = vpop.f32.mrb[102].mxu0 }
 0xbcb   : > { %v12849_v26 = vpop.eup %12848  ;;  %v6834_v52 = vmin.f32 %v6804_v37, 0.0  ;;  %7464 = vrot.lane.b32.xlu0 %v16639_v14, %s18437_s3  ;;  %7308 = vrot.lane.b32.xlu1 %v16639_v14, %s18427_s27  ;;  %v11805_v16 = vpop.f32.mrb[103].mxu0  ;;  %vm6821_vm2 = vcmp.gt.f32.partialorder %v6804_v37, 0.0 }
 0xbcc   : > { %v6882_v22 = vsel %vm6817_vm6, %v16636_v6, %v10895_v50  ;;  %v10896_v43 = vadd.f32 -1.0, %v12849_v26 }
 0xbcd   : > { %v16697_v8 = vpack.c.bf16 %v6882_v22, %v6882_v22  ;;  %v6859_v34 = vmul.f32 1.442695, %v6834_v52 }
 0xbce   : > { %v6883_v61 = vsel %vm6818_vm4, %v16646_v13, %v10896_v43 }
 0xbcf   : > { %v16701_v58 = vpack.c.bf16 %v6883_v61, %v6883_v61  ;;  %12854 = vpow2.f32 %v6859_v34  ;;  %7778 = vrot.lane.b32.xlu0 %v16603_v23, %s18434_s0  ;;  %7099 = vrot.lane.b32.xlu1 %v16639_v14, %s18425_s29  ;;  %6949 = vst.msk [vmem:[#allocation5 + $0x20] sm:$0xf] %vm6940_vm9, %v16697_v8 }
 0xbd1   : > { %v12851_v18 = vpop.eup %12850  ;;  %6950 = vst.msk [vmem:[#allocation5 + $0x24] sm:$0xf] %vm6940_vm9, %v16701_v58 }
 0xbd2   : > { %v10897_v5 = vadd.f32 -1.0, %v12851_v18 }
 0xbd3   : > { %v12853_v7 = vpop.eup %12852  ;;  %7830 = vrot.lane.b32.xlu0 %v16603_v23, %s18594_s26  ;;  %7516 = vrot.lane.b32.xlu1 %v16639_v14, %s18429_s22 }
 0xbd4   : > { %v6884_v39 = vsel %vm6819_vm15, %v6796_v20, %v10897_v5  ;;  %v10898_v17 = vadd.f32 -1.0, %v12853_v7 }
 0xbd5   : > { %v16717_v4 = vpack.c.bf16 %v6884_v39, %v6884_v39 }
 0xbd6   : > { %v6885_v6 = vsel %vm6820_vm13, %v6799_v56, %v10898_v17  ;;  %v7019_v56 = vrot.slane %v7017_v42, 4  ;;  %v7026_v42 = vrot.slane %v16676_v28, 6 }
 0xbd7   : > { %v16723_v55 = vpack.c.bf16 %v6885_v6, %v6885_v6  ;;  %7880 = vrot.lane.b32.xlu0 %v16639_v14, %s18439_s15  ;;  %7048 = vrot.lane.b32.xlu1 %v16721_v21, %s18376_s24  ;;  %6951 = vst.msk [vmem:[#allocation5 + $0x28] sm:$0xf] %vm6940_vm9, %v16717_v4 }
 0xbd8   : > { %v16848_v19 = vsel %vm15876_vm5, %v7019_v56, %v7020_v38  ;;  %v7028_v38 = vrot.slane %v7026_v42, 4  ;;  %v7029_v56 = vrot.slane %v16680_v31, 6 }
 0xbd9   : > { %v12855_v25 = vpop.eup %12854  ;;  %6952 = vst.msk [vmem:[#allocation5 + $0x2c] sm:$0xf] %vm6940_vm9, %v16723_v55 }
 0xbda   : > { %v10899_v30 = vadd.f32 -1.0, %v12855_v25 }
 0xbdb   : > { %7466 = vrot.lane.b32.xlu1 %v16721_v21, %s18437_s3  ;;  %7258 = vrot.lane.b32.xlu0 %v16721_v21, %s18436_s2 }
 0xbdc   : > { %v6886_v48 = vsel %vm6821_vm2, %v6804_v37, %v10899_v30  ;;  %v16867_v37 = vsel %vm15876_vm5, %v7022_v10, %v7023_v33 }
 0xbdd   : > { %v16737_v13 = vpack.c.bf16 %v6886_v48, %v6886_v48 }
 0xbdf   : > { %7882 = vrot.lane.b32.xlu1 %v16721_v21, %s18439_s15  ;;  %7310 = vrot.lane.b32.xlu0 %v16721_v21, %s18427_s27  ;;  %6954 = vst.msk [vmem:[#allocation5 + $0x30] sm:$0x3] %vm6953_vm10, %v16737_v13 }
 0xbe3   : > { %7101 = vrot.lane.b32.xlu0 %v16721_v21, %s18425_s29  ;;  %7416 = vrot.lane.b32.xlu1 %v16624_v46, %s18428_s21 }
 0xbe7   : > { %7518 = vrot.lane.b32.xlu0 %v16721_v21, %s18429_s22  ;;  %7156 = vrot.lane.b32.xlu1 %v16624_v46, %s18377_s16 }
 0xbeb   : > { %7208 = vrot.lane.b32.xlu1 %v16624_v46, %s18426_s23  ;;  %6959 = vrot.lane.b32.xlu0 %v16624_v46, %s18373_s30 }
 0xbef   : > { %7780 = vrot.lane.b32.xlu1 %v16624_v46, %s18434_s0  ;;  %7364 = vrot.lane.b32.xlu0 %v16624_v46, %s18432_s28 }
 0xbf3   : > { %7832 = vrot.lane.b32.xlu1 %v16624_v46, %s18594_s26  ;;  %7418 = vrot.lane.b32.xlu0 %v16627_v60, %s18428_s21 }
 0xbf7   : > { %7158 = vrot.lane.b32.xlu0 %v16627_v60, %s18377_s16  ;;  %6961 = vrot.lane.b32.xlu1 %v16627_v60, %s18373_s30 }
 0xbfb   : > { %7210 = vrot.lane.b32.xlu0 %v16627_v60, %s18426_s23  ;;  %7366 = vrot.lane.b32.xlu1 %v16627_v60, %s18432_s28 }
 0xbff   : > { %7782 = vrot.lane.b32.xlu0 %v16627_v60, %s18434_s0  ;;  %7260 = vrot.lane.b32.xlu1 %v16776_v47, %s18436_s2 }
 0xc03   : > { %7834 = vrot.lane.b32.xlu0 %v16627_v60, %s18594_s26  ;;  %7312 = vrot.lane.b32.xlu1 %v16776_v47, %s18427_s27 }
 0xc07   : > { %7050 = vrot.lane.b32.xlu1 %v16776_v47, %s18376_s24  ;;  %7262 = vrot.lane.b32.xlu0 %v16789_v1, %s18436_s2 }
 0xc0b   : > { %7103 = vrot.lane.b32.xlu1 %v16776_v47, %s18425_s29  ;;  %7314 = vrot.lane.b32.xlu0 %v16789_v1, %s18427_s27 }
 0xc0f   : > { %7468 = vrot.lane.b32.xlu1 %v16776_v47, %s18437_s3  ;;  %7052 = vrot.lane.b32.xlu0 %v16789_v1, %s18376_s24 }
 0xc13   : > { %7520 = vrot.lane.b32.xlu1 %v16776_v47, %s18429_s22  ;;  %7105 = vrot.lane.b32.xlu0 %v16789_v1, %s18425_s29 }
 0xc17   : > { %7470 = vrot.lane.b32.xlu0 %v16789_v1, %s18437_s3  ;;  %7160 = vrot.lane.b32.xlu1 %v16653_v45, %s18377_s16 }
 0xc1b   : > { %7522 = vrot.lane.b32.xlu0 %v16789_v1, %s18429_s22  ;;  %7212 = vrot.lane.b32.xlu1 %v16653_v45, %s18426_s23 }
 0xc1f   : > { %7784 = vrot.lane.b32.xlu1 %v16653_v45, %s18434_s0  ;;  %6963 = vrot.lane.b32.xlu0 %v16653_v45, %s18373_s30 }
 0xc21   : > { %v7153_v2 = vpop.permute.xlu1 %7152  ;;  %v6956_v32 = vpop.permute.xlu0 %6955 }
 0xc22   : > { %7191 = vst.msk [vmem:[#allocation5 + $0x64] sm:$0xf] %vm6940_vm9, %v7153_v2  ;;  %v7025_v2 = vrot.slane %v7023_v33, 4 }
 0xc23   : > { %6995 = vst.msk [vmem:[#allocation5] sm:$0xf] %vm6994_vm3, %v6956_v32  ;;  %7836 = vrot.lane.b32.xlu1 %v16653_v45, %s18594_s26  ;;  %7368 = vrot.lane.b32.xlu0 %v16653_v45, %s18432_s28 }
 0xc25   : > { %v7205_v36 = vpop.permute.xlu1 %7204  ;;  %v7361_v20 = vpop.permute.xlu0 %7360 }
 0xc26   : > { %7243 = vst.msk [vmem:[#allocation5 + $0x64] sm:$0xf] %vm6994_vm3, %v7205_v36 }
 0xc27   : > { %7399 = vst.msk [vmem:[#allocation5 + $0xc8] sm:$0xf] %vm6940_vm9, %v7361_v20  ;;  %7420 = vrot.lane.b32.xlu0 %v16653_v45, %s18428_s21  ;;  %6965 = vrot.lane.b32.xlu1 %v16658_v62, %s18373_s30  ;;  %v16951_v20 = vsel %vm15876_vm5, %v7025_v2, %v7026_v42  ;;  %v7035_v2 = vrot.slane %v16701_v58, 6 }
 0xc29   : > { %v7777_v44 = vpop.permute.xlu1 %7776  ;;  %v7413_v41 = vpop.permute.xlu0 %7412 }
 0xc2a   : > { %7815 = vst.msk [vmem:[#allocation5 + $0x190] sm:$0xf] %vm6940_vm9, %v7777_v44 }
 0xc2b   : > { %7451 = vst.msk [vmem:[#allocation5 + $0xc8] sm:$0xf] %vm6994_vm3, %v7413_v41  ;;  %7786 = vrot.lane.b32.xlu0 %v16658_v62, %s18434_s0  ;;  %7370 = vrot.lane.b32.xlu1 %v16658_v62, %s18432_s28 }
 0xc2d   : > { %v7829_v3 = vpop.permute.xlu1 %7828  ;;  %v7257_v40 = vpop.permute.xlu0 %7256 }
 0xc2e   : > { %7867 = vst.msk [vmem:[#allocation5 + $0x190] sm:$0xf] %vm6994_vm3, %v7829_v3 }
 0xc2f   : > { %7295 = vst.msk [vmem:[#allocation5 + $0x94] sm:$0xc] %vm7085_vm1, %v7257_v40  ;;  %7838 = vrot.lane.b32.xlu0 %v16658_v62, %s18594_s26  ;;  %7422 = vrot.lane.b32.xlu1 %v16658_v62, %s18428_s21 }
 0xc31   : > { %v7155_v49 = vpop.permute.xlu0 %7154  ;;  %v6958_v11 = vpop.permute.xlu1 %6957 }
 0xc32   : > { %7192 = vst.msk [vmem:[#allocation5 + $0x68] sm:$0xf] %vm6940_vm9, %v7155_v49 }
 0xc33   : > { %6996 = vst.msk [vmem:[#allocation5 + $0x4] sm:$0xf] %vm6994_vm3, %v6958_v11  ;;  %7054 = vrot.lane.b32.xlu0 %v16848_v19, %s18376_s24  ;;  %7162 = vrot.lane.b32.xlu1 %v16658_v62, %s18377_s16 }
 0xc35   : > { %v7207_v63 = vpop.permute.xlu0 %7206  ;;  %v7363_v59 = vpop.permute.xlu1 %7362 }
 0xc36   : > { %7244 = vst.msk [vmem:[#allocation5 + $0x68] sm:$0xf] %vm6994_vm3, %v7207_v63  ;;  %v16983_v63 = vsel %vm15876_vm5, %v7028_v38, %v7029_v56 }
 0xc37   : > { %7400 = vst.msk [vmem:[#allocation5 + $0xcc] sm:$0xf] %vm6940_vm9, %v7363_v59  ;;  %7107 = vrot.lane.b32.xlu0 %v16848_v19, %s18425_s29  ;;  %7214 = vrot.lane.b32.xlu1 %v16658_v62, %s18426_s23 }
 0xc39   : > { %v7047_v35 = vpop.permute.xlu0 %7046  ;;  %v7415_v53 = vpop.permute.xlu1 %7414 }
 0xc3a   : > { %7086 = vst.msk [vmem:[#allocation5 + $0x30] sm:$0xc] %vm7085_vm1, %v7047_v35 }
 0xc3b   : > { %7452 = vst.msk [vmem:[#allocation5 + $0xcc] sm:$0xf] %vm6994_vm3, %v7415_v53  ;;  %7578 = vrot.lane.b32.xlu1 %v16658_v62, %s18433_s25  ;;  %7474 = vrot.lane.b32.xlu0 %v16867_v37, %s18437_s3 }
 0xc3d   : > { %v7465_v12 = vpop.permute.xlu0 %7464  ;;  %v7309_v50 = vpop.permute.xlu1 %7308 }
 0xc3e   : > { %7503 = vst.msk [vmem:[#allocation5 + $0xf8] sm:$0xc] %vm7085_vm1, %v7465_v12 }
 0xc3f   : > { %7347 = vst.msk [vmem:[#allocation5 + $0x94] sm:$0xc] %vm7138_vm8, %v7309_v50  ;;  %7630 = vrot.lane.b32.xlu1 %v16658_v62, %s18430_s17  ;;  %7526 = vrot.lane.b32.xlu0 %v16867_v37, %s18429_s22 }
 0xc41   : > { %v7779_v9 = vpop.permute.xlu0 %7778  ;;  %v7100_v26 = vpop.permute.xlu1 %7099 }
 0xc42   : > { %7816 = vst.msk [vmem:[#allocation5 + $0x194] sm:$0xf] %vm6940_vm9, %v7779_v9 }
 0xc43   : > { %7139 = vst.msk [vmem:[#allocation5 + $0x30] sm:$0xc] %vm7138_vm8, %v7100_v26  ;;  %7264 = vrot.lane.b32.xlu1 %v16848_v19, %s18436_s2  ;;  %6967 = vrot.lane.b32.xlu0 %v16676_v28, %s18373_s30 }
 0xc45   : > { %v7831_v52 = vpop.permute.xlu0 %7830  ;;  %v7517_v16 = vpop.permute.xlu1 %7516 }
 0xc46   : > { %7868 = vst.msk [vmem:[#allocation5 + $0x194] sm:$0xf] %vm6994_vm3, %v7831_v52 }
 0xc47   : > { %7555 = vst.msk [vmem:[#allocation5 + $0xf8] sm:$0xc] %vm7138_vm8, %v7517_v16  ;;  %7316 = vrot.lane.b32.xlu1 %v16848_v19, %s18427_s27  ;;  %7372 = vrot.lane.b32.xlu0 %v16676_v28, %s18432_s28 }
 0xc49   : > { %v7881_v22 = vpop.permute.xlu0 %7880  ;;  %v7049_v43 = vpop.permute.xlu1 %7048 }
 0xc4a   : > { %7919 = vst.msk [vmem:[#allocation5 + $0x1c0] sm:$0xc] %vm7085_vm1, %v7881_v22 }
 0xc4b   : > { %7087 = vst.msk [vmem:[#allocation5 + $0x34] sm:$0xf] %vm6940_vm9, %v7049_v43  ;;  %7472 = vrot.lane.b32.xlu1 %v16848_v19, %s18437_s3  ;;  %7424 = vrot.lane.b32.xlu0 %v16676_v28, %s18428_s21 }
 0xc4d   : > { %v7467_v34 = vpop.permute.xlu1 %7466  ;;  %v7259_v61 = vpop.permute.xlu0 %7258 }
 0xc4e   : > { %7504 = vst.msk [vmem:[#allocation5 + $0xfc] sm:$0xf] %vm6940_vm9, %v7467_v34  ;;  %7296 = vst.msk [vmem:[#allocation5 + $0x98] sm:$0xf] %vm6940_vm9, %v7259_v61 }
 0xc4f   : > { %7524 = vrot.lane.b32.xlu1 %v16848_v19, %s18429_s22  ;;  %7164 = vrot.lane.b32.xlu0 %v16676_v28, %s18377_s16 }
 0xc51   : > { %v7883_v18 = vpop.permute.xlu1 %7882  ;;  %v7311_v5 = vpop.permute.xlu0 %7310 }
 0xc52   : > { %7920 = vst.msk [vmem:[#allocation5 + $0x1c4] sm:$0xf] %vm6940_vm9, %v7883_v18 }
 0xc53   : > { %7348 = vst.msk [vmem:[#allocation5 + $0x98] sm:$0xf] %vm6994_vm3, %v7311_v5  ;;  %7056 = vrot.lane.b32.xlu1 %v16867_v37, %s18376_s24  ;;  %7216 = vrot.lane.b32.xlu0 %v16676_v28, %s18426_s23 }
 0xc55   : > { %v7102_v54 = vpop.permute.xlu0 %7101  ;;  %v7417_v0 = vpop.permute.xlu1 %7416 }
 0xc56   : > { %7140 = vst.msk [vmem:[#allocation5 + $0x34] sm:$0xf] %vm6994_vm3, %v7102_v54 }
 0xc57   : > { %7109 = vrot.lane.b32.xlu1 %v16867_v37, %s18425_s29  ;;  %7580 = vrot.lane.b32.xlu0 %v16676_v28, %s18433_s25 }
 0xc59   : > { %v7519_v7 = vpop.permute.xlu0 %7518  ;;  %v7157_v39 = vpop.permute.xlu1 %7156 }
 0xc5a   : > { %7556 = vst.msk [vmem:[#allocation5 + $0xfc] sm:$0xf] %vm6994_vm3, %v7519_v7 }
 0xc5b   : > { %7193 = vst.msk [vmem:[#allocation5 + $0x6c] sm:$0xf] %vm6940_vm9, %v7157_v39  ;;  %7266 = vrot.lane.b32.xlu1 %v16867_v37, %s18436_s2  ;;  %7632 = vrot.lane.b32.xlu0 %v16676_v28, %s18430_s17  ;;  %v7032_v39 = vrot.slane %v16697_v8, 6 }
 0xc5d   : > { %v7209_v17 = vpop.permute.xlu1 %7208  ;;  %v6960_v6 = vpop.permute.xlu0 %6959  ;;  %v7034_v42 = vrot.slane %v7032_v39, 4 }
 0xc5e   : > { %7245 = vst.msk [vmem:[#allocation5 + $0x6c] sm:$0xf] %vm6994_vm3, %v7209_v17  ;;  %6997 = vst.msk [vmem:[#allocation5 + $0x8] sm:$0xf] %vm6994_vm3, %v6960_v6  ;;  %v7031_v17 = vrot.slane %v7029_v56, 4 }
 0xc5f   : > { %7318 = vrot.lane.b32.xlu1 %v16867_v37, %s18427_s27  ;;  %7166 = vrot.lane.b32.xlu0 %v16680_v31, %s18377_s16 }
 0xc61   : > { %v7781_v25 = vpop.permute.xlu1 %7780  ;;  %v7365_v30 = vpop.permute.xlu0 %7364 }
 0xc62   : > { %7817 = vst.msk [vmem:[#allocation5 + $0x198] sm:$0xf] %vm6940_vm9, %v7781_v25  ;;  %7401 = vst.msk [vmem:[#allocation5 + $0xd0] sm:$0xf] %vm6940_vm9, %v7365_v30  ;;  %v17056_v30 = vsel %vm15876_vm5, %v7031_v17, %v7032_v39  ;;  %v7041_v17 = vrot.slane %v16723_v55, 6 }
 0xc63   : > { %7453 = vst.msk [vmem:[#allocation5 + $0xd0] sm:$0xf] %vm6994_vm3, %v7417_v0  ;;  %7788 = vrot.lane.b32.xlu1 %v16676_v28, %s18434_s0  ;;  %7218 = vrot.lane.b32.xlu0 %v16680_v31, %s18426_s23 }
 0xc65   : > { %v7833_v48 = vpop.permute.xlu1 %7832  ;;  %v7419_v29 = vpop.permute.xlu0 %7418 }
 0xc66   : > { %7869 = vst.msk [vmem:[#allocation5 + $0x198] sm:$0xf] %vm6994_vm3, %v7833_v48 }
 0xc67   : > { %7840 = vrot.lane.b32.xlu1 %v16676_v28, %s18594_s26  ;;  %7790 = vrot.lane.b32.xlu0 %v16680_v31, %s18434_s0 }
 0xc69   : > { %v7159_v57 = vpop.permute.xlu0 %7158  ;;  %v6962_v27 = vpop.permute.xlu1 %6961 }
 0xc6a   : > { %7194 = vst.msk [vmem:[#allocation5 + $0x70] sm:$0xf] %vm6940_vm9, %v7159_v57 }
 0xc6b   : > { %6998 = vst.msk [vmem:[#allocation5 + $0xc] sm:$0xf] %vm6994_vm3, %v6962_v27  ;;  %6969 = vrot.lane.b32.xlu1 %v16680_v31, %s18373_s30  ;;  %7842 = vrot.lane.b32.xlu0 %v16680_v31, %s18594_s26 }
 0xc6d   : > { %v7211_v32 = vpop.permute.xlu0 %7210  ;;  %v7367_v36 = vpop.permute.xlu1 %7366 }
 0xc6e   : > { %7246 = vst.msk [vmem:[#allocation5 + $0x70] sm:$0xf] %vm6994_vm3, %v7211_v32 }
 0xc6f   : > { %7402 = vst.msk [vmem:[#allocation5 + $0xd4] sm:$0xf] %vm6940_vm9, %v7367_v36  ;;  %7374 = vrot.lane.b32.xlu1 %v16680_v31, %s18432_s28  ;;  %7058 = vrot.lane.b32.xlu0 %v16951_v20, %s18376_s24 }
 0xc70   : > { %7454 = vst.msk [vmem:[#allocation5 + $0xd4] sm:$0xf] %vm6994_vm3, %v7419_v29 }
 0xc71   : > { %v7783_v62 = vpop.permute.xlu0 %7782  ;;  %v7261_v28 = vpop.permute.xlu1 %7260 }
 0xc72   : > { %7818 = vst.msk [vmem:[#allocation5 + $0x19c] sm:$0xf] %vm6940_vm9, %v7783_v62  ;;  %7297 = vst.msk [vmem:[#allocation5 + $0x9c] sm:$0xf] %vm6940_vm9, %v7261_v28  ;;  %v17085_v62 = vsel %vm15876_vm5, %v7034_v42, %v7035_v2 }
 0xc73   : > { %7426 = vrot.lane.b32.xlu1 %v16680_v31, %s18428_s21  ;;  %7111 = vrot.lane.b32.xlu0 %v16951_v20, %s18425_s29 }
 0xc75   : > { %v7835_v44 = vpop.permute.xlu0 %7834  ;;  %v7313_v41 = vpop.permute.xlu1 %7312 }
 0xc76   : > { %7870 = vst.msk [vmem:[#allocation5 + $0x19c] sm:$0xf] %vm6994_vm3, %v7835_v44  ;;  %7349 = vst.msk [vmem:[#allocation5 + $0x9c] sm:$0xf] %vm6994_vm3, %v7313_v41 }
 0xc77   : > { %7582 = vrot.lane.b32.xlu1 %v16680_v31, %s18433_s25  ;;  %7268 = vrot.lane.b32.xlu0 %v16951_v20, %s18436_s2 }
 0xc79   : > { %v7051_v3 = vpop.permute.xlu1 %7050  ;;  %v7263_v40 = vpop.permute.xlu0 %7262 }
 0xc7a   : > { %7088 = vst.msk [vmem:[#allocation5 + $0x38] sm:$0xf] %vm6940_vm9, %v7051_v3  ;;  %7298 = vst.msk [vmem:[#allocation5 + $0xa0] sm:$0xf] %vm6940_vm9, %v7263_v40 }
 0xc7b   : > { %7634 = vrot.lane.b32.xlu1 %v16680_v31, %s18430_s17  ;;  %7320 = vrot.lane.b32.xlu0 %v16951_v20, %s18427_s27 }
 0xc7d   : > { %v7104_v49 = vpop.permute.xlu1 %7103  ;;  %v7315_v11 = vpop.permute.xlu0 %7314 }
 0xc7e   : > { %7141 = vst.msk [vmem:[#allocation5 + $0x38] sm:$0xf] %vm6994_vm3, %v7104_v49  ;;  %7350 = vst.msk [vmem:[#allocation5 + $0xa0] sm:$0xf] %vm6994_vm3, %v7315_v11 }
 0xc7f   : > { %7476 = vrot.lane.b32.xlu1 %v16951_v20, %s18437_s3  ;;  %7478 = vrot.lane.b32.xlu0 %v16983_v63, %s18437_s3 }
 0xc81   : > { %v7469_v59 = vpop.permute.xlu1 %7468  ;;  %v7053_v10 = vpop.permute.xlu0 %7052 }
 0xc82   : > { %7505 = vst.msk [vmem:[#allocation5 + $0x100] sm:$0xf] %vm6940_vm9, %v7469_v59  ;;  %7089 = vst.msk [vmem:[#allocation5 + $0x3c] sm:$0xf] %vm6940_vm9, %v7053_v10 }
 0xc83   : > { %7528 = vrot.lane.b32.xlu1 %v16951_v20, %s18429_s22  ;;  %7530 = vrot.lane.b32.xlu0 %v16983_v63, %s18429_s22 }
 0xc85   : > { %v7521_v33 = vpop.permute.xlu1 %7520  ;;  %v7106_v35 = vpop.permute.xlu0 %7105 }
 0xc86   : > { %7557 = vst.msk [vmem:[#allocation5 + $0x100] sm:$0xf] %vm6994_vm3, %v7521_v33  ;;  %7142 = vst.msk [vmem:[#allocation5 + $0x3c] sm:$0xf] %vm6994_vm3, %v7106_v35  ;;  %v12722_v35 = vld [vmem:[#allocation5] sm:$0xff]  }
 0xc87   : > { %7060 = vrot.lane.b32.xlu1 %v16983_v63, %s18376_s24  ;;  %6971 = vrot.lane.b32.xlu0 %v16697_v8, %s18373_s30 }
 0xc89   : > { %v7471_v53 = vpop.permute.xlu0 %7470  ;;  %v7161_v12 = vpop.permute.xlu1 %7160 }
 0xc8a   : > { %7506 = vst.msk [vmem:[#allocation5 + $0x104] sm:$0xf] %vm6940_vm9, %v7471_v53  ;;  %7195 = vst.msk [vmem:[#allocation5 + $0x74] sm:$0xf] %vm6940_vm9, %v7161_v12 }
 0xc8b   : > { %7113 = vrot.lane.b32.xlu1 %v16983_v63, %s18425_s29  ;;  %7376 = vrot.lane.b32.xlu0 %v16697_v8, %s18432_s28 }
 0xc8d   : > { %v7523_v50 = vpop.permute.xlu0 %7522  ;;  %v7213_v9 = vpop.permute.xlu1 %7212 }
 0xc8e   : > { %7558 = vst.msk [vmem:[#allocation5 + $0x104] sm:$0xf] %vm6994_vm3, %v7523_v50  ;;  %7247 = vst.msk [vmem:[#allocation5 + $0x74] sm:$0xf] %vm6994_vm3, %v7213_v9 }
 0xc8f   : > { %7270 = vrot.lane.b32.xlu1 %v16983_v63, %s18436_s2  ;;  %7584 = vrot.lane.b32.xlu0 %v16697_v8, %s18433_s25 }
 0xc91   : > { %v7785_v26 = vpop.permute.xlu1 %7784  ;;  %v6964_v52 = vpop.permute.xlu0 %6963 }
 0xc92   : > { %7819 = vst.msk [vmem:[#allocation5 + $0x1a0] sm:$0xf] %vm6940_vm9, %v7785_v26  ;;  %v7038_v26 = vrot.slane %v16717_v4, 6 }
 0xc93   : > { %6999 = vst.msk [vmem:[#allocation5 + $0x10] sm:$0xf] %vm6994_vm3, %v6964_v52  ;;  %7322 = vrot.lane.b32.xlu1 %v16983_v63, %s18427_s27  ;;  %7636 = vrot.lane.b32.xlu0 %v16697_v8, %s18430_s17  ;;  %v7037_v52 = vrot.slane %v7035_v2, 4 }
 0xc94   : > { %v7040_v39 = vrot.slane %v7038_v26, 4 }
 0xc95   : > { %v7837_v16 = vpop.permute.xlu1 %7836  ;;  %v7369_v22 = vpop.permute.xlu0 %7368 }
 0xc96   : > { %7871 = vst.msk [vmem:[#allocation5 + $0x1a0] sm:$0xf] %vm6994_vm3, %v7837_v16 }
 0xc97   : > { %7403 = vst.msk [vmem:[#allocation5 + $0xd8] sm:$0xf] %vm6940_vm9, %v7369_v22  ;;  %7168 = vrot.lane.b32.xlu1 %v16697_v8, %s18377_s16  ;;  %7170 = vrot.lane.b32.xlu0 %v16701_v58, %s18377_s16 }
 0xc99   : > { %v7421_v43 = vpop.permute.xlu0 %7420  ;;  %v6966_v34 = vpop.permute.xlu1 %6965 }
 0xc9a   : > { %7455 = vst.msk [vmem:[#allocation5 + $0xd8] sm:$0xf] %vm6994_vm3, %v7421_v43  ;;  %7000 = vst.msk [vmem:[#allocation5 + $0x14] sm:$0xf] %vm6994_vm3, %v6966_v34  ;;  %v17144_v43 = vsel %vm15876_vm5, %v7037_v52, %v7038_v26 }
 0xc9b   : > { %7220 = vrot.lane.b32.xlu1 %v16697_v8, %s18426_s23  ;;  %7222 = vrot.lane.b32.xlu0 %v16701_v58, %s18426_s23 }
 0xc9d   : > { %v7787_v61 = vpop.permute.xlu0 %7786  ;;  %v7371_v18 = vpop.permute.xlu1 %7370 }
 0xc9e   : > { %7820 = vst.msk [vmem:[#allocation5 + $0x1a4] sm:$0xf] %vm6940_vm9, %v7787_v61  ;;  %7404 = vst.msk [vmem:[#allocation5 + $0xdc] sm:$0xf] %vm6940_vm9, %v7371_v18 }
 0xc9f   : > { %7428 = vrot.lane.b32.xlu1 %v16697_v8, %s18428_s21  ;;  %7430 = vrot.lane.b32.xlu0 %v16701_v58, %s18428_s21 }
 0xca1   : > { %v7839_v5 = vpop.permute.xlu0 %7838  ;;  %v7423_v54 = vpop.permute.xlu1 %7422 }
 0xca2   : > { %7872 = vst.msk [vmem:[#allocation5 + $0x1a4] sm:$0xf] %vm6994_vm3, %v7839_v5  ;;  %7456 = vst.msk [vmem:[#allocation5 + $0xdc] sm:$0xf] %vm6994_vm3, %v7423_v54 }
 0xca3   : > { %7792 = vrot.lane.b32.xlu1 %v16697_v8, %s18434_s0  ;;  %7794 = vrot.lane.b32.xlu0 %v16701_v58, %s18434_s0 }
 0xca5   : > { %v7055_v0 = vpop.permute.xlu0 %7054  ;;  %v7163_v7 = vpop.permute.xlu1 %7162 }
 0xca6   : > { %7090 = vst.msk [vmem:[#allocation5 + $0x40] sm:$0xf] %vm6940_vm9, %v7055_v0  ;;  %7196 = vst.msk [vmem:[#allocation5 + $0x78] sm:$0xf] %vm6940_vm9, %v7163_v7 }
 0xca7   : > { %7844 = vrot.lane.b32.xlu1 %v16697_v8, %s18594_s26  ;;  %7846 = vrot.lane.b32.xlu0 %v16701_v58, %s18594_s26 }
 0xca9   : > { %v7108_v6 = vpop.permute.xlu0 %7107  ;;  %v7215_v25 = vpop.permute.xlu1 %7214 }
 0xcaa   : > { %7143 = vst.msk [vmem:[#allocation5 + $0x40] sm:$0xf] %vm6994_vm3, %v7108_v6  ;;  %7248 = vst.msk [vmem:[#allocation5 + $0x78] sm:$0xf] %vm6994_vm3, %v7215_v25 }
 0xcab   : > { %6973 = vrot.lane.b32.xlu1 %v16701_v58, %s18373_s30  ;;  %7062 = vrot.lane.b32.xlu0 %v17056_v30, %s18376_s24 }
 0xcad   : > { %v7579_v8 = vpop.permute.xlu1 %7578  ;;  %v7475_v48 = vpop.permute.xlu0 %7474 }
 0xcae   : > { %7612 = vst.msk [vmem:[#allocation5 + $0x140] sm:$0xf] %vm6940_vm9, %v7579_v8  ;;  %7508 = vst.msk [vmem:[#allocation5 + $0x10c] sm:$0xf] %vm6940_vm9, %v7475_v48  ;;  %v17179_v8 = vsel %vm15876_vm5, %v7040_v39, %v7041_v17 }
 0xcaf   : > { %7378 = vrot.lane.b32.xlu1 %v16701_v58, %s18432_s28  ;;  %7115 = vrot.lane.b32.xlu0 %v17056_v30, %s18425_s29 }
 0xcb1   : > { %v7631_v31 = vpop.permute.xlu1 %7630  ;;  %v7527_v29 = vpop.permute.xlu0 %7526 }
 0xcb2   : > { %7664 = vst.msk [vmem:[#allocation5 + $0x140] sm:$0xf] %vm6994_vm3, %v7631_v31  ;;  %7560 = vst.msk [vmem:[#allocation5 + $0x10c] sm:$0xf] %vm6994_vm3, %v7527_v29 }
 0xcb3   : > { %7586 = vrot.lane.b32.xlu1 %v16701_v58, %s18433_s25  ;;  %7272 = vrot.lane.b32.xlu0 %v17056_v30, %s18436_s2 }
 0xcb5   : > { %v7265_v57 = vpop.permute.xlu1 %7264  ;;  %v6968_v27 = vpop.permute.xlu0 %6967 }
 0xcb6   : > { %7299 = vst.msk [vmem:[#allocation5 + $0xa4] sm:$0xf] %vm6940_vm9, %v7265_v57 }
 0xcb7   : > { %7001 = vst.msk [vmem:[#allocation5 + $0x18] sm:$0xf] %vm6994_vm3, %v6968_v27  ;;  %7638 = vrot.lane.b32.xlu1 %v16701_v58, %s18430_s17  ;;  %7324 = vrot.lane.b32.xlu0 %v17056_v30, %s18427_s27 }
 0xcb9   : > { %v7317_v32 = vpop.permute.xlu1 %7316  ;;  %v7373_v36 = vpop.permute.xlu0 %7372 }
 0xcba   : > { %7351 = vst.msk [vmem:[#allocation5 + $0xa4] sm:$0xf] %vm6994_vm3, %v7317_v32 }
 0xcbb   : > { %7405 = vst.msk [vmem:[#allocation5 + $0xe0] sm:$0xf] %vm6940_vm9, %v7373_v36  ;;  %7274 = vrot.lane.b32.xlu0 %v17085_v62, %s18436_s2  ;;  %7064 = vrot.lane.b32.xlu1 %v17085_v62, %s18376_s24 }
 0xcbd   : > { %v7473_v58 = vpop.permute.xlu1 %7472  ;;  %v7425_v28 = vpop.permute.xlu0 %7424 }
 0xcbe   : > { %7507 = vst.msk [vmem:[#allocation5 + $0x108] sm:$0xf] %vm6940_vm9, %v7473_v58 }
 0xcbf   : > { %7457 = vst.msk [vmem:[#allocation5 + $0xe0] sm:$0xf] %vm6994_vm3, %v7425_v28  ;;  %7117 = vrot.lane.b32.xlu1 %v17085_v62, %s18425_s29  ;;  %6975 = vrot.lane.b32.xlu0 %v16717_v4, %s18373_s30 }
 0xcc1   : > { %v7525_v44 = vpop.permute.xlu1 %7524  ;;  %v7165_v41 = vpop.permute.xlu0 %7164 }
 0xcc2   : > { %7559 = vst.msk [vmem:[#allocation5 + $0x108] sm:$0xf] %vm6994_vm3, %v7525_v44  ;;  %v12724_v44 = vld [vmem:[#allocation5 + $0x8] sm:$0xff]  }
 0xcc3   : > { %7197 = vst.msk [vmem:[#allocation5 + $0x7c] sm:$0xf] %vm6940_vm9, %v7165_v41  ;;  %7326 = vrot.lane.b32.xlu1 %v17085_v62, %s18427_s27  ;;  %7588 = vrot.lane.b32.xlu0 %v16717_v4, %s18433_s25 }
 0xcc5   : > { %v7057_v3 = vpop.permute.xlu1 %7056  ;;  %v7217_v40 = vpop.permute.xlu0 %7216 }
 0xcc6   : > { %7091 = vst.msk [vmem:[#allocation5 + $0x44] sm:$0xf] %vm6940_vm9, %v7057_v3 }
 0xcc7   : > { %7249 = vst.msk [vmem:[#allocation5 + $0x7c] sm:$0xf] %vm6994_vm3, %v7217_v40  ;;  %7690 = vrot.lane.b32.xlu1 %v17085_v62, %s18438_s18  ;;  %7640 = vrot.lane.b32.xlu0 %v16717_v4, %s18430_s17  ;;  %v7044_v40 = vrot.slane %v16737_v13, 6 }
 0xcc9   : > { %v7110_v38 = vpop.permute.xlu1 %7109  ;;  %v7581_v56 = vpop.permute.xlu0 %7580 }
 0xcca   : > { %7144 = vst.msk [vmem:[#allocation5 + $0x44] sm:$0xf] %vm6994_vm3, %v7110_v38  ;;  %v7043_v38 = vrot.slane %v7041_v17, 4 }
 0xccb   : > { %7613 = vst.msk [vmem:[#allocation5 + $0x144] sm:$0xf] %vm6940_vm9, %v7581_v56  ;;  %7742 = vrot.lane.b32.xlu1 %v17085_v62, %s18424_s20  ;;  %7174 = vrot.lane.b32.xlu0 %v16723_v55, %s18377_s16 }
 0xccd   : > { %v7267_v49 = vpop.permute.xlu1 %7266  ;;  %v7633_v11 = vpop.permute.xlu0 %7632 }
 0xcce   : > { %7300 = vst.msk [vmem:[#allocation5 + $0xa8] sm:$0xf] %vm6940_vm9, %v7267_v49 }
 0xccf   : > { %7665 = vst.msk [vmem:[#allocation5 + $0x144] sm:$0xf] %vm6994_vm3, %v7633_v11  ;;  %7172 = vrot.lane.b32.xlu1 %v16717_v4, %s18377_s16  ;;  %7382 = vrot.lane.b32.xlu0 %v16723_v55, %s18432_s28  ;;  %v17226_v11 = vsel %vm15876_vm5, %v7043_v38, %v7044_v40  ;;  %vm7007_vm5 = vcmask 42008  }
 0xcd1   : > { %v7319_v59 = vpop.permute.xlu1 %7318  ;;  %v7167_v10 = vpop.permute.xlu0 %7166  ;;  %v12721_v33 = vld [vmem:[#allocation5 + $0x40] sm:$0xff]  }
 0xcd2   : > { %7352 = vst.msk [vmem:[#allocation5 + $0xa8] sm:$0xf] %vm6994_vm3, %v7319_v59  ;;  %11456 = vmatprep.subr.bf16.mxu1 %v12721_v33 }
 0xcd3   : > { %7198 = vst.msk [vmem:[#allocation5 + $0x80] sm:$0xf] %vm6940_vm9, %v7167_v10  ;;  %7224 = vrot.lane.b32.xlu1 %v16717_v4, %s18426_s23  ;;  %7434 = vrot.lane.b32.xlu0 %v16723_v55, %s18428_s21 }
 0xcd4   : > { %11457 = vmatpush3.bf16.msra.mxu1 %v12722_v35 }
 0xcd5   : > { %v7789_v53 = vpop.permute.xlu1 %7788  ;;  %v7219_v12 = vpop.permute.xlu0 %7218 }
 0xcd6   : > { %7821 = vst.msk [vmem:[#allocation5 + $0x1a8] sm:$0xf] %vm6940_vm9, %v7789_v53 }
 0xcd7   : > { %7250 = vst.msk [vmem:[#allocation5 + $0x80] sm:$0xf] %vm6994_vm3, %v7219_v12  ;;  %7380 = vrot.lane.b32.xlu1 %v16717_v4, %s18432_s28  ;;  %7798 = vrot.lane.b32.xlu0 %v16723_v55, %s18434_s0 }
 0xcd9   : > { %v7841_v50 = vpop.permute.xlu1 %7840  ;;  %v7791_v9 = vpop.permute.xlu0 %7790 }
 0xcda   : > { %7873 = vst.msk [vmem:[#allocation5 + $0x1a8] sm:$0xf] %vm6994_vm3, %v7841_v50 }
 0xcdb   : > { %7822 = vst.msk [vmem:[#allocation5 + $0x1ac] sm:$0xf] %vm6940_vm9, %v7791_v9  ;;  %7432 = vrot.lane.b32.xlu1 %v16717_v4, %s18428_s21  ;;  %7850 = vrot.lane.b32.xlu0 %v16723_v55, %s18594_s26 }
 0xcdd   : > { %v6970_v16 = vpop.permute.xlu1 %6969  ;;  %v7843_v22 = vpop.permute.xlu0 %7842 }
 0xcde   : > { %7002 = vst.msk [vmem:[#allocation5 + $0x1c] sm:$0xf] %vm6994_vm3, %v6970_v16  ;;  %7874 = vst.msk [vmem:[#allocation5 + $0x1ac] sm:$0xf] %vm6994_vm3, %v7843_v22 }
 0xcdf   : > { %7796 = vrot.lane.b32.xlu1 %v16717_v4, %s18434_s0  ;;  %7066 = vrot.lane.b32.xlu0 %v17144_v43, %s18376_s24 }
 0xce1   : > { %v7375_v34 = vpop.permute.xlu1 %7374  ;;  %v7059_v61 = vpop.permute.xlu0 %7058 }
 0xce2   : > { %7406 = vst.msk [vmem:[#allocation5 + $0xe4] sm:$0xf] %vm6940_vm9, %v7375_v34  ;;  %7092 = vst.msk [vmem:[#allocation5 + $0x48] sm:$0xf] %vm6940_vm9, %v7059_v61 }
 0xce3   : > { %7848 = vrot.lane.b32.xlu1 %v16717_v4, %s18594_s26  ;;  %7119 = vrot.lane.b32.xlu0 %v17144_v43, %s18425_s29 }
 0xce5   : > { %v7427_v18 = vpop.permute.xlu1 %7426  ;;  %v7112_v5 = vpop.permute.xlu0 %7111 }
 0xce6   : > { %7458 = vst.msk [vmem:[#allocation5 + $0xe4] sm:$0xf] %vm6994_vm3, %v7427_v18  ;;  %7145 = vst.msk [vmem:[#allocation5 + $0x48] sm:$0xf] %vm6994_vm3, %v7112_v5 }
 0xce7   : > { %7226 = vrot.lane.b32.xlu1 %v16723_v55, %s18426_s23  ;;  %7328 = vrot.lane.b32.xlu0 %v17144_v43, %s18427_s27 }
 0xce9   : > { %v7583_v54 = vpop.permute.xlu1 %7582  ;;  %v7269_v0 = vpop.permute.xlu0 %7268 }
 0xcea   : > { %7614 = vst.msk [vmem:[#allocation5 + $0x148] sm:$0xf] %vm6940_vm9, %v7583_v54  ;;  %7301 = vst.msk [vmem:[#allocation5 + $0xac] sm:$0xf] %vm6940_vm9, %v7269_v0 }
 0xceb   : > { %6977 = vrot.lane.b32.xlu1 %v16723_v55, %s18373_s30  ;;  %7692 = vrot.lane.b32.xlu0 %v17144_v43, %s18438_s18 }
 0xced   : > { %v7635_v4 = vpop.permute.xlu1 %7634  ;;  %v7321_v7 = vpop.permute.xlu0 %7320 }
 0xcee   : > { %7666 = vst.msk [vmem:[#allocation5 + $0x148] sm:$0xf] %vm6994_vm3, %v7635_v4  ;;  %7353 = vst.msk [vmem:[#allocation5 + $0xac] sm:$0xf] %vm6994_vm3, %v7321_v7 }
 0xcef   : > { %7276 = vrot.lane.b32.xlu1 %v17144_v43, %s18436_s2  ;;  %7744 = vrot.lane.b32.xlu0 %v17144_v43, %s18424_s20 }
 0xcf1   : > { %v7477_v6 = vpop.permute.xlu1 %7476  ;;  %v7479_v25 = vpop.permute.xlu0 %7478 }
 0xcf2   : > { %7509 = vst.msk [vmem:[#allocation5 + $0x110] sm:$0xf] %vm6940_vm9, %v7477_v6  ;;  %7510 = vst.msk [vmem:[#allocation5 + $0x114] sm:$0xf] %vm6940_vm9, %v7479_v25 }
 0xcf3   : > { %7068 = vrot.lane.b32.xlu1 %v17179_v8, %s18376_s24  ;;  %7278 = vrot.lane.b32.xlu0 %v17179_v8, %s18436_s2 }
 0xcf5   : > { %v7529_v48 = vpop.permute.xlu1 %7528  ;;  %v7531_v31 = vpop.permute.xlu0 %7530 }
 0xcf6   : > { %7561 = vst.msk [vmem:[#allocation5 + $0x110] sm:$0xf] %vm6994_vm3, %v7529_v48  ;;  %7562 = vst.msk [vmem:[#allocation5 + $0x114] sm:$0xf] %vm6994_vm3, %v7531_v31 }
 0xcf7   : > { %7121 = vrot.lane.b32.xlu1 %v17179_v8, %s18425_s29  ;;  %7330 = vrot.lane.b32.xlu0 %v17179_v8, %s18427_s27 }
 0xcf9   : > { %v7061_v29 = vpop.permute.xlu1 %7060  ;;  %v6972_v57 = vpop.permute.xlu0 %6971 }
 0xcfa   : > { %7093 = vst.msk [vmem:[#allocation5 + $0x4c] sm:$0xf] %vm6940_vm9, %v7061_v29 }
 0xcfb   : > { %7003 = vst.msk [vmem:[#allocation5 + $0x20] sm:$0xf] %vm6994_vm3, %v6972_v57  ;;  %7694 = vrot.lane.b32.xlu1 %v17179_v8, %s18438_s18  ;;  %7228 = vrot.lane.b32.xlu0 %v16737_v13, %s18426_s23  ;;  %v12726_v57 = vld [vmem:[#allocation5 + $0x10] sm:$0xff]  }
 0xcfd   : > { %v7114_v27 = vpop.permute.xlu1 %7113  ;;  %v7377_v42 = vpop.permute.xlu0 %7376 }
 0xcfe   : > { %7146 = vst.msk [vmem:[#allocation5 + $0x4c] sm:$0xf] %vm6994_vm3, %v7114_v27 }
 0xcff   : > { %7407 = vst.msk [vmem:[#allocation5 + $0xe8] sm:$0xf] %vm6940_vm9, %v7377_v42  ;;  %7746 = vrot.lane.b32.xlu1 %v17179_v8, %s18424_s20  ;;  %6979 = vrot.lane.b32.xlu0 %v16737_v13, %s18373_s30  ;;  %s18595_s30 = smov 108  }
 0xd01   : > { %v7271_v2 = vpop.permute.xlu1 %7270  ;;  %v7585_v32 = vpop.permute.xlu0 %7584 }
 0xd02   : > { %7302 = vst.msk [vmem:[#allocation5 + $0xb0] sm:$0xf] %vm6940_vm9, %v7271_v2  ;;  %7615 = vst.msk [vmem:[#allocation5 + $0x14c] sm:$0xf] %vm6940_vm9, %v7585_v32 }
 0xd03   : > { %7436 = vrot.lane.b32.xlu0 %v16737_v13, %s18428_s21  ;;  %7176 = vrot.lane.b32.xlu1 %v16737_v13, %s18377_s16 }
 0xd05   : > { %v7323_v36 = vpop.permute.xlu1 %7322  ;;  %v7637_v58 = vpop.permute.xlu0 %7636  ;;  %v12723_v28 = vld [vmem:[#allocation5 + $0x48] sm:$0xff]  }
 0xd06   : > { %7354 = vst.msk [vmem:[#allocation5 + $0xb0] sm:$0xf] %vm6994_vm3, %v7323_v36  ;;  %7667 = vst.msk [vmem:[#allocation5 + $0x14c] sm:$0xf] %vm6994_vm3, %v7637_v58  ;;  %11458 = vmatprep.subr.bf16.mxu1 %v12723_v28 }
 0xd07   : > { %7852 = vrot.lane.b32.xlu0 %v16737_v13, %s18594_s26  ;;  %7384 = vrot.lane.b32.xlu1 %v16737_v13, %s18432_s28 }
 0xd08   : > { %11459 = vmatpush3.bf16.msra.mxu1 %v12724_v44 }
 0xd09   : > { %v7169_v41 = vpop.permute.xlu1 %7168  ;;  %v7171_v3 = vpop.permute.xlu0 %7170 }
 0xd0a   : > { %7199 = vst.msk [vmem:[#allocation5 + $0x84] sm:$0xf] %vm6940_vm9, %v7169_v41  ;;  %7200 = vst.msk [vmem:[#allocation5 + $0x88] sm:$0xf] %vm6940_vm9, %v7171_v3 }
 0xd0b   : > { %7934 = vrot.lane.b32.xlu0 %v16721_v21, %s18595_s30  ;;  %7800 = vrot.lane.b32.xlu1 %v16737_v13, %s18434_s0 }
 0xd0d   : > { %v7221_v56 = vpop.permute.xlu1 %7220  ;;  %v7223_v49 = vpop.permute.xlu0 %7222 }
 0xd0e   : > { %7251 = vst.msk [vmem:[#allocation5 + $0x84] sm:$0xf] %vm6994_vm3, %v7221_v56  ;;  %7252 = vst.msk [vmem:[#allocation5 + $0x88] sm:$0xf] %vm6994_vm3, %v7223_v49 }
 0xd0f   : > { %7592 = vrot.lane.b32.xlu0 %v16737_v13, %s18433_s25  ;;  %7280 = vrot.lane.b32.xlu1 %v17226_v11, %s18436_s2 }
 0xd11   : > { %v7429_v59 = vpop.permute.xlu1 %7428  ;;  %v7431_v10 = vpop.permute.xlu0 %7430 }
 0xd12   : > { %7459 = vst.msk [vmem:[#allocation5 + $0xe8] sm:$0xf] %vm6994_vm3, %v7429_v59 }
 0xd13   : > { %7480 = vrot.lane.b32.xlu0 %v17056_v30, %s18437_s3  ;;  %7332 = vrot.lane.b32.xlu1 %v17226_v11, %s18427_s27 }
 0xd15   : > { %v7793_v33 = vpop.permute.xlu1 %7792  ;;  %v7795_v15 = vpop.permute.xlu0 %7794 }
 0xd16   : > { %7823 = vst.msk [vmem:[#allocation5 + $0x1b0] sm:$0xf] %vm6940_vm9, %v7793_v33  ;;  %7824 = vst.msk [vmem:[#allocation5 + $0x1b4] sm:$0xf] %vm6940_vm9, %v7795_v15 }
 0xd17   : > { %7642 = vrot.lane.b32.xlu0 %v16723_v55, %s18430_s17  ;;  %7932 = vrot.lane.b32.xlu1 %v16639_v14, %s18595_s30 }
 0xd19   : > { %v7845_v35 = vpop.permute.xlu1 %7844  ;;  %v7847_v53 = vpop.permute.xlu0 %7846 }
 0xd1a   : > { %7875 = vst.msk [vmem:[#allocation5 + $0x1b0] sm:$0xf] %vm6994_vm3, %v7845_v35  ;;  %7876 = vst.msk [vmem:[#allocation5 + $0x1b4] sm:$0xf] %vm6994_vm3, %v7847_v53 }
 0xd1b   : > { %7070 = vrot.lane.b32.xlu0 %v17226_v11, %s18376_s24  ;;  %7590 = vrot.lane.b32.xlu1 %v16723_v55, %s18433_s25 }
 0xd1d   : > { %v6974_v12 = vpop.permute.xlu1 %6973  ;;  %v7063_v50 = vpop.permute.xlu0 %7062 }
 0xd1e   : > { %7004 = vst.msk [vmem:[#allocation5 + $0x24] sm:$0xf] %vm6994_vm3, %v6974_v12 }
 0xd1f   : > { %7094 = vst.msk [vmem:[#allocation5 + $0x50] sm:$0xf] %vm6940_vm9, %v7063_v50  ;;  %7123 = vrot.lane.b32.xlu0 %v17226_v11, %s18425_s29  ;;  %7672 = vrot.lane.b32.xlu1 %v16639_v14, %s18438_s18  ;;  %s18596_s29 = sld [smem:[#allocation17_spill]] }
 0xd21   : > { %v7379_v9 = vpop.permute.xlu1 %7378  ;;  %v7116_v26 = vpop.permute.xlu0 %7115 }
 0xd22   : > { %7408 = vst.msk [vmem:[#allocation5 + $0xec] sm:$0xf] %vm6940_vm9, %v7379_v9 }
 0xd23   : > { %7147 = vst.msk [vmem:[#allocation5 + $0x50] sm:$0xf] %vm6994_vm3, %v7116_v26  ;;  %7460 = vst.msk [vmem:[#allocation5 + $0xec] sm:$0xf] %vm6994_vm3, %v7431_v10  ;;  %7724 = vrot.lane.b32.xlu0 %v16639_v14, %s18424_s20  ;;  %7482 = vrot.lane.b32.xlu1 %v17085_v62, %s18437_s3 }
 0xd25   : > { %v7587_v55 = vpop.permute.xlu1 %7586  ;;  %v7273_v52 = vpop.permute.xlu0 %7272  ;;  %v17273_v14 = vld [vmem:[%s18596_s29] sm:$0xff]  ;;  %v17293_v54 = vld [vmem:[%s18596_s29 + $0x8] sm:$0xff] }
 0xd26   : > { %7616 = vst.msk [vmem:[#allocation5 + $0x150] sm:$0xf] %vm6940_vm9, %v7587_v55  ;;  %7303 = vst.msk [vmem:[#allocation5 + $0xb4] sm:$0xf] %vm6940_vm9, %v7273_v52  ;;  %v17298_v0 = vld [vmem:[%s18596_s29 + $0x28] sm:$0xff] }
 0xd27   : > { %7534 = vrot.lane.b32.xlu0 %v17085_v62, %s18429_s22  ;;  %7644 = vrot.lane.b32.xlu1 %v16737_v13, %s18430_s17  ;;  %v17282_v13 = vld [vmem:[%s18596_s29 + $0x20] sm:$0xff]  ;;  %v10915_v4 = vcombine.low %v17293_v54, %v17298_v0  ;;  %v10916_v7 = vcombine.high %v17293_v54, %v17298_v0  ;;  %v8130_v54 = vld [vmem:[%s18596_s29 + $0xa8] sm:$0xff] }
 0xd28   : > { %v10913_v34 = vcombine.low %v17273_v14, %v17282_v13  ;;  %v10914_v61 = vcombine.high %v17273_v14, %v17282_v13  ;;  %v8125_v14 = vld [vmem:[%s18596_s29 + $0x80] sm:$0xff] }
 0xd29   : > { %v7639_v16 = vpop.permute.xlu1 %7638  ;;  %v7325_v22 = vpop.permute.xlu0 %7324  ;;  %9290 = vmatprep.mubr.bf16.mxu0 %v10916_v7  ;;  %v8129_v13 = vld [vmem:[%s18596_s29 + $0xa0] sm:$0xff] }
 0xd2a   : > { %7668 = vst.msk [vmem:[#allocation5 + $0x150] sm:$0xf] %vm6994_vm3, %v7639_v16  ;;  %7355 = vst.msk [vmem:[#allocation5 + $0xb4] sm:$0xf] %vm6994_vm3, %v7325_v22  ;;  %9154 = vmatprep.mubr.bf16.mxu1 %v10914_v61 }
 0xd2b   : > { %7886 = vrot.lane.b32.xlu0 %v16789_v1, %s18439_s15  ;;  %7532 = vrot.lane.b32.xlu1 %v17056_v30, %s18429_s22 }
 0xd2d   : > { %v7275_v18 = vpop.permute.xlu0 %7274  ;;  %v7065_v5 = vpop.permute.xlu1 %7064 }
 0xd2e   : > { %7304 = vst.msk [vmem:[#allocation5 + $0xb8] sm:$0xf] %vm6940_vm9, %v7275_v18  ;;  %7095 = vst.msk [vmem:[#allocation5 + $0x54] sm:$0xf] %vm6940_vm9, %v7065_v5 }
 0xd2f   : > { %7938 = vrot.lane.b32.xlu0 %v16789_v1, %s18595_s30  ;;  %7884 = vrot.lane.b32.xlu1 %v16776_v47, %s18439_s15 }
 0xd31   : > { %v7118_v39 = vpop.permute.xlu1 %7117  ;;  %v6976_v17 = vpop.permute.xlu0 %6975 }
 0xd32   : > { %7148 = vst.msk [vmem:[#allocation5 + $0x54] sm:$0xf] %vm6994_vm3, %v7118_v39  ;;  %7005 = vst.msk [vmem:[#allocation5 + $0x28] sm:$0xf] %vm6994_vm3, %v6976_v17  ;;  %v12730_v17 = vld [vmem:[#allocation5 + $0x80] sm:$0xff]  }
 0xd33   : > { %7676 = vrot.lane.b32.xlu0 %v16776_v47, %s18438_s18  ;;  %7936 = vrot.lane.b32.xlu1 %v16776_v47, %s18595_s30 }
 0xd35   : > { %v7327_v6 = vpop.permute.xlu1 %7326  ;;  %v7589_v25 = vpop.permute.xlu0 %7588 }
 0xd36   : > { %7356 = vst.msk [vmem:[#allocation5 + $0xb8] sm:$0xf] %vm6994_vm3, %v7327_v6 }
 0xd37   : > { %7617 = vst.msk [vmem:[#allocation5 + $0x154] sm:$0xf] %vm6940_vm9, %v7589_v25  ;;  %7486 = vrot.lane.b32.xlu0 %v17179_v8, %s18437_s3  ;;  %7674 = vrot.lane.b32.xlu1 %v16721_v21, %s18438_s18 }
 0xd39   : > { %v7691_v48 = vpop.permute.xlu1 %7690  ;;  %v7641_v31 = vpop.permute.xlu0 %7640  ;;  %v12725_v29 = vld [vmem:[#allocation5 + $0x50] sm:$0xff]  }
 0xd3a   : > { %7720 = vst.msk [vmem:[#allocation5 + $0x180] sm:$0xf] %vm6940_vm9, %v7691_v48  ;;  %11460 = vmatprep.subr.bf16.mxu1 %v12725_v29  ;;  %v12733_v48 = vld [vmem:[#allocation5 + $0xd0] sm:$0xff]  }
 0xd3b   : > { %7669 = vst.msk [vmem:[#allocation5 + $0x154] sm:$0xf] %vm6994_vm3, %v7641_v31  ;;  %7728 = vrot.lane.b32.xlu0 %v16776_v47, %s18424_s20  ;;  %7484 = vrot.lane.b32.xlu1 %v17144_v43, %s18437_s3 }
 0xd3c   : > { %11461 = vmatpush3.bf16.msra.mxu1 %v12726_v57 }
 0xd3d   : > { %v7743_v27 = vpop.permute.xlu1 %7742  ;;  %v7175_v42 = vpop.permute.xlu0 %7174 }
 0xd3e   : > { %7772 = vst.msk [vmem:[#allocation5 + $0x180] sm:$0xf] %vm6994_vm3, %v7743_v27  ;;  %v12735_v27 = vld [vmem:[#allocation5 + $0xd8] sm:$0xff]  }
 0xd3f   : > { %7202 = vst.msk [vmem:[#allocation5 + $0x90] sm:$0xf] %vm6940_vm9, %v7175_v42  ;;  %7538 = vrot.lane.b32.xlu0 %v17179_v8, %s18429_s22  ;;  %7726 = vrot.lane.b32.xlu1 %v16721_v21, %s18424_s20 }
 0xd41   : > { %v7173_v2 = vpop.permute.xlu1 %7172  ;;  %v7383_v47 = vpop.permute.xlu0 %7382 }
 0xd42   : > { %7201 = vst.msk [vmem:[#allocation5 + $0x8c] sm:$0xf] %vm6940_vm9, %v7173_v2  ;;  %7410 = vst.msk [vmem:[#allocation5 + $0xf4] sm:$0xf] %vm6940_vm9, %v7383_v47  ;;  %v12737_v47 = vld [vmem:[#allocation5 + $0x20] sm:$0xff]  }
 0xd43   : > { %7890 = vrot.lane.b32.xlu0 %v16867_v37, %s18439_s15  ;;  %7536 = vrot.lane.b32.xlu1 %v17144_v43, %s18429_s22 }
 0xd45   : > { %v7225_v32 = vpop.permute.xlu1 %7224  ;;  %v7435_v36 = vpop.permute.xlu0 %7434 }
 0xd46   : > { %7253 = vst.msk [vmem:[#allocation5 + $0x8c] sm:$0xf] %vm6994_vm3, %v7225_v32  ;;  %7462 = vst.msk [vmem:[#allocation5 + $0xf4] sm:$0xf] %vm6994_vm3, %v7435_v36  ;;  %v12739_v32 = vld [vmem:[#allocation5 + $0x68] sm:$0xff]   ;;  %v12740_v36 = vld [vmem:[#allocation5 + $0xe0] sm:$0xff]  }
 0xd47   : > { %7942 = vrot.lane.b32.xlu0 %v16867_v37, %s18595_s30  ;;  %7888 = vrot.lane.b32.xlu1 %v16848_v19, %s18439_s15 }
 0xd49   : > { %v7381_v21 = vpop.permute.xlu1 %7380  ;;  %v7799_v58 = vpop.permute.xlu0 %7798 }
 0xd4a   : > { %7409 = vst.msk [vmem:[#allocation5 + $0xf0] sm:$0xf] %vm6940_vm9, %v7381_v21  ;;  %7826 = vst.msk [vmem:[#allocation5 + $0x1bc] sm:$0xf] %vm6940_vm9, %v7799_v58 }
 0xd4b   : > { %7680 = vrot.lane.b32.xlu0 %v16848_v19, %s18438_s18  ;;  %7940 = vrot.lane.b32.xlu1 %v16848_v19, %s18595_s30 }
 0xd4d   : > { %v7433_v28 = vpop.permute.xlu1 %7432  ;;  %v7851_v44 = vpop.permute.xlu0 %7850 }
 0xd4e   : > { %7461 = vst.msk [vmem:[#allocation5 + $0xf0] sm:$0xf] %vm6994_vm3, %v7433_v28  ;;  %7878 = vst.msk [vmem:[#allocation5 + $0x1bc] sm:$0xf] %vm6994_vm3, %v7851_v44  ;;  %v12742_v44 = vld [vmem:[#allocation5 + $0xa0] sm:$0xff]  }
 0xd4f   : > { %7568 = vrot.lane.b32.xlu0 %v16600_v24, %s18433_s25  ;;  %7678 = vrot.lane.b32.xlu1 %v16789_v1, %s18438_s18 }
 0xd51   : > { %v7797_v41 = vpop.permute.xlu1 %7796  ;;  %v7067_v3 = vpop.permute.xlu0 %7066 }
 0xd52   : > { %7825 = vst.msk [vmem:[#allocation5 + $0x1b8] sm:$0xf] %vm6940_vm9, %v7797_v41  ;;  %7096 = vst.msk [vmem:[#allocation5 + $0x58] sm:$0xf] %vm6940_vm9, %v7067_v3  ;;  %v12743_v41 = vld [vmem:[#allocation5 + $0x70] sm:$0xff]   ;;  %v12744_v3 = vld [vmem:[#allocation5 + $0xe8] sm:$0xff]  }
 0xd53   : > { %7732 = vrot.lane.b32.xlu0 %v16848_v19, %s18424_s20  ;;  %7730 = vrot.lane.b32.xlu1 %v16789_v1, %s18424_s20 }
 0xd55   : > { %v7849_v40 = vpop.permute.xlu1 %7848  ;;  %v7120_v38 = vpop.permute.xlu0 %7119 }
 0xd56   : > { %7877 = vst.msk [vmem:[#allocation5 + $0x1b8] sm:$0xf] %vm6994_vm3, %v7849_v40  ;;  %7149 = vst.msk [vmem:[#allocation5 + $0x58] sm:$0xf] %vm6994_vm3, %v7120_v38 }
 0xd57   : > { %7620 = vrot.lane.b32.xlu0 %v16600_v24, %s18430_s17  ;;  %7892 = vrot.lane.b32.xlu1 %v16951_v20, %s18439_s15 }
 0xd59   : > { %v7227_v56 = vpop.permute.xlu1 %7226  ;;  %v7329_v49 = vpop.permute.xlu0 %7328 }
 0xd5a   : > { %7254 = vst.msk [vmem:[#allocation5 + $0x90] sm:$0xf] %vm6994_vm3, %v7227_v56  ;;  %v12745_v56 = vld [vmem:[#allocation5 + $0xa8] sm:$0xff]  }
 0xd5b   : > { %7894 = vrot.lane.b32.xlu0 %v16983_v63, %s18439_s15  ;;  %7944 = vrot.lane.b32.xlu1 %v16951_v20, %s18595_s30 }
 0xd5d   : > { %v6978_v1 = vpop.permute.xlu1 %6977  ;;  %v7693_v19 = vpop.permute.xlu0 %7692 }
 0xd5e   : > { %7006 = vst.msk [vmem:[#allocation5 + $0x2c] sm:$0xf] %vm6994_vm3, %v6978_v1  ;;  %v12748_v1 = vld [vmem:[#allocation5 + $0xf0] sm:$0xff]  }
 0xd5f   : > { %7721 = vst.msk [vmem:[#allocation5 + $0x184] sm:$0xf] %vm6940_vm9, %v7693_v19  ;;  %7946 = vrot.lane.b32.xlu0 %v16983_v63, %s18595_s30  ;;  %7682 = vrot.lane.b32.xlu1 %v16867_v37, %s18438_s18 }
 0xd61   : > { %v7277_v24 = vpop.permute.xlu1 %7276  ;;  %v7745_v59 = vpop.permute.xlu0 %7744 }
 0xd62   : > { %7305 = vst.msk [vmem:[#allocation5 + $0xbc] sm:$0xf] %vm6940_vm9, %v7277_v24 }
 0xd63   : > { %7773 = vst.msk [vmem:[#allocation5 + $0x184] sm:$0xf] %vm6994_vm3, %v7745_v59  ;;  %7357 = vst.msk [vmem:[#allocation5 + $0xbc] sm:$0xf] %vm6994_vm3, %v7329_v49  ;;  %7696 = vrot.lane.b32.xlu0 %v17226_v11, %s18438_s18  ;;  %7570 = vrot.lane.b32.xlu1 %v16603_v23, %s18433_s25  ;;  %v12747_v49 = vld [vmem:[#allocation5 + $0x78] sm:$0xff]   ;;  %v8117_v59 = vld [vmem:[%s18596_s29 + $0x40] sm:$0xff] }
 0xd65   : > { %v7069_v10 = vpop.permute.xlu1 %7068  ;;  %v7279_v33 = vpop.permute.xlu0 %7278  ;;  %v12741_v28 = vld [vmem:[#allocation5 + $0x28] sm:$0xff]  }
 0xd66   : > { %7097 = vst.msk [vmem:[#allocation5 + $0x5c] sm:$0xf] %vm6940_vm9, %v7069_v10  ;;  %7306 = vst.msk [vmem:[#allocation5 + $0xc0] sm:$0xf] %vm6940_vm9, %v7279_v33  ;;  %v8121_v10 = vld [vmem:[%s18596_s29 + $0x60] sm:$0xff]  ;;  %v12750_v33 = vld [vmem:[#allocation5 + $0x38] sm:$0xff]  }
 0xd67   : > { %7748 = vrot.lane.b32.xlu0 %v17226_v11, %s18424_s20  ;;  %7734 = vrot.lane.b32.xlu1 %v16867_v37, %s18424_s20 }
 0xd69   : > { %v7122_v15 = vpop.permute.xlu1 %7121  ;;  %v7331_v35 = vpop.permute.xlu0 %7330 }
 0xd6a   : > { %7150 = vst.msk [vmem:[#allocation5 + $0x5c] sm:$0xf] %vm6994_vm3, %v7122_v15  ;;  %7358 = vst.msk [vmem:[#allocation5 + $0xc0] sm:$0xf] %vm6994_vm3, %v7331_v35  ;;  %v12749_v15 = vld [vmem:[#allocation5 + $0xb0] sm:$0xff]   ;;  %v12752_v35 = vld [vmem:[#allocation5 + $0x140] sm:$0xff]  }
 0xd6b   : > { %7684 = vrot.lane.b32.xlu0 %v16951_v20, %s18438_s18  ;;  %7622 = vrot.lane.b32.xlu1 %v16603_v23, %s18430_s17  ;;  %v12728_v23 = vld [vmem:[#allocation5 + $0x18] sm:$0xff]  }
 0xd6d   : > { %v7695_v53 = vpop.permute.xlu1 %7694  ;;  %v7229_v12 = vpop.permute.xlu0 %7228 }
 0xd6e   : > { %7722 = vst.msk [vmem:[#allocation5 + $0x188] sm:$0xf] %vm6940_vm9, %v7695_v53 }
 0xd6f   : > { %7572 = vrot.lane.b32.xlu0 %v16624_v46, %s18433_s25  ;;  %7896 = vrot.lane.b32.xlu1 %v17056_v30, %s18439_s15 }
 0xd71   : > { %v7747_v37 = vpop.permute.xlu1 %7746  ;;  %v6980_v50 = vpop.permute.xlu0 %6979  ;;  %v12727_v9 = vld [vmem:[#allocation5 + $0x58] sm:$0xff]  }
 0xd72   : > { %7774 = vst.msk [vmem:[#allocation5 + $0x188] sm:$0xf] %vm6994_vm3, %v7747_v37  ;;  %11462 = vmatprep.subr.bf16.mxu1 %v12727_v9  ;;  %v12754_v9 = vld [vmem:[#allocation5 + $0x100] sm:$0xff]  }
 0xd73   : > { %7008 = vst.msk [vmem:[#allocation5 + $0x30] sm:$0x3] %vm7007_vm5, %v6980_v50  ;;  %7736 = vrot.lane.b32.xlu0 %v16951_v20, %s18424_s20  ;;  %7948 = vrot.lane.b32.xlu1 %v17056_v30, %s18595_s30 }
 0xd74   : > { %11463 = vmatpush3.bf16.msra.mxu1 %v12728_v23  ;;  %v12755_v23 = vld [vmem:[#allocation5 + $0x148] sm:$0xff]  }
 0xd75   : > { %v7437_v26 = vpop.permute.xlu0 %7436  ;;  %v7177_v55 = vpop.permute.xlu1 %7176 }
 0xd76   : > { %7203 = vst.msk [vmem:[#allocation5 + $0x94] sm:$0x3] %vm6953_vm10, %v7177_v55  ;;  %v8118_v55 = vld [vmem:[%s18596_s29 + $0x48] sm:$0xff] }
 0xd77   : > { %7255 = vst.msk [vmem:[#allocation5 + $0x94] sm:$0x3] %vm7007_vm5, %v7229_v12  ;;  %7624 = vrot.lane.b32.xlu0 %v16624_v46, %s18430_s17  ;;  %7686 = vrot.lane.b32.xlu1 %v16983_v63, %s18438_s18  ;;  %v10922_v12 = vcombine.high %v8117_v59, %v8121_v10 }
 0xd79   : > { %v7853_v52 = vpop.permute.xlu0 %7852  ;;  %v7385_v20 = vpop.permute.xlu1 %7384 }
 0xd7a   : > { %7411 = vst.msk [vmem:[#allocation5 + $0xf8] sm:$0x3] %vm6953_vm10, %v7385_v20  ;;  %v12746_v38 = vld [vmem:[#allocation5 + $0x30] sm:$0xff]  }
 0xd7b   : > { %7463 = vst.msk [vmem:[#allocation5 + $0xf8] sm:$0x3] %vm7007_vm5, %v7437_v26  ;;  %7898 = vrot.lane.b32.xlu0 %v17085_v62, %s18439_s15  ;;  %7574 = vrot.lane.b32.xlu1 %v16627_v60, %s18433_s25  ;;  %v12753_v26 = vld [vmem:[#allocation5 + $0xb8] sm:$0xff]  }
 0xd7d   : > { %v7935_v16 = vpop.permute.xlu0 %7934  ;;  %v7801_v22 = vpop.permute.xlu1 %7800 }
 0xd7e   : > { %7972 = vst.msk [vmem:[#allocation5 + $0x1c4] sm:$0xf] %vm6994_vm3, %v7935_v16  ;;  %v12734_v57 = vld [vmem:[#allocation5 + $0x90] sm:$0xff]  }
 0xd7f   : > { %7827 = vst.msk [vmem:[#allocation5 + $0x1c0] sm:$0x3] %vm6953_vm10, %v7801_v22  ;;  %7950 = vrot.lane.b32.xlu0 %v17085_v62, %s18595_s30  ;;  %7738 = vrot.lane.b32.xlu1 %v16983_v63, %s18424_s20  ;;  %v12757_v22 = vld [vmem:[#allocation5 + $0x108] sm:$0xff]  }
 0xd80   : > { %7879 = vst.msk [vmem:[#allocation5 + $0x1c0] sm:$0x3] %vm7007_vm5, %v7853_v52  ;;  %v8122_v52 = vld [vmem:[%s18596_s29 + $0x68] sm:$0xff] }
 0xd81   : > { %v7593_v46 = vpop.permute.xlu0 %7592  ;;  %v7281_v61 = vpop.permute.xlu1 %7280 }
 0xd82   : > { %7619 = vst.msk [vmem:[#allocation5 + $0x15c] sm:$0x3] %vm6953_vm10, %v7593_v46  ;;  %v12751_v53 = vld [vmem:[#allocation5 + $0xf8] sm:$0xff]   ;;  %v10924_v46 = vcombine.high %v8118_v55, %v8122_v52 }
 0xd83   : > { %7307 = vst.msk [vmem:[#allocation5 + $0xc4] sm:$0xf] %vm6940_vm9, %v7281_v61  ;;  %7688 = vrot.lane.b32.xlu0 %v17056_v30, %s18438_s18  ;;  %7626 = vrot.lane.b32.xlu1 %v16627_v60, %s18430_s17  ;;  %v12756_v61 = vld [vmem:[#allocation5 + $0x180] sm:$0xff]   ;;  %s18598_s18 = sld [smem:[#allocation19_spill]] }
 0xd85   : > { %v7481_v18 = vpop.permute.xlu0 %7480  ;;  %v7333_v5 = vpop.permute.xlu1 %7332 }
 0xd86   : > { %7511 = vst.msk [vmem:[#allocation5 + $0x118] sm:$0xf] %vm6940_vm9, %v7481_v18  ;;  %v12758_v18 = vld [vmem:[#allocation5 + $0x150] sm:$0xff]  }
 0xd87   : > { %7359 = vst.msk [vmem:[#allocation5 + $0xc4] sm:$0xf] %vm6994_vm3, %v7333_v5  ;;  %7576 = vrot.lane.b32.xlu0 %v16653_v45, %s18433_s25  ;;  %7488 = vrot.lane.b32.xlu1 %v17226_v11, %s18437_s3  ;;  %v10921_v5 = vcombine.low %v8117_v59, %v8121_v10  ;;  %s18600_s25 = sld [smem:[#allocation21_spill]] }
 0xd89   : > { %v7643_v63 = vpop.permute.xlu0 %7642  ;;  %v7933_v62 = vpop.permute.xlu1 %7932 }
 0xd8a   : > { %7971 = vst.msk [vmem:[#allocation5 + $0x1c0] sm:$0xc] %vm7138_vm8, %v7933_v62 }
 0xd8b   : > { %7740 = vrot.lane.b32.xlu0 %v17056_v30, %s18424_s20  ;;  %7540 = vrot.lane.b32.xlu1 %v17226_v11, %s18429_s22  ;;  %v12731_v30 = vld [vmem:[#allocation5 + $0xc8] sm:$0xff]   ;;  %s18599_s22 = sld [smem:[#allocation18_spill]] }
 0xd8d   : > { %v7071_v60 = vpop.permute.xlu0 %7070  ;;  %v7591_v7 = vpop.permute.xlu1 %7590 }
 0xd8e   : > { %v12729_v39 = vld [vmem:[#allocation5 + $0xc0] sm:$0xff]   ;;  %7098 = vst.msk [vmem:[#allocation5 + $0x60] sm:$0xf] %vm6940_vm9, %v7071_v60  ;;  %7618 = vst.msk [vmem:[#allocation5 + $0x158] sm:$0xf] %vm6940_vm9, %v7591_v7  ;;  %v12759_v7 = vld [vmem:[#allocation5 + $0x110] sm:$0xff]  }
 0xd8f   : > { %7670 = vst.msk [vmem:[#allocation5 + $0x158] sm:$0xf] %vm6994_vm3, %v7643_v63  ;;  %7628 = vrot.lane.b32.xlu0 %v16653_v45, %s18430_s17  ;;  %7900 = vrot.lane.b32.xlu1 %v17144_v43, %s18439_s15  ;;  %v12732_v45 = vld [vmem:[#allocation5 + $0x88] sm:$0xff]   ;;  %v10930_v63 = vcombine.high %v8125_v14, %v8129_v13 }
 0xd90   : > { %11550 = vmatprep.subr.bf16.mxu0 %v12729_v39  ;;  %v8126_v39 = vld [vmem:[%s18596_s29 + $0x88] sm:$0xff] }
 0xd91   : > { %v7124_v6 = vpop.permute.xlu0 %7123  ;;  %11551 = vmatpush3.bf16.msra.mxu0 %v12730_v17  ;;  %v7673_v25 = vpop.permute.xlu1 %7672 }
 0xd92   : > { %7151 = vst.msk [vmem:[#allocation5 + $0x60] sm:$0xf] %vm6994_vm3, %v7124_v6  ;;  %11552 = vmatprep.subr.bf16.mxu0 %v12731_v30  ;;  %v8133_v6 = vld [vmem:[%s18596_s29 + $0xc0] sm:$0xff] }
 0xd93   : > { %7711 = vst.msk [vmem:[#allocation5 + $0x15c] sm:$0xc] %vm7085_vm1, %v7673_v25  ;;  %7902 = vrot.lane.b32.xlu0 %v17179_v8, %s18439_s15  ;;  %7952 = vrot.lane.b32.xlu1 %v17144_v43, %s18595_s30  ;;  %v8137_v25 = vld [vmem:[%s18596_s29 + $0xe0] sm:$0xff] }
 0xd95   : > { %v7725_v31 = vpop.permute.xlu0 %7724  ;;  %11553 = vmatpush3.bf16.msra.mxu0 %v12732_v45  ;;  %v7483_v29 = vpop.permute.xlu1 %7482  ;;  %v10932_v45 = vcombine.high %v8126_v39, %v8130_v54 }
 0xd96   : > { %7763 = vst.msk [vmem:[#allocation5 + $0x15c] sm:$0xc] %vm7138_vm8, %v7725_v31  ;;  %11554 = vmatprep.subr.bf16.mxu0 %v12733_v48  ;;  %v10929_v31 = vcombine.low %v8125_v14, %v8129_v13 }
 0xd97   : > { %7512 = vst.msk [vmem:[#allocation5 + $0x11c] sm:$0xf] %vm6940_vm9, %v7483_v29  ;;  %7954 = vrot.lane.b32.xlu0 %v17179_v8, %s18595_s30  ;;  %7904 = vrot.lane.b32.xlu1 %v17226_v11, %s18439_s15  ;;  %v12738_v8 = vld [vmem:[#allocation5 + $0x98] sm:$0xff]   ;;  %v10938_v29 = vcombine.high %v8133_v6, %v8137_v25 }
 0xd99   : > { %v7535_v42 = vpop.permute.xlu0 %7534  ;;  %11555 = vmatpush3.bf16.msra.mxu0 %v12734_v57  ;;  %v7645_v43 = vpop.permute.xlu1 %7644  ;;  %v12736_v2 = vld [vmem:[#allocation5 + $0x60] sm:$0xff]  }
 0xd9a   : > { %7564 = vst.msk [vmem:[#allocation5 + $0x11c] sm:$0xf] %vm6994_vm3, %v7535_v42  ;;  %11556 = vmatprep.subr.bf16.mxu0 %v12735_v27  ;;  %11464 = vmatprep.subr.bf16.mxu1 %v12736_v2  ;;  %v8138_v2 = vld [vmem:[%s18596_s29 + $0xe8] sm:$0xff] }
 0xd9b   : > { %7671 = vst.msk [vmem:[#allocation5 + $0x15c] sm:$0x3] %vm7007_vm5, %v7645_v43  ;;  %7956 = vrot.lane.b32.xlu0 %v17226_v11, %s18595_s30  ;;  %11465 = vmatpush3.bf16.msra.mxu1 %v12737_v47  ;;  %v8134_v43 = vld [vmem:[%s18596_s29 + $0xc8] sm:$0xff]  ;;  %v10931_v47 = vcombine.low %v8126_v39, %v8130_v54 }
 0xd9c   : > { %11466 = vmatprep.subr.bf16.mxu1 %v12739_v32 }
 0xd9d   : > { %v7887_v21 = vpop.permute.xlu0 %7886  ;;  %11557 = vmatpush3.bf16.msra.mxu0 %v12738_v8  ;;  %v7533_v58 = vpop.permute.xlu1 %7532  ;;  %v8141_v8 = vld [vmem:[%s18596_s29 + $0x100] sm:$0xff] }
 0xd9e   : > { %7922 = vst.msk [vmem:[#allocation5 + $0x1cc] sm:$0xf] %vm6940_vm9, %v7887_v21  ;;  %11558 = vmatprep.subr.bf16.mxu0 %v12740_v36 }
 0xd9f   : > { %7563 = vst.msk [vmem:[#allocation5 + $0x118] sm:$0xf] %vm6994_vm3, %v7533_v58  ;;  %11467 = vmatpush3.bf16.msra.mxu1 %v12741_v28  ;;  %v8145_v58 = vld [vmem:[%s18596_s29 + $0x120] sm:$0xff]  ;;  %v10940_v28 = vcombine.high %v8134_v43, %v8138_v2 }
 0xda0   : > { %11468 = vmatprep.subr.bf16.mxu1 %v12743_v41  ;;  %v10946_v41 = vcombine.high %v8141_v8, %v8145_v58  ;;  %v10945_v10 = vcombine.low %v8141_v8, %v8145_v58  ;;  %v12766_v8 = vld [vmem:[#allocation5 + $0x190] sm:$0xff]   ;;  %v8181_v58 = vld [vmem:[%s18596_s29 + $0x240] sm:$0xff] }
 0xda1   : > { %v7939_v11 = vpop.permute.xlu0 %7938  ;;  %11559 = vmatpush3.bf16.msra.mxu0 %v12742_v44  ;;  %v7885_v40 = vpop.permute.xlu1 %7884  ;;  %v10937_v44 = vcombine.low %v8133_v6, %v8137_v25 }
 0xda2   : > { %7974 = vst.msk [vmem:[#allocation5 + $0x1cc] sm:$0xf] %vm6994_vm3, %v7939_v11  ;;  %11560 = vmatprep.subr.bf16.mxu0 %v12744_v3  ;;  %v12760_v0 = vld [vmem:[#allocation5 + $0x158] sm:$0xff]  }
 0xda3   : > { %7921 = vst.msk [vmem:[#allocation5 + $0x1c8] sm:$0xf] %vm6940_vm9, %v7885_v40  ;;  %11469 = vmatpush3.bf16.msra.mxu1 %v12746_v38  ;;  %v8142_v40 = vld [vmem:[%s18596_s29 + $0x108] sm:$0xff] }
 0xda4   : > { %11470 = vmatprep.subr.bf16.mxu1 %v12747_v49  ;;  %v8146_v38 = vld [vmem:[%s18596_s29 + $0x128] sm:$0xff] }
 0xda5   : > { %v7677_v19 = vpop.permute.xlu0 %7676  ;;  %11561 = vmatpush3.bf16.msra.mxu0 %v12745_v56  ;;  %v7937_v24 = vpop.permute.xlu1 %7936  ;;  %v10939_v56 = vcombine.low %v8134_v43, %v8138_v2  ;;  %v10948_v59 = vcombine.high %v8142_v40, %v8146_v38  ;;  %v8174_v2 = vld [vmem:[%s18596_s29 + $0x208] sm:$0xff] }
 0xda6   : > { %7713 = vst.msk [vmem:[#allocation5 + $0x164] sm:$0xf] %vm6940_vm9, %v7677_v19  ;;  %11562 = vmatprep.subr.bf16.mxu0 %v12748_v1  ;;  %v12761_v48 = vld [vmem:[#allocation5 + $0x118] sm:$0xff]   ;;  %v8149_v19 = vld [vmem:[%s18596_s29 + $0x140] sm:$0xff] }
 0xda7   : > { %7973 = vst.msk [vmem:[#allocation5 + $0x1c8] sm:$0xf] %vm6994_vm3, %v7937_v24  ;;  %11471 = vmatpush3.bf16.msra.mxu1 %v12750_v33  ;;  %v8153_v24 = vld [vmem:[%s18596_s29 + $0x160] sm:$0xff] }
 0xda8   : > { %11644 = vmatprep.subr.bf16.mxu1 %v12752_v35  ;;  %v10954_v33 = vcombine.high %v8149_v19, %v8153_v24 }
 0xda9   : > { %v7487_v37 = vpop.permute.xlu0 %7486  ;;  %11563 = vmatpush3.bf16.msra.mxu0 %v12749_v15  ;;  %v7675_v50 = vpop.permute.xlu1 %7674 }
 0xdaa   : > { %7514 = vst.msk [vmem:[#allocation5 + $0x124] sm:$0xf] %vm6940_vm9, %v7487_v37  ;;  %7712 = vst.msk [vmem:[#allocation5 + $0x160] sm:$0xf] %vm6940_vm9, %v7675_v50  ;;  %11564 = vmatprep.subr.bf16.mxu0 %v12751_v53  ;;  %9155 = vmatmul.mubr.bf16.vlgmr.msra.gmra.mrb[108].mxu1 %v10913_v34  ;;  %v18597_v34 = vmov 0   ;;  %v8150_v53 = vld [vmem:[%s18596_s29 + $0x148] sm:$0xff]  ;;  %v10947_v37 = vcombine.low %v8142_v40, %v8146_v38 }
 0xdab   : > { %11645 = vmatpush3.bf16.msra.mxu1 %v12754_v9  ;;  %9162 = vmatprep.mubr.bf16.mxu1 %v10922_v12  ;;  %v8154_v12 = vld [vmem:[%s18596_s29 + $0x168] sm:$0xff]  ;;  %v8157_v50 = vld [vmem:[%s18596_s29 + $0x180] sm:$0xff]  ;;  %v12767_v38 = vld [vmem:[#allocation5 + $0x198] sm:$0xff]  }
 0xdac   : > { %11646 = vmatprep.subr.bf16.mxu1 %v12755_v23  ;;  %v8161_v9 = vld [vmem:[%s18596_s29 + $0x1a0] sm:$0xff] }
 0xdad   : > { %v7729_v20 = vpop.permute.xlu0 %7728  ;;  %11565 = vmatpush3.bf16.msra.mxu0 %v12753_v26  ;;  %v7485_v16 = vpop.permute.xlu1 %7484 }
 0xdae   : > { %7765 = vst.msk [vmem:[#allocation5 + $0x164] sm:$0xf] %vm6994_vm3, %v7729_v20  ;;  %9530 = vmatprep.subr.bf16.mxu0 %v18597_v34  ;;  %v10953_v20 = vcombine.low %v8149_v19, %v8153_v24  ;;  %v8189_v24 = vld [vmem:[%s18596_s29 + $0x280] sm:$0xff] }
 0xdaf   : > { %7513 = vst.msk [vmem:[#allocation5 + $0x120] sm:$0xf] %vm6940_vm9, %v7485_v16  ;;  %11647 = vmatpush3.bf16.msra.mxu1 %v12757_v22  ;;  %v10962_v16 = vcombine.high %v8157_v50, %v8161_v9  ;;  %v8158_v22 = vld [vmem:[%s18596_s29 + $0x188] sm:$0xff] }
 0xdb0   : > { %9291 = vmatmul.mubr.bf16.vlgmr.msra.gmra.mrb[104].mxu0 %v10915_v4  ;;  %11648 = vmatprep.subr.bf16.mxu1 %v12758_v18  ;;  %v10923_v4 = vcombine.low %v8118_v55, %v8122_v52  ;;  %v10956_v52 = vcombine.high %v8150_v53, %v8154_v12 }
 0xdb1   : > { %v7539_v62 = vpop.permute.xlu0 %7538  ;;  %9531 = vmatpush1.bf16.msra.mxu0 %v12756_v61  ;;  %v7727_v60 = vpop.permute.xlu1 %7726  ;;  %9298 = vmatprep.mubr.bf16.mxu0 %v10924_v46  ;;  %v8162_v46 = vld [vmem:[%s18596_s29 + $0x1a8] sm:$0xff]  ;;  %v10955_v61 = vcombine.low %v8150_v53, %v8154_v12 }
 0xdb2   : > { %7566 = vst.msk [vmem:[#allocation5 + $0x124] sm:$0xf] %vm6994_vm3, %v7539_v62  ;;  %7764 = vst.msk [vmem:[#allocation5 + $0x160] sm:$0xf] %vm6994_vm3, %v7727_v60  ;;  %9532 = vmatprep.subr.bf16.mxu0 %v18597_v34  ;;  %9163 = vmatmul.mubr.bf16.gmra.mrb[112].mxu1 %v10921_v5  ;;  %v8169_v62 = vld [vmem:[%s18596_s29 + $0x1e0] sm:$0xff]  ;;  %v10964_v60 = vcombine.high %v8158_v22, %v8162_v46 }
 0xdb3   : > { %11649 = vmatpush3.bf16.msra.mxu1 %v12759_v7  ;;  %9170 = vmatprep.mubr.bf16.mxu1 %v10930_v63  ;;  %v8165_v63 = vld [vmem:[%s18596_s29 + $0x1c0] sm:$0xff]  ;;  %v10961_v7 = vcombine.low %v8157_v50, %v8161_v9  ;;  %v8190_v9 = vld [vmem:[%s18596_s29 + $0x288] sm:$0xff] }
 0xdb4   : > { %11650 = vmatprep.subr.bf16.mxu1 %v12760_v0  ;;  %v10970_v39 = vcombine.high %v8165_v63, %v8169_v62  ;;  %v12769_v50 = vld [vmem:[#allocation5 + $0x1a8] sm:$0xff]  }
 0xdb5   : > { %v7891_v17 = vpop.permute.xlu0 %7890  ;;  %v7537_v30 = vpop.permute.xlu1 %7536 }
 0xdb6   : > { %7924 = vst.msk [vmem:[#allocation5 + $0x1d4] sm:$0xf] %vm6940_vm9, %v7891_v17  ;;  %v8170_v17 = vld [vmem:[%s18596_s29 + $0x1e8] sm:$0xff] }
 0xdb7   : > { %7565 = vst.msk [vmem:[#allocation5 + $0x120] sm:$0xf] %vm6994_vm3, %v7537_v30  ;;  %11651 = vmatpush3.bf16.msra.mxu1 %v12761_v48  ;;  %v10963_v30 = vcombine.low %v8158_v22, %v8162_v46  ;;  %v8177_v48 = vld [vmem:[%s18596_s29 + $0x220] sm:$0xff] }
 0xdb8   : > { %9299 = vmatmul.mubr.bf16.gmra.mrb[108].mxu0 %v10923_v4  ;;  %v8166_v4 = vld [vmem:[%s18596_s29 + $0x1c8] sm:$0xff] }
 0xdb9   : > { %v7943_v57 = vpop.permute.xlu0 %7942  ;;  %v7889_v27 = vpop.permute.xlu1 %7888  ;;  %v12762_v42 = vld [vmem:[#allocation5 + $0x160] sm:$0xff]   ;;  %9306 = vmatprep.mubr.bf16.mxu0 %v10932_v45 }
 0xdba   : > { %7976 = vst.msk [vmem:[#allocation5 + $0x1d4] sm:$0xf] %vm6994_vm3, %v7943_v57  ;;  %9171 = vmatmul.mubr.bf16.gmra.mrb[116].mxu1 %v10929_v31  ;;  %11652 = vmatprep.subr.bf16.mxu1 %v12762_v42  ;;  %v8173_v45 = vld [vmem:[%s18596_s29 + $0x200] sm:$0xff]  ;;  %v10972_v31 = vcombine.high %v8166_v4, %v8170_v17 }
 0xdbb   : > { %7923 = vst.msk [vmem:[#allocation5 + $0x1d0] sm:$0xf] %vm6940_vm9, %v7889_v27  ;;  %9178 = vmatprep.mubr.bf16.mxu1 %v10938_v29  ;;  %v10969_v29 = vcombine.low %v8165_v63, %v8169_v62  ;;  %v10978_v57 = vcombine.high %v8173_v45, %v8177_v48  ;;  %v8198_v63 = vld [vmem:[%s18596_s29 + $0x2c8] sm:$0xff] }
 0xdbc   : > { %v8202_v62 = vld [vmem:[%s18596_s29 + $0x2e8] sm:$0xff] }
 0xdbd   : > { %v7681_v32 = vpop.permute.xlu0 %7680  ;;  %v7941_v36 = vpop.permute.xlu1 %7940 }
 0xdbe   : > { %v12763_v21 = vld [vmem:[#allocation5 + $0x120] sm:$0xff]   ;;  %7715 = vst.msk [vmem:[#allocation5 + $0x16c] sm:$0xf] %vm6940_vm9, %v7681_v32  ;;  %v10971_v32 = vcombine.low %v8166_v4, %v8170_v17  ;;  %v11004_v4 = vcombine.high %v8198_v63, %v8202_v62 }
 0xdbf   : > { %7975 = vst.msk [vmem:[#allocation5 + $0x1d0] sm:$0xf] %vm6994_vm3, %v7941_v36  ;;  %11653 = vmatpush3.bf16.msra.mxu1 %v12763_v21 }
 0xdc0   : > { %9307 = vmatmul.mubr.bf16.gmra.mrb[112].mxu0 %v10931_v47  ;;  %v8178_v47 = vld [vmem:[%s18596_s29 + $0x228] sm:$0xff] }
 0xdc1   : > { %v7569_v3 = vpop.permute.xlu0 %7568  ;;  %v7679_v11 = vpop.permute.xlu1 %7678  ;;  %9314 = vmatprep.mubr.bf16.mxu0 %v10940_v28  ;;  %v8185_v28 = vld [vmem:[%s18596_s29 + $0x260] sm:$0xff]  ;;  %v10979_v19 = vcombine.low %v8174_v2, %v8178_v47 }
 0xdc2   : > { %7607 = vst.msk [vmem:[#allocation5 + $0x12c] sm:$0xf] %vm6940_vm9, %v7569_v3  ;;  %7714 = vst.msk [vmem:[#allocation5 + $0x168] sm:$0xf] %vm6940_vm9, %v7679_v11  ;;  %9179 = vmatmul.mubr.bf16.gmra.mrb[120].mxu1 %v10937_v44  ;;  %v10980_v44 = vcombine.high %v8174_v2, %v8178_v47  ;;  %v10986_v3 = vcombine.high %v8181_v58, %v8185_v28  ;;  %v8111_v47 = vld [vmem:[%s18596_s29 + $0x10] sm:$0xff] }
 0xdc3   : > { %9186 = vmatprep.mubr.bf16.mxu1 %v10946_v41  ;;  %v10977_v41 = vcombine.low %v8173_v45, %v8177_v48  ;;  %v12773_v45 = vld [vmem:[#allocation5 + $0x1c8] sm:$0xff]  }
 0xdc4   : > { %v8206_v48 = vld [vmem:[%s18596_s29 + $0x308] sm:$0xff] }
 0xdc5   : > { %v7733_v49 = vpop.permute.xlu0 %7732  ;;  %v7731_v1 = vpop.permute.xlu1 %7730  ;;  %v11012_v2 = vcombine.high %v8206_v48, %v8206_v48 }
 0xdc6   : > { %7767 = vst.msk [vmem:[#allocation5 + $0x16c] sm:$0xf] %vm6994_vm3, %v7733_v49  ;;  %7766 = vst.msk [vmem:[#allocation5 + $0x168] sm:$0xf] %vm6994_vm3, %v7731_v1  ;;  %v8186_v49 = vld [vmem:[%s18596_s29 + $0x268] sm:$0xff]  ;;  %v12768_v1 = vld [vmem:[#allocation5 + $0x1a0] sm:$0xff]  }
 0xdc8   : > { %9315 = vmatmul.mubr.bf16.gmra.mrb[116].mxu0 %v10939_v56  ;;  %v8182_v56 = vld [vmem:[%s18596_s29 + $0x248] sm:$0xff] }
 0xdc9   : > { %v7621_v15 = vpop.permute.xlu0 %7620  ;;  %v7893_v35 = vpop.permute.xlu1 %7892  ;;  %9322 = vmatprep.mubr.bf16.mxu0 %v10948_v59 }
 0xdca   : > { %7659 = vst.msk [vmem:[#allocation5 + $0x12c] sm:$0xf] %vm6994_vm3, %v7621_v15  ;;  %9187 = vmatmul.mubr.bf16.gmra.mrb[124].mxu1 %v10945_v10  ;;  %v10988_v15 = vcombine.high %v8182_v56, %v8186_v49 }
 0xdcb   : > { %7925 = vst.msk [vmem:[#allocation5 + $0x1d8] sm:$0xf] %vm6940_vm9, %v7893_v35  ;;  %9194 = vmatprep.mubr.bf16.mxu1 %v10954_v33  ;;  %v8193_v33 = vld [vmem:[%s18596_s29 + $0x2a0] sm:$0xff]  ;;  %v10985_v35 = vcombine.low %v8181_v58, %v8185_v28 }
 0xdcc   : > { %v10994_v53 = vcombine.high %v8189_v24, %v8193_v33  ;;  %v10993_v22 = vcombine.low %v8189_v24, %v8193_v33 }
 0xdcd   : > { %v7895_v23 = vpop.permute.xlu0 %7894  ;;  %v7945_v26 = vpop.permute.xlu1 %7944  ;;  %v12764_v55 = vld [vmem:[#allocation5 + $0x168] sm:$0xff]  }
 0xdce   : > { %7926 = vst.msk [vmem:[#allocation5 + $0x1dc] sm:$0xf] %vm6940_vm9, %v7895_v23  ;;  %11654 = vmatprep.subr.bf16.mxu1 %v12764_v55  ;;  %v8194_v23 = vld [vmem:[%s18596_s29 + $0x2a8] sm:$0xff] }
 0xdcf   : > { %7977 = vst.msk [vmem:[#allocation5 + $0x1d8] sm:$0xf] %vm6994_vm3, %v7945_v26  ;;  %v10987_v26 = vcombine.low %v8182_v56, %v8186_v49  ;;  %v11011_v49 = vcombine.low %v8206_v48, %v8206_v48 }
 0xdd0   : > { %9323 = vmatmul.mubr.bf16.gmra.mrb[120].mxu0 %v10947_v37 }
 0xdd1   : > { %v7947_v14 = vpop.permute.xlu0 %7946  ;;  %v7683_v13 = vpop.permute.xlu1 %7682  ;;  %9330 = vmatprep.mubr.bf16.mxu0 %v10956_v52 }
 0xdd2   : > { %7978 = vst.msk [vmem:[#allocation5 + $0x1dc] sm:$0xf] %vm6994_vm3, %v7947_v14  ;;  %9195 = vmatmul.mubr.bf16.gmra.mrb[128].mxu1 %v10953_v20  ;;  %v12770_v20 = vld [vmem:[#allocation5 + $0x1b0] sm:$0xff]   ;;  %v8201_v14 = vld [vmem:[%s18596_s29 + $0x2e0] sm:$0xff] }
 0xdd3   : > { %7716 = vst.msk [vmem:[#allocation5 + $0x170] sm:$0xf] %vm6940_vm9, %v7683_v13  ;;  %9202 = vmatprep.mubr.bf16.mxu1 %v10962_v16  ;;  %v8197_v16 = vld [vmem:[%s18596_s29 + $0x2c0] sm:$0xff]  ;;  %v10996_v13 = vcombine.high %v8190_v9, %v8194_v23 }
 0xdd4   : > { %v11002_v46 = vcombine.high %v8197_v16, %v8201_v14  ;;  %v11001_v17 = vcombine.low %v8197_v16, %v8201_v14  ;;  %v8128_v16 = vld [vmem:[%s18596_s29 + $0x98] sm:$0xff] }
 0xdd5   : > { %v7697_v18 = vpop.permute.xlu0 %7696  ;;  %v7571_v5 = vpop.permute.xlu1 %7570  ;;  %v8132_v14 = vld [vmem:[%s18596_s29 + $0xb8] sm:$0xff] }
 0xdd6   : > { %7723 = vst.msk [vmem:[#allocation5 + $0x18c] sm:$0xf] %vm6940_vm9, %v7697_v18  ;;  %7608 = vst.msk [vmem:[#allocation5 + $0x130] sm:$0xf] %vm6940_vm9, %v7571_v5  ;;  %v12771_v5 = vld [vmem:[#allocation5 + $0x1b8] sm:$0xff]  }
 0xdd8   : > { %9331 = vmatmul.mubr.bf16.gmra.mrb[124].mxu0 %v10955_v61 }
 0xdd9   : > { %v7749_v54 = vpop.permute.xlu0 %7748  ;;  %v7735_v0 = vpop.permute.xlu1 %7734  ;;  %9338 = vmatprep.mubr.bf16.mxu0 %v10964_v60  ;;  %v10995_v60 = vcombine.low %v8190_v9, %v8194_v23  ;;  %v12780_v58 = vld [vmem:[#allocation5 + $0x1d8] sm:$0xff]  }
 0xdda   : > { %7775 = vst.msk [vmem:[#allocation5 + $0x18c] sm:$0xf] %vm6994_vm3, %v7749_v54  ;;  %7768 = vst.msk [vmem:[#allocation5 + $0x170] sm:$0xf] %vm6994_vm3, %v7735_v0  ;;  %9203 = vmatmul.mubr.bf16.gmra.mrb[132].mxu1 %v10961_v7  ;;  %v12772_v54 = vld [vmem:[#allocation5 + $0x1c0] sm:$0xff]  }
 0xddb   : > { %9210 = vmatprep.mubr.bf16.mxu1 %v10970_v39  ;;  %v8205_v0 = vld [vmem:[%s18596_s29 + $0x300] sm:$0xff] }
 0xddd   : > { %v7685_v6 = vpop.permute.xlu0 %7684  ;;  %v7623_v25 = vpop.permute.xlu1 %7622 }
 0xdde   : > { %7717 = vst.msk [vmem:[#allocation5 + $0x174] sm:$0xf] %vm6940_vm9, %v7685_v6 }
 0xddf   : > { %7660 = vst.msk [vmem:[#allocation5 + $0x130] sm:$0xf] %vm6994_vm3, %v7623_v25 }
 0xde0   : > { %9339 = vmatmul.mubr.bf16.gmra.mrb[128].mxu0 %v10963_v30  ;;  %v11010_v30 = vcombine.high %v8205_v0, %v8205_v0 }
 0xde1   : > { %v7573_v27 = vpop.permute.xlu0 %7572  ;;  %v7897_v42 = vpop.permute.xlu1 %7896  ;;  %v12765_v43 = vld [vmem:[#allocation5 + $0x188] sm:$0xff]   ;;  %9346 = vmatprep.mubr.bf16.mxu0 %v10972_v31  ;;  %v12775_v31 = vld [vmem:[#allocation5 + $0x1d0] sm:$0xff]  }
 0xde2   : > { %7609 = vst.msk [vmem:[#allocation5 + $0x134] sm:$0xf] %vm6940_vm9, %v7573_v27  ;;  %7927 = vst.msk [vmem:[#allocation5 + $0x1e0] sm:$0xf] %vm6940_vm9, %v7897_v42  ;;  %9211 = vmatmul.mubr.bf16.gmra.mrb[136].mxu1 %v10969_v29  ;;  %9533 = vmatpush1.bf16.msra.mxu0 %v12765_v43  ;;  %v11003_v42 = vcombine.low %v8198_v63, %v8202_v62  ;;  %v8136_v63 = vld [vmem:[%s18596_s29 + $0xd8] sm:$0xff] }
 0xde3   : > { %9534 = vmatprep.subr.bf16.mxu0 %v18597_v34  ;;  %9218 = vmatprep.mubr.bf16.mxu1 %v10978_v57  ;;  %v8140_v62 = vld [vmem:[%s18596_s29 + $0xf8] sm:$0xff] }
 0xde5   : > { %v7737_v36 = vpop.permute.xlu0 %7736  ;;  %v7949_v21 = vpop.permute.xlu1 %7948 }
 0xde6   : > { %7769 = vst.msk [vmem:[#allocation5 + $0x174] sm:$0xf] %vm6994_vm3, %v7737_v36  ;;  %7979 = vst.msk [vmem:[#allocation5 + $0x1e0] sm:$0xf] %vm6994_vm3, %v7949_v21  ;;  %9535 = vmatpush1.bf16.msra.mxu0 %v12766_v8  ;;  %v8115_v8 = vld [vmem:[%s18596_s29 + $0x30] sm:$0xff] }
 0xde7   : > { %9536 = vmatprep.subr.bf16.mxu0 %v18597_v34  ;;  %v10918_v28 = vcombine.high %v8111_v47, %v8115_v8 }
 0xde8   : > { %9347 = vmatmul.mubr.bf16.gmra.mrb[132].mxu0 %v10971_v32  ;;  %v11009_v32 = vcombine.low %v8205_v0, %v8205_v0  ;;  %v8151_v0 = vld [vmem:[%s18596_s29 + $0x150] sm:$0xff] }
 0xde9   : > { %v7625_v11 = vpop.permute.xlu0 %7624  ;;  %v7687_v40 = vpop.permute.xlu1 %7686  ;;  %9354 = vmatprep.mubr.bf16.mxu0 %v10980_v44 }
 0xdea   : > { %7661 = vst.msk [vmem:[#allocation5 + $0x134] sm:$0xf] %vm6994_vm3, %v7625_v11  ;;  %9219 = vmatmul.mubr.bf16.gmra.mrb[140].mxu1 %v10977_v41  ;;  %9537 = vmatpush1.bf16.msra.mxu0 %v12767_v38  ;;  %v8116_v11 = vld [vmem:[%s18596_s29 + $0x38] sm:$0xff] }
 0xdeb   : > { %7718 = vst.msk [vmem:[#allocation5 + $0x178] sm:$0xf] %vm6940_vm9, %v7687_v40  ;;  %9538 = vmatprep.subr.bf16.mxu0 %v18597_v34  ;;  %9226 = vmatprep.mubr.bf16.mxu1 %v10986_v3  ;;  %v8112_v3 = vld [vmem:[%s18596_s29 + $0x18] sm:$0xff]  ;;  %v8119_v40 = vld [vmem:[%s18596_s29 + $0x50] sm:$0xff] }
 0xdec   : > { %v10920_v24 = vcombine.high %v8112_v3, %v8116_v11  ;;  %v10919_v9 = vcombine.low %v8112_v3, %v8116_v11  ;;  %v8175_v3 = vld [vmem:[%s18596_s29 + $0x210] sm:$0xff] }
 0xded   : > { %v7899_v59 = vpop.permute.xlu0 %7898  ;;  %v7575_v10 = vpop.permute.xlu1 %7574  ;;  %v12776_v43 = vld [vmem:[#allocation5 + $0x170] sm:$0xff]  }
 0xdee   : > { %7928 = vst.msk [vmem:[#allocation5 + $0x1e4] sm:$0xf] %vm6940_vm9, %v7899_v59  ;;  %7610 = vst.msk [vmem:[#allocation5 + $0x138] sm:$0xf] %vm6940_vm9, %v7575_v10  ;;  %9539 = vmatpush1.bf16.msra.mxu0 %v12768_v1  ;;  %v8123_v1 = vld [vmem:[%s18596_s29 + $0x70] sm:$0xff]  ;;  %v10917_v59 = vcombine.low %v8111_v47, %v8115_v8 }
 0xdef   : > { %9540 = vmatprep.subr.bf16.mxu0 %v18597_v34  ;;  %v10926_v10 = vcombine.high %v8119_v40, %v8123_v1  ;;  %v10925_v23 = vcombine.low %v8119_v40, %v8123_v1  ;;  %v8167_v8 = vld [vmem:[%s18596_s29 + $0x1d0] sm:$0xff]  ;;  %v8168_v40 = vld [vmem:[%s18596_s29 + $0x1d8] sm:$0xff] }
 0xdf0   : > { %9355 = vmatmul.mubr.bf16.gmra.mrb[136].mxu0 %v10979_v19  ;;  %v8179_v11 = vld [vmem:[%s18596_s29 + $0x230] sm:$0xff] }
 0xdf1   : > { %v7951_v12 = vpop.permute.xlu0 %7950  ;;  %v7739_v37 = vpop.permute.xlu1 %7738  ;;  %9362 = vmatprep.mubr.bf16.mxu0 %v10988_v15  ;;  %v12779_v44 = vld [vmem:[#allocation5 + $0x130] sm:$0xff]   ;;  %v10982_v1 = vcombine.high %v8175_v3, %v8179_v11 }
 0xdf2   : > { %7980 = vst.msk [vmem:[#allocation5 + $0x1e4] sm:$0xf] %vm6994_vm3, %v7951_v12  ;;  %7770 = vst.msk [vmem:[#allocation5 + $0x178] sm:$0xf] %vm6994_vm3, %v7739_v37  ;;  %9227 = vmatmul.mubr.bf16.gmra.mrb[144].mxu1 %v10985_v35  ;;  %9541 = vmatpush1.bf16.msra.mxu0 %v12769_v50  ;;  %v8127_v15 = vld [vmem:[%s18596_s29 + $0x90] sm:$0xff]  ;;  %v8124_v37 = vld [vmem:[%s18596_s29 + $0x78] sm:$0xff] }
 0xdf3   : > { %9542 = vmatprep.subr.bf16.mxu0 %v18597_v34  ;;  %9234 = vmatprep.mubr.bf16.mxu1 %v10994_v53  ;;  %v8131_v35 = vld [vmem:[%s18596_s29 + $0xb0] sm:$0xff]  ;;  %v8120_v53 = vld [vmem:[%s18596_s29 + $0x58] sm:$0xff] }
 0xdf5   : > { %v7689_v55 = vpop.permute.xlu0 %7688  ;;  %v7627_v52 = vpop.permute.xlu1 %7626 }
 0xdf6   : > { %7719 = vst.msk [vmem:[#allocation5 + $0x17c] sm:$0xf] %vm6940_vm9, %v7689_v55  ;;  %9543 = vmatpush1.bf16.msra.mxu0 %v12770_v20  ;;  %v10928_v55 = vcombine.high %v8120_v53, %v8124_v37  ;;  %v8139_v20 = vld [vmem:[%s18596_s29 + $0xf0] sm:$0xff] }
 0xdf7   : > { %7662 = vst.msk [vmem:[#allocation5 + $0x138] sm:$0xf] %vm6994_vm3, %v7627_v52  ;;  %9544 = vmatprep.subr.bf16.mxu0 %v18597_v34  ;;  %v8135_v52 = vld [vmem:[%s18596_s29 + $0xd0] sm:$0xff] }
 0xdf8   : > { %9363 = vmatmul.mubr.bf16.gmra.mrb[140].mxu0 %v10987_v26  ;;  %v10934_v26 = vcombine.high %v8127_v15, %v8131_v35 }
 0xdf9   : > { %v7577_v61 = vpop.permute.xlu0 %7576  ;;  %v7489_v18 = vpop.permute.xlu1 %7488  ;;  %9370 = vmatprep.mubr.bf16.mxu0 %v10996_v13  ;;  %v12783_v56 = vld [vmem:[#allocation5 + $0x1e0] sm:$0xff]   ;;  %v10933_v13 = vcombine.low %v8127_v15, %v8131_v35  ;;  %v10981_v15 = vcombine.low %v8175_v3, %v8179_v11 }
 0xdfa   : > { %7611 = vst.msk [vmem:[#allocation5 + $0x13c] sm:$0xf] %vm6940_vm9, %v7577_v61  ;;  %7515 = vst.msk [vmem:[#allocation5 + $0x128] sm:$0xf] %vm6940_vm9, %v7489_v18  ;;  %9235 = vmatmul.mubr.bf16.gmra.mrb[148].mxu1 %v10993_v22  ;;  %9545 = vmatpush1.bf16.msra.mxu0 %v12771_v5  ;;  %v10927_v22 = vcombine.low %v8120_v53, %v8124_v37  ;;  %v10936_v61 = vcombine.high %v8128_v16, %v8132_v14  ;;  %v8143_v18 = vld [vmem:[%s18596_s29 + $0x110] sm:$0xff] }
 0xdfb   : > { %9546 = vmatprep.subr.bf16.mxu0 %v18597_v34  ;;  %9242 = vmatprep.mubr.bf16.mxu1 %v11002_v46  ;;  %v10942_v46 = vcombine.high %v8135_v52, %v8139_v20  ;;  %v8147_v5 = vld [vmem:[%s18596_s29 + $0x130] sm:$0xff] }
 0xdfc   : > { %v8191_v37 = vld [vmem:[%s18596_s29 + $0x290] sm:$0xff] }
 0xdfd   : > { %v7741_v7 = vpop.permute.xlu0 %7740  ;;  %v7541_v39 = vpop.permute.xlu1 %7540 }
 0xdfe   : > { %7771 = vst.msk [vmem:[#allocation5 + $0x17c] sm:$0xf] %vm6994_vm3, %v7741_v7  ;;  %7567 = vst.msk [vmem:[#allocation5 + $0x128] sm:$0xf] %vm6994_vm3, %v7541_v39  ;;  %9547 = vmatpush1.bf16.msra.mxu0 %v12772_v54  ;;  %v10935_v7 = vcombine.low %v8128_v16, %v8132_v14  ;;  %v10950_v39 = vcombine.high %v8143_v18, %v8147_v5  ;;  %v10944_v54 = vcombine.high %v8136_v63, %v8140_v62  ;;  %v8199_v16 = vld [vmem:[%s18596_s29 + $0x2d0] sm:$0xff] }
 0xdff   : > { %9548 = vmatprep.subr.bf16.mxu0 %v18597_v34  ;;  %v8203_v14 = vld [vmem:[%s18596_s29 + $0x2f0] sm:$0xff] }
 0xe00   : > { %9371 = vmatmul.mubr.bf16.gmra.mrb[144].mxu0 %v10995_v60  ;;  %v10941_v60 = vcombine.low %v8135_v52, %v8139_v20 }
 0xe01   : > { %v7629_v6 = vpop.permute.xlu0 %7628  ;;  %v7901_v25 = vpop.permute.xlu1 %7900  ;;  %9378 = vmatprep.mubr.bf16.mxu0 %v11004_v4  ;;  %v8155_v4 = vld [vmem:[%s18596_s29 + $0x170] sm:$0xff] }
 0xe02   : > { %7663 = vst.msk [vmem:[#allocation5 + $0x13c] sm:$0xf] %vm6994_vm3, %v7629_v6  ;;  %9243 = vmatmul.mubr.bf16.gmra.mrb[152].mxu1 %v11001_v17  ;;  %9549 = vmatpush1.bf16.msra.mxu0 %v12773_v45  ;;  %v8144_v17 = vld [vmem:[%s18596_s29 + $0x118] sm:$0xff]  ;;  %v10949_v6 = vcombine.low %v8143_v18, %v8147_v5  ;;  %v10958_v45 = vcombine.high %v8151_v0, %v8155_v4 }
 0xe03   : > { %7929 = vst.msk [vmem:[#allocation5 + $0x1e8] sm:$0xf] %vm6940_vm9, %v7901_v25  ;;  %9550 = vmatprep.subr.bf16.mxu0 %v18597_v34  ;;  %9250 = vmatprep.mubr.bf16.mxu1 %v11010_v30  ;;  %v8148_v30 = vld [vmem:[%s18596_s29 + $0x138] sm:$0xff]  ;;  %v10943_v25 = vcombine.low %v8136_v63, %v8140_v62  ;;  %v11006_v18 = vcombine.high %v8199_v16, %v8203_v14  ;;  %v8207_v63 = vld [vmem:[%s18596_s29 + $0x310] sm:$0xff] }
 0xe04   : > { %v10952_v48 = vcombine.high %v8144_v17, %v8148_v30  ;;  %v8200_v62 = vld [vmem:[%s18596_s29 + $0x2d8] sm:$0xff] }
 0xe05   : > { %v7903_v29 = vpop.permute.xlu0 %7902  ;;  %v7953_v57 = vpop.permute.xlu1 %7952  ;;  %v12774_v27 = vld [vmem:[#allocation5 + $0x128] sm:$0xff]   ;;  %v12781_v41 = vld [vmem:[#allocation5 + $0x178] sm:$0xff]  }
 0xe06   : > { %7930 = vst.msk [vmem:[#allocation5 + $0x1ec] sm:$0xf] %vm6940_vm9, %v7903_v29  ;;  %11655 = vmatpush3.bf16.msra.mxu1 %v12774_v27  ;;  %9551 = vmatpush1.bf16.msra.mxu0 %v12775_v31  ;;  %v8159_v31 = vld [vmem:[%s18596_s29 + $0x190] sm:$0xff]  ;;  %v8156_v27 = vld [vmem:[%s18596_s29 + $0x178] sm:$0xff] }
 0xe07   : > { %7981 = vst.msk [vmem:[#allocation5 + $0x1e8] sm:$0xf] %vm6994_vm3, %v7953_v57  ;;  %11656 = vmatprep.subr.bf16.mxu1 %v12776_v43  ;;  %9552 = vmatprep.subr.bf16.mxu0 %v18597_v34  ;;  %v8163_v29 = vld [vmem:[%s18596_s29 + $0x1b0] sm:$0xff]  ;;  %v8152_v57 = vld [vmem:[%s18596_s29 + $0x158] sm:$0xff]  ;;  %v10951_v43 = vcombine.low %v8144_v17, %v8148_v30  ;;  %v11013_v17 = vcombine.low %v8207_v63, %v8207_v63 }
 0xe08   : > { %9379 = vmatmul.mubr.bf16.gmra.mrb[148].mxu0 %v11003_v42  ;;  %v10957_v42 = vcombine.low %v8151_v0, %v8155_v4  ;;  %v10960_v47 = vcombine.high %v8152_v57, %v8156_v27  ;;  %v8208_v4 = vld [vmem:[%s18596_s29 + $0x318] sm:$0xff] }
 0xe09   : > { %v7955_v36 = vpop.permute.xlu0 %7954  ;;  %v7905_v21 = vpop.permute.xlu1 %7904  ;;  %9386 = vmatprep.mubr.bf16.mxu0 %v11012_v2  ;;  %v12782_v19 = vld [vmem:[#allocation5 + $0x138] sm:$0xff]   ;;  %v10966_v2 = vcombine.high %v8159_v31, %v8163_v29 }
 0xe0a   : > { %7982 = vst.msk [vmem:[#allocation5 + $0x1ec] sm:$0xf] %vm6994_vm3, %v7955_v36  ;;  %9251 = vmatmul.mubr.bf16.gmra.mrb[156].mxu1 %v11009_v32  ;;  %9553 = vmatpush1.bf16.msra.mxu0 %v12780_v58  ;;  %v8171_v32 = vld [vmem:[%s18596_s29 + $0x1f0] sm:$0xff]  ;;  %v8160_v36 = vld [vmem:[%s18596_s29 + $0x198] sm:$0xff]  ;;  %v10965_v58 = vcombine.low %v8159_v31, %v8163_v29 }
 0xe0b   : > { %7931 = vst.msk [vmem:[#allocation5 + $0x1f0] sm:$0xf] %vm6940_vm9, %v7905_v21  ;;  %11657 = vmatpush3.bf16.msra.mxu1 %v12779_v44  ;;  %9554 = vmatprep.subr.bf16.mxu0 %v18597_v34  ;;  %vm9079_vm9 = vcmask 850944   ;;  %v8164_v21 = vld [vmem:[%s18596_s29 + $0x1b8] sm:$0xff]  ;;  %v10974_v44 = vcombine.high %v8167_v8, %v8171_v32 }
 0xe0c   : > { %11658 = vmatprep.subr.bf16.mxu1 %v12781_v41  ;;  %9426 = vmatprep.mubr.bf16.mxu1 %v10918_v28  ;;  %v10959_v28 = vcombine.low %v8152_v57, %v8156_v27  ;;  %v10968_v41 = vcombine.high %v8160_v36, %v8164_v21 }
 0xe0d   : > { %v7957_v38 = vpop.permute.xlu0 %7956 }
 0xe0e   : > { %7983 = vst.msk [vmem:[#allocation5 + $0x1f0] sm:$0xf] %vm6994_vm3, %v7957_v38  ;;  %9555 = vmatpush1.bf16.msra.mxu0 %v12783_v56  ;;  %v8172_v38 = vld [vmem:[%s18596_s29 + $0x1f8] sm:$0xff]  ;;  %v10973_v56 = vcombine.low %v8167_v8, %v8171_v32 }
 0xe0f   : > { %11659 = vmatpush3.bf16.msra.mxu1 %v12782_v19  ;;  %9556 = vmatprep.subr.bf16.mxu0 %v18597_v34  ;;  %v10976_v19 = vcombine.high %v8168_v40, %v8172_v38  ;;  %v10975_v35 = vcombine.low %v8168_v40, %v8172_v38 }
 0xe10   : > { %9387 = vmatmul.mubr.bf16.gmra.mrb[152].mxu0 %v11011_v49  ;;  %11806 = vmatprep.subr.bf16.mxu1 %v12939_v51  ;;  %v10967_v49 = vcombine.low %v8160_v36, %v8164_v21 }
 0xe11   : > { %v12786_v33 = vld [vmem:[#allocation5 + $0x1e8] sm:$0xff]   ;;  %11080 = vmatprep.mubr.msk.bf16.mxu0 %vm9079_vm9, %v10920_v24  ;;  %v8183_v24 = vld [vmem:[%s18596_s29 + $0x250] sm:$0xff] }
 0xe12   : > { %9427 = vmatmul.mubr.bf16.vlgmr.msra.gmra.mrb[160].mxu1 %v10917_v59  ;;  %9557 = vmatpush1.bf16.msra.mxu0 %v12786_v33  ;;  %v8187_v59 = vld [vmem:[%s18596_s29 + $0x270] sm:$0xff]  ;;  %v8180_v33 = vld [vmem:[%s18596_s29 + $0x238] sm:$0xff] }
 0xe13   : > { %9558 = vmatprep.subr.bf16.mxu0 %v18597_v34  ;;  %9434 = vmatprep.mubr.bf16.mxu1 %v10926_v10  ;;  %v8176_v10 = vld [vmem:[%s18596_s29 + $0x218] sm:$0xff]  ;;  %v10990_v53 = vcombine.high %v8183_v24, %v8187_v59 }
 0xe15   : > { %v12787_v12 = vld [vmem:[#allocation5 + $0x1f0] ss:$0 sps:$4 sm:$0xff]  }
 0xe16   : > { %v9120_v50 = vsel %vm3698_vm7, %v12787_v12, 0  ;;  %v10984_v12 = vcombine.high %v8176_v10, %v8180_v33 }
 0xe17   : > { %9559 = vmatpush1.bf16.msra.mxu0 %v9120_v50  ;;  %v8195_v50 = vld [vmem:[%s18596_s29 + $0x2b0] sm:$0xff] }
 0xe18   : > { %10421 = vmatprep.subr.bf16.mxu0 %v18597_v34  ;;  %v10998_v52 = vcombine.high %v8191_v37, %v8195_v50 }
 0xe1a   : > { %9435 = vmatmul.mubr.bf16.gmra.mrb[164].mxu1 %v10925_v23  ;;  %9563 = vmatmul.mubr.bf16.vlgmr.msra.gmra.mrb[156].mxu0 %v10919_v9  ;;  %v8184_v9 = vld [vmem:[%s18596_s29 + $0x258] sm:$0xff] }
 0xe1b   : > { %9442 = vmatprep.mubr.bf16.mxu1 %v10934_v26  ;;  %11081 = vmatprep.mubr.msk.bf16.mxu0 %vm9079_vm9, %v10928_v55  ;;  %v8188_v23 = vld [vmem:[%s18596_s29 + $0x278] sm:$0xff]  ;;  %v10989_v26 = vcombine.low %v8183_v24, %v8187_v59  ;;  %v10983_v55 = vcombine.low %v8176_v10, %v8180_v33 }
 0xe1c   : > { %v10992_v20 = vcombine.high %v8184_v9, %v8188_v23 }
 0xe22   : > { %9443 = vmatmul.mubr.bf16.gmra.mrb[168].mxu1 %v10933_v13  ;;  %9571 = vmatmul.mubr.bf16.gmra.mrb[160].mxu0 %v10927_v22  ;;  %v8192_v13 = vld [vmem:[%s18596_s29 + $0x298] sm:$0xff] }
 0xe23   : > { %9450 = vmatprep.mubr.bf16.mxu1 %v10942_v46  ;;  %11082 = vmatprep.mubr.msk.bf16.mxu0 %vm9079_vm9, %v10936_v61  ;;  %v8196_v22 = vld [vmem:[%s18596_s29 + $0x2b8] sm:$0xff]  ;;  %v10997_v46 = vcombine.low %v8191_v37, %v8195_v50  ;;  %v10991_v61 = vcombine.low %v8184_v9, %v8188_v23 }
 0xe24   : > { %v11000_v5 = vcombine.high %v8192_v13, %v8196_v22 }
 0xe2a   : > { %9451 = vmatmul.mubr.bf16.gmra.mrb[172].mxu1 %v10941_v60  ;;  %9579 = vmatmul.mubr.bf16.gmra.mrb[164].mxu0 %v10935_v7  ;;  %v8204_v60 = vld [vmem:[%s18596_s29 + $0x2f8] sm:$0xff]  ;;  %v11005_v7 = vcombine.low %v8199_v16, %v8203_v14 }
 0xe2b   : > { %9458 = vmatprep.mubr.bf16.mxu1 %v10950_v39  ;;  %11083 = vmatprep.mubr.msk.bf16.mxu0 %vm9079_vm9, %v10944_v54  ;;  %v10999_v39 = vcombine.low %v8192_v13, %v8196_v22  ;;  %v11014_v54 = vcombine.high %v8207_v63, %v8207_v63  ;;  %v11008_v0 = vcombine.high %v8200_v62, %v8204_v60 }
 0xe2c   : > { %v11007_v30 = vcombine.low %v8200_v62, %v8204_v60 }
 0xe32   : > { %9459 = vmatmul.mubr.bf16.gmra.mrb[176].mxu1 %v10949_v6  ;;  %9587 = vmatmul.mubr.bf16.gmra.mrb[168].mxu0 %v10943_v25  ;;  %v11016_v6 = vcombine.high %v8208_v4, %v8208_v4  ;;  %v11015_v25 = vcombine.low %v8208_v4, %v8208_v4 }
 0xe33   : > { %9466 = vmatprep.mubr.bf16.mxu1 %v10958_v45  ;;  %11084 = vmatprep.mubr.msk.bf16.mxu0 %vm9079_vm9, %v10952_v48 }
 0xe3a   : > { %9467 = vmatmul.mubr.bf16.gmra.mrb[180].mxu1 %v10957_v42  ;;  %9595 = vmatmul.mubr.bf16.gmra.mrb[172].mxu0 %v10951_v43 }
 0xe3b   : > { %9474 = vmatprep.mubr.bf16.mxu1 %v10966_v2  ;;  %11085 = vmatprep.mubr.msk.bf16.mxu0 %vm9079_vm9, %v10960_v47 }
 0xe42   : > { %9475 = vmatmul.mubr.bf16.gmra.mrb[184].mxu1 %v10965_v58  ;;  %9603 = vmatmul.mubr.bf16.gmra.mrb[176].mxu0 %v10959_v28 }
 0xe43   : > { %9482 = vmatprep.mubr.bf16.mxu1 %v10974_v44  ;;  %11086 = vmatprep.mubr.msk.bf16.mxu0 %vm9079_vm9, %v10968_v41 }
 0xe4a   : > { %9483 = vmatmul.mubr.bf16.gmra.mrb[188].mxu1 %v10973_v56  ;;  %9611 = vmatmul.mubr.bf16.gmra.mrb[180].mxu0 %v10967_v49 }
 0xe4b   : > { %9490 = vmatprep.mubr.bf16.mxu1 %v10982_v1  ;;  %11087 = vmatprep.mubr.msk.bf16.mxu0 %vm9079_vm9, %v10976_v19 }
 0xe52   : > { %9491 = vmatmul.mubr.bf16.gmra.mrb[192].mxu1 %v10981_v15  ;;  %9619 = vmatmul.mubr.bf16.gmra.mrb[184].mxu0 %v10975_v35 }
 0xe53   : > { %9498 = vmatprep.mubr.bf16.mxu1 %v10990_v53  ;;  %11088 = vmatprep.mubr.msk.bf16.mxu0 %vm9079_vm9, %v10984_v12 }
 0xe5a   : > { %9499 = vmatmul.mubr.bf16.gmra.mrb[196].mxu1 %v10989_v26  ;;  %9627 = vmatmul.mubr.bf16.gmra.mrb[188].mxu0 %v10983_v55 }
 0xe5b   : > { %9506 = vmatprep.mubr.bf16.mxu1 %v10998_v52  ;;  %11089 = vmatprep.mubr.msk.bf16.mxu0 %vm9079_vm9, %v10992_v20 }
 0xe62   : > { %9507 = vmatmul.mubr.bf16.gmra.mrb[200].mxu1 %v10997_v46  ;;  %9635 = vmatmul.mubr.bf16.gmra.mrb[192].mxu0 %v10991_v61 }
 0xe63   : > { %9514 = vmatprep.mubr.bf16.mxu1 %v11006_v18  ;;  %11090 = vmatprep.mubr.msk.bf16.mxu0 %vm9079_vm9, %v11000_v5 }
 0xe6a   : > { %9515 = vmatmul.mubr.bf16.gmra.mrb[204].mxu1 %v11005_v7  ;;  %9643 = vmatmul.mubr.bf16.gmra.mrb[196].mxu0 %v10999_v39 }
 0xe6b   : > { %9522 = vmatprep.mubr.bf16.mxu1 %v11014_v54  ;;  %11091 = vmatprep.mubr.msk.bf16.mxu0 %vm9079_vm9, %v11008_v0 }
 0xe72   : > { %9523 = vmatmul.mubr.bf16.gmra.mrb[208].mxu1 %v11013_v17  ;;  %9651 = vmatmul.mubr.bf16.gmra.mrb[200].mxu0 %v11007_v30 }
 0xe73   : > { %11092 = vmatprep.mubr.msk.bf16.mxu0 %vm9079_vm9, %v11016_v6  ;;  %11808 = vmatprep.mubr.msk.bf16.mxu1 %vm12940_vm12, %v12939_v51 }
 0xe7a   : > { %9659 = vmatmul.mubr.bf16.gmra.mrb[204].mxu0 %v11015_v25 }
 0xe7d   : > { %v11472_v45 = vpop.f32.mrb[108].mxu1 }
 0xe7e   : > { %v11473_v48 = vpop.f32.mrb[109].mxu1 }
 0xe7f   : > { %v11474_v31 = vadd.f32 %v11473_v48, %v11472_v45  ;;  %v11475_v29 = vpop.f32.mrb[110].mxu1 }
 0xe80   : > { %v11476_v57 = vpop.f32.mrb[111].mxu1 }
 0xe81   : > { %v11477_v27 = vadd.f32 %v11476_v57, %v11475_v29 }
 0xe83   : > { %v11566_v42 = vpop.f32.mrb[104].mxu0 }
 0xe84   : > { %v11567_v43 = vpop.f32.mrb[105].mxu0 }
 0xe85   : > { %v11568_v2 = vadd.f32 %v11567_v43, %v11566_v42  ;;  %v11569_v47 = vpop.f32.mrb[106].mxu0  ;;  %v11478_v32 = vpop.f32.mrb[112].mxu1 }
 0xe86   : > { %v11570_v8 = vpop.f32.mrb[107].mxu0  ;;  %v11479_v58 = vpop.f32.mrb[113].mxu1 }
 0xe87   : > { %v17852_v36 = vadd.f32 %v11568_v2, %v11474_v31  ;;  %v11571_v21 = vadd.f32 %v11570_v8, %v11569_v47  ;;  %v11480_v28 = vadd.f32 %v11479_v58, %v11478_v32  ;;  %v11481_v44 = vpop.f32.mrb[114].mxu1 }
 0xe88   : > { %v11482_v3 = vpop.f32.mrb[115].mxu1 }
 0xe89   : > { %v17854_v41 = vadd.f32 %v11571_v21, %v11477_v27  ;;  %v11483_v11 = vadd.f32 %v11482_v3, %v11481_v44 }
 0xe8b   : > { %v11572_v40 = vpop.f32.mrb[108].mxu0 }
 0xe8c   : > { %v11573_v38 = vpop.f32.mrb[109].mxu0 }
 0xe8d   : > { %v11574_v56 = vadd.f32 %v11573_v38, %v11572_v40  ;;  %v11575_v49 = vpop.f32.mrb[110].mxu0  ;;  %v11484_v19 = vpop.f32.mrb[116].mxu1 }
 0xe8e   : > { %v11576_v1 = vpop.f32.mrb[111].mxu0  ;;  %v11485_v10 = vpop.f32.mrb[117].mxu1 }
 0xe8f   : > { %v17856_v24 = vadd.f32 %v11574_v56, %v11480_v28  ;;  %v11577_v59 = vadd.f32 %v11576_v1, %v11575_v49  ;;  %v11486_v33 = vadd.f32 %v11485_v10, %v11484_v19  ;;  %v11487_v15 = vpop.f32.mrb[118].mxu1 }
 0xe90   : > { %v11488_v53 = vpop.f32.mrb[119].mxu1 }
 0xe91   : > { %v17858_v35 = vadd.f32 %v11577_v59, %v11483_v11  ;;  %v11489_v12 = vadd.f32 %v11488_v53, %v11487_v15 }
 0xe93   : > { %v11578_v37 = vpop.f32.mrb[112].mxu0 }
 0xe94   : > { %v11579_v50 = vpop.f32.mrb[113].mxu0 }
 0xe95   : > { %v11580_v9 = vadd.f32 %v11579_v50, %v11578_v37  ;;  %v11581_v23 = vpop.f32.mrb[114].mxu0  ;;  %v11490_v55 = vpop.f32.mrb[120].mxu1 }
 0xe96   : > { %v11582_v26 = vpop.f32.mrb[115].mxu0  ;;  %v11491_v16 = vpop.f32.mrb[121].mxu1 }
 0xe97   : > { %v17860_v52 = vadd.f32 %v11580_v9, %v11486_v33  ;;  %v11583_v20 = vadd.f32 %v11582_v26, %v11581_v23  ;;  %v11492_v14 = vadd.f32 %v11491_v16, %v11490_v55  ;;  %v11493_v13 = vpop.f32.mrb[122].mxu1 }
 0xe98   : > { %v11494_v46 = vpop.f32.mrb[123].mxu1 }
 0xe99   : > { %v17862_v22 = vadd.f32 %v11583_v20, %v11489_v12  ;;  %v11495_v61 = vadd.f32 %v11494_v46, %v11493_v13  ;;  %v9904_v12 = vld [vmem:[%s18598_s18] sm:$0x3] }
 0xe9a   : > { %v10096_v50 = vsel %vm3495_vm14, %v9904_v12, 0  ;;  %vm10055_vm14 = vcmask 31744  }
 0xe9b   : > { %v11584_v18 = vpop.f32.mrb[116].mxu0  ;;  %11807 = vmatpush3.bf16.msra.mxu1 %v10096_v50 }
 0xe9c   : > { %v11585_v5 = vpop.f32.mrb[117].mxu0 }
 0xe9d   : > { %v11586_v63 = vadd.f32 %v11585_v5, %v11584_v18  ;;  %v11587_v62 = vpop.f32.mrb[118].mxu0  ;;  %v11496_v7 = vpop.f32.mrb[124].mxu1 }
 0xe9e   : > { %v11588_v60 = vpop.f32.mrb[119].mxu0  ;;  %v11497_v0 = vpop.f32.mrb[125].mxu1 }
 0xe9f   : > { %v17864_v39 = vadd.f32 %v11586_v63, %v11492_v14  ;;  %v11589_v54 = vadd.f32 %v11588_v60, %v11587_v62  ;;  %v11498_v4 = vadd.f32 %v11497_v0, %v11496_v7  ;;  %v11499_v17 = vpop.f32.mrb[126].mxu1 }
 0xea0   : > { %v11500_v6 = vpop.f32.mrb[127].mxu1 }
 0xea1   : > { %v17866_v30 = vadd.f32 %v11589_v54, %v11495_v61  ;;  %v11501_v25 = vadd.f32 %v11500_v6, %v11499_v17 }
 0xea3   : > { %v11590_v45 = vpop.f32.mrb[120].mxu0 }
 0xea4   : > { %v11591_v48 = vpop.f32.mrb[121].mxu0 }
 0xea5   : > { %v11592_v31 = vadd.f32 %v11591_v48, %v11590_v45  ;;  %v11593_v29 = vpop.f32.mrb[122].mxu0  ;;  %v11502_v27 = vpop.f32.mrb[128].mxu1 }
 0xea6   : > { %v11594_v57 = vpop.f32.mrb[123].mxu0  ;;  %v11503_v2 = vpop.f32.mrb[129].mxu1 }
 0xea7   : > { %v17868_v42 = vadd.f32 %v11592_v31, %v11498_v4  ;;  %v11595_v43 = vadd.f32 %v11594_v57, %v11593_v29  ;;  %v11504_v47 = vadd.f32 %v11503_v2, %v11502_v27  ;;  %v11505_v8 = vpop.f32.mrb[130].mxu1 }
 0xea8   : > { %v11506_v21 = vpop.f32.mrb[131].mxu1 }
 0xea9   : > { %v17870_v32 = vadd.f32 %v11595_v43, %v11501_v25  ;;  %v11507_v58 = vadd.f32 %v11506_v21, %v11505_v8 }
 0xeab   : > { %v11596_v28 = vpop.f32.mrb[124].mxu0 }
 0xeac   : > { %v11597_v44 = vpop.f32.mrb[125].mxu0 }
 0xead   : > { %v11598_v3 = vadd.f32 %v11597_v44, %v11596_v28  ;;  %v11599_v11 = vpop.f32.mrb[126].mxu0  ;;  %v11508_v40 = vpop.f32.mrb[132].mxu1 }
 0xeae   : > { %v11600_v38 = vpop.f32.mrb[127].mxu0  ;;  %v11509_v49 = vpop.f32.mrb[133].mxu1 }
 0xeaf   : > { %v17872_v56 = vadd.f32 %v11598_v3, %v11504_v47  ;;  %v11601_v1 = vadd.f32 %v11600_v38, %v11599_v11  ;;  %v11510_v19 = vadd.f32 %v11509_v49, %v11508_v40  ;;  %v11511_v59 = vpop.f32.mrb[134].mxu1 }
 0xeb0   : > { %v11512_v33 = vpop.f32.mrb[135].mxu1 }
 0xeb1   : > { %v17874_v10 = vadd.f32 %v11601_v1, %v11507_v58  ;;  %v11513_v15 = vadd.f32 %v11512_v33, %v11511_v59 }
 0xeb3   : > { %v11602_v53 = vpop.f32.mrb[128].mxu0 }
 0xeb4   : > { %v11603_v37 = vpop.f32.mrb[129].mxu0 }
 0xeb5   : > { %v11604_v9 = vadd.f32 %v11603_v37, %v11602_v53  ;;  %v11605_v23 = vpop.f32.mrb[130].mxu0  ;;  %v11514_v26 = vpop.f32.mrb[136].mxu1 }
 0xeb6   : > { %v11606_v55 = vpop.f32.mrb[131].mxu0  ;;  %v11515_v20 = vpop.f32.mrb[137].mxu1 }
 0xeb7   : > { %v17880_v16 = vadd.f32 %v11604_v9, %v11510_v19  ;;  %v11607_v14 = vadd.f32 %v11606_v55, %v11605_v23  ;;  %v11516_v13 = vadd.f32 %v11515_v20, %v11514_v26  ;;  %v11517_v46 = vpop.f32.mrb[138].mxu1 }
 0xeb8   : > { %v11518_v61 = vpop.f32.mrb[139].mxu1 }
 0xeb9   : > { %v17882_v18 = vadd.f32 %v11607_v14, %v11513_v15  ;;  %v11519_v5 = vadd.f32 %v11518_v61, %v11517_v46 }
 0xebb   : > { %v11608_v63 = vpop.f32.mrb[132].mxu0 }
 0xebc   : > { %v11609_v62 = vpop.f32.mrb[133].mxu0 }
 0xebd   : > { %v11610_v60 = vadd.f32 %v11609_v62, %v11608_v63  ;;  %v11611_v7 = vpop.f32.mrb[134].mxu0  ;;  %v11520_v54 = vpop.f32.mrb[140].mxu1 }
 0xebe   : > { %v11612_v0 = vpop.f32.mrb[135].mxu0  ;;  %v11521_v4 = vpop.f32.mrb[141].mxu1 }
 0xebf   : > { %v17884_v17 = vadd.f32 %v11610_v60, %v11516_v13  ;;  %v11613_v6 = vadd.f32 %v11612_v0, %v11611_v7  ;;  %v11522_v25 = vadd.f32 %v11521_v4, %v11520_v54  ;;  %v11523_v45 = vpop.f32.mrb[142].mxu1 }
 0xec0   : > { %v11524_v48 = vpop.f32.mrb[143].mxu1 }
 0xec1   : > { %v17886_v31 = vadd.f32 %v11613_v6, %v11519_v5  ;;  %v11525_v29 = vadd.f32 %v11524_v48, %v11523_v45 }
 0xec3   : > { %v11614_v57 = vpop.f32.mrb[136].mxu0 }
 0xec4   : > { %v11615_v27 = vpop.f32.mrb[137].mxu0 }
 0xec5   : > { %v11616_v43 = vadd.f32 %v11615_v27, %v11614_v57  ;;  %v11617_v2 = vpop.f32.mrb[138].mxu0  ;;  %v11526_v47 = vpop.f32.mrb[144].mxu1 }
 0xec6   : > { %v11618_v8 = vpop.f32.mrb[139].mxu0  ;;  %v11527_v21 = vpop.f32.mrb[145].mxu1 }
 0xec7   : > { %v17888_v58 = vadd.f32 %v11616_v43, %v11522_v25  ;;  %v11619_v28 = vadd.f32 %v11618_v8, %v11617_v2  ;;  %v11528_v44 = vadd.f32 %v11527_v21, %v11526_v47  ;;  %v11529_v3 = vpop.f32.mrb[146].mxu1 }
 0xec8   : > { %v11530_v11 = vpop.f32.mrb[147].mxu1 }
 0xec9   : > { %v17890_v40 = vadd.f32 %v11619_v28, %v11525_v29  ;;  %v11531_v38 = vadd.f32 %v11530_v11, %v11529_v3 }
 0xecb   : > { %v11620_v49 = vpop.f32.mrb[140].mxu0 }
 0xecc   : > { %v11621_v1 = vpop.f32.mrb[141].mxu0 }
 0xecd   : > { %v11622_v19 = vadd.f32 %v11621_v1, %v11620_v49  ;;  %v11623_v59 = vpop.f32.mrb[142].mxu0  ;;  %v11532_v33 = vpop.f32.mrb[148].mxu1 }
 0xece   : > { %v11624_v15 = vpop.f32.mrb[143].mxu0  ;;  %v11533_v53 = vpop.f32.mrb[149].mxu1 }
 0xecf   : > { %v17892_v12 = vadd.f32 %v11622_v19, %v11528_v44  ;;  %v11625_v37 = vadd.f32 %v11624_v15, %v11623_v59  ;;  %v11534_v50 = vadd.f32 %v11533_v53, %v11532_v33  ;;  %v11535_v9 = vpop.f32.mrb[150].mxu1 }
 0xed0   : > { %v11536_v23 = vpop.f32.mrb[151].mxu1 }
 0xed1   : > { %v17894_v26 = vadd.f32 %v11625_v37, %v11531_v38  ;;  %v11537_v55 = vadd.f32 %v11536_v23, %v11535_v9 }
 0xed3   : > { %v11626_v20 = vpop.f32.mrb[144].mxu0 }
 0xed4   : > { %v11627_v14 = vpop.f32.mrb[145].mxu0 }
 0xed5   : > { %v11628_v13 = vadd.f32 %v11627_v14, %v11626_v20  ;;  %v11629_v46 = vpop.f32.mrb[146].mxu0  ;;  %v11538_v61 = vpop.f32.mrb[152].mxu1 }
 0xed6   : > { %v11630_v5 = vpop.f32.mrb[147].mxu0  ;;  %v11539_v63 = vpop.f32.mrb[153].mxu1 }
 0xed7   : > { %v17896_v62 = vadd.f32 %v11628_v13, %v11534_v50  ;;  %v11631_v60 = vadd.f32 %v11630_v5, %v11629_v46  ;;  %v11540_v7 = vadd.f32 %v11539_v63, %v11538_v61  ;;  %v11541_v54 = vpop.f32.mrb[154].mxu1 }
 0xed8   : > { %v11542_v0 = vpop.f32.mrb[155].mxu1 }
 0xed9   : > { %v17898_v4 = vadd.f32 %v11631_v60, %v11537_v55  ;;  %v11543_v6 = vadd.f32 %v11542_v0, %v11541_v54 }
 0xedb   : > { %v11632_v25 = vpop.f32.mrb[148].mxu0 }
 0xedc   : > { %v11633_v45 = vpop.f32.mrb[149].mxu0 }
 0xedd   : > { %v11544_v48 = vpop.f32.mrb[156].mxu1  ;;  %v11634_v29 = vadd.f32 %v11633_v45, %v11632_v25  ;;  %v11635_v57 = vpop.f32.mrb[150].mxu0 }
 0xede   : > { %v11545_v27 = vpop.f32.mrb[157].mxu1  ;;  %v11636_v43 = vpop.f32.mrb[151].mxu0 }
 0xedf   : > { %v11546_v2 = vadd.f32 %v11545_v27, %v11544_v48  ;;  %v11547_v47 = vpop.f32.mrb[158].mxu1  ;;  %v17900_v8 = vadd.f32 %v11634_v29, %v11540_v7  ;;  %v11637_v21 = vadd.f32 %v11636_v43, %v11635_v57 }
 0xee0   : > { %v11548_v28 = vpop.f32.mrb[159].mxu1 }
 0xee1   : > { %v17902_v44 = vadd.f32 %v11637_v21, %v11543_v6 }
 0xee3   : > { %v11638_v3 = vpop.f32.mrb[152].mxu0 }
 0xee4   : > { %v11639_v11 = vpop.f32.mrb[153].mxu0 }
 0xee5   : > { %v11660_v38 = vpop.f32.mrb[160].mxu1  ;;  %v11640_v49 = vadd.f32 %v11639_v11, %v11638_v3  ;;  %v11641_v1 = vpop.f32.mrb[154].mxu0 }
 0xee6   : > { %v11661_v19 = vpop.f32.mrb[161].mxu1  ;;  %v11642_v59 = vpop.f32.mrb[155].mxu0 }
 0xee7   : > { %v11662_v33 = vadd.f32 %v11661_v19, %v11660_v38  ;;  %v11663_v15 = vpop.f32.mrb[162].mxu1  ;;  %v17904_v53 = vadd.f32 %v11640_v49, %v11546_v2 }
 0xee8   : > { %v11664_v37 = vpop.f32.mrb[163].mxu1 }
 0xee9   : > { %v11665_v50 = vadd.f32 %v11664_v37, %v11663_v15  ;;  %v9429_v9 = vadd.f32 %v11662_v33, %v17852_v36 }
 0xeeb   : > { %v9432_v23 = vadd.f32 %v11665_v50, %v17854_v41 }
 0xeed   : > { %v11666_v55 = vpop.f32.mrb[164].mxu1  ;;  %v9564_v20 = vpop.f32.mrb[156].mxu0 }
 0xeee   : > { %v17908_v14 = vadd.f32 %v9564_v20, %v9429_v9  ;;  %v11667_v13 = vpop.f32.mrb[165].mxu1  ;;  %v9566_v46 = vpop.f32.mrb[157].mxu0 }
 0xeef   : > { %v11668_v61 = vadd.f32 %v11667_v13, %v11666_v55  ;;  %v11669_v5 = vpop.f32.mrb[166].mxu1  ;;  %v9567_v63 = vpop.f32.mrb[158].mxu0 }
 0xef0   : > { %v17910_v60 = vadd.f32 %v9567_v63, %v9432_v23  ;;  %v11670_v7 = vpop.f32.mrb[167].mxu1  ;;  %v9569_v54 = vpop.f32.mrb[159].mxu0 }
 0xef1   : > { %v11671_v0 = vadd.f32 %v11670_v7, %v11669_v5  ;;  %v9437_v6 = vadd.f32 %v11668_v61, %v17856_v24 }
 0xef2   : > { %v12252_v36 = vpack.i.bf16 %v17910_v60, %v17908_v14 }
 0xef3   : > { %v9440_v41 = vadd.f32 %v11671_v0, %v17858_v35 }
 0xef4   : > { %12253 = vrot.lane.b32.xlu0 %v12252_v36, %s18377_s16  ;;  %12248 = vrot.lane.b32.xlu1 %v12252_v36, %s18376_s24 }
 0xef5   : > { %v11672_v25 = vpop.f32.mrb[168].mxu1  ;;  %v9572_v45 = vpop.f32.mrb[160].mxu0 }
 0xef6   : > { %v17918_v48 = vadd.f32 %v9572_v45, %v9437_v6  ;;  %v11673_v29 = vpop.f32.mrb[169].mxu1  ;;  %v9574_v57 = vpop.f32.mrb[161].mxu0 }
 0xef7   : > { %v11674_v27 = vadd.f32 %v11673_v29, %v11672_v25  ;;  %v11675_v43 = vpop.f32.mrb[170].mxu1  ;;  %v9575_v2 = vpop.f32.mrb[162].mxu0 }
 0xef8   : > { %v17920_v47 = vadd.f32 %v9575_v2, %v9440_v41  ;;  %v11676_v24 = vpop.f32.mrb[171].mxu1  ;;  %v9577_v21 = vpop.f32.mrb[163].mxu0 }
 0xef9   : > { %v11677_v28 = vadd.f32 %v11676_v24, %v11675_v43  ;;  %v9445_v35 = vadd.f32 %v11674_v27, %v17860_v52 }
 0xefa   : > { %v12262_v3 = vpack.i.bf16 %v17920_v47, %v17918_v48 }
 0xefb   : > { %v9448_v11 = vadd.f32 %v11677_v28, %v17862_v22 }
 0xefc   : > { %12263 = vrot.lane.b32.xlu0 %v12262_v3, %s18377_s16  ;;  %12258 = vrot.lane.b32.xlu1 %v12262_v3, %s18376_s24 }
 0xefd   : > { %v11678_v38 = vpop.f32.mrb[172].mxu1  ;;  %v9580_v49 = vpop.f32.mrb[164].mxu0 }
 0xefe   : > { %v17928_v1 = vadd.f32 %v9580_v49, %v9445_v35  ;;  %v11679_v19 = vpop.f32.mrb[173].mxu1  ;;  %v9582_v59 = vpop.f32.mrb[165].mxu0 }
 0xeff   : > { %v11680_v33 = vadd.f32 %v11679_v19, %v11678_v38  ;;  %v11681_v15 = vpop.f32.mrb[174].mxu1  ;;  %v9583_v37 = vpop.f32.mrb[166].mxu0 }
 0xf00   : > { %v17930_v50 = vadd.f32 %v9583_v37, %v9448_v11  ;;  %v11682_v52 = vpop.f32.mrb[175].mxu1  ;;  %v9585_v9 = vpop.f32.mrb[167].mxu0 }
 0xf01   : > { %v11683_v23 = vadd.f32 %v11682_v52, %v11681_v15  ;;  %v9453_v22 = vadd.f32 %v11680_v33, %v17864_v39 }
 0xf02   : > { %v12272_v55 = vpack.i.bf16 %v17930_v50, %v17928_v1 }
 0xf03   : > { %v9456_v20 = vadd.f32 %v11683_v23, %v17866_v30 }
 0xf04   : > { %12273 = vrot.lane.b32.xlu0 %v12272_v55, %s18377_s16  ;;  %12268 = vrot.lane.b32.xlu1 %v12272_v55, %s18376_s24 }
 0xf05   : > { %v11684_v13 = vpop.f32.mrb[176].mxu1  ;;  %v9588_v46 = vpop.f32.mrb[168].mxu0 }
 0xf06   : > { %v17938_v61 = vadd.f32 %v9588_v46, %v9453_v22  ;;  %v11685_v5 = vpop.f32.mrb[177].mxu1  ;;  %v9590_v63 = vpop.f32.mrb[169].mxu0 }
 0xf07   : > { %v11686_v7 = vadd.f32 %v11685_v5, %v11684_v13  ;;  %v11687_v54 = vpop.f32.mrb[178].mxu1  ;;  %v9591_v0 = vpop.f32.mrb[170].mxu0 }
 0xf08   : > { %v17940_v6 = vadd.f32 %v9591_v0, %v9456_v20  ;;  %v11688_v39 = vpop.f32.mrb[179].mxu1  ;;  %v9593_v36 = vpop.f32.mrb[171].mxu0 }
 0xf09   : > { %v11689_v41 = vadd.f32 %v11688_v39, %v11687_v54  ;;  %v9461_v30 = vadd.f32 %v11686_v7, %v17868_v42 }
 0xf0a   : > { %v12282_v25 = vpack.i.bf16 %v17940_v6, %v17938_v61 }
 0xf0b   : > { %v9464_v45 = vadd.f32 %v11689_v41, %v17870_v32 }
 0xf0c   : > { %12283 = vrot.lane.b32.xlu0 %v12282_v25, %s18377_s16  ;;  %12278 = vrot.lane.b32.xlu1 %v12282_v25, %s18376_s24 }
 0xf0d   : > { %v11690_v29 = vpop.f32.mrb[180].mxu1  ;;  %v9596_v57 = vpop.f32.mrb[172].mxu0 }
 0xf0e   : > { %v17948_v27 = vadd.f32 %v9596_v57, %v9461_v30  ;;  %v11691_v43 = vpop.f32.mrb[181].mxu1  ;;  %v9598_v2 = vpop.f32.mrb[173].mxu0 }
 0xf0f   : > { %v11692_v24 = vadd.f32 %v11691_v43, %v11690_v29  ;;  %v11693_v21 = vpop.f32.mrb[182].mxu1  ;;  %v9599_v28 = vpop.f32.mrb[174].mxu0 }
 0xf10   : > { %v17950_v35 = vadd.f32 %v9599_v28, %v9464_v45  ;;  %v11694_v42 = vpop.f32.mrb[183].mxu1  ;;  %v9601_v3 = vpop.f32.mrb[175].mxu0 }
 0xf11   : > { %v11695_v11 = vadd.f32 %v11694_v42, %v11693_v21  ;;  %v9469_v32 = vadd.f32 %v11692_v24, %v17872_v56 }
 0xf12   : > { %v12292_v38 = vpack.i.bf16 %v17950_v35, %v17948_v27 }
 0xf13   : > { %v9472_v49 = vadd.f32 %v11695_v11, %v17874_v10 }
 0xf14   : > { %12293 = vrot.lane.b32.xlu0 %v12292_v38, %s18377_s16  ;;  %12288 = vrot.lane.b32.xlu1 %v12292_v38, %s18376_s24 }
 0xf15   : > { %v11696_v19 = vpop.f32.mrb[184].mxu1  ;;  %v9604_v59 = vpop.f32.mrb[176].mxu0 }
 0xf16   : > { %v17958_v33 = vadd.f32 %v9604_v59, %v9469_v32  ;;  %v11697_v15 = vpop.f32.mrb[185].mxu1  ;;  %v9606_v37 = vpop.f32.mrb[177].mxu0 }
 0xf17   : > { %v11698_v52 = vadd.f32 %v11697_v15, %v11696_v19  ;;  %v11699_v9 = vpop.f32.mrb[186].mxu1  ;;  %v9607_v23 = vpop.f32.mrb[178].mxu0 }
 0xf18   : > { %v17960_v22 = vadd.f32 %v9607_v23, %v9472_v49  ;;  %v11700_v56 = vpop.f32.mrb[187].mxu1  ;;  %v9609_v55 = vpop.f32.mrb[179].mxu0 }
 0xf19   : > { %v11701_v20 = vadd.f32 %v11700_v56, %v11699_v9  ;;  %v9477_v10 = vadd.f32 %v11698_v52, %v17880_v16 }
 0xf1a   : > { %v12302_v13 = vpack.i.bf16 %v17960_v22, %v17958_v33 }
 0xf1b   : > { %v9480_v46 = vadd.f32 %v11701_v20, %v17882_v18 }
 0xf1c   : > { %12303 = vrot.lane.b32.xlu0 %v12302_v13, %s18377_s16  ;;  %12298 = vrot.lane.b32.xlu1 %v12302_v13, %s18376_s24 }
 0xf1d   : > { %v11702_v5 = vpop.f32.mrb[188].mxu1  ;;  %v9612_v63 = vpop.f32.mrb[180].mxu0 }
 0xf1e   : > { %v17968_v7 = vadd.f32 %v9612_v63, %v9477_v10  ;;  %v11703_v54 = vpop.f32.mrb[189].mxu1  ;;  %v9614_v0 = vpop.f32.mrb[181].mxu0 }
 0xf1f   : > { %v11704_v39 = vadd.f32 %v11703_v54, %v11702_v5  ;;  %v11705_v36 = vpop.f32.mrb[190].mxu1  ;;  %v9615_v41 = vpop.f32.mrb[182].mxu0 }
 0xf20   : > { %v17970_v30 = vadd.f32 %v9615_v41, %v9480_v46  ;;  %v11706_v16 = vpop.f32.mrb[191].mxu1  ;;  %v9617_v25 = vpop.f32.mrb[183].mxu0 }
 0xf21   : > { %v11707_v45 = vadd.f32 %v11706_v16, %v11705_v36  ;;  %v9485_v18 = vadd.f32 %v11704_v39, %v17884_v17 }
 0xf22   : > { %v12312_v29 = vpack.i.bf16 %v17970_v30, %v17968_v7 }
 0xf23   : > { %v9488_v57 = vadd.f32 %v11707_v45, %v17886_v31 }
 0xf24   : > { %12313 = vrot.lane.b32.xlu0 %v12312_v29, %s18377_s16  ;;  %12308 = vrot.lane.b32.xlu1 %v12312_v29, %s18376_s24 }
 0xf25   : > { %v11708_v43 = vpop.f32.mrb[192].mxu1  ;;  %v9620_v2 = vpop.f32.mrb[184].mxu0 }
 0xf26   : > { %v17978_v24 = vadd.f32 %v9620_v2, %v9485_v18  ;;  %v11709_v21 = vpop.f32.mrb[193].mxu1  ;;  %v9622_v28 = vpop.f32.mrb[185].mxu0 }
 0xf27   : > { %v11710_v42 = vadd.f32 %v11709_v21, %v11708_v43  ;;  %v11711_v3 = vpop.f32.mrb[194].mxu1  ;;  %v9623_v11 = vpop.f32.mrb[186].mxu0 }
 0xf28   : > { %v17980_v32 = vadd.f32 %v9623_v11, %v9488_v57  ;;  %v11712_v17 = vpop.f32.mrb[195].mxu1  ;;  %v9625_v38 = vpop.f32.mrb[187].mxu0 }
 0xf29   : > { %v11713_v49 = vadd.f32 %v11712_v17, %v11711_v3  ;;  %v9493_v31 = vadd.f32 %v11710_v42, %v17888_v58 }
 0xf2a   : > { %v12322_v19 = vpack.i.bf16 %v17980_v32, %v17978_v24 }
 0xf2b   : > { %v9496_v59 = vadd.f32 %v11713_v49, %v17890_v40 }
 0xf2c   : > { %12323 = vrot.lane.b32.xlu0 %v12322_v19, %s18377_s16  ;;  %12318 = vrot.lane.b32.xlu1 %v12322_v19, %s18376_s24 }
 0xf2d   : > { %v11714_v15 = vpop.f32.mrb[196].mxu1  ;;  %v9628_v37 = vpop.f32.mrb[188].mxu0 }
 0xf2e   : > { %v17988_v52 = vadd.f32 %v9628_v37, %v9493_v31  ;;  %v11715_v9 = vpop.f32.mrb[197].mxu1  ;;  %v9630_v23 = vpop.f32.mrb[189].mxu0 }
 0xf2f   : > { %v11716_v56 = vadd.f32 %v11715_v9, %v11714_v15  ;;  %v11717_v55 = vpop.f32.mrb[198].mxu1  ;;  %v9631_v20 = vpop.f32.mrb[190].mxu0 }
 0xf30   : > { %v17990_v10 = vadd.f32 %v9631_v20, %v9496_v59  ;;  %v11718_v58 = vpop.f32.mrb[199].mxu1  ;;  %v9633_v13 = vpop.f32.mrb[191].mxu0 }
 0xf31   : > { %v11719_v46 = vadd.f32 %v11718_v58, %v11717_v55  ;;  %v9501_v40 = vadd.f32 %v11716_v56, %v17892_v12 }
 0xf32   : > { %v12332_v5 = vpack.i.bf16 %v17990_v10, %v17988_v52 }
 0xf33   : > { %v9504_v63 = vadd.f32 %v11719_v46, %v17894_v26 }
 0xf34   : > { %12333 = vrot.lane.b32.xlu0 %v12332_v5, %s18377_s16  ;;  %12328 = vrot.lane.b32.xlu1 %v12332_v5, %s18376_s24 }
 0xf35   : > { %v11720_v54 = vpop.f32.mrb[200].mxu1  ;;  %v9636_v0 = vpop.f32.mrb[192].mxu0 }
 0xf36   : > { %v17998_v39 = vadd.f32 %v9636_v0, %v9501_v40  ;;  %v11721_v36 = vpop.f32.mrb[201].mxu1  ;;  %v9638_v41 = vpop.f32.mrb[193].mxu0 }
 0xf37   : > { %v11722_v16 = vadd.f32 %v11721_v36, %v11720_v54  ;;  %v11723_v25 = vpop.f32.mrb[202].mxu1  ;;  %v9639_v45 = vpop.f32.mrb[194].mxu0 }
 0xf38   : > { %v18000_v18 = vadd.f32 %v9639_v45, %v9504_v63  ;;  %v11724_v12 = vpop.f32.mrb[203].mxu1  ;;  %v9641_v29 = vpop.f32.mrb[195].mxu0  ;;  %v9908_v45 = vld [vmem:[%s18599_s22 + $0x18] sm:$0xff] }
 0xf39   : > { %v11725_v57 = vadd.f32 %v11724_v12, %v11723_v25  ;;  %v9509_v26 = vadd.f32 %v11722_v16, %v17896_v62  ;;  %v9905_v25 = vld [vmem:[%s18599_s22] sm:$0xff]  ;;  %v9907_v12 = vld [vmem:[%s18599_s22 + $0x10] sm:$0xff]  ;;  %v9910_v29 = vld [vmem:[%s18599_s22 + $0x28] sm:$0xff] }
 0xf3a   : > { %v12342_v43 = vpack.i.bf16 %v18000_v18, %v17998_v39 }
 0xf3b   : > { %v9512_v2 = vadd.f32 %v11725_v57, %v17898_v4  ;;  %v9909_v57 = vld [vmem:[%s18599_s22 + $0x20] sm:$0xff] }
 0xf3c   : > { %12343 = vrot.lane.b32.xlu0 %v12342_v43, %s18377_s16  ;;  %12338 = vrot.lane.b32.xlu1 %v12342_v43, %s18376_s24  ;;  %v9911_v43 = vld [vmem:[%s18599_s22 + $0x30] sm:$0xff] }
 0xf3d   : > { %v11726_v21 = vpop.f32.mrb[204].mxu1  ;;  %v9644_v28 = vpop.f32.mrb[196].mxu0 }
 0xf3e   : > { %v18008_v42 = vadd.f32 %v9644_v28, %v9509_v26  ;;  %v11727_v3 = vpop.f32.mrb[205].mxu1  ;;  %v9646_v11 = vpop.f32.mrb[197].mxu0  ;;  %v9912_v26 = vld [vmem:[%s18599_s22 + $0x38] sm:$0xff] }
 0xf3f   : > { %v11728_v17 = vadd.f32 %v11727_v3, %v11726_v21  ;;  %v11729_v38 = vpop.f32.mrb[206].mxu1  ;;  %v9647_v49 = vpop.f32.mrb[198].mxu0  ;;  %v9913_v21 = vld [vmem:[%s18599_s22 + $0x40] sm:$0xff]  ;;  %v9916_v28 = vld [vmem:[%s18599_s22 + $0x58] sm:$0xff]  ;;  %v9915_v3 = vld [vmem:[%s18599_s22 + $0x50] sm:$0xff] }
 0xf40   : > { %v18010_v31 = vadd.f32 %v9647_v49, %v9512_v2  ;;  %v11730_v62 = vpop.f32.mrb[207].mxu1  ;;  %v9649_v19 = vpop.f32.mrb[199].mxu0  ;;  %v9914_v2 = vld [vmem:[%s18599_s22 + $0x48] sm:$0xff] }
 0xf41   : > { %v11731_v59 = vadd.f32 %v11730_v62, %v11729_v38  ;;  %v9517_v4 = vadd.f32 %v11728_v17, %v17900_v8 }
 0xf42   : > { %v12352_v15 = vpack.i.bf16 %v18010_v31, %v18008_v42 }
 0xf43   : > { %v9520_v37 = vadd.f32 %v11731_v59, %v17902_v44 }
 0xf44   : > { %12353 = vrot.lane.b32.xlu0 %v12352_v15, %s18377_s16  ;;  %12348 = vrot.lane.b32.xlu1 %v12352_v15, %s18376_s24  ;;  %v9918_v15 = vld [vmem:[%s18599_s22 + $0x68] sm:$0xff] }
 0xf45   : > { %v11732_v9 = vpop.f32.mrb[208].mxu1  ;;  %v9652_v23 = vpop.f32.mrb[200].mxu0 }
 0xf46   : > { %v18018_v56 = vadd.f32 %v9652_v23, %v9517_v4  ;;  %v11733_v55 = vpop.f32.mrb[209].mxu1  ;;  %v9654_v20 = vpop.f32.mrb[201].mxu0 }
 0xf47   : > { %v11734_v58 = vadd.f32 %v11733_v55, %v11732_v9  ;;  %v9655_v13 = vpop.f32.mrb[202].mxu0  ;;  %v11735_v46 = vpop.f32.mrb[210].mxu1 }
 0xf48   : > { %v18020_v40 = vadd.f32 %v9655_v13, %v9520_v37  ;;  %v9657_v8 = vpop.f32.mrb[203].mxu0  ;;  %v11736_v5 = vpop.f32.mrb[211].mxu1  ;;  %v9917_v37 = vld [vmem:[%s18599_s22 + $0x60] sm:$0xff] }
 0xf49   : > { %v9525_v63 = vadd.f32 %v11734_v58, %v17904_v53  ;;  %v9906_v53 = vld [vmem:[%s18599_s22 + $0x8] sm:$0xff] }
 0xf4a   : > { %v12362_v44 = vpack.i.bf16 %v18020_v40, %v18018_v56 }
 0xf4c   : > { %12363 = vrot.lane.b32.xlu0 %v12362_v44, %s18377_s16  ;;  %12358 = vrot.lane.b32.xlu1 %v12362_v44, %s18376_s24 }
 0xf4d   : > { %v9660_v54 = vpop.f32.mrb[204].mxu0 }
 0xf4e   : > { %v18027_v0 = vadd.f32 %v9660_v54, %v9525_v63  ;;  %v9662_v36 = vpop.f32.mrb[205].mxu0  ;;  %v9922_v54 = vld [vmem:[%s18599_s22 + $0x88] sm:$0xff] }
 0xf4f   : > { %v9663_v41 = vpop.f32.mrb[206].mxu0  ;;  %v9921_v36 = vld [vmem:[%s18599_s22 + $0x80] sm:$0xff] }
 0xf50   : > { %9839 = vrot.lane.b32.xlu0 %v18027_v0, %s18377_s16  ;;  %9739 = vrot.lane.b32.xlu1 %v18027_v0, %s18376_s24  ;;  %v9664_v16 = vpop.f32.mrb[207].mxu0  ;;  %s10543_s16 = sshll.u32 %s18602_s12, 2 }
 0xf51   : > { %s492_s1 = scalar_lea.vmem %s18603_s9, %s10543_s16 }
 0xf54   : > { %9937 = vperm.xlu0 %12085, %v9906_v53   ;;  %9932 = vperm.xlu1 %12086, %v9905_v25  }
 0xf58   : > { %9947 = vperm.xlu0 %12085, %v9908_v45   ;;  %9942 = vperm.xlu1 %12086, %v9907_v12  }
 0xf5c   : > { %9957 = vperm.xlu0 %12085, %v9910_v29   ;;  %9952 = vperm.xlu1 %12086, %v9909_v57  }
 0xf60   : > { %9967 = vperm.xlu0 %12085, %v9912_v26   ;;  %9962 = vperm.xlu1 %12086, %v9911_v43  }
 0xf64   : > { %9977 = vperm.xlu0 %12085, %v9914_v2   ;;  %9972 = vperm.xlu1 %12086, %v9913_v21   ;;  %v9926_v21 = vld [vmem:[%s18599_s22 + $0xa8] sm:$0xff] }
 0xf66   : > { %v12254_v11 = vpop.permute.xlu0 %12253  ;;  %v12249_v17 = vpop.permute.xlu1 %12248 }
 0xf67   : > { %v12251_v38 = vunpack.i.h.bf16 %v12249_v17  ;;  %v12250_v49 = vunpack.i.l.bf16 %v12249_v17  ;;  %v12256_v62 = vunpack.i.h.bf16 %v12254_v11  ;;  %v12255_v19 = vunpack.i.l.bf16 %v12254_v11 }
 0xf68   : > { %9987 = vperm.xlu0 %12085, %v9916_v28   ;;  %9982 = vperm.xlu1 %12086, %v9915_v3   ;;  %v9925_v28 = vld [vmem:[%s18599_s22 + $0xa0] sm:$0xff] }
 0xf69   : > { %v9767_v59 = vmax.f32 %v17910_v60, %v12251_v38  ;;  %v9766_v4 = vmax.f32 %v17908_v14, %v12250_v49  ;;  %v9920_v60 = vld [vmem:[%s18599_s22 + $0x78] sm:$0xff]  ;;  %v9919_v14 = vld [vmem:[%s18599_s22 + $0x70] sm:$0xff] }
 0xf6b   : > { %v9867_v9 = vmax.f32 %v9767_v59, %v12256_v62  ;;  %v9866_v23 = vmax.f32 %v9766_v4, %v12255_v19 }
 0xf6c   : > { %9997 = vperm.xlu0 %12085, %v9918_v15   ;;  %9992 = vperm.xlu1 %12086, %v9917_v37  }
 0xf6d   : > { %v9891_v55 = vpack.c.bf16 %v9867_v9, %v9866_v23  ;;  %v10398_v9 = vld [vmem:[%s18600_s25] sm:$0xf] }
 0xf6e   : > { %v12264_v20 = vpop.permute.xlu0 %12263  ;;  %v12259_v58 = vpop.permute.xlu1 %12258  ;;  %v9929_v23 = vld [vmem:[%s18599_s22 + $0xc0] sm:$0xff] }
 0xf6f   : > { %v12261_v13 = vunpack.i.h.bf16 %v12259_v58  ;;  %v12260_v46 = vunpack.i.l.bf16 %v12259_v58  ;;  %11809 = vmatmul.mubr.msk.bf16.vlgmr.msra.gmra.mrb[212].mxu1 %vm10055_vm14, %v9891_v55  ;;  %v12266_v8 = vunpack.i.h.bf16 %v12264_v20  ;;  %v12265_v5 = vunpack.i.l.bf16 %v12264_v20 }
 0xf70   : > { %10007 = vperm.xlu0 %12085, %v9920_v60   ;;  %10002 = vperm.xlu1 %12086, %v9919_v14  }
 0xf71   : > { %v9769_v63 = vmax.f32 %v17920_v47, %v12261_v13  ;;  %v9768_v44 = vmax.f32 %v17918_v48, %v12260_v46  ;;  %11812 = vmatprep.mubr.msk.bf16.mxu1 %vm12940_vm12, %v12939_v51  ;;  %v9924_v48 = vld [vmem:[%s18599_s22 + $0x98] sm:$0xff]  ;;  %v9923_v47 = vld [vmem:[%s18599_s22 + $0x90] sm:$0xff] }
 0xf73   : > { %v9869_v41 = vmax.f32 %v9769_v63, %v12266_v8  ;;  %v9868_v16 = vmax.f32 %v9768_v44, %v12265_v5 }
 0xf74   : > { %10017 = vperm.xlu0 %12085, %v9922_v54   ;;  %10012 = vperm.xlu1 %12086, %v9921_v36  }
 0xf75   : > { %v9892_v53 = vpack.c.bf16 %v9869_v41, %v9868_v16 }
 0xf76   : > { %v12274_v25 = vpop.permute.xlu0 %12273  ;;  %v12269_v45 = vpop.permute.xlu1 %12268 }
 0xf77   : > { %v12271_v12 = vunpack.i.h.bf16 %v12269_v45  ;;  %v12270_v29 = vunpack.i.l.bf16 %v12269_v45  ;;  %11813 = vmatmul.mubr.msk.bf16.gmra.mrb[216].mxu1 %vm10055_vm14, %v9892_v53  ;;  %v12276_v57 = vunpack.i.h.bf16 %v12274_v25  ;;  %v12275_v26 = vunpack.i.l.bf16 %v12274_v25 }
 0xf78   : > { %10027 = vperm.xlu0 %12085, %v9924_v48   ;;  %10022 = vperm.xlu1 %12086, %v9923_v47  }
 0xf79   : > { %v9771_v43 = vmax.f32 %v17930_v50, %v12271_v12  ;;  %v9770_v2 = vmax.f32 %v17928_v1, %v12270_v29  ;;  %11816 = vmatprep.mubr.msk.bf16.mxu1 %vm12940_vm12, %v12939_v51  ;;  %v9928_v1 = vld [vmem:[%s18599_s22 + $0xb8] sm:$0xff]  ;;  %v9927_v50 = vld [vmem:[%s18599_s22 + $0xb0] sm:$0xff] }
 0xf7b   : > { %v9871_v3 = vmax.f32 %v9771_v43, %v12276_v57  ;;  %v9870_v11 = vmax.f32 %v9770_v2, %v12275_v26 }
 0xf7c   : > { %10037 = vperm.xlu0 %12085, %v9926_v21   ;;  %10032 = vperm.xlu1 %12086, %v9925_v28  }
 0xf7d   : > { %v9893_v17 = vpack.c.bf16 %v9871_v3, %v9870_v11 }
 0xf7e   : > { %v12284_v38 = vpop.permute.xlu0 %12283  ;;  %v12279_v49 = vpop.permute.xlu1 %12278 }
 0xf7f   : > { %v12281_v62 = vunpack.i.h.bf16 %v12279_v49  ;;  %v12280_v19 = vunpack.i.l.bf16 %v12279_v49  ;;  %11817 = vmatmul.mubr.msk.bf16.gmra.mrb[220].mxu1 %vm10055_vm14, %v9893_v17  ;;  %v12286_v59 = vunpack.i.h.bf16 %v12284_v38  ;;  %v12285_v4 = vunpack.i.l.bf16 %v12284_v38 }
 0xf80   : > { %10047 = vperm.xlu0 %12085, %v9928_v1   ;;  %10042 = vperm.xlu1 %12086, %v9927_v50  }
 0xf81   : > { %v9773_v15 = vmax.f32 %v17940_v6, %v12281_v62  ;;  %v9772_v37 = vmax.f32 %v17938_v61, %v12280_v19  ;;  %11820 = vmatprep.mubr.msk.bf16.mxu1 %vm12940_vm12, %v12939_v51 }
 0xf83   : > { %v9873_v55 = vmax.f32 %v9773_v15, %v12286_v59  ;;  %v9872_v60 = vmax.f32 %v9772_v37, %v12285_v4 }
 0xf84   : > { %10401 = vperm.xlu0 %12085, %v10398_v9   ;;  %10052 = vperm.xlu1 %12086, %v9929_v23  }
 0xf85   : > { %v9894_v14 = vpack.c.bf16 %v9873_v55, %v9872_v60 }
 0xf86   : > { %v12294_v20 = vpop.permute.xlu0 %12293  ;;  %v12289_v6 = vpop.permute.xlu1 %12288 }
 0xf87   : > { %v12291_v58 = vunpack.i.h.bf16 %v12289_v6  ;;  %v12290_v61 = vunpack.i.l.bf16 %v12289_v6  ;;  %11821 = vmatmul.mubr.msk.bf16.gmra.mrb[224].mxu1 %vm10055_vm14, %v9894_v14  ;;  %v12296_v13 = vunpack.i.h.bf16 %v12294_v20  ;;  %v12295_v46 = vunpack.i.l.bf16 %v12294_v20 }
 0xf88   : > { %11824 = vmatprep.mubr.msk.bf16.mxu1 %vm12940_vm12, %v12939_v51 }
 0xf89   : > { %v9775_v8 = vmax.f32 %v17950_v35, %v12291_v58  ;;  %v9774_v5 = vmax.f32 %v17948_v27, %v12290_v61 }
 0xf8b   : > { %v9875_v63 = vmax.f32 %v9775_v8, %v12296_v13  ;;  %v9874_v44 = vmax.f32 %v9774_v5, %v12295_v46 }
 0xf8d   : > { %v9895_v54 = vpack.c.bf16 %v9875_v63, %v9874_v44 }
 0xf8e   : > { %v12304_v36 = vpop.permute.xlu0 %12303  ;;  %v12299_v41 = vpop.permute.xlu1 %12298 }
 0xf8f   : > { %v12301_v16 = vunpack.i.h.bf16 %v12299_v41  ;;  %v12300_v53 = vunpack.i.l.bf16 %v12299_v41  ;;  %11825 = vmatmul.mubr.msk.bf16.gmra.mrb[228].mxu1 %vm10055_vm14, %v9895_v54  ;;  %v12306_v48 = vunpack.i.h.bf16 %v12304_v36  ;;  %v12305_v47 = vunpack.i.l.bf16 %v12304_v36 }
 0xf90   : > { %11828 = vmatprep.mubr.msk.bf16.mxu1 %vm12940_vm12, %v12939_v51 }
 0xf91   : > { %v9777_v25 = vmax.f32 %v17960_v22, %v12301_v16  ;;  %v9776_v35 = vmax.f32 %v17958_v33, %v12300_v53 }
 0xf93   : > { %v9877_v45 = vmax.f32 %v9777_v25, %v12306_v48  ;;  %v9876_v27 = vmax.f32 %v9776_v35, %v12305_v47 }
 0xf95   : > { %v9896_v12 = vpack.c.bf16 %v9877_v45, %v9876_v27 }
 0xf96   : > { %v12314_v29 = vpop.permute.xlu0 %12313  ;;  %v12309_v57 = vpop.permute.xlu1 %12308 }
 0xf97   : > { %v12311_v26 = vunpack.i.h.bf16 %v12309_v57  ;;  %v12310_v43 = vunpack.i.l.bf16 %v12309_v57  ;;  %11829 = vmatmul.mubr.msk.bf16.gmra.mrb[232].mxu1 %vm10055_vm14, %v9896_v12  ;;  %v12316_v2 = vunpack.i.h.bf16 %v12314_v29  ;;  %v12315_v21 = vunpack.i.l.bf16 %v12314_v29 }
 0xf98   : > { %11832 = vmatprep.mubr.msk.bf16.mxu1 %vm12940_vm12, %v12939_v51 }
 0xf99   : > { %v9779_v28 = vmax.f32 %v17970_v30, %v12311_v26  ;;  %v9778_v22 = vmax.f32 %v17968_v7, %v12310_v43 }
 0xf9b   : > { %v9879_v3 = vmax.f32 %v9779_v28, %v12316_v2  ;;  %v9878_v33 = vmax.f32 %v9778_v22, %v12315_v21 }
 0xf9d   : > { %v9897_v11 = vpack.c.bf16 %v9879_v3, %v9878_v33 }
 0xf9e   : > { %v12324_v17 = vpop.permute.xlu0 %12323  ;;  %v12319_v1 = vpop.permute.xlu1 %12318 }
 0xf9f   : > { %v12321_v50 = vunpack.i.h.bf16 %v12319_v1  ;;  %v12320_v38 = vunpack.i.l.bf16 %v12319_v1  ;;  %11833 = vmatmul.mubr.msk.bf16.gmra.mrb[236].mxu1 %vm10055_vm14, %v9897_v11  ;;  %v12326_v49 = vunpack.i.h.bf16 %v12324_v17  ;;  %v12325_v62 = vunpack.i.l.bf16 %v12324_v17 }
 0xfa0   : > { %11836 = vmatprep.mubr.msk.bf16.mxu1 %vm12940_vm12, %v12939_v51 }
 0xfa1   : > { %v9781_v19 = vmax.f32 %v17980_v32, %v12321_v50  ;;  %v9780_v30 = vmax.f32 %v17978_v24, %v12320_v38 }
 0xfa3   : > { %v9881_v59 = vmax.f32 %v9781_v19, %v12326_v49  ;;  %v9880_v7 = vmax.f32 %v9780_v30, %v12325_v62 }
 0xfa5   : > { %v9898_v4 = vpack.c.bf16 %v9881_v59, %v9880_v7 }
 0xfa6   : > { %v12334_v15 = vpop.permute.xlu0 %12333  ;;  %v12329_v37 = vpop.permute.xlu1 %12328 }
 0xfa7   : > { %v12331_v9 = vunpack.i.h.bf16 %v12329_v37  ;;  %v12330_v23 = vunpack.i.l.bf16 %v12329_v37  ;;  %11837 = vmatmul.mubr.msk.bf16.gmra.mrb[240].mxu1 %vm10055_vm14, %v9898_v4  ;;  %v12336_v55 = vunpack.i.h.bf16 %v12334_v15  ;;  %v12335_v60 = vunpack.i.l.bf16 %v12334_v15 }
 0xfa8   : > { %11840 = vmatprep.mubr.msk.bf16.mxu1 %vm12940_vm12, %v12939_v51 }
 0xfa9   : > { %v9783_v14 = vmax.f32 %v17990_v10, %v12331_v9  ;;  %v9782_v32 = vmax.f32 %v17988_v52, %v12330_v23 }
 0xfab   : > { %v9883_v20 = vmax.f32 %v9783_v14, %v12336_v55  ;;  %v9882_v24 = vmax.f32 %v9782_v32, %v12335_v60 }
 0xfad   : > { %v9899_v6 = vpack.c.bf16 %v9883_v20, %v9882_v24 }
 0xfae   : > { %v12344_v58 = vpop.permute.xlu0 %12343  ;;  %v12339_v61 = vpop.permute.xlu1 %12338 }
 0xfaf   : > { %v12341_v13 = vunpack.i.h.bf16 %v12339_v61  ;;  %v12340_v46 = vunpack.i.l.bf16 %v12339_v61  ;;  %11841 = vmatmul.mubr.msk.bf16.gmra.mrb[244].mxu1 %vm10055_vm14, %v9899_v6  ;;  %v12346_v8 = vunpack.i.h.bf16 %v12344_v58  ;;  %v12345_v5 = vunpack.i.l.bf16 %v12344_v58 }
 0xfb0   : > { %11844 = vmatprep.mubr.msk.bf16.mxu1 %vm12940_vm12, %v12939_v51 }
 0xfb1   : > { %v9785_v63 = vmax.f32 %v18000_v18, %v12341_v13  ;;  %v9784_v10 = vmax.f32 %v17998_v39, %v12340_v46 }
 0xfb3   : > { %v9885_v44 = vmax.f32 %v9785_v63, %v12346_v8  ;;  %v9884_v52 = vmax.f32 %v9784_v10, %v12345_v5 }
 0xfb5   : > { %v9900_v54 = vpack.c.bf16 %v9885_v44, %v9884_v52 }
 0xfb6   : > { %v12354_v36 = vpop.permute.xlu0 %12353  ;;  %v12349_v41 = vpop.permute.xlu1 %12348 }
 0xfb7   : > { %v12351_v16 = vunpack.i.h.bf16 %v12349_v41  ;;  %v12350_v53 = vunpack.i.l.bf16 %v12349_v41  ;;  %11845 = vmatmul.mubr.msk.bf16.gmra.mrb[248].mxu1 %vm10055_vm14, %v9900_v54  ;;  %v12356_v48 = vunpack.i.h.bf16 %v12354_v36  ;;  %v12355_v47 = vunpack.i.l.bf16 %v12354_v36 }
 0xfb8   : > { %11848 = vmatprep.mubr.msk.bf16.mxu1 %vm12940_vm12, %v12939_v51 }
 0xfb9   : > { %v9787_v25 = vmax.f32 %v18010_v31, %v12351_v16  ;;  %v9786_v18 = vmax.f32 %v18008_v42, %v12350_v53 }
 0xfbb   : > { %v9887_v35 = vmax.f32 %v9787_v25, %v12356_v48  ;;  %v9886_v39 = vmax.f32 %v9786_v18, %v12355_v47 }
 0xfbd   : > { %v9901_v45 = vpack.c.bf16 %v9887_v35, %v9886_v39 }
 0xfbe   : > { %v12364_v27 = vpop.permute.xlu0 %12363  ;;  %v12359_v12 = vpop.permute.xlu1 %12358 }
 0xfbf   : > { %v12361_v29 = vunpack.i.h.bf16 %v12359_v12  ;;  %v12360_v57 = vunpack.i.l.bf16 %v12359_v12  ;;  %11849 = vmatmul.mubr.msk.bf16.gmra.mrb[252].mxu1 %vm10055_vm14, %v9901_v45  ;;  %v12366_v26 = vunpack.i.h.bf16 %v12364_v27  ;;  %v12365_v43 = vunpack.i.l.bf16 %v12364_v27 }
 0xfc0   : > { %11852 = vmatprep.mubr.msk.bf16.mxu1 %vm12940_vm12, %v12939_v51 }
 0xfc1   : > { %v9789_v2 = vmax.f32 %v18020_v40, %v12361_v29  ;;  %v9788_v31 = vmax.f32 %v18018_v56, %v12360_v57  ;;  %v18176_v56 = vld.sshfl [vmem:[%s18601_s4] sm:$0x33 pattern:$0x76325410] }
 0xfc2   : > { %v9740_v21 = vpop.permute.xlu1 %9739  ;;  %v9840_v33 = vpop.permute.xlu0 %9839  ;;  %v10412_v40 = vcombine.high %v18176_v56, %v18176_v56 }
 0xfc3   : > { %v9889_v42 = vmax.f32 %v9789_v2, %v12366_v26  ;;  %v9888_v28 = vmax.f32 %v9788_v31, %v12365_v43  ;;  %v9790_v3 = vmax.f32 %v18027_v0, %v9740_v21 }
 0xfc4   : > { %11132 = vmatprep.mubr.msk.bf16.mxu0 %vm10414_vm11, %v10412_v40 }
 0xfc5   : > { %v9902_v22 = vpack.c.bf16 %v9889_v42, %v9888_v28  ;;  %v9890_v11 = vmax.f32 %v9790_v3, %v9840_v33 }
 0xfc7   : > { %11853 = vmatmul.mubr.msk.bf16.gmra.mrb[0].mxu1 %vm10055_vm14, %v9902_v22  ;;  %v9903_v17 = vpack.c.bf16 %v9890_v11, %v9890_v11 }
 0xfc8   : > { %11856 = vmatprep.mubr.msk.bf16.mxu1 %vm12940_vm12, %v12939_v51 }
 0xfcf   : > { %11857 = vmatmul.mubr.msk.bf16.gmra.mrb[4].mxu1 %vm10055_vm14, %v9903_v17 }
 0xfd3   : > { %v9933_v0 = vpop.permute.xlu1 %9932  ;;  %v9938_v49 = vpop.permute.xlu0 %9937 }
 0xfd7   : > { %v9943_v15 = vpop.permute.xlu1 %9942  ;;  %v9948_v55 = vpop.permute.xlu0 %9947 }
 0xfdb   : > { %v9953_v61 = vpop.permute.xlu1 %9952  ;;  %v9958_v63 = vpop.permute.xlu0 %9957 }
 0xfdf   : > { %v9963_v39 = vpop.permute.xlu1 %9962  ;;  %v9968_v57 = vpop.permute.xlu0 %9967 }
0x1042   : > { %v10132_v1 = vpop.f32.mrb[212].mxu1 }
0x1043   : > { %v10133_v50 = vadd.f32 %v10132_v1, %v9933_v0  ;;  %v11810_v38 = vpop.f32.mrb[213].mxu1  ;;  %v9973_v0 = vpop.permute.xlu1 %9972 }
0x1044   : > { %v10135_v51 = vpop.f32.mrb[214].mxu1 }
0x1045   : > { %v10259_v62 = vmin.f32 %v10133_v50, 0.0  ;;  %v10136_v19 = vadd.f32 %v10135_v51, %v9938_v49  ;;  %v11811_v30 = vpop.f32.mrb[215].mxu1  ;;  %vm10234_vm12 = vcmp.gt.f32.partialorder %v10133_v50, 0.0  ;;  %v9978_v51 = vpop.permute.xlu0 %9977 }
0x1047   : > { %v10284_v59 = vmul.f32 1.442695, %v10259_v62  ;;  %v10260_v7 = vmin.f32 %v10136_v19, 0.0  ;;  %vm10235_vm0 = vcmp.gt.f32.partialorder %v10136_v19, 0.0 }
0x1049   : > { %12856 = vpow2.f32 %v10284_v59  ;;  %v10286_v4 = vmul.f32 1.442695, %v10260_v7 }
0x104a   : > { %v10140_v37 = vpop.f32.mrb[216].mxu1 }
0x104b   : > { %12858 = vpow2.f32 %v10286_v4  ;;  %v10141_v9 = vadd.f32 %v10140_v37, %v9943_v15  ;;  %v11814_v23 = vpop.f32.mrb[217].mxu1 }
0x104c   : > { %v10143_v60 = vpop.f32.mrb[218].mxu1 }
0x104d   : > { %v10261_v14 = vmin.f32 %v10141_v9, 0.0  ;;  %v10144_v32 = vadd.f32 %v10143_v60, %v9948_v55  ;;  %v11815_v20 = vpop.f32.mrb[219].mxu1  ;;  %vm10236_vm6 = vcmp.gt.f32.partialorder %v10141_v9, 0.0 }
0x104f   : > { %v10288_v24 = vmul.f32 1.442695, %v10261_v14  ;;  %v10262_v6 = vmin.f32 %v10144_v32, 0.0  ;;  %vm10237_vm4 = vcmp.gt.f32.partialorder %v10144_v32, 0.0 }
0x1051   : > { %12860 = vpow2.f32 %v10288_v24  ;;  %v10290_v58 = vmul.f32 1.442695, %v10262_v6 }
0x1052   : > { %v10148_v13 = vpop.f32.mrb[220].mxu1 }
0x1053   : > { %v12857_v46 = vpop.eup %12856  ;;  %12862 = vpow2.f32 %v10290_v58  ;;  %v18180_v8 = vadd.f32 %v10148_v13, %v9953_v61  ;;  %v11818_v5 = vpop.f32.mrb[221].mxu1 }
0x1054   : > { %v11106_v10 = vadd.f32 -1.0, %v12857_v46  ;;  %v10151_v44 = vpop.f32.mrb[222].mxu1  ;;  %v9988_v61 = vpop.permute.xlu0 %9987 }
0x1055   : > { %v12859_v52 = vpop.eup %12858  ;;  %v10263_v54 = vmin.f32 %v18180_v8, 0.0  ;;  %v10152_v36 = vadd.f32 %v10151_v44, %v9958_v63  ;;  %v11819_v41 = vpop.f32.mrb[223].mxu1  ;;  %vm10238_vm15 = vcmp.gt.f32.partialorder %v18180_v8, 0.0 }
0x1056   : > { %v11107_v16 = vadd.f32 -1.0, %v12859_v52  ;;  %v10359_v47 = vsel %vm10234_vm12, %v10133_v50, %v11106_v10 }
0x1057   : > { %v10292_v53 = vmul.f32 1.442695, %v10263_v54  ;;  %v10264_v48 = vmin.f32 %v10152_v36, 0.0  ;;  %vm10239_vm13 = vcmp.gt.f32.partialorder %v10152_v36, 0.0 }
0x1058   : > { %v10360_v25 = vsel %vm10235_vm0, %v10136_v19, %v11107_v16 }
0x1059   : > { %v10385_v18 = vpack.c.bf16 %v10360_v25, %v10359_v47  ;;  %12864 = vpow2.f32 %v10292_v53  ;;  %v10294_v35 = vmul.f32 1.442695, %v10264_v48 }
0x105a   : > { %v10156_v45 = vpop.f32.mrb[224].mxu1 }
0x105b   : > { %v12861_v27 = vpop.eup %12860  ;;  %12866 = vpow2.f32 %v10294_v35  ;;  %v18183_v12 = vadd.f32 %v10156_v45, %v9963_v39  ;;  %v11822_v29 = vpop.f32.mrb[225].mxu1  ;;  %10422 = vmatpush1.bf16.msra.mxu0 %v10385_v18 }
0x105c   : > { %v11108_v26 = vadd.f32 -1.0, %v12861_v27  ;;  %v10159_v43 = vpop.f32.mrb[226].mxu1  ;;  %10423 = vmatprep.subr.bf16.mxu0 %v18597_v34  ;;  %v9998_v39 = vpop.permute.xlu0 %9997 }
0x105d   : > { %v12863_v2 = vpop.eup %12862  ;;  %v10265_v31 = vmin.f32 %v18183_v12, 0.0  ;;  %v10160_v21 = vadd.f32 %v10159_v43, %v9968_v57  ;;  %v11823_v42 = vpop.f32.mrb[227].mxu1  ;;  %vm10240_vm2 = vcmp.gt.f32.partialorder %v18183_v12, 0.0 }
0x105e   : > { %v11109_v28 = vadd.f32 -1.0, %v12863_v2  ;;  %v10361_v33 = vsel %vm10236_vm6, %v10141_v9, %v11108_v26 }
0x105f   : > { %v10296_v22 = vmul.f32 1.442695, %v10265_v31  ;;  %v10266_v3 = vmin.f32 %v10160_v21, 0.0  ;;  %vm10241_vm10 = vcmp.gt.f32.partialorder %v10160_v21, 0.0 }
0x1060   : > { %v10362_v11 = vsel %vm10237_vm4, %v10144_v32, %v11109_v28  ;;  %v9983_v32 = vpop.permute.xlu1 %9982 }
0x1061   : > { %v10386_v17 = vpack.c.bf16 %v10362_v11, %v10361_v33  ;;  %12868 = vpow2.f32 %v10296_v22  ;;  %v10298_v40 = vmul.f32 1.442695, %v10266_v3 }
0x1062   : > { %v10164_v1 = vpop.f32.mrb[228].mxu1 }
0x1063   : > { %v12865_v50 = vpop.eup %12864  ;;  %12870 = vpow2.f32 %v10298_v40  ;;  %v18187_v38 = vadd.f32 %v10164_v1, %v9973_v0  ;;  %v11826_v49 = vpop.f32.mrb[229].mxu1  ;;  %10424 = vmatpush1.bf16.msra.mxu0 %v10386_v17 }
0x1064   : > { %v11110_v62 = vadd.f32 -1.0, %v12865_v50  ;;  %v10167_v19 = vpop.f32.mrb[230].mxu1  ;;  %10425 = vmatprep.subr.bf16.mxu0 %v18597_v34  ;;  %v9993_v48 = vpop.permute.xlu1 %9992 }
0x1065   : > { %v12867_v30 = vpop.eup %12866  ;;  %v10267_v59 = vmin.f32 %v18187_v38, 0.0  ;;  %v10168_v7 = vadd.f32 %v10167_v19, %v9978_v51  ;;  %v11827_v4 = vpop.f32.mrb[231].mxu1  ;;  %vm10242_vm3 = vcmp.gt.f32.partialorder %v18187_v38, 0.0 }
0x1066   : > { %v11111_v15 = vadd.f32 -1.0, %v12867_v30  ;;  %v10363_v23 = vsel %vm10238_vm15, %v18180_v8, %v11110_v62  ;;  %v10008_v0 = vpop.permute.xlu0 %10007 }
0x1067   : > { %v10300_v37 = vmul.f32 1.442695, %v10267_v59  ;;  %v10268_v9 = vmin.f32 %v10168_v7, 0.0  ;;  %vm10243_vm1 = vcmp.gt.f32.partialorder %v10168_v7, 0.0 }
0x1068   : > { %v10364_v55 = vsel %vm10239_vm13, %v10152_v36, %v11111_v15  ;;  %v10003_v3 = vpop.permute.xlu1 %10002 }
0x1069   : > { %v10387_v60 = vpack.c.bf16 %v10364_v55, %v10363_v23  ;;  %12872 = vpow2.f32 %v10300_v37  ;;  %v10302_v14 = vmul.f32 1.442695, %v10268_v9 }
0x106a   : > { %v10172_v20 = vpop.f32.mrb[232].mxu1 }
0x106b   : > { %v12869_v24 = vpop.eup %12868  ;;  %12874 = vpow2.f32 %v10302_v14  ;;  %v18193_v6 = vadd.f32 %v10172_v20, %v9983_v32  ;;  %v11830_v58 = vpop.f32.mrb[233].mxu1  ;;  %10426 = vmatpush1.bf16.msra.mxu0 %v10387_v60 }
0x106c   : > { %v11112_v13 = vadd.f32 -1.0, %v12869_v24  ;;  %v10175_v46 = vpop.f32.mrb[234].mxu1  ;;  %10427 = vmatprep.subr.bf16.mxu0 %v18597_v34  ;;  %v10013_v9 = vpop.permute.xlu1 %10012 }
0x106d   : > { %v12871_v5 = vpop.eup %12870  ;;  %v10269_v8 = vmin.f32 %v18193_v6, 0.0  ;;  %v10176_v63 = vadd.f32 %v10175_v46, %v9988_v61  ;;  %v11831_v10 = vpop.f32.mrb[235].mxu1  ;;  %vm10244_vm8 = vcmp.gt.f32.partialorder %v18193_v6, 0.0 }
0x106e   : > { %v11113_v44 = vadd.f32 -1.0, %v12871_v5  ;;  %v10365_v36 = vsel %vm10240_vm2, %v18183_v12, %v11112_v13  ;;  %v10018_v32 = vpop.permute.xlu0 %10017 }
0x106f   : > { %v10304_v52 = vmul.f32 1.442695, %v10269_v8  ;;  %v10270_v54 = vmin.f32 %v10176_v63, 0.0  ;;  %vm10245_vm5 = vcmp.gt.f32.partialorder %v10176_v63, 0.0 }
0x1070   : > { %v10366_v41 = vsel %vm10241_vm10, %v10160_v21, %v11113_v44 }
0x1071   : > { %v10388_v16 = vpack.c.bf16 %v10366_v41, %v10365_v36  ;;  %12876 = vpow2.f32 %v10304_v52  ;;  %v10306_v53 = vmul.f32 1.442695, %v10270_v54  ;;  %v10023_v54 = vpop.permute.xlu1 %10022 }
0x1072   : > { %v10180_v47 = vpop.f32.mrb[236].mxu1 }
0x1073   : > { %v12873_v25 = vpop.eup %12872  ;;  %12878 = vpow2.f32 %v10306_v53  ;;  %v18199_v18 = vadd.f32 %v10180_v47, %v9993_v48  ;;  %v11834_v35 = vpop.f32.mrb[237].mxu1  ;;  %10428 = vmatpush1.bf16.msra.mxu0 %v10388_v16 }
0x1074   : > { %v11114_v45 = vadd.f32 -1.0, %v12873_v25  ;;  %v10183_v27 = vpop.f32.mrb[238].mxu1  ;;  %10429 = vmatprep.subr.bf16.mxu0 %v18597_v34  ;;  %v10028_v48 = vpop.permute.xlu0 %10027 }
0x1075   : > { %v12875_v29 = vpop.eup %12874  ;;  %v10271_v12 = vmin.f32 %v18199_v18, 0.0  ;;  %v10184_v57 = vadd.f32 %v10183_v27, %v9998_v39  ;;  %v11835_v26 = vpop.f32.mrb[239].mxu1  ;;  %vm10246_vm9 = vcmp.gt.f32.partialorder %v18199_v18, 0.0 }
0x1076   : > { %v11115_v43 = vadd.f32 -1.0, %v12875_v29  ;;  %v10367_v21 = vsel %vm10242_vm3, %v18187_v38, %v11114_v45 }
0x1077   : > { %v10308_v2 = vmul.f32 1.442695, %v10271_v12  ;;  %v10272_v31 = vmin.f32 %v10184_v57, 0.0  ;;  %vm10247_vm14 = vcmp.gt.f32.partialorder %v10184_v57, 0.0 }
0x1078   : > { %v10368_v42 = vsel %vm10243_vm1, %v10168_v7, %v11115_v43 }
0x1079   : > { %v10389_v28 = vpack.c.bf16 %v10368_v42, %v10367_v21  ;;  %12880 = vpow2.f32 %v10308_v2  ;;  %v10310_v22 = vmul.f32 1.442695, %v10272_v31  ;;  %v10033_v31 = vpop.permute.xlu1 %10032 }
0x107a   : > { %v10188_v33 = vpop.f32.mrb[240].mxu1 }
0x107b   : > { %v12877_v11 = vpop.eup %12876  ;;  %12882 = vpow2.f32 %v10310_v22  ;;  %v18205_v17 = vadd.f32 %v10188_v33, %v10003_v3  ;;  %v11838_v40 = vpop.f32.mrb[241].mxu1  ;;  %10430 = vmatpush1.bf16.msra.mxu0 %v10389_v28 }
0x107c   : > { %v11116_v1 = vadd.f32 -1.0, %v12877_v11  ;;  %v10191_v50 = vpop.f32.mrb[242].mxu1  ;;  %10431 = vmatprep.subr.bf16.mxu0 %v18597_v34  ;;  %v10038_v3 = vpop.permute.xlu0 %10037 }
0x107d   : > { %v12879_v49 = vpop.eup %12878  ;;  %v10273_v38 = vmin.f32 %v18205_v17, 0.0  ;;  %v10192_v51 = vadd.f32 %v10191_v50, %v10008_v0  ;;  %v11839_v62 = vpop.f32.mrb[243].mxu1  ;;  %vm10248_vm11 = vcmp.gt.f32.partialorder %v18205_v17, 0.0 }
0x107e   : > { %v11117_v19 = vadd.f32 -1.0, %v12879_v49  ;;  %v10369_v7 = vsel %vm10244_vm8, %v18193_v6, %v11116_v1  ;;  %vm10461_vm8 = vcmask 11264  }
0x107f   : > { %v10312_v30 = vmul.f32 1.442695, %v10273_v38  ;;  %v10274_v59 = vmin.f32 %v10192_v51, 0.0  ;;  %vm10249_vm12 = vcmp.gt.f32.partialorder %v10192_v51, 0.0 }
0x1080   : > { %v10370_v4 = vsel %vm10245_vm5, %v10176_v63, %v11117_v19 }
0x1081   : > { %v10390_v15 = vpack.c.bf16 %v10370_v4, %v10369_v7  ;;  %12884 = vpow2.f32 %v10312_v30  ;;  %v10314_v37 = vmul.f32 1.442695, %v10274_v59  ;;  %v10043_v59 = vpop.permute.xlu1 %10042 }
0x1082   : > { %v10196_v23 = vpop.f32.mrb[244].mxu1 }
0x1083   : > { %v12881_v55 = vpop.eup %12880  ;;  %12886 = vpow2.f32 %v10314_v37  ;;  %v18211_v60 = vadd.f32 %v10196_v23, %v10013_v9  ;;  %v11842_v14 = vpop.f32.mrb[245].mxu1  ;;  %10432 = vmatpush1.bf16.msra.mxu0 %v10390_v15 }
0x1084   : > { %v11118_v20 = vadd.f32 -1.0, %v12881_v55  ;;  %v10199_v24 = vpop.f32.mrb[246].mxu1  ;;  %10433 = vmatprep.subr.bf16.mxu0 %v18597_v34  ;;  %v10048_v9 = vpop.permute.xlu0 %10047 }
0x1085   : > { %v12883_v58 = vpop.eup %12882  ;;  %v10275_v6 = vmin.f32 %v18211_v60, 0.0  ;;  %v10200_v61 = vadd.f32 %v10199_v24, %v10018_v32  ;;  %v11843_v13 = vpop.f32.mrb[247].mxu1  ;;  %vm10250_vm0 = vcmp.gt.f32.partialorder %v18211_v60, 0.0 }
0x1086   : > { %v11119_v46 = vadd.f32 -1.0, %v12883_v58  ;;  %v10371_v63 = vsel %vm10246_vm9, %v18199_v18, %v11118_v20 }
0x1087   : > { %v10316_v5 = vmul.f32 1.442695, %v10275_v6  ;;  %v10276_v8 = vmin.f32 %v10200_v61, 0.0  ;;  %vm10251_vm6 = vcmp.gt.f32.partialorder %v10200_v61, 0.0 }
0x1088   : > { %v10372_v10 = vsel %vm10247_vm14, %v10184_v57, %v11119_v46 }
0x1089   : > { %v10391_v44 = vpack.c.bf16 %v10372_v10, %v10371_v63  ;;  %12888 = vpow2.f32 %v10316_v5  ;;  %v10318_v52 = vmul.f32 1.442695, %v10276_v8  ;;  %v10053_v8 = vpop.permute.xlu1 %10052 }
0x108a   : > { %v10204_v36 = vpop.f32.mrb[248].mxu1 }
0x108b   : > { %v12885_v41 = vpop.eup %12884  ;;  %12890 = vpow2.f32 %v10318_v52  ;;  %v18217_v16 = vadd.f32 %v10204_v36, %v10023_v54  ;;  %v11846_v53 = vpop.f32.mrb[249].mxu1  ;;  %10434 = vmatpush1.bf16.msra.mxu0 %v10391_v44 }
0x108c   : > { %v11120_v47 = vadd.f32 -1.0, %v12885_v41  ;;  %v10207_v25 = vpop.f32.mrb[250].mxu1  ;;  %10435 = vmatprep.subr.bf16.mxu0 %v18597_v34 }
0x108d   : > { %v12887_v35 = vpop.eup %12886  ;;  %v10277_v18 = vmin.f32 %v18217_v16, 0.0  ;;  %v10208_v39 = vadd.f32 %v10207_v25, %v10028_v48  ;;  %v11847_v45 = vpop.f32.mrb[251].mxu1  ;;  %vm10252_vm4 = vcmp.gt.f32.partialorder %v18217_v16, 0.0 }
0x108e   : > { %v11121_v27 = vadd.f32 -1.0, %v12887_v35  ;;  %v10373_v57 = vsel %vm10248_vm11, %v18205_v17, %v11120_v47 }
0x108f   : > { %v10320_v29 = vmul.f32 1.442695, %v10277_v18  ;;  %v10278_v12 = vmin.f32 %v10208_v39, 0.0  ;;  %vm10253_vm15 = vcmp.gt.f32.partialorder %v10208_v39, 0.0 }
0x1090   : > { %v10374_v26 = vsel %vm10249_vm12, %v10192_v51, %v11121_v27 }
0x1091   : > { %v10392_v43 = vpack.c.bf16 %v10374_v26, %v10373_v57  ;;  %12892 = vpow2.f32 %v10320_v29  ;;  %v10322_v2 = vmul.f32 1.442695, %v10278_v12 }
0x1092   : > { %v10212_v21 = vpop.f32.mrb[252].mxu1 }
0x1093   : > { %v12889_v42 = vpop.eup %12888  ;;  %12894 = vpow2.f32 %v10322_v2  ;;  %v18223_v28 = vadd.f32 %v10212_v21, %v10033_v31  ;;  %v11850_v22 = vpop.f32.mrb[253].mxu1  ;;  %10436 = vmatpush1.bf16.msra.mxu0 %v10392_v43 }
0x1094   : > { %v11122_v33 = vadd.f32 -1.0, %v12889_v42  ;;  %v10215_v11 = vpop.f32.mrb[254].mxu1  ;;  %10437 = vmatprep.subr.bf16.mxu0 %v18597_v34 }
0x1095   : > { %v12891_v40 = vpop.eup %12890  ;;  %v10279_v17 = vmin.f32 %v18223_v28, 0.0  ;;  %v10216_v0 = vadd.f32 %v10215_v11, %v10038_v3  ;;  %v11851_v1 = vpop.f32.mrb[255].mxu1  ;;  %vm10254_vm13 = vcmp.gt.f32.partialorder %v18223_v28, 0.0 }
0x1096   : > { %v11123_v50 = vadd.f32 -1.0, %v12891_v40  ;;  %v10375_v51 = vsel %vm10250_vm0, %v18211_v60, %v11122_v33 }
0x1097   : > { %v10324_v49 = vmul.f32 1.442695, %v10279_v17  ;;  %v10280_v38 = vmin.f32 %v10216_v0, 0.0  ;;  %vm10255_vm2 = vcmp.gt.f32.partialorder %v10216_v0, 0.0 }
0x1098   : > { %v10376_v62 = vsel %vm10251_vm6, %v10200_v61, %v11123_v50 }
0x1099   : > { %v10393_v19 = vpack.c.bf16 %v10376_v62, %v10375_v51  ;;  %12896 = vpow2.f32 %v10324_v49  ;;  %v10326_v30 = vmul.f32 1.442695, %v10280_v38 }
0x109a   : > { %v10220_v7 = vpop.f32.mrb[0].mxu1 }
0x109b   : > { %v12893_v4 = vpop.eup %12892  ;;  %12898 = vpow2.f32 %v10326_v30  ;;  %v10221_v15 = vadd.f32 %v10220_v7, %v10043_v59  ;;  %v11854_v37 = vpop.f32.mrb[1].mxu1  ;;  %10438 = vmatpush1.bf16.msra.mxu0 %v10393_v19 }
0x109c   : > { %v11124_v23 = vadd.f32 -1.0, %v12893_v4  ;;  %v10223_v55 = vpop.f32.mrb[2].mxu1  ;;  %10439 = vmatprep.subr.bf16.mxu0 %v18597_v34 }
0x109d   : > { %v12895_v14 = vpop.eup %12894  ;;  %v10281_v32 = vmin.f32 %v10221_v15, 0.0  ;;  %v10224_v20 = vadd.f32 %v10223_v55, %v10048_v9  ;;  %v11855_v60 = vpop.f32.mrb[3].mxu1  ;;  %vm10256_vm10 = vcmp.gt.f32.partialorder %v10221_v15, 0.0 }
0x109e   : > { %v11125_v24 = vadd.f32 -1.0, %v12895_v14  ;;  %v10377_v61 = vsel %vm10252_vm4, %v18217_v16, %v11124_v23 }
0x109f   : > { %v10328_v58 = vmul.f32 1.442695, %v10281_v32  ;;  %v10282_v6 = vmin.f32 %v10224_v20, 0.0  ;;  %vm10257_vm3 = vcmp.gt.f32.partialorder %v10224_v20, 0.0 }
0x10a0   : > { %v10378_v13 = vsel %vm10253_vm15, %v10208_v39, %v11125_v24 }
0x10a1   : > { %v10394_v46 = vpack.c.bf16 %v10378_v13, %v10377_v61  ;;  %12900 = vpow2.f32 %v10328_v58  ;;  %v10330_v5 = vmul.f32 1.442695, %v10282_v6 }
0x10a2   : > { %v10228_v63 = vpop.f32.mrb[4].mxu1 }
0x10a3   : > { %v12897_v10 = vpop.eup %12896  ;;  %12902 = vpow2.f32 %v10330_v5  ;;  %v10229_v44 = vadd.f32 %v10228_v63, %v10053_v8  ;;  %v11858_v52 = vpop.f32.mrb[5].mxu1  ;;  %10440 = vmatpush1.bf16.msra.mxu0 %v10394_v46 }
0x10a4   : > { %v11126_v54 = vadd.f32 -1.0, %v12897_v10  ;;  %v10231_v36 = vpop.f32.mrb[6].mxu1  ;;  %10441 = vmatprep.subr.bf16.mxu0 %v18597_v34 }
0x10a5   : > { %v12899_v41 = vpop.eup %12898  ;;  %v10283_v53 = vmin.f32 %v10229_v44, 0.0  ;;  %v11859_v48 = vpop.f32.mrb[7].mxu1  ;;  %vm10258_vm1 = vcmp.gt.f32.partialorder %v10229_v44, 0.0 }
0x10a6   : > { %v11127_v47 = vadd.f32 -1.0, %v12899_v41  ;;  %v10379_v25 = vsel %vm10254_vm13, %v18223_v28, %v11126_v54  ;;  %v10402_v28 = vpop.permute.xlu0 %10401 }
0x10a7   : > { %v10332_v16 = vmul.f32 1.442695, %v10283_v53 }
0x10a8   : > { %v10380_v35 = vsel %vm10255_vm2, %v10216_v0, %v11127_v47 }
0x10a9   : > { %v10395_v18 = vpack.c.bf16 %v10380_v35, %v10379_v25  ;;  %12904 = vpow2.f32 %v10332_v16 }
0x10ab   : > { %v12901_v39 = vpop.eup %12900  ;;  %10442 = vmatpush1.bf16.msra.mxu0 %v10395_v18 }
0x10ac   : > { %v11128_v45 = vadd.f32 -1.0, %v12901_v39  ;;  %10443 = vmatprep.subr.bf16.mxu0 %v18597_v34 }
0x10ad   : > { %v12903_v27 = vpop.eup %12902 }
0x10ae   : > { %v11129_v29 = vadd.f32 -1.0, %v12903_v27  ;;  %v10381_v12 = vsel %vm10256_vm10, %v10221_v15, %v11128_v45 }
0x10b0   : > { %v10382_v57 = vsel %vm10257_vm3, %v10224_v20, %v11129_v29 }
0x10b1   : > { %v10396_v26 = vpack.c.bf16 %v10382_v57, %v10381_v12 }
0x10b3   : > { %v12905_v43 = vpop.eup %12904  ;;  %10444 = vmatpush1.bf16.msra.mxu0 %v10396_v26 }
0x10b4   : > { %v11130_v2 = vadd.f32 -1.0, %v12905_v43  ;;  %10445 = vmatprep.subr.bf16.mxu0 %v18597_v34 }
0x10b6   : > { %v10383_v31 = vsel %vm10258_vm1, %v10229_v44, %v11130_v2 }
0x10b7   : > { %v10397_v21 = vpack.c.bf16 %v10383_v31, %v10383_v31 }
0x10b9   : > { %v10419_v42 = vsel %vm3698_vm7, %v10397_v21, 0 }
0x10ba   : > { %10446 = vmatpush1.bf16.msra.mxu0 %v10419_v42 }
0x10bd   : > { %10454 = vmatmul.mubr.bf16.vlgmr.msra.gmra.mrb[208].mxu0 %v18176_v56 }
0x1190   : > { %v10455_v22 = vpop.f32.mrb[208].mxu0 }
0x1191   : > { %v10456_v3 = vadd.f32 %v10455_v22, %v10402_v28  ;;  %v10457_v33 = vpop.f32.mrb[209].mxu0 }
0x1192   : > { %v10458_v11 = vpop.f32.mrb[210].mxu0 }
0x1193   : > { %v10462_v40 = vsel %vm10461_vm8, %v10456_v3, -inf  ;;  %v10459_v17 = vpop.f32.mrb[211].mxu0 }
0x1194   : > { %v10463_v0 = vrot.slane %v10462_v40, 4 }
0x1196   : > { %v10464_v1 = vmax.f32 %v10462_v40, %v10463_v0 }
0x1198   : > { %v10465_v34 = vrot.slane %v10464_v1, 2 }
0x119a   : > { %v10466_v50 = vmax.f32 %v10464_v1, %v10465_v34 }
0x119c   : > { %v10467_v49 = vrot.slane %v10466_v50, 1 }
0x119e   : > { %v10468_v38 = vmax.f32 %v10466_v50, %v10467_v49 }
0x11a0   : > { %v10469_v51 = vsub.f32 %v10456_v3, %v10468_v38 }
0x11a2   : > { %v10470_v62 = vmul.f32 1.442695, %v10469_v51 }
0x11a4   : > { %12906 = vpow2.f32 %v10470_v62 }
0x11ae   : > { %v12907_v56 = vpop.eup %12906 }
0x11af   : > { %v10472_v19 = vsel %vm10461_vm8, %v12907_v56, 0.0 }
0x11b0   : > { %v10473_v30 = vrot.slane %v10472_v19, 4 }
0x11b2   : > { %v10474_v59 = vadd.f32 %v10473_v30, %v10472_v19 }
0x11b4   : > { %v10475_v7 = vrot.slane %v10474_v59, 2 }
0x11b6   : > { %v10476_v4 = vadd.f32 %v10475_v7, %v10474_v59 }
0x11b8   : > { %v10477_v15 = vrot.slane %v10476_v4, 1 }
0x11ba   : > { %v10478_v37 = vadd.f32 %v10477_v15, %v10476_v4 }
0x11bc   : > { %12908 = vlog2.f32 %v10478_v37 }
0x11c6   : > { %v12909_v9 = vpop.eup %12908 }
0x11c7   : > { %v10480_v23 = vmul.f32 0.6931472, %v12909_v9 }
0x11c9   : > { %v10481_v55 = vsub.f32 %v10469_v51, %v10480_v23 }
0x11cb   : > { %10482 = vst.msk [vmem:[%s492_s1] sm:$0xf] %vm10461_vm8, %v10481_v55 }
0x11cc PF: > { %s18604_s26 = sld [smem:[#allocation6_spill]] }
0x11d2   : > { %s25_s18 = sadd.s32 1, %s18604_s26  }
0x11d3   : > { %p22_p4 = scmp.ge.s32.totalorder %s25_s18, 4  }
0x11d5   :  { %24 = sbr.rel (!%p22_p4) target bundleno = 14 (0xe), region = 110 }

</bundles_post_ra>
